<compile_context>
chip_gen: v6e
topology: v6e:2x2x1
jax: 0.10.0
libtpu: 0.0.40
codegen_flags: <defaults>
</compile_context>

<pallas_src>
import functools

import jax
import jax.numpy as jnp
from jax.experimental import pallas as pl
from jax.experimental.pallas import tpu as pltpu

BETA = 0.5            # snn.Leaky beta (no effect for one step w/ zero membrane)
THRESHOLD = 1.0       # snn.Leaky default threshold
BN_EPS = 1e-5         # PyTorch BatchNorm default eps
MXU_DTYPE = jnp.bfloat16
VMEM_LIMIT = 32 * 1024 * 1024


def _round_up(x, m):
    return (x + m - 1) // m * m


# ----------------------------- Pallas kernels ------------------------------- #

def _conv_spike_kernel(w_ref, x_ref, thr_ref, o_ref):
    # (Cout, K) @ (K, tm) -> (Cout, tm): pixel axis in lanes -> unmasked vst,
    # dense epilogue.  BN scale pre-folded into w, BN bias folded into thr.
    acc = jnp.dot(w_ref[...], x_ref[...], preferred_element_type=jnp.float32)
    o_ref[...] = jnp.where(acc > thr_ref[...], 1.0, 0.0).astype(o_ref.dtype)


def _fc_stack_kernel(x_ref, w1_ref, t1_ref, w2_ref, b2_ref, w3_ref, b3_ref,
                     logit_ref, mem_ref):
    # fc1 + bnfc1 + lif4 (bias folded into the per-column threshold t1)
    h1 = jnp.dot(x_ref[...], w1_ref[...], preferred_element_type=jnp.float32)
    s1 = jnp.where(h1 > t1_ref[...], 1.0, 0.0).astype(MXU_DTYPE)
    # fc2 + bnfc2 ; mem5 = membrane after one Leaky step with zero init
    h2 = jnp.dot(s1, w2_ref[...], preferred_element_type=jnp.float32) + b2_ref[...]
    mem_ref[...] = h2
    # lif5 spike + fc3 (logits)
    s2 = jnp.where(h2 > THRESHOLD, 1.0, 0.0).astype(MXU_DTYPE)
    logit_ref[...] = jnp.dot(s2, w3_ref[...],
                             preferred_element_type=jnp.float32) + b3_ref[...]


# ------------------------------ wrappers ------------------------------------ #

def conv_matmul_spike(w_mat, patches, thr_eff, *, tm_max=8192):
    """spike(w_mat @ patches + bias) with the bias pre-folded into thr_eff.

    w_mat: (Cout, K) f32 (BN scale folded); patches: (K, M) channel-major
    im2col; thr_eff: (Cout, 1) f32.  Returns (Cout, M) bf16 spikes in {0,1}.
    """
    Cout, K = w_mat.shape
    K2, M = patches.shape
    assert K == K2
    # Balanced lane tiling of the pixel axis; >= 2 parallel steps for v7x.
    grid = max(pl.cdiv(M, tm_max), 2)
    tm = _round_up(pl.cdiv(M, grid), 128)
    Mp = grid * tm
    xb = patches.astype(MXU_DTYPE)
    if Mp != M:
        xb = jnp.pad(xb, ((0, 0), (0, Mp - M)))
    wb = w_mat.astype(MXU_DTYPE)
    thr = thr_eff.astype(jnp.float32)

    out = pl.pallas_call(
        _conv_spike_kernel,
        out_shape=jax.ShapeDtypeStruct((Cout, Mp), MXU_DTYPE),
        grid_spec=pltpu.PrefetchScalarGridSpec(
            num_scalar_prefetch=0,
            grid=(grid,),
            in_specs=[
                pl.BlockSpec((Cout, K), lambda i: (0, 0)),   # weights resident
                pl.BlockSpec((K, tm), lambda i: (0, i)),
                pl.BlockSpec((Cout, 1), lambda i: (0, 0)),
            ],
            out_specs=pl.BlockSpec((Cout, tm), lambda i: (0, i)),
        ),
        compiler_params=pltpu.CompilerParams(
            dimension_semantics=("parallel",),
            vmem_limit_bytes=VMEM_LIMIT),
    )(wb, xb, thr)
    # Padded pixel columns compute spike garbage; always slice them off.
    return out[:, :M]


def _pad2(a, rows, cols):
    r, c = a.shape
    return jnp.pad(a, ((0, rows - r), (0, cols - c)))


def fc_stack(x, w1, b1, w2, b2, w3, b3):
    """Fused fc1+bn+lif4 -> fc2+bn (mem5) -> lif5 -> fc3 in ONE pallas_call.

    Weights are (in, out) with BN scale folded; widths zero-padded to multiples
    of 128 (padded rows/cols are zero so results are unaffected; sliced off).
    Returns (logits (B, d3) f32, mem5 (B, d2) f32).
    """
    B, K = x.shape
    d1, d2, d3 = w1.shape[1], w2.shape[1], w3.shape[1]
    P1, P2, P3 = _round_up(d1, 128), _round_up(d2, 128), _round_up(d3, 128)
    Bp = _round_up(B, 8)

    xb = jnp.pad(x.astype(MXU_DTYPE), ((0, Bp - B), (0, 0)))
    w1p = _pad2(w1, K, P1).astype(MXU_DTYPE)
    w2p = _pad2(w2, P1, P2).astype(MXU_DTYPE)
    w3p = _pad2(w3, P2, P3).astype(MXU_DTYPE)
    # lif4 bias folded into per-column threshold; padded cols -> thr=1 -> no spike.
    t1p = (THRESHOLD - jnp.pad(b1, (0, P1 - d1))).reshape(1, P1).astype(jnp.float32)
    b2p = jnp.pad(b2, (0, P2 - d2)).reshape(1, P2).astype(jnp.float32)
    b3p = jnp.pad(b3, (0, P3 - d3)).reshape(1, P3).astype(jnp.float32)

    # TODO(synk): give this call >=2 parallel grid steps for v7x megacore once
    # the batch is large enough to split (Bp=8 is a single minimal row tile).
    logits, mem = pl.pallas_call(
        _fc_stack_kernel,
        out_shape=(jax.ShapeDtypeStruct((Bp, P3), jnp.float32),
                   jax.ShapeDtypeStruct((Bp, P2), jnp.float32)),
        grid_spec=pltpu.PrefetchScalarGridSpec(
            num_scalar_prefetch=0,
            grid=(1,),
            in_specs=[
                pl.BlockSpec((Bp, K), lambda i: (0, 0)),
                pl.BlockSpec((K, P1), lambda i: (0, 0)),
                pl.BlockSpec((1, P1), lambda i: (0, 0)),
                pl.BlockSpec((P1, P2), lambda i: (0, 0)),
                pl.BlockSpec((1, P2), lambda i: (0, 0)),
                pl.BlockSpec((P2, P3), lambda i: (0, 0)),
                pl.BlockSpec((1, P3), lambda i: (0, 0)),
            ],
            out_specs=[
                pl.BlockSpec((Bp, P3), lambda i: (0, 0)),
                pl.BlockSpec((Bp, P2), lambda i: (0, 0)),
            ],
        ),
        compiler_params=pltpu.CompilerParams(
            dimension_semantics=("arbitrary",),
            vmem_limit_bytes=VMEM_LIMIT),
    )(xb, w1p, t1p, w2p, b2p, w3p, b3p)
    return logits[:B, :d3], mem[:B, :d2]


# ------------------------------ JAX glue ------------------------------------ #

def im2col_cm(x_cnhw, kh, kw, stride, pad):
    """Channel-major im2col: (C, N, H, W) -> patches (kh*kw*C, N*Ho*Wo).

    Row index k = (dy*kw + dx)*C + c matches the (Cout, kh*kw*Cin) weight
    layout built in conv_bn_spike; column index m = (n, oy, ox) row-major.
    """
    C, N, H, W = x_cnhw.shape
    xp = jnp.pad(x_cnhw, ((0, 0), (0, 0), (pad, pad), (pad, pad)))
    Ho = (H + 2 * pad - kh) // stride + 1
    Wo = (W + 2 * pad - kw) // stride + 1
    taps = []
    for dy in range(kh):
        for dx in range(kw):
            taps.append(xp[:, :, dy:dy + stride * Ho:stride,
                           dx:dx + stride * Wo:stride])
    patches = jnp.stack(taps, axis=0)                    # (kh*kw, C, N, Ho, Wo)
    return patches.reshape(kh * kw * C, N * Ho * Wo), Ho, Wo


def conv_bn_spike(x_cnhw, w, b, gamma, beta_, mean, var, *, stride, pad):
    """conv2d (PyTorch (Cout,Cin,kh,kw) weights) + BN(eval) + Leaky spike.

    Inputs/outputs are channel-major (C, N, H, W) so the Pallas matmul writes
    a lane-dense (Cout, pixels) slab with no relayout anywhere.
    """
    Cout, Cin, kh, kw = w.shape
    patches, Ho, Wo = im2col_cm(x_cnhw, kh, kw, stride, pad)
    scale = gamma / jnp.sqrt(var + BN_EPS)
    w_mat = (jnp.transpose(w, (0, 2, 3, 1)).reshape(Cout, kh * kw * Cin)
             * scale[:, None])                           # BN scale folded (f32)
    bias = (b - mean) * scale + beta_
    thr_eff = (THRESHOLD - bias).reshape(Cout, 1)        # spike = acc > thr-bias
    out = conv_matmul_spike(w_mat, patches, thr_eff)     # (Cout, M) {0,1} bf16
    N = x_cnhw.shape[1]
    return out.reshape(Cout, N, Ho, Wo)


def avg_pool2_cm(x_cnhw):
    """F.avg_pool2d(x, 2) (kernel=stride=2, floor) on channel-major data."""
    C, N, H, W = x_cnhw.shape
    Ho, Wo = H // 2, W // 2
    x = x_cnhw[:, :, :Ho * 2, :Wo * 2]
    return x.reshape(C, N, Ho, 2, Wo, 2).mean(axis=(3, 5))


# ---------------------------- parameters ------------------------------------ #

def _uniform(key, shape, fan_in):
    bound = 1.0 / jnp.sqrt(jnp.float32(fan_in))
    return jax.random.uniform(key, shape, jnp.float32, -bound, bound)


def init_params(key):
    ks = jax.random.split(key, 12)
    p = {}
    p["conv1_w"] = _uniform(ks[0], (16, 3, 5, 5), 3 * 5 * 5)
    p["conv1_b"] = _uniform(ks[1], (16,), 3 * 5 * 5)
    p["conv2_w"] = _uniform(ks[2], (32, 16, 5, 5), 16 * 5 * 5)
    p["conv2_b"] = _uniform(ks[3], (32,), 16 * 5 * 5)
    p["conv3_w"] = _uniform(ks[4], (64, 32, 3, 3), 32 * 3 * 3)
    p["conv3_b"] = _uniform(ks[5], (64,), 32 * 3 * 3)
    p["fc1_w"] = _uniform(ks[6], (500, 64 * 6 * 6), 64 * 6 * 6)
    p["fc1_b"] = _uniform(ks[7], (500,), 64 * 6 * 6)
    p["fc2_w"] = _uniform(ks[8], (50, 500), 500)
    p["fc2_b"] = _uniform(ks[9], (50,), 500)
    p["fc3_w"] = _uniform(ks[10], (2, 50), 50)
    p["fc3_b"] = _uniform(ks[11], (2,), 50)
    # BatchNorm params: PyTorch defaults (gamma=1, beta=0, running mean/var=0/1).
    for name, c in (("bn1", 16), ("bn2", 32), ("bn3", 64),
                    ("bnfc1", 500), ("bnfc2", 50)):
        p[name + "_g"] = jnp.ones((c,), jnp.float32)
        p[name + "_b"] = jnp.zeros((c,), jnp.float32)
        p[name + "_m"] = jnp.zeros((c,), jnp.float32)
        p[name + "_v"] = jnp.ones((c,), jnp.float32)
    return p


# ------------------------------ forward -------------------------------------- #

def forward(params, x_nchw):
    p = params
    # NCHW -> channel-major (C, N, H, W), bf16: a cheap batch/channel swap that
    # keeps every conv's pixel axis contiguous for lane-dense Pallas outputs.
    x = jnp.transpose(x_nchw, (1, 0, 2, 3)).astype(MXU_DTYPE)
    # conv1 + bn1 + lif1 ; pool
    x = conv_bn_spike(x, p["conv1_w"], p["conv1_b"],
                      p["bn1_g"], p["bn1_b"], p["bn1_m"], p["bn1_v"],
                      stride=2, pad=1)
    x = avg_pool2_cm(x)
    # conv2 + bn2 + lif2 ; pool
    x = conv_bn_spike(x, p["conv2_w"], p["conv2_b"],
                      p["bn2_g"], p["bn2_b"], p["bn2_m"], p["bn2_v"],
                      stride=2, pad=1)
    x = avg_pool2_cm(x)
    # conv3 + bn3 + lif3 ; pool
    x = conv_bn_spike(x, p["conv3_w"], p["conv3_b"],
                      p["bn3_g"], p["bn3_b"], p["bn3_m"], p["bn3_v"],
                      stride=1, pad=1)
    x = avg_pool2_cm(x)                                    # (64, N, 6, 6)
    # (C, N, H, W) -> (N, C*H*W): exactly PyTorch's CHW flatten order, so fc1
    # weights need no row permutation; this transpose moves only ~18 KB.
    C, N, Hf, Wf = x.shape
    x = jnp.transpose(x, (1, 0, 2, 3)).reshape(N, C * Hf * Wf)

    # Fold inference-mode BN into the FC weights/biases (f32; bf16 in fc_stack).
    s1 = p["bnfc1_g"] / jnp.sqrt(p["bnfc1_v"] + BN_EPS)
    w1 = p["fc1_w"].T * s1[None, :]
    b1 = (p["fc1_b"] - p["bnfc1_m"]) * s1 + p["bnfc1_b"]
    s2 = p["bnfc2_g"] / jnp.sqrt(p["bnfc2_v"] + BN_EPS)
    w2 = p["fc2_w"].T * s2[None, :]
    b2 = (p["fc2_b"] - p["bnfc2_m"]) * s2 + p["bnfc2_b"]
    w3 = p["fc3_w"].T
    b3 = p["fc3_b"]

    logits, mem5 = fc_stack(x, w1, b1, w2, b2, w3, b3)     # single fused call
    return logits, mem5


# -------------------------------- main ---------------------------------------- #

if __name__ == "__main__":
    key = jax.random.PRNGKey(0)
    pkey, xkey = jax.random.split(key)
    params = init_params(pkey)
    # Input: NCHW, 3 channels; 224x224 is implied by fc1.in_features == 64*6*6.
    x = jax.random.normal(xkey, (2, 3, 224, 224), jnp.float32)

    logits, mem5 = jax.jit(forward)(params, x)
    jax.block_until_ready((logits, mem5))

    assert logits.shape == (2, 2) and logits.dtype == jnp.float32
    assert mem5.shape == (2, 50) and mem5.dtype == jnp.float32
    print("KERNEL_OK")
</pallas_src>

<mosaic_0001>
module attributes {stable_mosaic.version = 11 : i64} {
  func.func @_conv_spike_kernel(%arg0: i32, %arg1: memref<16x75xbf16, #tpu.memory_space<vmem>>, %arg2: memref<75x6272xbf16, #tpu.memory_space<vmem>>, %arg3: memref<16x1xf32, #tpu.memory_space<vmem>>, %arg4: memref<16x6272xbf16, #tpu.memory_space<vmem>>) attributes {dimension_semantics = [#tpu.dimension_semantics<parallel>], iteration_bounds = array<i64: 4>, scalar_prefetch = 0 : i64, scratch_operands = 0 : i64, tpu.core_type = #tpu.core_type<tc>, window_params = [{pipeline_mode = #tpu.pipeline_mode<synchronous>, transform_indices = @transform_0, window_bounds = array<i64: 16, 75>}, {transform_indices = @transform_1, window_bounds = array<i64: 75, 6272>}, {pipeline_mode = #tpu.pipeline_mode<synchronous>, transform_indices = @transform_2, window_bounds = array<i64: 16, 1>}, {transform_indices = @transform_3, window_bounds = array<i64: 16, 6272>}]} {
    %c0 = arith.constant 0 : index
    %c0_0 = arith.constant 0 : index
    %0 = vector.load %arg1[%c0, %c0_0] : memref<16x75xbf16, #tpu.memory_space<vmem>>, vector<16x75xbf16>
    %c0_1 = arith.constant 0 : index
    %c0_2 = arith.constant 0 : index
    %1 = vector.load %arg2[%c0_1, %c0_2] : memref<75x6272xbf16, #tpu.memory_space<vmem>>, vector<75x6272xbf16>
    %cst = arith.constant dense<0.000000e+00> : vector<16x6272xf32>
    %2 = tpu.matmul %0, %1, %cst {dimension_numbers = #tpu.dot_dimension_numbers<[1], [0], [0], [1], [0, 0, 1, 1], [], []>} : vector<16x75xbf16>, vector<75x6272xbf16>, vector<16x6272xf32> -> vector<16x6272xf32>
    %c0_3 = arith.constant 0 : index
    %c0_4 = arith.constant 0 : index
    %3 = vector.load %arg3[%c0_3, %c0_4] : memref<16x1xf32, #tpu.memory_space<vmem>>, vector<16x1xf32>
    %4 = vector.broadcast %3 : vector<16x1xf32> to vector<16x6272xf32>
    %5 = arith.cmpf ogt, %2, %4 : vector<16x6272xf32>
    %cst_5 = arith.constant 1.000000e+00 : f32
    %cst_6 = arith.constant 0.000000e+00 : f32
    %6 = vector.broadcast %cst_5 : f32 to vector<16x6272xf32>
    %7 = vector.broadcast %cst_6 : f32 to vector<16x6272xf32>
    %8 = arith.select %5, %6, %7 : vector<16x6272xi1>, vector<16x6272xf32>
    %9 = arith.truncf %8 : vector<16x6272xf32> to vector<16x6272xbf16>
    %c0_7 = arith.constant 0 : index
    %c0_8 = arith.constant 0 : index
    %10 = vector.load %arg4[%c0_7, %c0_8] : memref<16x6272xbf16, #tpu.memory_space<vmem>>, vector<16x6272xbf16>
    tpu.vector_store %arg4[%c0_7, %c0_8], %9 {strides = array<i32>} : memref<16x6272xbf16, #tpu.memory_space<vmem>>, vector<16x6272xbf16>,
    return
  }
  func.func @transform_0(%arg0: i32) -> (i32, i32) {
    %c0_i32 = arith.constant 0 : i32
    %c0_i32_0 = arith.constant 0 : i32
    %c0_i32_1 = arith.constant 0 : i32
    return %c0_i32, %c0_i32_0 : i32, i32
  }
  func.func @transform_1(%arg0: i32) -> (i32, i32) {
    %c0_i32 = arith.constant 0 : i32
    %c0_i32_0 = arith.constant 0 : i32
    return %c0_i32, %arg0 : i32, i32
  }
  func.func @transform_2(%arg0: i32) -> (i32, i32) {
    %c0_i32 = arith.constant 0 : i32
    %c0_i32_0 = arith.constant 0 : i32
    %c0_i32_1 = arith.constant 0 : i32
    return %c0_i32, %c0_i32_0 : i32, i32
  }
  func.func @transform_3(%arg0: i32) -> (i32, i32) {
    %c0_i32 = arith.constant 0 : i32
    %c0_i32_0 = arith.constant 0 : i32
    return %c0_i32, %arg0 : i32, i32
  }
}

module attributes {stable_mosaic.version = 11 : i64} {
  func.func @_conv_spike_kernel(%arg0: i32, %arg1: memref<32x400xbf16, #tpu.memory_space<vmem>>, %arg2: memref<400x768xbf16, #tpu.memory_space<vmem>>, %arg3: memref<32x1xf32, #tpu.memory_space<vmem>>, %arg4: memref<32x768xbf16, #tpu.memory_space<vmem>>) attributes {dimension_semantics = [#tpu.dimension_semantics<parallel>], iteration_bounds = array<i64: 2>, scalar_prefetch = 0 : i64, scratch_operands = 0 : i64, tpu.core_type = #tpu.core_type<tc>, window_params = [{pipeline_mode = #tpu.pipeline_mode<synchronous>, transform_indices = @transform_0, window_bounds = array<i64: 32, 400>}, {transform_indices = @transform_1, window_bounds = array<i64: 400, 768>}, {pipeline_mode = #tpu.pipeline_mode<synchronous>, transform_indices = @transform_2, window_bounds = array<i64: 32, 1>}, {transform_indices = @transform_3, window_bounds = array<i64: 32, 768>}]} {
    %c0 = arith.constant 0 : index
    %c0_0 = arith.constant 0 : index
    %0 = vector.load %arg1[%c0, %c0_0] : memref<32x400xbf16, #tpu.memory_space<vmem>>, vector<32x400xbf16>
    %c0_1 = arith.constant 0 : index
    %c0_2 = arith.constant 0 : index
    %1 = vector.load %arg2[%c0_1, %c0_2] : memref<400x768xbf16, #tpu.memory_space<vmem>>, vector<400x768xbf16>
    %cst = arith.constant dense<0.000000e+00> : vector<32x768xf32>
    %2 = tpu.matmul %0, %1, %cst {dimension_numbers = #tpu.dot_dimension_numbers<[1], [0], [0], [1], [0, 0, 1, 1], [], []>} : vector<32x400xbf16>, vector<400x768xbf16>, vector<32x768xf32> -> vector<32x768xf32>
    %c0_3 = arith.constant 0 : index
    %c0_4 = arith.constant 0 : index
    %3 = vector.load %arg3[%c0_3, %c0_4] : memref<32x1xf32, #tpu.memory_space<vmem>>, vector<32x1xf32>
    %4 = vector.broadcast %3 : vector<32x1xf32> to vector<32x768xf32>
    %5 = arith.cmpf ogt, %2, %4 : vector<32x768xf32>
    %cst_5 = arith.constant 1.000000e+00 : f32
    %cst_6 = arith.constant 0.000000e+00 : f32
    %6 = vector.broadcast %cst_5 : f32 to vector<32x768xf32>
    %7 = vector.broadcast %cst_6 : f32 to vector<32x768xf32>
    %8 = arith.select %5, %6, %7 : vector<32x768xi1>, vector<32x768xf32>
    %9 = arith.truncf %8 : vector<32x768xf32> to vector<32x768xbf16>
    %c0_7 = arith.constant 0 : index
    %c0_8 = arith.constant 0 : index
    %10 = vector.load %arg4[%c0_7, %c0_8] : memref<32x768xbf16, #tpu.memory_space<vmem>>, vector<32x768xbf16>
    tpu.vector_store %arg4[%c0_7, %c0_8], %9 {strides = array<i32>} : memref<32x768xbf16, #tpu.memory_space<vmem>>, vector<32x768xbf16>,
    return
  }
  func.func @transform_0(%arg0: i32) -> (i32, i32) {
    %c0_i32 = arith.constant 0 : i32
    %c0_i32_0 = arith.constant 0 : i32
    %c0_i32_1 = arith.constant 0 : i32
    return %c0_i32, %c0_i32_0 : i32, i32
  }
  func.func @transform_1(%arg0: i32) -> (i32, i32) {
    %c0_i32 = arith.constant 0 : i32
    %c0_i32_0 = arith.constant 0 : i32
    return %c0_i32, %arg0 : i32, i32
  }
  func.func @transform_2(%arg0: i32) -> (i32, i32) {
    %c0_i32 = arith.constant 0 : i32
    %c0_i32_0 = arith.constant 0 : i32
    %c0_i32_1 = arith.constant 0 : i32
    return %c0_i32, %c0_i32_0 : i32, i32
  }
  func.func @transform_3(%arg0: i32) -> (i32, i32) {
    %c0_i32 = arith.constant 0 : i32
    %c0_i32_0 = arith.constant 0 : i32
    return %c0_i32, %arg0 : i32, i32
  }
}

module attributes {stable_mosaic.version = 11 : i64} {
  func.func @_conv_spike_kernel(%arg0: i32, %arg1: memref<64x288xbf16, #tpu.memory_space<vmem>>, %arg2: memref<288x256xbf16, #tpu.memory_space<vmem>>, %arg3: memref<64x1xf32, #tpu.memory_space<vmem>>, %arg4: memref<64x256xbf16, #tpu.memory_space<vmem>>) attributes {dimension_semantics = [#tpu.dimension_semantics<parallel>], iteration_bounds = array<i64: 2>, scalar_prefetch = 0 : i64, scratch_operands = 0 : i64, tpu.core_type = #tpu.core_type<tc>, window_params = [{pipeline_mode = #tpu.pipeline_mode<synchronous>, transform_indices = @transform_0, window_bounds = array<i64: 64, 288>}, {transform_indices = @transform_1, window_bounds = array<i64: 288, 256>}, {pipeline_mode = #tpu.pipeline_mode<synchronous>, transform_indices = @transform_2, window_bounds = array<i64: 64, 1>}, {transform_indices = @transform_3, window_bounds = array<i64: 64, 256>}]} {
    %c0 = arith.constant 0 : index
    %c0_0 = arith.constant 0 : index
    %0 = vector.load %arg1[%c0, %c0_0] : memref<64x288xbf16, #tpu.memory_space<vmem>>, vector<64x288xbf16>
    %c0_1 = arith.constant 0 : index
    %c0_2 = arith.constant 0 : index
    %1 = vector.load %arg2[%c0_1, %c0_2] : memref<288x256xbf16, #tpu.memory_space<vmem>>, vector<288x256xbf16>
    %cst = arith.constant dense<0.000000e+00> : vector<64x256xf32>
    %2 = tpu.matmul %0, %1, %cst {dimension_numbers = #tpu.dot_dimension_numbers<[1], [0], [0], [1], [0, 0, 1, 1], [], []>} : vector<64x288xbf16>, vector<288x256xbf16>, vector<64x256xf32> -> vector<64x256xf32>
    %c0_3 = arith.constant 0 : index
    %c0_4 = arith.constant 0 : index
    %3 = vector.load %arg3[%c0_3, %c0_4] : memref<64x1xf32, #tpu.memory_space<vmem>>, vector<64x1xf32>
    %4 = vector.broadcast %3 : vector<64x1xf32> to vector<64x256xf32>
    %5 = arith.cmpf ogt, %2, %4 : vector<64x256xf32>
    %cst_5 = arith.constant 1.000000e+00 : f32
    %cst_6 = arith.constant 0.000000e+00 : f32
    %6 = vector.broadcast %cst_5 : f32 to vector<64x256xf32>
    %7 = vector.broadcast %cst_6 : f32 to vector<64x256xf32>
    %8 = arith.select %5, %6, %7 : vector<64x256xi1>, vector<64x256xf32>
    %9 = arith.truncf %8 : vector<64x256xf32> to vector<64x256xbf16>
    %c0_7 = arith.constant 0 : index
    %c0_8 = arith.constant 0 : index
    %10 = vector.load %arg4[%c0_7, %c0_8] : memref<64x256xbf16, #tpu.memory_space<vmem>>, vector<64x256xbf16>
    tpu.vector_store %arg4[%c0_7, %c0_8], %9 {strides = array<i32>} : memref<64x256xbf16, #tpu.memory_space<vmem>>, vector<64x256xbf16>,
    return
  }
  func.func @transform_0(%arg0: i32) -> (i32, i32) {
    %c0_i32 = arith.constant 0 : i32
    %c0_i32_0 = arith.constant 0 : i32
    %c0_i32_1 = arith.constant 0 : i32
    return %c0_i32, %c0_i32_0 : i32, i32
  }
  func.func @transform_1(%arg0: i32) -> (i32, i32) {
    %c0_i32 = arith.constant 0 : i32
    %c0_i32_0 = arith.constant 0 : i32
    return %c0_i32, %arg0 : i32, i32
  }
  func.func @transform_2(%arg0: i32) -> (i32, i32) {
    %c0_i32 = arith.constant 0 : i32
    %c0_i32_0 = arith.constant 0 : i32
    %c0_i32_1 = arith.constant 0 : i32
    return %c0_i32, %c0_i32_0 : i32, i32
  }
  func.func @transform_3(%arg0: i32) -> (i32, i32) {
    %c0_i32 = arith.constant 0 : i32
    %c0_i32_0 = arith.constant 0 : i32
    return %c0_i32, %arg0 : i32, i32
  }
}

module attributes {stable_mosaic.version = 11 : i64} {
  func.func @_fc_stack_kernel(%arg0: i32, %arg1: memref<8x2304xbf16, #tpu.memory_space<vmem>>, %arg2: memref<2304x512xbf16, #tpu.memory_space<vmem>>, %arg3: memref<1x512xf32, #tpu.memory_space<vmem>>, %arg4: memref<512x128xbf16, #tpu.memory_space<vmem>>, %arg5: memref<1x128xf32, #tpu.memory_space<vmem>>, %arg6: memref<128x128xbf16, #tpu.memory_space<vmem>>, %arg7: memref<1x128xf32, #tpu.memory_space<vmem>>, %arg8: memref<8x128xf32, #tpu.memory_space<vmem>>, %arg9: memref<8x128xf32, #tpu.memory_space<vmem>>) attributes {dimension_semantics = [#tpu.dimension_semantics<arbitrary>], iteration_bounds = array<i64: 1>, scalar_prefetch = 0 : i64, scratch_operands = 0 : i64, tpu.core_type = #tpu.core_type<tc>, window_params = [{pipeline_mode = #tpu.pipeline_mode<synchronous>, transform_indices = @transform_0, window_bounds = array<i64: 8, 2304>}, {pipeline_mode = #tpu.pipeline_mode<synchronous>, transform_indices = @transform_1, window_bounds = array<i64: 2304, 512>}, {pipeline_mode = #tpu.pipeline_mode<synchronous>, transform_indices = @transform_2, window_bounds = array<i64: 1, 512>}, {pipeline_mode = #tpu.pipeline_mode<synchronous>, transform_indices = @transform_3, window_bounds = array<i64: 512, 128>}, {pipeline_mode = #tpu.pipeline_mode<synchronous>, transform_indices = @transform_4, window_bounds = array<i64: 1, 128>}, {pipeline_mode = #tpu.pipeline_mode<synchronous>, transform_indices = @transform_5, window_bounds = array<i64: 128, 128>}, {pipeline_mode = #tpu.pipeline_mode<synchronous>, transform_indices = @transform_6, window_bounds = array<i64: 1, 128>}, {pipeline_mode = #tpu.pipeline_mode<synchronous>, transform_indices = @transform_7, window_bounds = array<i64: 8, 128>}, {pipeline_mode = #tpu.pipeline_mode<synchronous>, transform_indices = @transform_8, window_bounds = array<i64: 8, 128>}]} {
    %c0 = arith.constant 0 : index
    %c0_0 = arith.constant 0 : index
    %0 = vector.load %arg1[%c0, %c0_0] : memref<8x2304xbf16, #tpu.memory_space<vmem>>, vector<8x2304xbf16>
    %c0_1 = arith.constant 0 : index
    %c0_2 = arith.constant 0 : index
    %1 = vector.load %arg2[%c0_1, %c0_2] : memref<2304x512xbf16, #tpu.memory_space<vmem>>, vector<2304x512xbf16>
    %cst = arith.constant dense<0.000000e+00> : vector<8x512xf32>
    %2 = tpu.matmul %0, %1, %cst {dimension_numbers = #tpu.dot_dimension_numbers<[1], [0], [0], [1], [0, 0, 1, 1], [], []>} : vector<8x2304xbf16>, vector<2304x512xbf16>, vector<8x512xf32> -> vector<8x512xf32>
    %c0_3 = arith.constant 0 : index
    %c0_4 = arith.constant 0 : index
    %3 = vector.load %arg3[%c0_3, %c0_4] : memref<1x512xf32, #tpu.memory_space<vmem>>, vector<1x512xf32>
    %4 = vector.broadcast %3 : vector<1x512xf32> to vector<8x512xf32>
    %5 = arith.cmpf ogt, %2, %4 : vector<8x512xf32>
    %cst_5 = arith.constant 1.000000e+00 : f32
    %cst_6 = arith.constant 0.000000e+00 : f32
    %6 = vector.broadcast %cst_5 : f32 to vector<8x512xf32>
    %7 = vector.broadcast %cst_6 : f32 to vector<8x512xf32>
    %8 = arith.select %5, %6, %7 : vector<8x512xi1>, vector<8x512xf32>
    %9 = arith.truncf %8 : vector<8x512xf32> to vector<8x512xbf16>
    %c0_7 = arith.constant 0 : index
    %c0_8 = arith.constant 0 : index
    %10 = vector.load %arg4[%c0_7, %c0_8] : memref<512x128xbf16, #tpu.memory_space<vmem>>, vector<512x128xbf16>
    %cst_9 = arith.constant dense<0.000000e+00> : vector<8x128xf32>
    %11 = tpu.matmul %9, %10, %cst_9 {dimension_numbers = #tpu.dot_dimension_numbers<[1], [0], [0], [1], [0, 0, 1, 1], [], []>} : vector<8x512xbf16>, vector<512x128xbf16>, vector<8x128xf32> -> vector<8x128xf32>
    %c0_10 = arith.constant 0 : index
    %c0_11 = arith.constant 0 : index
    %12 = vector.load %arg5[%c0_10, %c0_11] : memref<1x128xf32, #tpu.memory_space<vmem>>, vector<1x128xf32>
    %13 = vector.broadcast %12 : vector<1x128xf32> to vector<8x128xf32>
    %14 = arith.addf %11, %13 : vector<8x128xf32>
    %c0_12 = arith.constant 0 : index
    %c0_13 = arith.constant 0 : index
    %15 = vector.load %arg9[%c0_12, %c0_13] : memref<8x128xf32, #tpu.memory_space<vmem>>, vector<8x128xf32>
    tpu.vector_store %arg9[%c0_12, %c0_13], %14 {strides = array<i32>} : memref<8x128xf32, #tpu.memory_space<vmem>>, vector<8x128xf32>,
    %cst_14 = arith.constant 1.000000e+00 : f32
    %16 = vector.broadcast %cst_14 : f32 to vector<8x128xf32>
    %17 = arith.cmpf ogt, %14, %16 : vector<8x128xf32>
    %cst_15 = arith.constant 1.000000e+00 : f32
    %cst_16 = arith.constant 0.000000e+00 : f32
    %18 = vector.broadcast %cst_15 : f32 to vector<8x128xf32>
    %19 = vector.broadcast %cst_16 : f32 to vector<8x128xf32>
    %20 = arith.select %17, %18, %19 : vector<8x128xi1>, vector<8x128xf32>
    %21 = arith.truncf %20 : vector<8x128xf32> to vector<8x128xbf16>
    %c0_17 = arith.constant 0 : index
    %c0_18 = arith.constant 0 : index
    %22 = vector.load %arg6[%c0_17, %c0_18] : memref<128x128xbf16, #tpu.memory_space<vmem>>, vector<128x128xbf16>
    %cst_19 = arith.constant dense<0.000000e+00> : vector<8x128xf32>
    %23 = tpu.matmul %21, %22, %cst_19 {dimension_numbers = #tpu.dot_dimension_numbers<[1], [0], [0], [1], [0, 0, 1, 1], [], []>} : vector<8x128xbf16>, vector<128x128xbf16>, vector<8x128xf32> -> vector<8x128xf32>
    %c0_20 = arith.constant 0 : index
    %c0_21 = arith.constant 0 : index
    %24 = vector.load %arg7[%c0_20, %c0_21] : memref<1x128xf32, #tpu.memory_space<vmem>>, vector<1x128xf32>
    %25 = vector.broadcast %24 : vector<1x128xf32> to vector<8x128xf32>
    %26 = arith.addf %23, %25 : vector<8x128xf32>
    %c0_22 = arith.constant 0 : index
    %c0_23 = arith.constant 0 : index
    %27 = vector.load %arg8[%c0_22, %c0_23] : memref<8x128xf32, #tpu.memory_space<vmem>>, vector<8x128xf32>
    tpu.vector_store %arg8[%c0_22, %c0_23], %26 {strides = array<i32>} : memref<8x128xf32, #tpu.memory_space<vmem>>, vector<8x128xf32>,
    return
  }
  func.func @transform_0(%arg0: i32) -> (i32, i32) {
    %c0_i32 = arith.constant 0 : i32
    %c0_i32_0 = arith.constant 0 : i32
    %c0_i32_1 = arith.constant 0 : i32
    return %c0_i32, %c0_i32_0 : i32, i32
  }
  func.func @transform_1(%arg0: i32) -> (i32, i32) {
    %c0_i32 = arith.constant 0 : i32
    %c0_i32_0 = arith.constant 0 : i32
    %c0_i32_1 = arith.constant 0 : i32
    return %c0_i32, %c0_i32_0 : i32, i32
  }
  func.func @transform_2(%arg0: i32) -> (i32, i32) {
    %c0_i32 = arith.constant 0 : i32
    %c0_i32_0 = arith.constant 0 : i32
    %c0_i32_1 = arith.constant 0 : i32
    return %c0_i32, %c0_i32_0 : i32, i32
  }
  func.func @transform_3(%arg0: i32) -> (i32, i32) {
    %c0_i32 = arith.constant 0 : i32
    %c0_i32_0 = arith.constant 0 : i32
    %c0_i32_1 = arith.constant 0 : i32
    return %c0_i32, %c0_i32_0 : i32, i32
  }
  func.func @transform_4(%arg0: i32) -> (i32, i32) {
    %c0_i32 = arith.constant 0 : i32
    %c0_i32_0 = arith.constant 0 : i32
    %c0_i32_1 = arith.constant 0 : i32
    return %c0_i32, %c0_i32_0 : i32, i32
  }
  func.func @transform_5(%arg0: i32) -> (i32, i32) {
    %c0_i32 = arith.constant 0 : i32
    %c0_i32_0 = arith.constant 0 : i32
    %c0_i32_1 = arith.constant 0 : i32
    return %c0_i32, %c0_i32_0 : i32, i32
  }
  func.func @transform_6(%arg0: i32) -> (i32, i32) {
    %c0_i32 = arith.constant 0 : i32
    %c0_i32_0 = arith.constant 0 : i32
    %c0_i32_1 = arith.constant 0 : i32
    return %c0_i32, %c0_i32_0 : i32, i32
  }
  func.func @transform_7(%arg0: i32) -> (i32, i32) {
    %c0_i32 = arith.constant 0 : i32
    %c0_i32_0 = arith.constant 0 : i32
    %c0_i32_1 = arith.constant 0 : i32
    return %c0_i32, %c0_i32_0 : i32, i32
  }
  func.func @transform_8(%arg0: i32) -> (i32, i32) {
    %c0_i32 = arith.constant 0 : i32
    %c0_i32_0 = arith.constant 0 : i32
    %c0_i32_1 = arith.constant 0 : i32
    return %c0_i32, %c0_i32_0 : i32, i32
  }
}

</mosaic_0001>

<bundles_post_ra>
// kernel: forward.4
= control target key start
LH: loop header
LB: loop body
LE: loop exit
PB: predicated region body
PF: predicated region fallthrough
CT: control target
= control target key end

     0   :  { %s4988_s12 = smov 0   ;;  %s4990_s13 = smov 0   ;;  %s6310_s0 = inlined_call_operand.vmem [shape: bf16[16,75], index: 0, kind: input, shape index: {}]   ;;  %s6311_s1 = inlined_call_operand.vmem [shape: bf16[75,25088], index: 1, kind: input, shape index: {}]   ;;  %s6312_s2 = inlined_call_operand.vmem [shape: f32[16,1], index: 2, kind: input, shape index: {}]   ;;  %s6313_s3 = inlined_call_operand.vmem [shape: bf16[16,25088], index: 3, kind: output, shape index: {}]  }
   0x1   :  { %s4992_s14 = smov 0  }
   0x2 LB: > { %s4115_s15 = sadd.s32 4294967295, %s4962_s14   ;;  %s5005_s16 = sadd.s32 1, %s4962_s14   ;;  %s4962_s14 = sphi %s4992_s14, %s6317_s14   ;;  %s4958_s13 = sphi %s4990_s13, %s6316_s13   ;;  %s4954_s12 = sphi %s4988_s12, %s6315_s12  }
   0x3   : > { %s38_s17 = ssub.s32 %s4962_s14, %s5005_s16  ;;  %s41_s18 = sadd.s32 1, %s4958_s13 }
   0x4   : > { %p39_p0 = scmp.eq.s32.totalorder %s38_s17, 0  ;;  %p48_p1 = scmp.ne.s32.totalorder %s4958_s13, %s4954_s12 }
   0x5   : > { %p49_p2 = scmp.eq.s32.totalorder %s4962_s14, 0  ;;  %p99_p3 = scmp.eq.s32.totalorder %s4115_s15, 3 }
   0x6   : > { %s5016_s19 = scalar_select %p39_p0, %s4958_s13, %s41_s18  }
   0x7   : > { %p50_p4 = por %p49_p2, %p48_p1  ;;  %p5018_p5 = por %p99_p3, %p48_p1 }
   0x8   : > { %p4118_p6 = scmp.ge.s32.totalorder %s4962_s14, 4 }
   0xa   : > { %127 = sbr.rel (%p4118_p6) target bundleno = 146 (0x92), region = 24 }
   0xf   : > { %130 = sbr.rel (!%p50_p4) target bundleno = 146 (0x92), region = 28  ;;  %s132_s21 = sand.u32 (%p50_p4), 1, %s4958_s13  }
  0x10   : > { %s4469_s22 = smul.u32 (%p50_p4), 196, %s4962_s14 }
  0x11   : > { %s4541_s23 = smul.u32 (%p50_p4), 1960, %s132_s21 }
  0x12   : > { %s5028_s26 = scalar_lea.vmem (%p50_p4), %s6311_s1, %s4469_s22 }
  0x13   : > { %v152_v0 = vld [vmem:[%s5028_s26] sm:$0xff] (%p50_p4)  ;;  %v154_v1 = vld [vmem:[%s5028_s26 + $0x8] sm:$0xff] (%p50_p4)  ;;  %v156_v2 = vld [vmem:[%s5028_s26 + $0x10] sm:$0xff] (%p50_p4)  ;;  %s5033_s27 = scalar_lea.vmem (%p50_p4), [#allocation2], %s4541_s23 }
  0x14   : > { %153 = vst [vmem:[%s5033_s27] sm:$0xff] %v152_v0  ;;  %155 = vst [vmem:[%s5033_s27 + $0x8] sm:$0xff] %v154_v1  ;;  %v158_v3 = vld [vmem:[%s5028_s26 + $0x18] sm:$0xff]  ;;  %v160_v4 = vld [vmem:[%s5028_s26 + $0x20] sm:$0xff] }
  0x15   : > { %157 = vst [vmem:[%s5033_s27 + $0x10] sm:$0xff] %v156_v2  ;;  %v162_v5 = vld [vmem:[%s5028_s26 + $0x28] sm:$0xff]  ;;  %159 = vst [vmem:[%s5033_s27 + $0x18] sm:$0xff] %v158_v3  ;;  %v164_v6 = vld [vmem:[%s5028_s26 + $0x30] sm:$0xff] }
  0x16   : > { %161 = vst [vmem:[%s5033_s27 + $0x20] sm:$0xff] %v160_v4  ;;  %163 = vst [vmem:[%s5033_s27 + $0x28] sm:$0xff] %v162_v5  ;;  %v166_v7 = vld [vmem:[%s5028_s26 + $0x38] sm:$0xff]  ;;  %v168_v8 = vld [vmem:[%s5028_s26 + $0x40] sm:$0xff] }
  0x17   : > { %165 = vst [vmem:[%s5033_s27 + $0x30] sm:$0xff] %v164_v6  ;;  %167 = vst [vmem:[%s5033_s27 + $0x38] sm:$0xff] %v166_v7  ;;  %v170_v9 = vld [vmem:[%s5028_s26 + $0x48] sm:$0xff]  ;;  %v172_v10 = vld [vmem:[%s5028_s26 + $0x50] sm:$0xff] }
  0x18   : > { %169 = vst [vmem:[%s5033_s27 + $0x40] sm:$0xff] %v168_v8  ;;  %v174_v11 = vld [vmem:[%s5028_s26 + $0x58] sm:$0xff]  ;;  %171 = vst [vmem:[%s5033_s27 + $0x48] sm:$0xff] %v170_v9  ;;  %v176_v12 = vld [vmem:[%s5028_s26 + $0x60] sm:$0xff] }
  0x19   : > { %173 = vst [vmem:[%s5033_s27 + $0x50] sm:$0xff] %v172_v10  ;;  %175 = vst [vmem:[%s5033_s27 + $0x58] sm:$0xff] %v174_v11  ;;  %v178_v13 = vld [vmem:[%s5028_s26 + $0x68] sm:$0xff]  ;;  %v180_v14 = vld [vmem:[%s5028_s26 + $0x70] sm:$0xff] }
  0x1a   : > { %177 = vst [vmem:[%s5033_s27 + $0x60] sm:$0xff] %v176_v12  ;;  %179 = vst [vmem:[%s5033_s27 + $0x68] sm:$0xff] %v178_v13  ;;  %v182_v15 = vld [vmem:[%s5028_s26 + $0x78] sm:$0xff]  ;;  %v184_v16 = vld [vmem:[%s5028_s26 + $0x80] sm:$0xff] }
  0x1b   : > { %181 = vst [vmem:[%s5033_s27 + $0x70] sm:$0xff] %v180_v14  ;;  %v186_v17 = vld [vmem:[%s5028_s26 + $0x88] sm:$0xff]  ;;  %183 = vst [vmem:[%s5033_s27 + $0x78] sm:$0xff] %v182_v15  ;;  %v188_v18 = vld [vmem:[%s5028_s26 + $0x90] sm:$0xff] }
  0x1c   : > { %185 = vst [vmem:[%s5033_s27 + $0x80] sm:$0xff] %v184_v16  ;;  %187 = vst [vmem:[%s5033_s27 + $0x88] sm:$0xff] %v186_v17  ;;  %v190_v19 = vld [vmem:[%s5028_s26 + $0x98] sm:$0xff]  ;;  %v192_v20 = vld [vmem:[%s5028_s26 + $0xa0] sm:$0xff] }
  0x1d   : > { %189 = vst [vmem:[%s5033_s27 + $0x90] sm:$0xff] %v188_v18  ;;  %191 = vst [vmem:[%s5033_s27 + $0x98] sm:$0xff] %v190_v19  ;;  %v194_v21 = vld [vmem:[%s5028_s26 + $0xa8] sm:$0xff]  ;;  %v196_v22 = vld [vmem:[%s5028_s26 + $0xb0] sm:$0xff] }
  0x1e   : > { %193 = vst [vmem:[%s5033_s27 + $0xa0] sm:$0xff] %v192_v20  ;;  %v198_v23 = vld [vmem:[%s5028_s26 + $0xb8] sm:$0xff]  ;;  %195 = vst [vmem:[%s5033_s27 + $0xa8] sm:$0xff] %v194_v21  ;;  %v200_v24 = vld [vmem:[%s5028_s26 + $0x310] sm:$0xff] }
  0x1f   : > { %197 = vst [vmem:[%s5033_s27 + $0xb0] sm:$0xff] %v196_v22  ;;  %199 = vst [vmem:[%s5033_s27 + $0xb8] sm:$0xff] %v198_v23  ;;  %v202_v25 = vld [vmem:[%s5028_s26 + $0x318] sm:$0xff]  ;;  %v204_v26 = vld [vmem:[%s5028_s26 + $0x320] sm:$0xff] }
  0x20   : > { %201 = vst [vmem:[%s5033_s27 + $0xc4] sm:$0xff] %v200_v24  ;;  %203 = vst [vmem:[%s5033_s27 + $0xcc] sm:$0xff] %v202_v25  ;;  %v206_v27 = vld [vmem:[%s5028_s26 + $0x328] sm:$0xff]  ;;  %v208_v28 = vld [vmem:[%s5028_s26 + $0x330] sm:$0xff] }
  0x21   : > { %205 = vst [vmem:[%s5033_s27 + $0xd4] sm:$0xff] %v204_v26  ;;  %v210_v29 = vld [vmem:[%s5028_s26 + $0x338] sm:$0xff]  ;;  %207 = vst [vmem:[%s5033_s27 + $0xdc] sm:$0xff] %v206_v27  ;;  %v212_v30 = vld [vmem:[%s5028_s26 + $0x340] sm:$0xff] }
  0x22   : > { %209 = vst [vmem:[%s5033_s27 + $0xe4] sm:$0xff] %v208_v28  ;;  %211 = vst [vmem:[%s5033_s27 + $0xec] sm:$0xff] %v210_v29  ;;  %v214_v31 = vld [vmem:[%s5028_s26 + $0x348] sm:$0xff]  ;;  %v216_v32 = vld [vmem:[%s5028_s26 + $0x350] sm:$0xff] }
  0x23   : > { %213 = vst [vmem:[%s5033_s27 + $0xf4] sm:$0xff] %v212_v30  ;;  %215 = vst [vmem:[%s5033_s27 + $0xfc] sm:$0xff] %v214_v31  ;;  %v218_v33 = vld [vmem:[%s5028_s26 + $0x358] sm:$0xff]  ;;  %v220_v34 = vld [vmem:[%s5028_s26 + $0x360] sm:$0xff] }
  0x24   : > { %217 = vst [vmem:[%s5033_s27 + $0x104] sm:$0xff] %v216_v32  ;;  %v222_v35 = vld [vmem:[%s5028_s26 + $0x368] sm:$0xff]  ;;  %219 = vst [vmem:[%s5033_s27 + $0x10c] sm:$0xff] %v218_v33  ;;  %v224_v36 = vld [vmem:[%s5028_s26 + $0x370] sm:$0xff] }
  0x25   : > { %221 = vst [vmem:[%s5033_s27 + $0x114] sm:$0xff] %v220_v34  ;;  %223 = vst [vmem:[%s5033_s27 + $0x11c] sm:$0xff] %v222_v35  ;;  %v226_v37 = vld [vmem:[%s5028_s26 + $0x378] sm:$0xff]  ;;  %v228_v38 = vld [vmem:[%s5028_s26 + $0x380] sm:$0xff] }
  0x26   : > { %225 = vst [vmem:[%s5033_s27 + $0x124] sm:$0xff] %v224_v36  ;;  %227 = vst [vmem:[%s5033_s27 + $0x12c] sm:$0xff] %v226_v37  ;;  %v230_v39 = vld [vmem:[%s5028_s26 + $0x388] sm:$0xff]  ;;  %v232_v40 = vld [vmem:[%s5028_s26 + $0x390] sm:$0xff] }
  0x27   : > { %229 = vst [vmem:[%s5033_s27 + $0x134] sm:$0xff] %v228_v38  ;;  %v234_v41 = vld [vmem:[%s5028_s26 + $0x398] sm:$0xff]  ;;  %231 = vst [vmem:[%s5033_s27 + $0x13c] sm:$0xff] %v230_v39  ;;  %v236_v42 = vld [vmem:[%s5028_s26 + $0x3a0] sm:$0xff] }
  0x28   : > { %233 = vst [vmem:[%s5033_s27 + $0x144] sm:$0xff] %v232_v40  ;;  %235 = vst [vmem:[%s5033_s27 + $0x14c] sm:$0xff] %v234_v41  ;;  %v238_v43 = vld [vmem:[%s5028_s26 + $0x3a8] sm:$0xff]  ;;  %v240_v44 = vld [vmem:[%s5028_s26 + $0x3b0] sm:$0xff] }
  0x29   : > { %237 = vst [vmem:[%s5033_s27 + $0x154] sm:$0xff] %v236_v42  ;;  %239 = vst [vmem:[%s5033_s27 + $0x15c] sm:$0xff] %v238_v43  ;;  %v242_v45 = vld [vmem:[%s5028_s26 + $0x3b8] sm:$0xff]  ;;  %v244_v46 = vld [vmem:[%s5028_s26 + $0x3c0] sm:$0xff] }
  0x2a   : > { %241 = vst [vmem:[%s5033_s27 + $0x164] sm:$0xff] %v240_v44  ;;  %v246_v47 = vld [vmem:[%s5028_s26 + $0x3c8] sm:$0xff]  ;;  %243 = vst [vmem:[%s5033_s27 + $0x16c] sm:$0xff] %v242_v45  ;;  %v248_v48 = vld [vmem:[%s5028_s26 + $0x620] sm:$0xff] }
  0x2b   : > { %245 = vst [vmem:[%s5033_s27 + $0x174] sm:$0xff] %v244_v46  ;;  %247 = vst [vmem:[%s5033_s27 + $0x17c] sm:$0xff] %v246_v47  ;;  %v250_v49 = vld [vmem:[%s5028_s26 + $0x628] sm:$0xff]  ;;  %v252_v50 = vld [vmem:[%s5028_s26 + $0x630] sm:$0xff] }
  0x2c   : > { %249 = vst [vmem:[%s5033_s27 + $0x188] sm:$0xff] %v248_v48  ;;  %251 = vst [vmem:[%s5033_s27 + $0x190] sm:$0xff] %v250_v49  ;;  %v254_v51 = vld [vmem:[%s5028_s26 + $0x638] sm:$0xff]  ;;  %v256_v52 = vld [vmem:[%s5028_s26 + $0x640] sm:$0xff] }
  0x2d   : > { %253 = vst [vmem:[%s5033_s27 + $0x198] sm:$0xff] %v252_v50  ;;  %v258_v53 = vld [vmem:[%s5028_s26 + $0x648] sm:$0xff]  ;;  %255 = vst [vmem:[%s5033_s27 + $0x1a0] sm:$0xff] %v254_v51  ;;  %v260_v54 = vld [vmem:[%s5028_s26 + $0x650] sm:$0xff] }
  0x2e   : > { %257 = vst [vmem:[%s5033_s27 + $0x1a8] sm:$0xff] %v256_v52  ;;  %259 = vst [vmem:[%s5033_s27 + $0x1b0] sm:$0xff] %v258_v53  ;;  %v262_v55 = vld [vmem:[%s5028_s26 + $0x658] sm:$0xff]  ;;  %v264_v56 = vld [vmem:[%s5028_s26 + $0x660] sm:$0xff] }
  0x2f   : > { %261 = vst [vmem:[%s5033_s27 + $0x1b8] sm:$0xff] %v260_v54  ;;  %263 = vst [vmem:[%s5033_s27 + $0x1c0] sm:$0xff] %v262_v55  ;;  %v266_v57 = vld [vmem:[%s5028_s26 + $0x668] sm:$0xff]  ;;  %v268_v58 = vld [vmem:[%s5028_s26 + $0x670] sm:$0xff] }
  0x30   : > { %265 = vst [vmem:[%s5033_s27 + $0x1c8] sm:$0xff] %v264_v56  ;;  %v270_v59 = vld [vmem:[%s5028_s26 + $0x678] sm:$0xff]  ;;  %267 = vst [vmem:[%s5033_s27 + $0x1d0] sm:$0xff] %v266_v57  ;;  %v272_v60 = vld [vmem:[%s5028_s26 + $0x680] sm:$0xff] }
  0x31   : > { %269 = vst [vmem:[%s5033_s27 + $0x1d8] sm:$0xff] %v268_v58  ;;  %271 = vst [vmem:[%s5033_s27 + $0x1e0] sm:$0xff] %v270_v59  ;;  %v274_v61 = vld [vmem:[%s5028_s26 + $0x688] sm:$0xff]  ;;  %v276_v62 = vld [vmem:[%s5028_s26 + $0x690] sm:$0xff] }
  0x32   : > { %273 = vst [vmem:[%s5033_s27 + $0x1e8] sm:$0xff] %v272_v60  ;;  %275 = vst [vmem:[%s5033_s27 + $0x1f0] sm:$0xff] %v274_v61  ;;  %v278_v63 = vld [vmem:[%s5028_s26 + $0x698] sm:$0xff]  ;;  %v280_v0 = vld [vmem:[%s5028_s26 + $0x6a0] sm:$0xff] }
  0x33   : > { %277 = vst [vmem:[%s5033_s27 + $0x1f8] sm:$0xff] %v276_v62  ;;  %v282_v1 = vld [vmem:[%s5028_s26 + $0x6a8] sm:$0xff]  ;;  %279 = vst [vmem:[%s5033_s27 + $0x200] sm:$0xff] %v278_v63  ;;  %v284_v2 = vld [vmem:[%s5028_s26 + $0x6b0] sm:$0xff] }
  0x34   : > { %281 = vst [vmem:[%s5033_s27 + $0x208] sm:$0xff] %v280_v0  ;;  %283 = vst [vmem:[%s5033_s27 + $0x210] sm:$0xff] %v282_v1  ;;  %v286_v3 = vld [vmem:[%s5028_s26 + $0x6b8] sm:$0xff]  ;;  %v288_v4 = vld [vmem:[%s5028_s26 + $0x6c0] sm:$0xff] }
  0x35   : > { %285 = vst [vmem:[%s5033_s27 + $0x218] sm:$0xff] %v284_v2  ;;  %287 = vst [vmem:[%s5033_s27 + $0x220] sm:$0xff] %v286_v3  ;;  %v290_v5 = vld [vmem:[%s5028_s26 + $0x6c8] sm:$0xff]  ;;  %v292_v6 = vld [vmem:[%s5028_s26 + $0x6d0] sm:$0xff] }
  0x36   : > { %289 = vst [vmem:[%s5033_s27 + $0x228] sm:$0xff] %v288_v4  ;;  %v294_v7 = vld [vmem:[%s5028_s26 + $0x6d8] sm:$0xff]  ;;  %291 = vst [vmem:[%s5033_s27 + $0x230] sm:$0xff] %v290_v5  ;;  %v296_v8 = vld [vmem:[%s5028_s26 + $0x930] sm:$0xff] }
  0x37   : > { %293 = vst [vmem:[%s5033_s27 + $0x238] sm:$0xff] %v292_v6  ;;  %295 = vst [vmem:[%s5033_s27 + $0x240] sm:$0xff] %v294_v7  ;;  %v298_v9 = vld [vmem:[%s5028_s26 + $0x938] sm:$0xff]  ;;  %v300_v10 = vld [vmem:[%s5028_s26 + $0x940] sm:$0xff] }
  0x38   : > { %297 = vst [vmem:[%s5033_s27 + $0x24c] sm:$0xff] %v296_v8  ;;  %299 = vst [vmem:[%s5033_s27 + $0x254] sm:$0xff] %v298_v9  ;;  %v302_v11 = vld [vmem:[%s5028_s26 + $0x948] sm:$0xff]  ;;  %v304_v12 = vld [vmem:[%s5028_s26 + $0x950] sm:$0xff] }
  0x39   : > { %301 = vst [vmem:[%s5033_s27 + $0x25c] sm:$0xff] %v300_v10  ;;  %v306_v13 = vld [vmem:[%s5028_s26 + $0x958] sm:$0xff]  ;;  %303 = vst [vmem:[%s5033_s27 + $0x264] sm:$0xff] %v302_v11  ;;  %v308_v14 = vld [vmem:[%s5028_s26 + $0x960] sm:$0xff] }
  0x3a   : > { %305 = vst [vmem:[%s5033_s27 + $0x26c] sm:$0xff] %v304_v12  ;;  %307 = vst [vmem:[%s5033_s27 + $0x274] sm:$0xff] %v306_v13  ;;  %v310_v15 = vld [vmem:[%s5028_s26 + $0x968] sm:$0xff]  ;;  %v312_v16 = vld [vmem:[%s5028_s26 + $0x970] sm:$0xff] }
  0x3b   : > { %309 = vst [vmem:[%s5033_s27 + $0x27c] sm:$0xff] %v308_v14  ;;  %311 = vst [vmem:[%s5033_s27 + $0x284] sm:$0xff] %v310_v15  ;;  %v314_v17 = vld [vmem:[%s5028_s26 + $0x978] sm:$0xff]  ;;  %v316_v18 = vld [vmem:[%s5028_s26 + $0x980] sm:$0xff] }
  0x3c   : > { %313 = vst [vmem:[%s5033_s27 + $0x28c] sm:$0xff] %v312_v16  ;;  %v318_v19 = vld [vmem:[%s5028_s26 + $0x988] sm:$0xff]  ;;  %315 = vst [vmem:[%s5033_s27 + $0x294] sm:$0xff] %v314_v17  ;;  %v320_v20 = vld [vmem:[%s5028_s26 + $0x990] sm:$0xff] }
  0x3d   : > { %317 = vst [vmem:[%s5033_s27 + $0x29c] sm:$0xff] %v316_v18  ;;  %319 = vst [vmem:[%s5033_s27 + $0x2a4] sm:$0xff] %v318_v19  ;;  %v322_v21 = vld [vmem:[%s5028_s26 + $0x998] sm:$0xff]  ;;  %v324_v22 = vld [vmem:[%s5028_s26 + $0x9a0] sm:$0xff] }
  0x3e   : > { %321 = vst [vmem:[%s5033_s27 + $0x2ac] sm:$0xff] %v320_v20  ;;  %323 = vst [vmem:[%s5033_s27 + $0x2b4] sm:$0xff] %v322_v21  ;;  %v326_v23 = vld [vmem:[%s5028_s26 + $0x9a8] sm:$0xff]  ;;  %v328_v24 = vld [vmem:[%s5028_s26 + $0x9b0] sm:$0xff] }
  0x3f   : > { %325 = vst [vmem:[%s5033_s27 + $0x2bc] sm:$0xff] %v324_v22  ;;  %v330_v25 = vld [vmem:[%s5028_s26 + $0x9b8] sm:$0xff]  ;;  %327 = vst [vmem:[%s5033_s27 + $0x2c4] sm:$0xff] %v326_v23  ;;  %v332_v26 = vld [vmem:[%s5028_s26 + $0x9c0] sm:$0xff] }
  0x40   : > { %329 = vst [vmem:[%s5033_s27 + $0x2cc] sm:$0xff] %v328_v24  ;;  %331 = vst [vmem:[%s5033_s27 + $0x2d4] sm:$0xff] %v330_v25  ;;  %v334_v27 = vld [vmem:[%s5028_s26 + $0x9c8] sm:$0xff]  ;;  %v336_v28 = vld [vmem:[%s5028_s26 + $0x9d0] sm:$0xff] }
  0x41   : > { %333 = vst [vmem:[%s5033_s27 + $0x2dc] sm:$0xff] %v332_v26  ;;  %335 = vst [vmem:[%s5033_s27 + $0x2e4] sm:$0xff] %v334_v27  ;;  %v338_v29 = vld [vmem:[%s5028_s26 + $0x9d8] sm:$0xff]  ;;  %v340_v30 = vld [vmem:[%s5028_s26 + $0x9e0] sm:$0xff] }
  0x42   : > { %337 = vst [vmem:[%s5033_s27 + $0x2ec] sm:$0xff] %v336_v28  ;;  %v342_v31 = vld [vmem:[%s5028_s26 + $0x9e8] sm:$0xff]  ;;  %339 = vst [vmem:[%s5033_s27 + $0x2f4] sm:$0xff] %v338_v29  ;;  %v344_v32 = vld [vmem:[%s5028_s26 + $0xc40] sm:$0xff] }
  0x43   : > { %341 = vst [vmem:[%s5033_s27 + $0x2fc] sm:$0xff] %v340_v30  ;;  %343 = vst [vmem:[%s5033_s27 + $0x304] sm:$0xff] %v342_v31  ;;  %v346_v33 = vld [vmem:[%s5028_s26 + $0xc48] sm:$0xff]  ;;  %v348_v34 = vld [vmem:[%s5028_s26 + $0xc50] sm:$0xff] }
  0x44   : > { %345 = vst [vmem:[%s5033_s27 + $0x310] sm:$0xff] %v344_v32  ;;  %347 = vst [vmem:[%s5033_s27 + $0x318] sm:$0xff] %v346_v33  ;;  %v350_v35 = vld [vmem:[%s5028_s26 + $0xc58] sm:$0xff]  ;;  %v352_v36 = vld [vmem:[%s5028_s26 + $0xc60] sm:$0xff] }
  0x45   : > { %349 = vst [vmem:[%s5033_s27 + $0x320] sm:$0xff] %v348_v34  ;;  %v354_v37 = vld [vmem:[%s5028_s26 + $0xc68] sm:$0xff]  ;;  %351 = vst [vmem:[%s5033_s27 + $0x328] sm:$0xff] %v350_v35  ;;  %v356_v38 = vld [vmem:[%s5028_s26 + $0xc70] sm:$0xff] }
  0x46   : > { %353 = vst [vmem:[%s5033_s27 + $0x330] sm:$0xff] %v352_v36  ;;  %355 = vst [vmem:[%s5033_s27 + $0x338] sm:$0xff] %v354_v37  ;;  %v358_v39 = vld [vmem:[%s5028_s26 + $0xc78] sm:$0xff]  ;;  %v360_v40 = vld [vmem:[%s5028_s26 + $0xc80] sm:$0xff] }
  0x47   : > { %357 = vst [vmem:[%s5033_s27 + $0x340] sm:$0xff] %v356_v38  ;;  %359 = vst [vmem:[%s5033_s27 + $0x348] sm:$0xff] %v358_v39  ;;  %v362_v41 = vld [vmem:[%s5028_s26 + $0xc88] sm:$0xff]  ;;  %v364_v42 = vld [vmem:[%s5028_s26 + $0xc90] sm:$0xff] }
  0x48   : > { %361 = vst [vmem:[%s5033_s27 + $0x350] sm:$0xff] %v360_v40  ;;  %v366_v43 = vld [vmem:[%s5028_s26 + $0xc98] sm:$0xff]  ;;  %363 = vst [vmem:[%s5033_s27 + $0x358] sm:$0xff] %v362_v41  ;;  %v368_v44 = vld [vmem:[%s5028_s26 + $0xca0] sm:$0xff] }
  0x49   : > { %365 = vst [vmem:[%s5033_s27 + $0x360] sm:$0xff] %v364_v42  ;;  %367 = vst [vmem:[%s5033_s27 + $0x368] sm:$0xff] %v366_v43  ;;  %v370_v45 = vld [vmem:[%s5028_s26 + $0xca8] sm:$0xff]  ;;  %v372_v46 = vld [vmem:[%s5028_s26 + $0xcb0] sm:$0xff] }
  0x4a   : > { %369 = vst [vmem:[%s5033_s27 + $0x370] sm:$0xff] %v368_v44  ;;  %371 = vst [vmem:[%s5033_s27 + $0x378] sm:$0xff] %v370_v45  ;;  %v374_v47 = vld [vmem:[%s5028_s26 + $0xcb8] sm:$0xff]  ;;  %v376_v48 = vld [vmem:[%s5028_s26 + $0xcc0] sm:$0xff] }
  0x4b   : > { %373 = vst [vmem:[%s5033_s27 + $0x380] sm:$0xff] %v372_v46  ;;  %v378_v49 = vld [vmem:[%s5028_s26 + $0xcc8] sm:$0xff]  ;;  %375 = vst [vmem:[%s5033_s27 + $0x388] sm:$0xff] %v374_v47  ;;  %v380_v50 = vld [vmem:[%s5028_s26 + $0xcd0] sm:$0xff] }
  0x4c   : > { %377 = vst [vmem:[%s5033_s27 + $0x390] sm:$0xff] %v376_v48  ;;  %379 = vst [vmem:[%s5033_s27 + $0x398] sm:$0xff] %v378_v49  ;;  %v382_v51 = vld [vmem:[%s5028_s26 + $0xcd8] sm:$0xff]  ;;  %v384_v52 = vld [vmem:[%s5028_s26 + $0xce0] sm:$0xff] }
  0x4d   : > { %381 = vst [vmem:[%s5033_s27 + $0x3a0] sm:$0xff] %v380_v50  ;;  %383 = vst [vmem:[%s5033_s27 + $0x3a8] sm:$0xff] %v382_v51  ;;  %v386_v53 = vld [vmem:[%s5028_s26 + $0xce8] sm:$0xff]  ;;  %v388_v54 = vld [vmem:[%s5028_s26 + $0xcf0] sm:$0xff] }
  0x4e   : > { %385 = vst [vmem:[%s5033_s27 + $0x3b0] sm:$0xff] %v384_v52  ;;  %v390_v55 = vld [vmem:[%s5028_s26 + $0xcf8] sm:$0xff]  ;;  %387 = vst [vmem:[%s5033_s27 + $0x3b8] sm:$0xff] %v386_v53  ;;  %v392_v56 = vld [vmem:[%s5028_s26 + $0xf50] sm:$0xff] }
  0x4f   : > { %389 = vst [vmem:[%s5033_s27 + $0x3c0] sm:$0xff] %v388_v54  ;;  %391 = vst [vmem:[%s5033_s27 + $0x3c8] sm:$0xff] %v390_v55  ;;  %v394_v57 = vld [vmem:[%s5028_s26 + $0xf58] sm:$0xff]  ;;  %v396_v58 = vld [vmem:[%s5028_s26 + $0xf60] sm:$0xff] }
  0x50   : > { %393 = vst [vmem:[%s5033_s27 + $0x3d4] sm:$0xff] %v392_v56  ;;  %395 = vst [vmem:[%s5033_s27 + $0x3dc] sm:$0xff] %v394_v57  ;;  %v398_v59 = vld [vmem:[%s5028_s26 + $0xf68] sm:$0xff]  ;;  %v400_v60 = vld [vmem:[%s5028_s26 + $0xf70] sm:$0xff] }
  0x51   : > { %397 = vst [vmem:[%s5033_s27 + $0x3e4] sm:$0xff] %v396_v58  ;;  %v402_v61 = vld [vmem:[%s5028_s26 + $0xf78] sm:$0xff]  ;;  %399 = vst [vmem:[%s5033_s27 + $0x3ec] sm:$0xff] %v398_v59  ;;  %v404_v62 = vld [vmem:[%s5028_s26 + $0xf80] sm:$0xff] }
  0x52   : > { %401 = vst [vmem:[%s5033_s27 + $0x3f4] sm:$0xff] %v400_v60  ;;  %403 = vst [vmem:[%s5033_s27 + $0x3fc] sm:$0xff] %v402_v61  ;;  %v406_v63 = vld [vmem:[%s5028_s26 + $0xf88] sm:$0xff]  ;;  %v408_v0 = vld [vmem:[%s5028_s26 + $0xf90] sm:$0xff] }
  0x53   : > { %405 = vst [vmem:[%s5033_s27 + $0x404] sm:$0xff] %v404_v62  ;;  %407 = vst [vmem:[%s5033_s27 + $0x40c] sm:$0xff] %v406_v63  ;;  %v410_v1 = vld [vmem:[%s5028_s26 + $0xf98] sm:$0xff]  ;;  %v412_v2 = vld [vmem:[%s5028_s26 + $0xfa0] sm:$0xff] }
  0x54   : > { %409 = vst [vmem:[%s5033_s27 + $0x414] sm:$0xff] %v408_v0  ;;  %v414_v3 = vld [vmem:[%s5028_s26 + $0xfa8] sm:$0xff]  ;;  %411 = vst [vmem:[%s5033_s27 + $0x41c] sm:$0xff] %v410_v1  ;;  %v416_v4 = vld [vmem:[%s5028_s26 + $0xfb0] sm:$0xff] }
  0x55   : > { %413 = vst [vmem:[%s5033_s27 + $0x424] sm:$0xff] %v412_v2  ;;  %415 = vst [vmem:[%s5033_s27 + $0x42c] sm:$0xff] %v414_v3  ;;  %v418_v5 = vld [vmem:[%s5028_s26 + $0xfb8] sm:$0xff]  ;;  %v420_v6 = vld [vmem:[%s5028_s26 + $0xfc0] sm:$0xff] }
  0x56   : > { %417 = vst [vmem:[%s5033_s27 + $0x434] sm:$0xff] %v416_v4  ;;  %419 = vst [vmem:[%s5033_s27 + $0x43c] sm:$0xff] %v418_v5  ;;  %v422_v7 = vld [vmem:[%s5028_s26 + $0xfc8] sm:$0xff]  ;;  %v424_v8 = vld [vmem:[%s5028_s26 + $0xfd0] sm:$0xff] }
  0x57   : > { %421 = vst [vmem:[%s5033_s27 + $0x444] sm:$0xff] %v420_v6  ;;  %v426_v9 = vld [vmem:[%s5028_s26 + $0xfd8] sm:$0xff]  ;;  %423 = vst [vmem:[%s5033_s27 + $0x44c] sm:$0xff] %v422_v7  ;;  %v428_v10 = vld [vmem:[%s5028_s26 + $0xfe0] sm:$0xff] }
  0x58   : > { %425 = vst [vmem:[%s5033_s27 + $0x454] sm:$0xff] %v424_v8  ;;  %427 = vst [vmem:[%s5033_s27 + $0x45c] sm:$0xff] %v426_v9  ;;  %v430_v11 = vld [vmem:[%s5028_s26 + $0xfe8] sm:$0xff]  ;;  %v432_v12 = vld [vmem:[%s5028_s26 + $0xff0] sm:$0xff] }
  0x59   : > { %429 = vst [vmem:[%s5033_s27 + $0x464] sm:$0xff] %v428_v10  ;;  %431 = vst [vmem:[%s5033_s27 + $0x46c] sm:$0xff] %v430_v11  ;;  %v434_v13 = vld [vmem:[%s5028_s26 + $0xff8] sm:$0xff]  ;;  %v436_v14 = vld [vmem:[%s5028_s26 + $0x1000] sm:$0xff] }
  0x5a   : > { %433 = vst [vmem:[%s5033_s27 + $0x474] sm:$0xff] %v432_v12  ;;  %v438_v15 = vld [vmem:[%s5028_s26 + $0x1008] sm:$0xff]  ;;  %435 = vst [vmem:[%s5033_s27 + $0x47c] sm:$0xff] %v434_v13  ;;  %v440_v16 = vld [vmem:[%s5028_s26 + $0x1260] sm:$0xff] }
  0x5b   : > { %437 = vst [vmem:[%s5033_s27 + $0x484] sm:$0xff] %v436_v14  ;;  %439 = vst [vmem:[%s5033_s27 + $0x48c] sm:$0xff] %v438_v15  ;;  %v442_v17 = vld [vmem:[%s5028_s26 + $0x1268] sm:$0xff]  ;;  %v444_v18 = vld [vmem:[%s5028_s26 + $0x1270] sm:$0xff] }
  0x5c   : > { %441 = vst [vmem:[%s5033_s27 + $0x498] sm:$0xff] %v440_v16  ;;  %443 = vst [vmem:[%s5033_s27 + $0x4a0] sm:$0xff] %v442_v17  ;;  %v446_v19 = vld [vmem:[%s5028_s26 + $0x1278] sm:$0xff]  ;;  %v448_v20 = vld [vmem:[%s5028_s26 + $0x1280] sm:$0xff] }
  0x5d   : > { %445 = vst [vmem:[%s5033_s27 + $0x4a8] sm:$0xff] %v444_v18  ;;  %v450_v21 = vld [vmem:[%s5028_s26 + $0x1288] sm:$0xff]  ;;  %447 = vst [vmem:[%s5033_s27 + $0x4b0] sm:$0xff] %v446_v19  ;;  %v452_v22 = vld [vmem:[%s5028_s26 + $0x1290] sm:$0xff] }
  0x5e   : > { %449 = vst [vmem:[%s5033_s27 + $0x4b8] sm:$0xff] %v448_v20  ;;  %451 = vst [vmem:[%s5033_s27 + $0x4c0] sm:$0xff] %v450_v21  ;;  %v454_v23 = vld [vmem:[%s5028_s26 + $0x1298] sm:$0xff]  ;;  %v456_v24 = vld [vmem:[%s5028_s26 + $0x12a0] sm:$0xff] }
  0x5f   : > { %453 = vst [vmem:[%s5033_s27 + $0x4c8] sm:$0xff] %v452_v22  ;;  %455 = vst [vmem:[%s5033_s27 + $0x4d0] sm:$0xff] %v454_v23  ;;  %v458_v25 = vld [vmem:[%s5028_s26 + $0x12a8] sm:$0xff]  ;;  %v460_v26 = vld [vmem:[%s5028_s26 + $0x12b0] sm:$0xff] }
  0x60   : > { %457 = vst [vmem:[%s5033_s27 + $0x4d8] sm:$0xff] %v456_v24  ;;  %v462_v27 = vld [vmem:[%s5028_s26 + $0x12b8] sm:$0xff]  ;;  %459 = vst [vmem:[%s5033_s27 + $0x4e0] sm:$0xff] %v458_v25  ;;  %v464_v28 = vld [vmem:[%s5028_s26 + $0x12c0] sm:$0xff] }
  0x61   : > { %461 = vst [vmem:[%s5033_s27 + $0x4e8] sm:$0xff] %v460_v26  ;;  %463 = vst [vmem:[%s5033_s27 + $0x4f0] sm:$0xff] %v462_v27  ;;  %v466_v29 = vld [vmem:[%s5028_s26 + $0x12c8] sm:$0xff]  ;;  %v468_v30 = vld [vmem:[%s5028_s26 + $0x12d0] sm:$0xff] }
  0x62   : > { %465 = vst [vmem:[%s5033_s27 + $0x4f8] sm:$0xff] %v464_v28  ;;  %467 = vst [vmem:[%s5033_s27 + $0x500] sm:$0xff] %v466_v29  ;;  %v470_v31 = vld [vmem:[%s5028_s26 + $0x12d8] sm:$0xff]  ;;  %v472_v32 = vld [vmem:[%s5028_s26 + $0x12e0] sm:$0xff] }
  0x63   : > { %469 = vst [vmem:[%s5033_s27 + $0x508] sm:$0xff] %v468_v30  ;;  %v474_v33 = vld [vmem:[%s5028_s26 + $0x12e8] sm:$0xff]  ;;  %471 = vst [vmem:[%s5033_s27 + $0x510] sm:$0xff] %v470_v31  ;;  %v476_v34 = vld [vmem:[%s5028_s26 + $0x12f0] sm:$0xff] }
  0x64   : > { %473 = vst [vmem:[%s5033_s27 + $0x518] sm:$0xff] %v472_v32  ;;  %475 = vst [vmem:[%s5033_s27 + $0x520] sm:$0xff] %v474_v33  ;;  %v478_v35 = vld [vmem:[%s5028_s26 + $0x12f8] sm:$0xff]  ;;  %v480_v36 = vld [vmem:[%s5028_s26 + $0x1300] sm:$0xff] }
  0x65   : > { %477 = vst [vmem:[%s5033_s27 + $0x528] sm:$0xff] %v476_v34  ;;  %479 = vst [vmem:[%s5033_s27 + $0x530] sm:$0xff] %v478_v35  ;;  %v482_v37 = vld [vmem:[%s5028_s26 + $0x1308] sm:$0xff]  ;;  %v484_v38 = vld [vmem:[%s5028_s26 + $0x1310] sm:$0xff] }
  0x66   : > { %481 = vst [vmem:[%s5033_s27 + $0x538] sm:$0xff] %v480_v36  ;;  %v486_v39 = vld [vmem:[%s5028_s26 + $0x1318] sm:$0xff]  ;;  %483 = vst [vmem:[%s5033_s27 + $0x540] sm:$0xff] %v482_v37  ;;  %v488_v40 = vld [vmem:[%s5028_s26 + $0x1570] sm:$0xff] }
  0x67   : > { %485 = vst [vmem:[%s5033_s27 + $0x548] sm:$0xff] %v484_v38  ;;  %487 = vst [vmem:[%s5033_s27 + $0x550] sm:$0xff] %v486_v39  ;;  %v490_v41 = vld [vmem:[%s5028_s26 + $0x1578] sm:$0xff]  ;;  %v492_v42 = vld [vmem:[%s5028_s26 + $0x1580] sm:$0xff] }
  0x68   : > { %489 = vst [vmem:[%s5033_s27 + $0x55c] sm:$0xff] %v488_v40  ;;  %491 = vst [vmem:[%s5033_s27 + $0x564] sm:$0xff] %v490_v41  ;;  %v494_v43 = vld [vmem:[%s5028_s26 + $0x1588] sm:$0xff]  ;;  %v496_v44 = vld [vmem:[%s5028_s26 + $0x1590] sm:$0xff] }
  0x69   : > { %493 = vst [vmem:[%s5033_s27 + $0x56c] sm:$0xff] %v492_v42  ;;  %v498_v45 = vld [vmem:[%s5028_s26 + $0x1598] sm:$0xff]  ;;  %495 = vst [vmem:[%s5033_s27 + $0x574] sm:$0xff] %v494_v43  ;;  %v500_v46 = vld [vmem:[%s5028_s26 + $0x15a0] sm:$0xff] }
  0x6a   : > { %497 = vst [vmem:[%s5033_s27 + $0x57c] sm:$0xff] %v496_v44  ;;  %499 = vst [vmem:[%s5033_s27 + $0x584] sm:$0xff] %v498_v45  ;;  %v502_v47 = vld [vmem:[%s5028_s26 + $0x15a8] sm:$0xff]  ;;  %v504_v48 = vld [vmem:[%s5028_s26 + $0x15b0] sm:$0xff] }
  0x6b   : > { %501 = vst [vmem:[%s5033_s27 + $0x58c] sm:$0xff] %v500_v46  ;;  %503 = vst [vmem:[%s5033_s27 + $0x594] sm:$0xff] %v502_v47  ;;  %v506_v49 = vld [vmem:[%s5028_s26 + $0x15b8] sm:$0xff]  ;;  %v508_v50 = vld [vmem:[%s5028_s26 + $0x15c0] sm:$0xff] }
  0x6c   : > { %505 = vst [vmem:[%s5033_s27 + $0x59c] sm:$0xff] %v504_v48  ;;  %v510_v51 = vld [vmem:[%s5028_s26 + $0x15c8] sm:$0xff]  ;;  %507 = vst [vmem:[%s5033_s27 + $0x5a4] sm:$0xff] %v506_v49  ;;  %v512_v52 = vld [vmem:[%s5028_s26 + $0x15d0] sm:$0xff] }
  0x6d   : > { %509 = vst [vmem:[%s5033_s27 + $0x5ac] sm:$0xff] %v508_v50  ;;  %511 = vst [vmem:[%s5033_s27 + $0x5b4] sm:$0xff] %v510_v51  ;;  %v514_v53 = vld [vmem:[%s5028_s26 + $0x15d8] sm:$0xff]  ;;  %v516_v54 = vld [vmem:[%s5028_s26 + $0x15e0] sm:$0xff] }
  0x6e   : > { %513 = vst [vmem:[%s5033_s27 + $0x5bc] sm:$0xff] %v512_v52  ;;  %515 = vst [vmem:[%s5033_s27 + $0x5c4] sm:$0xff] %v514_v53  ;;  %v518_v55 = vld [vmem:[%s5028_s26 + $0x15e8] sm:$0xff]  ;;  %v520_v56 = vld [vmem:[%s5028_s26 + $0x15f0] sm:$0xff] }
  0x6f   : > { %517 = vst [vmem:[%s5033_s27 + $0x5cc] sm:$0xff] %v516_v54  ;;  %v522_v57 = vld [vmem:[%s5028_s26 + $0x15f8] sm:$0xff]  ;;  %519 = vst [vmem:[%s5033_s27 + $0x5d4] sm:$0xff] %v518_v55  ;;  %v524_v58 = vld [vmem:[%s5028_s26 + $0x1600] sm:$0xff] }
  0x70   : > { %521 = vst [vmem:[%s5033_s27 + $0x5dc] sm:$0xff] %v520_v56  ;;  %523 = vst [vmem:[%s5033_s27 + $0x5e4] sm:$0xff] %v522_v57  ;;  %v526_v59 = vld [vmem:[%s5028_s26 + $0x1608] sm:$0xff]  ;;  %v528_v60 = vld [vmem:[%s5028_s26 + $0x1610] sm:$0xff] }
  0x71   : > { %525 = vst [vmem:[%s5033_s27 + $0x5ec] sm:$0xff] %v524_v58  ;;  %527 = vst [vmem:[%s5033_s27 + $0x5f4] sm:$0xff] %v526_v59  ;;  %v530_v61 = vld [vmem:[%s5028_s26 + $0x1618] sm:$0xff]  ;;  %v532_v62 = vld [vmem:[%s5028_s26 + $0x1620] sm:$0xff] }
  0x72   : > { %529 = vst [vmem:[%s5033_s27 + $0x5fc] sm:$0xff] %v528_v60  ;;  %v534_v63 = vld [vmem:[%s5028_s26 + $0x1628] sm:$0xff]  ;;  %531 = vst [vmem:[%s5033_s27 + $0x604] sm:$0xff] %v530_v61  ;;  %v536_v0 = vld [vmem:[%s5028_s26 + $0x1880] sm:$0xff] }
  0x73   : > { %533 = vst [vmem:[%s5033_s27 + $0x60c] sm:$0xff] %v532_v62  ;;  %535 = vst [vmem:[%s5033_s27 + $0x614] sm:$0xff] %v534_v63  ;;  %v538_v1 = vld [vmem:[%s5028_s26 + $0x1888] sm:$0xff]  ;;  %v540_v2 = vld [vmem:[%s5028_s26 + $0x1890] sm:$0xff] }
  0x74   : > { %537 = vst [vmem:[%s5033_s27 + $0x620] sm:$0xff] %v536_v0  ;;  %539 = vst [vmem:[%s5033_s27 + $0x628] sm:$0xff] %v538_v1  ;;  %v542_v3 = vld [vmem:[%s5028_s26 + $0x1898] sm:$0xff]  ;;  %v544_v4 = vld [vmem:[%s5028_s26 + $0x18a0] sm:$0xff] }
  0x75   : > { %541 = vst [vmem:[%s5033_s27 + $0x630] sm:$0xff] %v540_v2  ;;  %v546_v5 = vld [vmem:[%s5028_s26 + $0x18a8] sm:$0xff]  ;;  %543 = vst [vmem:[%s5033_s27 + $0x638] sm:$0xff] %v542_v3  ;;  %v548_v6 = vld [vmem:[%s5028_s26 + $0x18b0] sm:$0xff] }
  0x76   : > { %545 = vst [vmem:[%s5033_s27 + $0x640] sm:$0xff] %v544_v4  ;;  %547 = vst [vmem:[%s5033_s27 + $0x648] sm:$0xff] %v546_v5  ;;  %v550_v7 = vld [vmem:[%s5028_s26 + $0x18b8] sm:$0xff]  ;;  %v552_v8 = vld [vmem:[%s5028_s26 + $0x18c0] sm:$0xff] }
  0x77   : > { %549 = vst [vmem:[%s5033_s27 + $0x650] sm:$0xff] %v548_v6  ;;  %551 = vst [vmem:[%s5033_s27 + $0x658] sm:$0xff] %v550_v7  ;;  %v554_v9 = vld [vmem:[%s5028_s26 + $0x18c8] sm:$0xff]  ;;  %v556_v10 = vld [vmem:[%s5028_s26 + $0x18d0] sm:$0xff] }
  0x78   : > { %553 = vst [vmem:[%s5033_s27 + $0x660] sm:$0xff] %v552_v8  ;;  %v558_v11 = vld [vmem:[%s5028_s26 + $0x18d8] sm:$0xff]  ;;  %555 = vst [vmem:[%s5033_s27 + $0x668] sm:$0xff] %v554_v9  ;;  %v560_v12 = vld [vmem:[%s5028_s26 + $0x18e0] sm:$0xff] }
  0x79   : > { %557 = vst [vmem:[%s5033_s27 + $0x670] sm:$0xff] %v556_v10  ;;  %559 = vst [vmem:[%s5033_s27 + $0x678] sm:$0xff] %v558_v11  ;;  %v562_v13 = vld [vmem:[%s5028_s26 + $0x18e8] sm:$0xff]  ;;  %v564_v14 = vld [vmem:[%s5028_s26 + $0x18f0] sm:$0xff] }
  0x7a   : > { %561 = vst [vmem:[%s5033_s27 + $0x680] sm:$0xff] %v560_v12  ;;  %563 = vst [vmem:[%s5033_s27 + $0x688] sm:$0xff] %v562_v13  ;;  %v566_v15 = vld [vmem:[%s5028_s26 + $0x18f8] sm:$0xff]  ;;  %v568_v16 = vld [vmem:[%s5028_s26 + $0x1900] sm:$0xff] }
  0x7b   : > { %565 = vst [vmem:[%s5033_s27 + $0x690] sm:$0xff] %v564_v14  ;;  %v570_v17 = vld [vmem:[%s5028_s26 + $0x1908] sm:$0xff]  ;;  %567 = vst [vmem:[%s5033_s27 + $0x698] sm:$0xff] %v566_v15  ;;  %v572_v18 = vld [vmem:[%s5028_s26 + $0x1910] sm:$0xff] }
  0x7c   : > { %569 = vst [vmem:[%s5033_s27 + $0x6a0] sm:$0xff] %v568_v16  ;;  %571 = vst [vmem:[%s5033_s27 + $0x6a8] sm:$0xff] %v570_v17  ;;  %v574_v19 = vld [vmem:[%s5028_s26 + $0x1918] sm:$0xff]  ;;  %v576_v20 = vld [vmem:[%s5028_s26 + $0x1920] sm:$0xff] }
  0x7d   : > { %573 = vst [vmem:[%s5033_s27 + $0x6b0] sm:$0xff] %v572_v18  ;;  %575 = vst [vmem:[%s5033_s27 + $0x6b8] sm:$0xff] %v574_v19  ;;  %v578_v21 = vld [vmem:[%s5028_s26 + $0x1928] sm:$0xff]  ;;  %v580_v22 = vld [vmem:[%s5028_s26 + $0x1930] sm:$0xff] }
  0x7e   : > { %577 = vst [vmem:[%s5033_s27 + $0x6c0] sm:$0xff] %v576_v20  ;;  %v582_v23 = vld [vmem:[%s5028_s26 + $0x1938] sm:$0xff]  ;;  %579 = vst [vmem:[%s5033_s27 + $0x6c8] sm:$0xff] %v578_v21  ;;  %v584_v24 = vld [vmem:[%s5028_s26 + $0x1b90] sm:$0xff] }
  0x7f   : > { %581 = vst [vmem:[%s5033_s27 + $0x6d0] sm:$0xff] %v580_v22  ;;  %583 = vst [vmem:[%s5033_s27 + $0x6d8] sm:$0xff] %v582_v23  ;;  %v586_v25 = vld [vmem:[%s5028_s26 + $0x1b98] sm:$0xff]  ;;  %v588_v26 = vld [vmem:[%s5028_s26 + $0x1ba0] sm:$0xff] }
  0x80   : > { %585 = vst [vmem:[%s5033_s27 + $0x6e4] sm:$0xff] %v584_v24  ;;  %587 = vst [vmem:[%s5033_s27 + $0x6ec] sm:$0xff] %v586_v25  ;;  %v590_v27 = vld [vmem:[%s5028_s26 + $0x1ba8] sm:$0xff]  ;;  %v592_v28 = vld [vmem:[%s5028_s26 + $0x1bb0] sm:$0xff] }
  0x81   : > { %589 = vst [vmem:[%s5033_s27 + $0x6f4] sm:$0xff] %v588_v26  ;;  %v594_v29 = vld [vmem:[%s5028_s26 + $0x1bb8] sm:$0xff]  ;;  %591 = vst [vmem:[%s5033_s27 + $0x6fc] sm:$0xff] %v590_v27  ;;  %v596_v30 = vld [vmem:[%s5028_s26 + $0x1bc0] sm:$0xff] }
  0x82   : > { %593 = vst [vmem:[%s5033_s27 + $0x704] sm:$0xff] %v592_v28  ;;  %595 = vst [vmem:[%s5033_s27 + $0x70c] sm:$0xff] %v594_v29  ;;  %v598_v31 = vld [vmem:[%s5028_s26 + $0x1bc8] sm:$0xff]  ;;  %v600_v32 = vld [vmem:[%s5028_s26 + $0x1bd0] sm:$0xff] }
  0x83   : > { %597 = vst [vmem:[%s5033_s27 + $0x714] sm:$0xff] %v596_v30  ;;  %599 = vst [vmem:[%s5033_s27 + $0x71c] sm:$0xff] %v598_v31  ;;  %v602_v33 = vld [vmem:[%s5028_s26 + $0x1bd8] sm:$0xff]  ;;  %v604_v34 = vld [vmem:[%s5028_s26 + $0x1be0] sm:$0xff] }
  0x84   : > { %601 = vst [vmem:[%s5033_s27 + $0x724] sm:$0xff] %v600_v32  ;;  %v606_v35 = vld [vmem:[%s5028_s26 + $0x1be8] sm:$0xff]  ;;  %603 = vst [vmem:[%s5033_s27 + $0x72c] sm:$0xff] %v602_v33  ;;  %v608_v36 = vld [vmem:[%s5028_s26 + $0x1bf0] sm:$0xff] }
  0x85   : > { %605 = vst [vmem:[%s5033_s27 + $0x734] sm:$0xff] %v604_v34  ;;  %607 = vst [vmem:[%s5033_s27 + $0x73c] sm:$0xff] %v606_v35  ;;  %v610_v37 = vld [vmem:[%s5028_s26 + $0x1bf8] sm:$0xff]  ;;  %v612_v38 = vld [vmem:[%s5028_s26 + $0x1c00] sm:$0xff] }
  0x86   : > { %609 = vst [vmem:[%s5033_s27 + $0x744] sm:$0xff] %v608_v36  ;;  %611 = vst [vmem:[%s5033_s27 + $0x74c] sm:$0xff] %v610_v37  ;;  %v614_v39 = vld [vmem:[%s5028_s26 + $0x1c08] sm:$0xff]  ;;  %v616_v40 = vld [vmem:[%s5028_s26 + $0x1c10] sm:$0xff] }
  0x87   : > { %613 = vst [vmem:[%s5033_s27 + $0x754] sm:$0xff] %v612_v38  ;;  %v618_v41 = vld [vmem:[%s5028_s26 + $0x1c18] sm:$0xff]  ;;  %615 = vst [vmem:[%s5033_s27 + $0x75c] sm:$0xff] %v614_v39  ;;  %v620_v42 = vld [vmem:[%s5028_s26 + $0x1c20] sm:$0xff] }
  0x88   : > { %617 = vst [vmem:[%s5033_s27 + $0x764] sm:$0xff] %v616_v40  ;;  %619 = vst [vmem:[%s5033_s27 + $0x76c] sm:$0xff] %v618_v41  ;;  %v622_v43 = vld [vmem:[%s5028_s26 + $0x1c28] sm:$0xff]  ;;  %v624_v44 = vld [vmem:[%s5028_s26 + $0x1c30] sm:$0xff] }
  0x89   : > { %621 = vst [vmem:[%s5033_s27 + $0x774] sm:$0xff] %v620_v42  ;;  %623 = vst [vmem:[%s5033_s27 + $0x77c] sm:$0xff] %v622_v43  ;;  %v626_v45 = vld [vmem:[%s5028_s26 + $0x1c38] sm:$0xff]  ;;  %v628_v46 = vld [vmem:[%s5028_s26 + $0x1c40] sm:$0xff] }
  0x8a   : > { %625 = vst [vmem:[%s5033_s27 + $0x784] sm:$0xff] %v624_v44  ;;  %v630_v47 = vld [vmem:[%s5028_s26 + $0x1c48] sm:$0xff]  ;;  %627 = vst [vmem:[%s5033_s27 + $0x78c] sm:$0xff] %v626_v45  ;;  %v4120_v48 = vld [vmem:[%s5028_s26 + $0xc0] sm:$0xf] }
  0x8b   : > { %629 = vst [vmem:[%s5033_s27 + $0x794] sm:$0xff] %v628_v46  ;;  %631 = vst [vmem:[%s5033_s27 + $0x79c] sm:$0xff] %v630_v47  ;;  %v4122_v49 = vld [vmem:[%s5028_s26 + $0x3d0] sm:$0xf]  ;;  %v4124_v50 = vld [vmem:[%s5028_s26 + $0x6e0] sm:$0xf] }
  0x8c   : > { %4121 = vst [vmem:[%s5033_s27 + $0xc0] sm:$0xf] %v4120_v48  ;;  %4123 = vst [vmem:[%s5033_s27 + $0x184] sm:$0xf] %v4122_v49  ;;  %v4126_v51 = vld [vmem:[%s5028_s26 + $0x9f0] sm:$0xf] }
  0x8d   : > { %4125 = vst [vmem:[%s5033_s27 + $0x248] sm:$0xf] %v4124_v50  ;;  %v4128_v52 = vld [vmem:[%s5028_s26 + $0xd00] sm:$0xf]  ;;  %v4130_v53 = vld [vmem:[%s5028_s26 + $0x1010] sm:$0xf] }
  0x8e   : > { %4127 = vst [vmem:[%s5033_s27 + $0x30c] sm:$0xf] %v4126_v51  ;;  %4129 = vst [vmem:[%s5033_s27 + $0x3d0] sm:$0xf] %v4128_v52  ;;  %v4132_v54 = vld [vmem:[%s5028_s26 + $0x1320] sm:$0xf] }
  0x8f   : > { %4131 = vst [vmem:[%s5033_s27 + $0x494] sm:$0xf] %v4130_v53  ;;  %v4134_v55 = vld [vmem:[%s5028_s26 + $0x1630] sm:$0xf]  ;;  %v4136_v56 = vld [vmem:[%s5028_s26 + $0x1940] sm:$0xf] }
  0x90   : > { %4133 = vst [vmem:[%s5033_s27 + $0x558] sm:$0xf] %v4132_v54  ;;  %4135 = vst [vmem:[%s5033_s27 + $0x61c] sm:$0xf] %v4134_v55  ;;  %v4138_v57 = vld [vmem:[%s5028_s26 + $0x1c50] sm:$0xf] }
  0x91   : > { %4137 = vst [vmem:[%s5033_s27 + $0x6e0] sm:$0xf] %v4136_v56  ;;  %4139 = vst [vmem:[%s5033_s27 + $0x7a4] sm:$0xf] %v4138_v57 }
  0x92 PF: > { %p4140_p7 = scmp.ge.s32.totalorder %s4962_s14, 1  ;;  %p664_p8 = scmp.lt.s32.totalorder %s4962_s14, 5 }
  0x94   : > { %p665_p9 = pnand %p4140_p7, %p664_p8 }
  0x95   : > { %s671_s28 = sand.u32 (!%p665_p9), 1, %s4954_s12  }
  0x96   : > { %668 = sbr.rel (%p665_p9) target bundleno = 630 (0x276), region = 54 }
  0x97   : > { %s4542_s29 = smul.u32 (!%p665_p9), 1960, %s671_s28 }
  0x98   : > { %s5885_s17 = smul.u32 (!%p665_p9), 392, %s671_s28 }
  0x99   : > { %s5548_s7 = scalar_lea.vmem (!%p665_p9), [#allocation2], %s4542_s29 }
  0x9a   : > { %s5906_s12 = scalar_lea.vmem (!%p665_p9), [#allocation3], %s5885_s17 }
  0x9b   : > { %vm2138_vm0 = vcmask 1044480   ;;  %vm2139_vm1 = vcmask 1045504   ;;  %v4964_v58 = vmov 65535   ;;  %v4965_v60 = vmov 0   ;;  %v3362_v61 = vld [vmem:[%s6312_s2] sm:$0xff]  ;;  %v3363_v63 = vld [vmem:[%s6312_s2 + $0x8] sm:$0xff] }
  0x9c   : > { %v2140_v59 = vsel %vm2138_vm0, 4294967295, %v4964_v58  ;;  %2321 = vmatprep.mubr.bf16.mxu0 %v4965_v60  ;;  %2364 = vmatprep.mubr.bf16.mxu1 %v4965_v60  ;;  %v4573_v0 = vld [vmem:[%s5548_s7 + $0x624] ss:$196 sps:$4 sm:$0x3f]   ;;  %v4576_v3 = vld [vmem:[%s5548_s7 + $0x49c] ss:$196 sps:$4 sm:$0xff]  }
  0x9d   : > { %4572 = vset.pattern.permute.xlu0 %v4965_v60  ;;  %v5543_v62 = vsel %vm2139_vm1, %v2140_v59, 0  ;;  %v4575_v1 = vld [vmem:[%s5548_s7 + $0x620] ss:$196 sps:$4 sm:$0x3f]   ;;  %v4578_v5 = vld [vmem:[%s5548_s7 + $0x498] ss:$196 sps:$4 sm:$0xff]  }
  0x9e   : > { %3366 = vperm.xlu0 %4572, %v3362_v61   ;;  %v2146_v2 = vand.u32 %v4573_v0, %v5543_v62  ;;  %v2143_v4 = vand.u32 %v4575_v1, %v5543_v62  ;;  %v4584_v6 = vld [vmem:[%s5548_s7 + $0x62c] ss:$196 sps:$4 sm:$0x3f]   ;;  %v4579_v7 = vld [vmem:[%s5548_s7 + $0x314] ss:$196 sps:$4 sm:$0xff]   ;;  %vm2134_vm2 = vcmask 613376  }
  0x9f   : > { %v4587_v8 = vld [vmem:[%s5548_s7 + $0x628] ss:$196 sps:$4 sm:$0x3f]   ;;  %v2152_v9 = vand.u32 %v4584_v6, %v5543_v62  ;;  %v4581_v10 = vld [vmem:[%s5548_s7 + $0x310] ss:$196 sps:$4 sm:$0xff]   ;;  %v5576_v23 = vld [vmem:[%s6310_s0] sm:$0xff]  }
  0xa0   : > { %2295 = vmatprep.subr.bf16.mxu0 %v2146_v2  ;;  %v2149_v11 = vand.u32 %v4587_v8, %v5543_v62  ;;  %v4590_v12 = vld [vmem:[%s5548_s7 + $0x4a4] ss:$196 sps:$4 sm:$0xff]   ;;  %v4582_v13 = vld [vmem:[%s5548_s7 + $0x18c] ss:$196 sps:$4 sm:$0xff]   ;;  %v4595_v15 = vld [vmem:[%s5548_s7 + $0x31c] ss:$196 sps:$4 sm:$0xff]  }
  0xa1   : > { %2296 = vmatpush1.bf16.msra.mxu0 %v2143_v4  ;;  %2338 = vmatprep.subr.bf16.mxu1 %v2152_v9  ;;  %v4593_v14 = vld [vmem:[%s5548_s7 + $0x4a0] ss:$196 sps:$4 sm:$0xff]   ;;  %v4586_v16 = vld [vmem:[%s5548_s7 + $0x188] ss:$196 sps:$4 sm:$0xff]   ;;  %v4600_v19 = vld [vmem:[%s5548_s7 + $0x318] ss:$196 sps:$4 sm:$0xff]  }
  0xa2   : > { %3371 = vperm.xlu0 %4572, %v3363_v63   ;;  %2297 = vmatprep.subr.bf16.mxu0 %v4576_v3  ;;  %v4588_v17 = vld [vmem:[%s5548_s7 + $0x4] ss:$196 sps:$4 sm:$0xff]   ;;  %v4599_v18 = vld [vmem:[%s5548_s7 + $0x634] ss:$196 sps:$4 sm:$0x3f]   ;;  %vm4967_vm1 = vmmov 0  }
  0xa3   : > { %2339 = vmatpush1.bf16.msra.mxu1 %v2149_v11  ;;  %v4601_v20 = vld [vmem:[%s5548_s7 + $0x194] ss:$196 sps:$4 sm:$0xff]   ;;  %v4592_v21 = vld [vmem:[%s5548_s7] ss:$196 sps:$4 sm:$0xff]   ;;  %v2158_v24 = vand.u32 %v4599_v18, %v5543_v62  ;;  %v4607_v26 = vld [vmem:[%s5548_s7 + $0xc] ss:$196 sps:$4 sm:$0xff]  }
  0xa4   : > { %2340 = vmatprep.subr.bf16.mxu1 %v4590_v12  ;;  %v4597_v22 = vld [vmem:[%s5548_s7 + $0x630] ss:$196 sps:$4 sm:$0x3f]   ;;  %v4618_v27 = vld [vmem:[%s5548_s7 + $0x63c] ss:$196 sps:$4 sm:$0x3f]  }
  0xa5   : > { %2298 = vmatpush1.bf16.msra.mxu0 %v4578_v5  ;;  %v4606_v25 = vld [vmem:[%s5548_s7 + $0x190] ss:$196 sps:$4 sm:$0xff]   ;;  %v2155_v28 = vand.u32 %v4597_v22, %v5543_v62  ;;  %v4612_v30 = vld [vmem:[%s5548_s7 + $0x8] ss:$196 sps:$4 sm:$0xff]   ;;  %v2164_v32 = vand.u32 %v4618_v27, %v5543_v62  ;;  %v4609_v37 = vld [vmem:[%s5548_s7 + $0x320] ss:$196 sps:$4 sm:$0xff]  }
  0xa6   : > { %2299 = vmatprep.subr.bf16.mxu0 %v4579_v7  ;;  %v4605_v29 = vld [vmem:[%s5548_s7 + $0x4ac] ss:$196 sps:$4 sm:$0xff]   ;;  %v4616_v31 = vld [vmem:[%s5548_s7 + $0x638] ss:$196 sps:$4 sm:$0x3f]   ;;  %s4520_s18 = smul.u32 (%p5018_p5), 196, %s4115_s15 }
  0xa7   : > { %2341 = vmatpush1.bf16.msra.mxu1 %v4593_v14  ;;  %v4603_v33 = vld [vmem:[%s5548_s7 + $0x4a8] ss:$196 sps:$4 sm:$0xff]   ;;  %v2161_v35 = vand.u32 %v4616_v31, %v5543_v62  ;;  %v4624_v36 = vld [vmem:[%s5548_s7 + $0x4b4] ss:$196 sps:$4 sm:$0xff]   ;;  %v4615_v38 = vld [vmem:[%s5548_s7 + $0x19c] ss:$196 sps:$4 sm:$0xff]  }
  0xa8   : > { %2342 = vmatprep.subr.bf16.mxu1 %v4595_v15  ;;  %v4611_v34 = vld [vmem:[%s5548_s7 + $0x324] ss:$196 sps:$4 sm:$0xff]   ;;  %v4622_v39 = vld [vmem:[%s5548_s7 + $0x4b0] ss:$196 sps:$4 sm:$0xff]   ;;  %v4613_v41 = vld [vmem:[%s5548_s7 + $0x198] ss:$196 sps:$4 sm:$0xff]   ;;  %s6204_s21 = scalar_lea.vmem (%p5018_p5), %s6313_s3, %s4520_s18 }
  0xa9   : > { %2300 = vmatpush1.bf16.msra.mxu0 %v4581_v10  ;;  %v4627_v40 = vld [vmem:[%s5548_s7 + $0x32c] ss:$196 sps:$4 sm:$0xff]   ;;  %v4621_v42 = vld [vmem:[%s5548_s7 + $0x14] ss:$196 sps:$4 sm:$0xff]   ;;  %v4633_v45 = vld [vmem:[%s5548_s7 + $0x1a4] ss:$196 sps:$4 sm:$0xff]  }
  0xaa   : > { %2301 = vmatprep.subr.bf16.mxu0 %v4582_v13  ;;  %v4625_v43 = vld [vmem:[%s5548_s7 + $0x328] ss:$196 sps:$4 sm:$0xff]   ;;  %v4619_v46 = vld [vmem:[%s5548_s7 + $0x10] ss:$196 sps:$4 sm:$0xff]   ;;  %v4631_v48 = vld [vmem:[%s5548_s7 + $0x1a0] ss:$196 sps:$4 sm:$0xff]  }
  0xab   : > { %2343 = vmatpush1.bf16.msra.mxu1 %v4600_v19  ;;  %v4630_v44 = vld [vmem:[%s5548_s7 + $0x644] ss:$196 sps:$4 sm:$0x3f]   ;;  %v4639_v50 = vld [vmem:[%s5548_s7 + $0x1c] ss:$196 sps:$4 sm:$0xff]  }
  0xac   : > { %2344 = vmatprep.subr.bf16.mxu1 %v4601_v20  ;;  %v4628_v47 = vld [vmem:[%s5548_s7 + $0x640] ss:$196 sps:$4 sm:$0x3f]   ;;  %v2170_v49 = vand.u32 %v4630_v44, %v5543_v62  ;;  %v4648_v51 = vld [vmem:[%s5548_s7 + $0x64c] ss:$196 sps:$4 sm:$0x3f]  }
  0xad   : > { %2302 = vmatpush1.bf16.msra.mxu0 %v4586_v16  ;;  %v2167_v52 = vand.u32 %v4628_v47, %v5543_v62  ;;  %v4636_v53 = vld [vmem:[%s5548_s7 + $0x4bc] ss:$196 sps:$4 sm:$0xff]   ;;  %v4646_v55 = vld [vmem:[%s5548_s7 + $0x648] ss:$196 sps:$4 sm:$0x3f]   ;;  %v2176_v56 = vand.u32 %v4648_v51, %v5543_v62 }
  0xae   : > { %2303 = vmatprep.subr.bf16.mxu0 %v4588_v17  ;;  %v4637_v54 = vld [vmem:[%s5548_s7 + $0x18] ss:$196 sps:$4 sm:$0xff]   ;;  %v2173_v59 = vand.u32 %v4646_v55, %v5543_v62  ;;  %v4654_v61 = vld [vmem:[%s5548_s7 + $0x4c4] ss:$196 sps:$4 sm:$0xff]   ;;  %v4640_v63 = vld [vmem:[%s5548_s7 + $0x330] ss:$196 sps:$4 sm:$0xff]  }
  0xaf   : > { %2345 = vmatpush1.bf16.msra.mxu1 %v4606_v25  ;;  %v4634_v57 = vld [vmem:[%s5548_s7 + $0x4b8] ss:$196 sps:$4 sm:$0xff]   ;;  %v4645_v0 = vld [vmem:[%s5548_s7 + $0x1ac] ss:$196 sps:$4 sm:$0xff]   ;;  %v4652_v1 = vld [vmem:[%s5548_s7 + $0x4c0] ss:$196 sps:$4 sm:$0xff]  }
  0xb0   : > { %2346 = vmatprep.subr.bf16.mxu1 %v4607_v26  ;;  %v4642_v58 = vld [vmem:[%s5548_s7 + $0x334] ss:$196 sps:$4 sm:$0xff]   ;;  %v4657_v2 = vld [vmem:[%s5548_s7 + $0x33c] ss:$196 sps:$4 sm:$0xff]   ;;  %v4643_v3 = vld [vmem:[%s5548_s7 + $0x1a8] ss:$196 sps:$4 sm:$0xff]  }
  0xb1   : > { %2304 = vmatpush1.bf16.msra.mxu0 %v4592_v21  ;;  %v4651_v4 = vld [vmem:[%s5548_s7 + $0x24] ss:$196 sps:$4 sm:$0xff]   ;;  %v4655_v5 = vld [vmem:[%s5548_s7 + $0x338] ss:$196 sps:$4 sm:$0xff]   ;;  %v4661_v11 = vld [vmem:[%s5548_s7 + $0x1b0] ss:$196 sps:$4 sm:$0xff]  }
  0xb2   : > { %2381 = vmatprep.subr.bf16.mxu0 %v2158_v24  ;;  %v4660_v6 = vld [vmem:[%s5548_s7 + $0x654] ss:$196 sps:$4 sm:$0x3f]   ;;  %v4649_v8 = vld [vmem:[%s5548_s7 + $0x20] ss:$196 sps:$4 sm:$0xff]  }
  0xb3   : > { %2347 = vmatpush1.bf16.msra.mxu1 %v4612_v30  ;;  %v4663_v7 = vld [vmem:[%s5548_s7 + $0x1b4] ss:$196 sps:$4 sm:$0xff]   ;;  %v2182_v10 = vand.u32 %v4660_v6, %v5543_v62  ;;  %v4669_v12 = vld [vmem:[%s5548_s7 + $0x2c] ss:$196 sps:$4 sm:$0xff]   ;;  %v4672_v20 = vld [vmem:[%s5548_s7 + $0x344] ss:$196 sps:$4 sm:$0xff]  }
  0xb4   : > { %4387 = vmatmul.mubr.msk.bf16.vlgmr.msra.gmra.mxu0 %vm2134_vm2, %v5576_v23  ;;  %2424 = vmatprep.subr.bf16.mxu1 %v2164_v32  ;;  %v4658_v9 = vld [vmem:[%s5548_s7 + $0x650] ss:$196 sps:$4 sm:$0x3f]   ;;  %v4678_v13 = vld [vmem:[%s5548_s7 + $0x65c] ss:$196 sps:$4 sm:$0x3f]  }
  0xb5   : > { %2382 = vmatpush1.bf16.msra.mxu0 %v2155_v28  ;;  %2407 = vmatprep.mubr.bf16.mxu0 %v4965_v60  ;;  %v2179_v14 = vand.u32 %v4658_v9, %v5543_v62  ;;  %v4666_v15 = vld [vmem:[%s5548_s7 + $0x4cc] ss:$196 sps:$4 sm:$0xff]   ;;  %v4676_v17 = vld [vmem:[%s5548_s7 + $0x658] ss:$196 sps:$4 sm:$0x3f]   ;;  %v2188_v18 = vand.u32 %v4678_v13, %v5543_v62 }
  0xb6   : > { %2383 = vmatprep.subr.bf16.mxu0 %v4605_v29  ;;  %4388 = vmatmul.mubr.msk.bf16.vlgmr.msra.gmra.mxu1 %vm2134_vm2, %v5576_v23  ;;  %v4667_v16 = vld [vmem:[%s5548_s7 + $0x28] ss:$196 sps:$4 sm:$0xff]   ;;  %v2185_v21 = vand.u32 %v4676_v17, %v5543_v62  ;;  %v4684_v22 = vld [vmem:[%s5548_s7 + $0x4d4] ss:$196 sps:$4 sm:$0xff]   ;;  %v4670_v24 = vld [vmem:[%s5548_s7 + $0x340] ss:$196 sps:$4 sm:$0xff]  }
  0xb7   : > { %2425 = vmatpush1.bf16.msra.mxu1 %v2161_v35  ;;  %2450 = vmatprep.mubr.bf16.mxu1 %v4965_v60  ;;  %v4664_v19 = vld [vmem:[%s5548_s7 + $0x4c8] ss:$196 sps:$4 sm:$0xff]   ;;  %v4675_v25 = vld [vmem:[%s5548_s7 + $0x1bc] ss:$196 sps:$4 sm:$0xff]   ;;  %v4682_v26 = vld [vmem:[%s5548_s7 + $0x4d0] ss:$196 sps:$4 sm:$0xff]  }
  0xb8   : > { %2426 = vmatprep.subr.bf16.mxu1 %v4624_v36  ;;  %v4687_v27 = vld [vmem:[%s5548_s7 + $0x34c] ss:$196 sps:$4 sm:$0xff]   ;;  %v4673_v28 = vld [vmem:[%s5548_s7 + $0x1b8] ss:$196 sps:$4 sm:$0xff]   ;;  %v4693_v32 = vld [vmem:[%s5548_s7 + $0x1c4] ss:$196 sps:$4 sm:$0xff]  }
  0xb9   : > { %2384 = vmatpush1.bf16.msra.mxu0 %v4603_v33  ;;  %v4681_v29 = vld [vmem:[%s5548_s7 + $0x34] ss:$196 sps:$4 sm:$0xff]   ;;  %v4685_v30 = vld [vmem:[%s5548_s7 + $0x348] ss:$196 sps:$4 sm:$0xff]   ;;  %v4691_v36 = vld [vmem:[%s5548_s7 + $0x1c0] ss:$196 sps:$4 sm:$0xff]  }
  0xba   : > { %2385 = vmatprep.subr.bf16.mxu0 %v4611_v34  ;;  %v4690_v31 = vld [vmem:[%s5548_s7 + $0x664] ss:$196 sps:$4 sm:$0x3f]   ;;  %v4679_v33 = vld [vmem:[%s5548_s7 + $0x30] ss:$196 sps:$4 sm:$0xff]  }
  0xbb   : > { %2427 = vmatpush1.bf16.msra.mxu1 %v4622_v39  ;;  %v4688_v34 = vld [vmem:[%s5548_s7 + $0x660] ss:$196 sps:$4 sm:$0x3f]   ;;  %v2194_v35 = vand.u32 %v4690_v31, %v5543_v62  ;;  %v4694_v44 = vld [vmem:[%s5548_s7 + $0x4d8] ss:$196 sps:$4 sm:$0xff]  }
  0xbc   : > { %2428 = vmatprep.subr.bf16.mxu1 %v4627_v40  ;;  %v2191_v39 = vand.u32 %v4688_v34, %v5543_v62  ;;  %v4696_v40 = vld [vmem:[%s5548_s7 + $0x4dc] ss:$196 sps:$4 sm:$0xff]   ;;  %v4714_v47 = vld [vmem:[%s5548_s7 + $0x4e4] ss:$196 sps:$4 sm:$0xff]   ;;  %v4744_v9 = vld [vmem:[%s5548_s7 + $0x4f4] ss:$196 sps:$4 sm:$0xff]  }
  0xbd   : > { %2386 = vmatpush1.bf16.msra.mxu0 %v4609_v37  ;;  %v4699_v37 = vld [vmem:[%s5548_s7 + $0x3c] ss:$196 sps:$4 sm:$0xff]   ;;  %v4720_v55 = vld [vmem:[%s5548_s7 + $0x674] ss:$196 sps:$4 sm:$0x3f]  }
  0xbe   : > { %2387 = vmatprep.subr.bf16.mxu0 %v4615_v38  ;;  %v4708_v38 = vld [vmem:[%s5548_s7 + $0x66c] ss:$196 sps:$4 sm:$0x3f]   ;;  %v4717_v51 = vld [vmem:[%s5548_s7 + $0x35c] ss:$196 sps:$4 sm:$0xff]  }
  0xbf   : > { %2429 = vmatpush1.bf16.msra.mxu1 %v4625_v43  ;;  %v2200_v43 = vand.u32 %v4708_v38, %v5543_v62  ;;  %v4724_v6 = vld [vmem:[%s5548_s7 + $0x4e8] ss:$196 sps:$4 sm:$0xff]   ;;  %v4754_v31 = vld [vmem:[%s5548_s7 + $0x4f8] ss:$196 sps:$4 sm:$0xff]  }
  0xc0   : > { %2430 = vmatprep.subr.bf16.mxu1 %v4633_v45  ;;  %v4702_v45 = vld [vmem:[%s5548_s7 + $0x354] ss:$196 sps:$4 sm:$0xff]   ;;  %v4747_v13 = vld [vmem:[%s5548_s7 + $0x36c] ss:$196 sps:$4 sm:$0xff]   ;;  %v4774_v34 = vld [vmem:[%s5548_s7 + $0x504] ss:$196 sps:$4 sm:$0xff]  }
  0xc1   : > { %2388 = vmatpush1.bf16.msra.mxu0 %v4613_v41  ;;  %v4697_v41 = vld [vmem:[%s5548_s7 + $0x38] ss:$196 sps:$4 sm:$0xff]   ;;  %v4750_v17 = vld [vmem:[%s5548_s7 + $0x684] ss:$196 sps:$4 sm:$0x3f]  }
  0xc2   : > { %2389 = vmatprep.subr.bf16.mxu0 %v4621_v42  ;;  %v4706_v42 = vld [vmem:[%s5548_s7 + $0x668] ss:$196 sps:$4 sm:$0x3f]   ;;  %v4777_v38 = vld [vmem:[%s5548_s7 + $0x37c] ss:$196 sps:$4 sm:$0xff]  }
  0xc3   : > { %2431 = vmatpush1.bf16.msra.mxu1 %v4631_v48  ;;  %v4700_v48 = vld [vmem:[%s5548_s7 + $0x350] ss:$196 sps:$4 sm:$0xff]  }
  0xc4   : > { %2432 = vmatprep.subr.bf16.mxu1 %v4639_v50  ;;  %v4712_v50 = vld [vmem:[%s5548_s7 + $0x4e0] ss:$196 sps:$4 sm:$0xff]  }
  0xc5   : > { %2390 = vmatpush1.bf16.msra.mxu0 %v4619_v46  ;;  %v2197_v46 = vand.u32 %v4706_v42, %v5543_v62  ;;  %v4780_v42 = vld [vmem:[%s5548_s7 + $0x694] ss:$196 sps:$4 sm:$0x3f]  }
  0xc6   : > { %2467 = vmatprep.subr.bf16.mxu0 %v2170_v49  ;;  %v4705_v49 = vld [vmem:[%s5548_s7 + $0x1cc] ss:$196 sps:$4 sm:$0xff]  }
  0xc7   : > { %2433 = vmatpush1.bf16.msra.mxu1 %v4637_v54  ;;  %v4715_v54 = vld [vmem:[%s5548_s7 + $0x358] ss:$196 sps:$4 sm:$0xff]  }
  0xc8   : > { %4389 = vmatmul.mubr.msk.bf16.vlgmr.msra.gmra.mxu0 %vm2134_vm2, %v5576_v23  ;;  %2510 = vmatprep.subr.bf16.mxu1 %v2176_v56  ;;  %v4723_v56 = vld [vmem:[%s5548_s7 + $0x1d4] ss:$196 sps:$4 sm:$0xff]  }
  0xc9   : > { %2468 = vmatpush1.bf16.msra.mxu0 %v2167_v52  ;;  %2493 = vmatprep.mubr.bf16.mxu0 %v4965_v60  ;;  %v4703_v52 = vld [vmem:[%s5548_s7 + $0x1c8] ss:$196 sps:$4 sm:$0xff]  }
  0xca   : > { %2469 = vmatprep.subr.bf16.mxu0 %v4636_v53  ;;  %4390 = vmatmul.mubr.msk.bf16.vlgmr.msra.gmra.mxu1 %vm2134_vm2, %v5576_v23  ;;  %v4711_v53 = vld [vmem:[%s5548_s7 + $0x44] ss:$196 sps:$4 sm:$0xff]  }
  0xcb   : > { %2511 = vmatpush1.bf16.msra.mxu1 %v2173_v59  ;;  %2536 = vmatprep.mubr.bf16.mxu1 %v4965_v60  ;;  %v2206_v59 = vand.u32 %v4720_v55, %v5543_v62  ;;  %v4784_v55 = vld [vmem:[%s5548_s7 + $0x508] ss:$196 sps:$4 sm:$0xff]  }
  0xcc   : > { %2512 = vmatprep.subr.bf16.mxu1 %v4654_v61  ;;  %v4721_v61 = vld [vmem:[%s5548_s7 + $0x1d0] ss:$196 sps:$4 sm:$0xff]  }
  0xcd   : > { %2470 = vmatpush1.bf16.msra.mxu0 %v4634_v57  ;;  %v4709_v57 = vld [vmem:[%s5548_s7 + $0x40] ss:$196 sps:$4 sm:$0xff]  }
  0xce   : > { %2471 = vmatprep.subr.bf16.mxu0 %v4642_v58  ;;  %v4718_v58 = vld [vmem:[%s5548_s7 + $0x670] ss:$196 sps:$4 sm:$0x3f]  }
  0xcf   : > { %2513 = vmatpush1.bf16.msra.mxu1 %v4652_v1  ;;  %v2203_v1 = vand.u32 %v4718_v58, %v5543_v62  ;;  %v4804_v58 = vld [vmem:[%s5548_s7 + $0x514] ss:$196 sps:$4 sm:$0xff]  }
  0xd0   : > { %2514 = vmatprep.subr.bf16.mxu1 %v4657_v2  ;;  %v4726_v2 = vld [vmem:[%s5548_s7 + $0x4ec] ss:$196 sps:$4 sm:$0xff]  }
  0xd1   : > { %2472 = vmatpush1.bf16.msra.mxu0 %v4640_v63  ;;  %v4729_v63 = vld [vmem:[%s5548_s7 + $0x4c] ss:$196 sps:$4 sm:$0xff]  }
  0xd2   : > { %2473 = vmatprep.subr.bf16.mxu0 %v4645_v0  ;;  %v4738_v0 = vld [vmem:[%s5548_s7 + $0x67c] ss:$196 sps:$4 sm:$0x3f]  }
  0xd3   : > { %2515 = vmatpush1.bf16.msra.mxu1 %v4655_v5  ;;  %v2212_v5 = vand.u32 %v4738_v0, %v5543_v62  ;;  %v4807_v0 = vld [vmem:[%s5548_s7 + $0x38c] ss:$196 sps:$4 sm:$0xff]  }
  0xd4   : > { %2516 = vmatprep.subr.bf16.mxu1 %v4663_v7  ;;  %v4732_v7 = vld [vmem:[%s5548_s7 + $0x364] ss:$196 sps:$4 sm:$0xff]  }
  0xd5   : > { %2474 = vmatpush1.bf16.msra.mxu0 %v4643_v3  ;;  %v4727_v3 = vld [vmem:[%s5548_s7 + $0x48] ss:$196 sps:$4 sm:$0xff]  }
  0xd6   : > { %2475 = vmatprep.subr.bf16.mxu0 %v4651_v4  ;;  %v4736_v4 = vld [vmem:[%s5548_s7 + $0x678] ss:$196 sps:$4 sm:$0x3f]  }
  0xd7   : > { %2517 = vmatpush1.bf16.msra.mxu1 %v4661_v11  ;;  %v4735_v11 = vld [vmem:[%s5548_s7 + $0x1dc] ss:$196 sps:$4 sm:$0xff]  }
  0xd8   : > { %2518 = vmatprep.subr.bf16.mxu1 %v4669_v12  ;;  %v4742_v12 = vld [vmem:[%s5548_s7 + $0x4f0] ss:$196 sps:$4 sm:$0xff]  }
  0xd9   : > { %2476 = vmatpush1.bf16.msra.mxu0 %v4649_v8  ;;  %v2209_v8 = vand.u32 %v4736_v4, %v5543_v62  ;;  %v4810_v4 = vld [vmem:[%s5548_s7 + $0x6a4] ss:$196 sps:$4 sm:$0x3f]  }
  0xda   : > { %2553 = vmatprep.subr.bf16.mxu0 %v2182_v10  ;;  %v4730_v10 = vld [vmem:[%s5548_s7 + $0x360] ss:$196 sps:$4 sm:$0xff]  }
  0xdb   : > { %2519 = vmatpush1.bf16.msra.mxu1 %v4667_v16  ;;  %v4745_v16 = vld [vmem:[%s5548_s7 + $0x368] ss:$196 sps:$4 sm:$0xff]  }
  0xdc   : > { %4391 = vmatmul.mubr.msk.bf16.vlgmr.msra.gmra.mxu0 %vm2134_vm2, %v5576_v23  ;;  %2596 = vmatprep.subr.bf16.mxu1 %v2188_v18  ;;  %v4753_v18 = vld [vmem:[%s5548_s7 + $0x1e4] ss:$196 sps:$4 sm:$0xff]  }
  0xdd   : > { %2554 = vmatpush1.bf16.msra.mxu0 %v2179_v14  ;;  %2579 = vmatprep.mubr.bf16.mxu0 %v4965_v60  ;;  %v4733_v14 = vld [vmem:[%s5548_s7 + $0x1d8] ss:$196 sps:$4 sm:$0xff]  }
  0xde   : > { %2555 = vmatprep.subr.bf16.mxu0 %v4666_v15  ;;  %4392 = vmatmul.mubr.msk.bf16.vlgmr.msra.gmra.mxu1 %vm2134_vm2, %v5576_v23  ;;  %v4741_v15 = vld [vmem:[%s5548_s7 + $0x54] ss:$196 sps:$4 sm:$0xff]  }
  0xdf   : > { %2597 = vmatpush1.bf16.msra.mxu1 %v2185_v21  ;;  %2622 = vmatprep.mubr.bf16.mxu1 %v4965_v60  ;;  %v2218_v21 = vand.u32 %v4750_v17, %v5543_v62  ;;  %v4814_v17 = vld [vmem:[%s5548_s7 + $0x518] ss:$196 sps:$4 sm:$0xff]  }
  0xe0   : > { %2598 = vmatprep.subr.bf16.mxu1 %v4684_v22  ;;  %v4751_v22 = vld [vmem:[%s5548_s7 + $0x1e0] ss:$196 sps:$4 sm:$0xff]  }
  0xe1   : > { %2556 = vmatpush1.bf16.msra.mxu0 %v4664_v19  ;;  %v4739_v19 = vld [vmem:[%s5548_s7 + $0x50] ss:$196 sps:$4 sm:$0xff]  }
  0xe2   : > { %2557 = vmatprep.subr.bf16.mxu0 %v4672_v20  ;;  %v4748_v20 = vld [vmem:[%s5548_s7 + $0x680] ss:$196 sps:$4 sm:$0x3f]  }
  0xe3   : > { %2599 = vmatpush1.bf16.msra.mxu1 %v4682_v26  ;;  %v2215_v26 = vand.u32 %v4748_v20, %v5543_v62  ;;  %v4834_v20 = vld [vmem:[%s5548_s7 + $0x524] ss:$196 sps:$4 sm:$0xff]  }
  0xe4   : > { %2600 = vmatprep.subr.bf16.mxu1 %v4687_v27  ;;  %v4756_v27 = vld [vmem:[%s5548_s7 + $0x4fc] ss:$196 sps:$4 sm:$0xff]  }
  0xe5   : > { %2558 = vmatpush1.bf16.msra.mxu0 %v4670_v24  ;;  %v4759_v24 = vld [vmem:[%s5548_s7 + $0x5c] ss:$196 sps:$4 sm:$0xff]  }
  0xe6   : > { %2559 = vmatprep.subr.bf16.mxu0 %v4675_v25  ;;  %v4768_v25 = vld [vmem:[%s5548_s7 + $0x68c] ss:$196 sps:$4 sm:$0x3f]  }
  0xe7   : > { %2601 = vmatpush1.bf16.msra.mxu1 %v4685_v30  ;;  %v2224_v30 = vand.u32 %v4768_v25, %v5543_v62  ;;  %v4837_v25 = vld [vmem:[%s5548_s7 + $0x39c] ss:$196 sps:$4 sm:$0xff]  }
  0xe8   : > { %2602 = vmatprep.subr.bf16.mxu1 %v4693_v32  ;;  %v4762_v32 = vld [vmem:[%s5548_s7 + $0x374] ss:$196 sps:$4 sm:$0xff]  }
  0xe9   : > { %2560 = vmatpush1.bf16.msra.mxu0 %v4673_v28  ;;  %v4757_v28 = vld [vmem:[%s5548_s7 + $0x58] ss:$196 sps:$4 sm:$0xff]  }
  0xea   : > { %2561 = vmatprep.subr.bf16.mxu0 %v4681_v29  ;;  %v4766_v29 = vld [vmem:[%s5548_s7 + $0x688] ss:$196 sps:$4 sm:$0x3f]  }
  0xeb   : > { %2603 = vmatpush1.bf16.msra.mxu1 %v4691_v36  ;;  %v4765_v36 = vld [vmem:[%s5548_s7 + $0x1ec] ss:$196 sps:$4 sm:$0xff]  }
  0xec   : > { %2604 = vmatprep.subr.bf16.mxu1 %v4699_v37  ;;  %v4772_v37 = vld [vmem:[%s5548_s7 + $0x500] ss:$196 sps:$4 sm:$0xff]  }
  0xed   : > { %2562 = vmatpush1.bf16.msra.mxu0 %v4679_v33  ;;  %v2221_v33 = vand.u32 %v4766_v29, %v5543_v62  ;;  %v4840_v29 = vld [vmem:[%s5548_s7 + $0x6b4] ss:$196 sps:$4 sm:$0x3f]  }
  0xee   : > { %2639 = vmatprep.subr.bf16.mxu0 %v2194_v35  ;;  %v4760_v35 = vld [vmem:[%s5548_s7 + $0x370] ss:$196 sps:$4 sm:$0xff]  }
  0xef   : > { %2605 = vmatpush1.bf16.msra.mxu1 %v4697_v41  ;;  %v4775_v41 = vld [vmem:[%s5548_s7 + $0x378] ss:$196 sps:$4 sm:$0xff]  }
  0xf0   : > { %4393 = vmatmul.mubr.msk.bf16.vlgmr.msra.gmra.mxu0 %vm2134_vm2, %v5576_v23  ;;  %2682 = vmatprep.subr.bf16.mxu1 %v2200_v43  ;;  %v4783_v43 = vld [vmem:[%s5548_s7 + $0x1f4] ss:$196 sps:$4 sm:$0xff]  }
  0xf1   : > { %2640 = vmatpush1.bf16.msra.mxu0 %v2191_v39  ;;  %2665 = vmatprep.mubr.bf16.mxu0 %v4965_v60  ;;  %v4763_v39 = vld [vmem:[%s5548_s7 + $0x1e8] ss:$196 sps:$4 sm:$0xff]  }
  0xf2   : > { %2641 = vmatprep.subr.bf16.mxu0 %v4696_v40  ;;  %4394 = vmatmul.mubr.msk.bf16.vlgmr.msra.gmra.mxu1 %vm2134_vm2, %v5576_v23  ;;  %v4771_v40 = vld [vmem:[%s5548_s7 + $0x64] ss:$196 sps:$4 sm:$0xff]  }
  0xf3   : > { %2683 = vmatpush1.bf16.msra.mxu1 %v2197_v46  ;;  %2708 = vmatprep.mubr.bf16.mxu1 %v4965_v60  ;;  %v4781_v46 = vld [vmem:[%s5548_s7 + $0x1f0] ss:$196 sps:$4 sm:$0xff]  }
  0xf4   : > { %2684 = vmatprep.subr.bf16.mxu1 %v4714_v47  ;;  %v2230_v47 = vand.u32 %v4780_v42, %v5543_v62  ;;  %v4844_v42 = vld [vmem:[%s5548_s7 + $0x528] ss:$196 sps:$4 sm:$0xff]  }
  0xf5   : > { %2642 = vmatpush1.bf16.msra.mxu0 %v4694_v44  ;;  %v4769_v44 = vld [vmem:[%s5548_s7 + $0x60] ss:$196 sps:$4 sm:$0xff]  }
  0xf6   : > { %2643 = vmatprep.subr.bf16.mxu0 %v4702_v45  ;;  %v4778_v45 = vld [vmem:[%s5548_s7 + $0x690] ss:$196 sps:$4 sm:$0x3f]  }
  0xf7   : > { %2685 = vmatpush1.bf16.msra.mxu1 %v4712_v50  ;;  %v2227_v50 = vand.u32 %v4778_v45, %v5543_v62  ;;  %v4864_v45 = vld [vmem:[%s5548_s7 + $0x534] ss:$196 sps:$4 sm:$0xff]  }
  0xf8   : > { %2686 = vmatprep.subr.bf16.mxu1 %v4717_v51  ;;  %v4786_v51 = vld [vmem:[%s5548_s7 + $0x50c] ss:$196 sps:$4 sm:$0xff]  }
  0xf9   : > { %2644 = vmatpush1.bf16.msra.mxu0 %v4700_v48  ;;  %v4789_v48 = vld [vmem:[%s5548_s7 + $0x6c] ss:$196 sps:$4 sm:$0xff]  }
  0xfa   : > { %2645 = vmatprep.subr.bf16.mxu0 %v4705_v49  ;;  %v4798_v49 = vld [vmem:[%s5548_s7 + $0x69c] ss:$196 sps:$4 sm:$0x3f]  }
  0xfb   : > { %2687 = vmatpush1.bf16.msra.mxu1 %v4715_v54  ;;  %v2236_v54 = vand.u32 %v4798_v49, %v5543_v62  ;;  %v4867_v49 = vld [vmem:[%s5548_s7 + $0x3ac] ss:$196 sps:$4 sm:$0xff]  }
  0xfc   : > { %2688 = vmatprep.subr.bf16.mxu1 %v4723_v56  ;;  %v4792_v56 = vld [vmem:[%s5548_s7 + $0x384] ss:$196 sps:$4 sm:$0xff]  }
  0xfd   : > { %2646 = vmatpush1.bf16.msra.mxu0 %v4703_v52  ;;  %v4787_v52 = vld [vmem:[%s5548_s7 + $0x68] ss:$196 sps:$4 sm:$0xff]  }
  0xfe   : > { %2647 = vmatprep.subr.bf16.mxu0 %v4711_v53  ;;  %v4796_v53 = vld [vmem:[%s5548_s7 + $0x698] ss:$196 sps:$4 sm:$0x3f]  }
  0xff   : > { %2689 = vmatpush1.bf16.msra.mxu1 %v4721_v61  ;;  %v5779_v61 = vld [vmem:[%s6310_s0] sm:$0xff]  }
 0x100   : > { %2690 = vmatprep.subr.bf16.mxu1 %v4729_v63  ;;  %v4802_v63 = vld [vmem:[%s5548_s7 + $0x510] ss:$196 sps:$4 sm:$0xff]  }
 0x101   : > { %2648 = vmatpush1.bf16.msra.mxu0 %v4709_v57  ;;  %v2233_v57 = vand.u32 %v4796_v53, %v5543_v62  ;;  %v4870_v53 = vld [vmem:[%s5548_s7 + $0x6c4] ss:$196 sps:$4 sm:$0x3f]  }
 0x102   : > { %2725 = vmatprep.subr.bf16.mxu0 %v2206_v59  ;;  %v4790_v59 = vld [vmem:[%s5548_s7 + $0x380] ss:$196 sps:$4 sm:$0xff]  }
 0x103   : > { %2691 = vmatpush1.bf16.msra.mxu1 %v4727_v3  ;;  %v4805_v3 = vld [vmem:[%s5548_s7 + $0x388] ss:$196 sps:$4 sm:$0xff]  }
 0x104   : > { %4395 = vmatmul.mubr.msk.bf16.vlgmr.msra.gmra.mxu0 %vm2134_vm2, %v5576_v23  ;;  %2768 = vmatprep.subr.bf16.mxu1 %v2212_v5  ;;  %v4813_v5 = vld [vmem:[%s5548_s7 + $0x204] ss:$196 sps:$4 sm:$0xff]  }
 0x105   : > { %2726 = vmatpush1.bf16.msra.mxu0 %v2203_v1  ;;  %2751 = vmatprep.mubr.bf16.mxu0 %v4965_v60  ;;  %v4793_v1 = vld [vmem:[%s5548_s7 + $0x1f8] ss:$196 sps:$4 sm:$0xff]  }
 0x106   : > { %2727 = vmatprep.subr.bf16.mxu0 %v4726_v2  ;;  %4396 = vmatmul.mubr.msk.bf16.vlgmr.msra.gmra.mxu1 %vm2134_vm2, %v5576_v23  ;;  %v4801_v2 = vld [vmem:[%s5548_s7 + $0x74] ss:$196 sps:$4 sm:$0xff]  }
 0x107   : > { %2769 = vmatpush1.bf16.msra.mxu1 %v2209_v8  ;;  %2794 = vmatprep.mubr.bf16.mxu1 %v4965_v60  ;;  %v4811_v8 = vld [vmem:[%s5548_s7 + $0x200] ss:$196 sps:$4 sm:$0xff]  }
 0x108   : > { %2770 = vmatprep.subr.bf16.mxu1 %v4744_v9  ;;  %v2242_v9 = vand.u32 %v4810_v4, %v5543_v62  ;;  %v4874_v4 = vld [vmem:[%s5548_s7 + $0x538] ss:$196 sps:$4 sm:$0xff]  }
 0x109   : > { %2728 = vmatpush1.bf16.msra.mxu0 %v4724_v6  ;;  %v4799_v6 = vld [vmem:[%s5548_s7 + $0x70] ss:$196 sps:$4 sm:$0xff]  }
 0x10a   : > { %2729 = vmatprep.subr.bf16.mxu0 %v4732_v7  ;;  %v4808_v7 = vld [vmem:[%s5548_s7 + $0x6a0] ss:$196 sps:$4 sm:$0x3f]  }
 0x10b   : > { %2771 = vmatpush1.bf16.msra.mxu1 %v4742_v12  ;;  %v2239_v12 = vand.u32 %v4808_v7, %v5543_v62  ;;  %v4894_v7 = vld [vmem:[%s5548_s7 + $0x544] ss:$196 sps:$4 sm:$0xff]  }
 0x10c   : > { %2772 = vmatprep.subr.bf16.mxu1 %v4747_v13  ;;  %v4816_v13 = vld [vmem:[%s5548_s7 + $0x51c] ss:$196 sps:$4 sm:$0xff]  }
 0x10d   : > { %2730 = vmatpush1.bf16.msra.mxu0 %v4730_v10  ;;  %v4828_v10 = vld [vmem:[%s5548_s7 + $0x6ac] ss:$196 sps:$4 sm:$0x3f]  }
 0x10e   : > { %2731 = vmatprep.subr.bf16.mxu0 %v4735_v11  ;;  %v4819_v11 = vld [vmem:[%s5548_s7 + $0x7c] ss:$196 sps:$4 sm:$0xff]  }
 0x10f   : > { %2773 = vmatpush1.bf16.msra.mxu1 %v4745_v16  ;;  %v2248_v16 = vand.u32 %v4828_v10, %v5543_v62  ;;  %v4892_v10 = vld [vmem:[%s5548_s7 + $0x540] ss:$196 sps:$4 sm:$0xff]  }
 0x110   : > { %2774 = vmatprep.subr.bf16.mxu1 %v4753_v18  ;;  %v4822_v18 = vld [vmem:[%s5548_s7 + $0x394] ss:$196 sps:$4 sm:$0xff]  }
 0x111   : > { %2732 = vmatpush1.bf16.msra.mxu0 %v4733_v14  ;;  %v4817_v14 = vld [vmem:[%s5548_s7 + $0x78] ss:$196 sps:$4 sm:$0xff]  }
 0x112   : > { %2733 = vmatprep.subr.bf16.mxu0 %v4741_v15  ;;  %v4826_v15 = vld [vmem:[%s5548_s7 + $0x6a8] ss:$196 sps:$4 sm:$0x3f]  }
 0x113   : > { %2775 = vmatpush1.bf16.msra.mxu1 %v4751_v22  ;;  %v4825_v22 = vld [vmem:[%s5548_s7 + $0x20c] ss:$196 sps:$4 sm:$0xff]  }
 0x114   : > { %2776 = vmatprep.subr.bf16.mxu1 %v4759_v24  ;;  %v4832_v24 = vld [vmem:[%s5548_s7 + $0x520] ss:$196 sps:$4 sm:$0xff]  }
 0x115   : > { %2734 = vmatpush1.bf16.msra.mxu0 %v4739_v19  ;;  %v2245_v19 = vand.u32 %v4826_v15, %v5543_v62  ;;  %v4895_v15 = vld [vmem:[%s5548_s7 + $0x3b8] ss:$196 sps:$4 sm:$0xff]  }
 0x116   : > { %2811 = vmatprep.subr.bf16.mxu0 %v2218_v21  ;;  %v4820_v21 = vld [vmem:[%s5548_s7 + $0x390] ss:$196 sps:$4 sm:$0xff]  }
 0x117   : > { %2777 = vmatpush1.bf16.msra.mxu1 %v4757_v28  ;;  %v4835_v28 = vld [vmem:[%s5548_s7 + $0x398] ss:$196 sps:$4 sm:$0xff]  }
 0x118   : > { %4397 = vmatmul.mubr.msk.bf16.vlgmr.msra.gmra.mxu0 %vm2134_vm2, %v5576_v23  ;;  %2854 = vmatprep.subr.bf16.mxu1 %v2224_v30  ;;  %v4843_v30 = vld [vmem:[%s5548_s7 + $0x214] ss:$196 sps:$4 sm:$0xff]  }
 0x119   : > { %2812 = vmatpush1.bf16.msra.mxu0 %v2215_v26  ;;  %2837 = vmatprep.mubr.bf16.mxu0 %v4965_v60  ;;  %v4823_v26 = vld [vmem:[%s5548_s7 + $0x208] ss:$196 sps:$4 sm:$0xff]  }
 0x11a   : > { %2813 = vmatprep.subr.bf16.mxu0 %v4756_v27  ;;  %4398 = vmatmul.mubr.msk.bf16.vlgmr.msra.gmra.mxu1 %vm2134_vm2, %v5576_v23  ;;  %v4831_v27 = vld [vmem:[%s5548_s7 + $0x84] ss:$196 sps:$4 sm:$0xff]  }
 0x11b   : > { %2855 = vmatpush1.bf16.msra.mxu1 %v2221_v33  ;;  %2880 = vmatprep.mubr.bf16.mxu1 %v4965_v60  ;;  %v2254_v33 = vand.u32 %v4840_v29, %v5543_v62  ;;  %v4918_v29 = vld [vmem:[%s5548_s7 + $0x6dc] ss:$196 sps:$4 sm:$0x3f]  }
 0x11c   : > { %2856 = vmatprep.subr.bf16.mxu1 %v4774_v34  ;;  %v4841_v34 = vld [vmem:[%s5548_s7 + $0x210] ss:$196 sps:$4 sm:$0xff]  }
 0x11d   : > { %2814 = vmatpush1.bf16.msra.mxu0 %v4754_v31  ;;  %v4829_v31 = vld [vmem:[%s5548_s7 + $0x80] ss:$196 sps:$4 sm:$0xff]  }
 0x11e   : > { %2815 = vmatprep.subr.bf16.mxu0 %v4762_v32  ;;  %v4838_v32 = vld [vmem:[%s5548_s7 + $0x6b0] ss:$196 sps:$4 sm:$0x3f]  }
 0x11f   : > { %2857 = vmatpush1.bf16.msra.mxu1 %v4772_v37  ;;  %v2251_v37 = vand.u32 %v4838_v32, %v5543_v62 }
 0x120   : > { %2858 = vmatprep.subr.bf16.mxu1 %v4777_v38  ;;  %v4846_v38 = vld [vmem:[%s5548_s7 + $0x52c] ss:$196 sps:$4 sm:$0xff]  }
 0x121   : > { %2816 = vmatpush1.bf16.msra.mxu0 %v4760_v35  ;;  %v4849_v35 = vld [vmem:[%s5548_s7 + $0x8c] ss:$196 sps:$4 sm:$0xff]  }
 0x122   : > { %2817 = vmatprep.subr.bf16.mxu0 %v4765_v36  ;;  %v4858_v36 = vld [vmem:[%s5548_s7 + $0x6bc] ss:$196 sps:$4 sm:$0x3f]  }
 0x123   : > { %2859 = vmatpush1.bf16.msra.mxu1 %v4775_v41  ;;  %v2260_v41 = vand.u32 %v4858_v36, %v5543_v62 }
 0x124   : > { %2860 = vmatprep.subr.bf16.mxu1 %v4783_v43  ;;  %v4852_v43 = vld [vmem:[%s5548_s7 + $0x3a4] ss:$196 sps:$4 sm:$0xff]  }
 0x125   : > { %2818 = vmatpush1.bf16.msra.mxu0 %v4763_v39  ;;  %v4847_v39 = vld [vmem:[%s5548_s7 + $0x88] ss:$196 sps:$4 sm:$0xff]  }
 0x126   : > { %2819 = vmatprep.subr.bf16.mxu0 %v4771_v40  ;;  %v4856_v40 = vld [vmem:[%s5548_s7 + $0x6b8] ss:$196 sps:$4 sm:$0x3f]  }
 0x127   : > { %2861 = vmatpush1.bf16.msra.mxu1 %v4781_v46  ;;  %v4850_v46 = vld [vmem:[%s5548_s7 + $0x3a0] ss:$196 sps:$4 sm:$0xff]  }
 0x128   : > { %2862 = vmatprep.subr.bf16.mxu1 %v4789_v48  ;;  %v4862_v48 = vld [vmem:[%s5548_s7 + $0x530] ss:$196 sps:$4 sm:$0xff]  }
 0x129   : > { %2820 = vmatpush1.bf16.msra.mxu0 %v4769_v44  ;;  %v2257_v44 = vand.u32 %v4856_v40, %v5543_v62 }
 0x12a   : > { %2897 = vmatprep.subr.bf16.mxu0 %v2230_v47  ;;  %v4855_v47 = vld [vmem:[%s5548_s7 + $0x21c] ss:$196 sps:$4 sm:$0xff]  }
 0x12b   : > { %2863 = vmatpush1.bf16.msra.mxu1 %v4787_v52  ;;  %v4865_v52 = vld [vmem:[%s5548_s7 + $0x3a8] ss:$196 sps:$4 sm:$0xff]  }
 0x12c   : > { %4399 = vmatmul.mubr.msk.bf16.vlgmr.msra.gmra.mxu0 %vm2134_vm2, %v5576_v23  ;;  %2940 = vmatprep.subr.bf16.mxu1 %v2236_v54  ;;  %v4795_v23 = vld [vmem:[%s5548_s7 + $0x1fc] ss:$196 sps:$4 sm:$0xff]   ;;  %v4873_v54 = vld [vmem:[%s5548_s7 + $0x224] ss:$196 sps:$4 sm:$0xff]  }
 0x12d   : > { %2898 = vmatpush1.bf16.msra.mxu0 %v2227_v50  ;;  %2923 = vmatprep.mubr.bf16.mxu0 %v4965_v60  ;;  %v4853_v50 = vld [vmem:[%s5548_s7 + $0x218] ss:$196 sps:$4 sm:$0xff]  }
 0x12e   : > { %2899 = vmatprep.subr.bf16.mxu0 %v4786_v51  ;;  %4400 = vmatmul.mubr.msk.bf16.vlgmr.msra.gmra.mxu1 %vm2134_vm2, %v5779_v61  ;;  %v4861_v51 = vld [vmem:[%s5548_s7 + $0x94] ss:$196 sps:$4 sm:$0xff]  }
 0x12f   : > { %2941 = vmatpush1.bf16.msra.mxu1 %v2233_v57  ;;  %2966 = vmatprep.mubr.bf16.mxu1 %v4965_v60  ;;  %v2266_v57 = vand.u32 %v4870_v53, %v5543_v62  ;;  %v4924_v53 = vld [vmem:[%s5548_s7 + $0x554] ss:$196 sps:$4 sm:$0xff]  }
 0x130   : > { %2942 = vmatprep.subr.bf16.mxu1 %v4804_v58  ;;  %v4871_v58 = vld [vmem:[%s5548_s7 + $0x220] ss:$196 sps:$4 sm:$0xff]  }
 0x131   : > { %2900 = vmatpush1.bf16.msra.mxu0 %v4784_v55  ;;  %v4859_v55 = vld [vmem:[%s5548_s7 + $0x90] ss:$196 sps:$4 sm:$0xff]  }
 0x132   : > { %2901 = vmatprep.subr.bf16.mxu0 %v4792_v56  ;;  %v4868_v56 = vld [vmem:[%s5548_s7 + $0x6c0] ss:$196 sps:$4 sm:$0x3f]  }
 0x133   : > { %2943 = vmatpush1.bf16.msra.mxu1 %v4802_v63  ;;  %v2263_v63 = vand.u32 %v4868_v56, %v5543_v62 }
 0x134   : > { %2944 = vmatprep.subr.bf16.mxu1 %v4807_v0  ;;  %v4876_v0 = vld [vmem:[%s5548_s7 + $0x53c] ss:$196 sps:$4 sm:$0xff]  }
 0x135   : > { %2902 = vmatpush1.bf16.msra.mxu0 %v4790_v59  ;;  %v4879_v59 = vld [vmem:[%s5548_s7 + $0x9c] ss:$196 sps:$4 sm:$0xff]  }
 0x136   : > { %2903 = vmatprep.subr.bf16.mxu0 %v4795_v23  ;;  %v4888_v23 = vld [vmem:[%s5548_s7 + $0x6cc] ss:$196 sps:$4 sm:$0x3f]  }
 0x137   : > { %2945 = vmatpush1.bf16.msra.mxu1 %v4805_v3  ;;  %v2272_v3 = vand.u32 %v4888_v23, %v5543_v62  ;;  %v4913_v23 = vld [vmem:[%s5548_s7 + $0x238] ss:$196 sps:$4 sm:$0xff]  }
 0x138   : > { %2946 = vmatprep.subr.bf16.mxu1 %v4813_v5  ;;  %v4882_v5 = vld [vmem:[%s5548_s7 + $0x3b4] ss:$196 sps:$4 sm:$0xff]  }
 0x139   : > { %2904 = vmatpush1.bf16.msra.mxu0 %v4793_v1  ;;  %v4877_v1 = vld [vmem:[%s5548_s7 + $0x98] ss:$196 sps:$4 sm:$0xff]  }
 0x13a   : > { %2905 = vmatprep.subr.bf16.mxu0 %v4801_v2  ;;  %v4886_v2 = vld [vmem:[%s5548_s7 + $0x6c8] ss:$196 sps:$4 sm:$0x3f]  }
 0x13b   : > { %2947 = vmatpush1.bf16.msra.mxu1 %v4811_v8  ;;  %v4880_v8 = vld [vmem:[%s5548_s7 + $0x3b0] ss:$196 sps:$4 sm:$0xff]  }
 0x13c   : > { %2948 = vmatprep.subr.bf16.mxu1 %v4819_v11  ;;  %v4897_v11 = vld [vmem:[%s5548_s7 + $0x3bc] ss:$196 sps:$4 sm:$0xff]  }
 0x13d   : > { %2906 = vmatpush1.bf16.msra.mxu0 %v4799_v6  ;;  %v2269_v6 = vand.u32 %v4886_v2, %v5543_v62 }
 0x13e   : > { %2983 = vmatprep.subr.bf16.mxu0 %v2242_v9  ;;  %v4885_v9 = vld [vmem:[%s5548_s7 + $0x22c] ss:$196 sps:$4 sm:$0xff]  }
 0x13f   : > { %2949 = vmatpush1.bf16.msra.mxu1 %v4817_v14  ;;  %v4891_v14 = vld [vmem:[%s5548_s7 + $0xa4] ss:$196 sps:$4 sm:$0xff]  }
 0x140   : > { %4401 = vmatmul.mubr.msk.bf16.vlgmr.msra.gmra.mxu0 %vm2134_vm2, %v5779_v61  ;;  %3026 = vmatprep.subr.bf16.mxu1 %v2248_v16  ;;  %v4900_v16 = vld [vmem:[%s5548_s7 + $0x6d4] ss:$196 sps:$4 sm:$0x3f]  }
 0x141   : > { %2984 = vmatpush1.bf16.msra.mxu0 %v2239_v12  ;;  %3009 = vmatprep.mubr.bf16.mxu0 %v4965_v60  ;;  %v5876_v12 = vpop.permute.xlu0 %3366 }
 0x142   : > { %2985 = vmatprep.subr.bf16.mxu0 %v4816_v13  ;;  %4402 = vmatmul.mubr.msk.bf16.vlgmr.msra.gmra.mxu1 %vm2134_vm2, %v5779_v61  ;;  %v4883_v13 = vld [vmem:[%s5548_s7 + $0x228] ss:$196 sps:$4 sm:$0xff]  }
 0x143   : > { %3027 = vmatpush1.bf16.msra.mxu1 %v2245_v19  ;;  %3052 = vmatprep.mubr.bf16.mxu1 %v4965_v60  ;;  %v4889_v19 = vld [vmem:[%s5548_s7 + $0xa0] ss:$196 sps:$4 sm:$0xff]  }
 0x144   : > { %3028 = vmatprep.subr.bf16.mxu1 %v4834_v20  ;;  %v4898_v20 = vld [vmem:[%s5548_s7 + $0x6d0] ss:$196 sps:$4 sm:$0x3f]  }
 0x145   : > { %2986 = vmatpush1.bf16.msra.mxu0 %v4814_v17  ;;  %v4903_v17 = vld [vmem:[%s5548_s7 + $0x234] ss:$196 sps:$4 sm:$0xff]  }
 0x146   : > { %2987 = vmatprep.subr.bf16.mxu0 %v4822_v18 }
 0x147   : > { %3029 = vmatpush1.bf16.msra.mxu1 %v4832_v24 }
 0x148   : > { %3030 = vmatprep.subr.bf16.mxu1 %v4837_v25  ;;  %v5891_v25 = vpop.permute.xlu0 %3371 }
 0x149   : > { %2988 = vmatpush1.bf16.msra.mxu0 %v4820_v21  ;;  %v4966_v21 = vmov 0.0  }
 0x14a   : > { %2989 = vmatprep.subr.bf16.mxu0 %v4825_v22 }
 0x14b   : > { %3031 = vmatpush1.bf16.msra.mxu1 %v4835_v28  ;;  %v4909_v28 = vld [vmem:[%s5548_s7 + $0xac] ss:$196 sps:$4 sm:$0xff]  }
 0x14c   : > { %3032 = vmatprep.subr.bf16.mxu1 %v4843_v30 }
 0x14d   : > { %2990 = vmatpush1.bf16.msra.mxu0 %v4823_v26  ;;  %v2278_v26 = vand.u32 %v4900_v16, %v5543_v62 }
 0x14e   : > { %2991 = vmatprep.subr.bf16.mxu0 %v4831_v27  ;;  %v4901_v27 = vld [vmem:[%s5548_s7 + $0x230] ss:$196 sps:$4 sm:$0xff]  }
 0x14f   : > { %3033 = vmatpush1.bf16.msra.mxu1 %v4841_v34  ;;  %v4906_v34 = vld [vmem:[%s5548_s7 + $0x54c] ss:$196 sps:$4 sm:$0xff]  }
 0x150   : > { %3034 = vmatprep.subr.bf16.mxu1 %v4849_v35 }
 0x151   : > { %2992 = vmatpush1.bf16.msra.mxu0 %v4829_v31 }
 0x152   : > { %3069 = vmatprep.subr.bf16.mxu0 %v2254_v33  ;;  %v2275_v33 = vand.u32 %v4898_v20, %v5543_v62  ;;  %v4932_v20 = vld [vmem:[%s5548_s7 + $0x558] ss:$196 sps:$4 sm:$0xff]  }
 0x153   : > { %3035 = vmatpush1.bf16.msra.mxu1 %v4847_v39 }
 0x154   : > { %4403 = vmatmul.mubr.msk.bf16.vlgmr.msra.gmra.mxu0 %vm2134_vm2, %v5779_v61  ;;  %3112 = vmatprep.subr.bf16.mxu1 %v2260_v41  ;;  %v2284_v41 = vand.u32 %v4918_v29, %v5543_v62  ;;  %v4936_v29 = vld [vmem:[%s5548_s7 + $0x3d0] ss:$196 sps:$4 sm:$0xff]  }
 0x155   : > { %3070 = vmatpush1.bf16.msra.mxu0 %v2251_v37  ;;  %3095 = vmatprep.mubr.bf16.mxu0 %v4965_v60  ;;  %v4907_v37 = vld [vmem:[%s5548_s7 + $0xa8] ss:$196 sps:$4 sm:$0xff]  }
 0x156   : > { %3071 = vmatprep.subr.bf16.mxu0 %v4846_v38  ;;  %4404 = vmatmul.mubr.msk.bf16.vlgmr.msra.gmra.mxu1 %vm2134_vm2, %v5779_v61  ;;  %v4916_v38 = vld [vmem:[%s5548_s7 + $0x6d8] ss:$196 sps:$4 sm:$0x3f]  }
 0x157   : > { %3113 = vmatpush1.bf16.msra.mxu1 %v2257_v44  ;;  %3138 = vmatprep.mubr.bf16.mxu1 %v4965_v60 }
 0x158   : > { %3114 = vmatprep.subr.bf16.mxu1 %v4864_v45  ;;  %v4904_v45 = vld [vmem:[%s5548_s7 + $0x548] ss:$196 sps:$4 sm:$0xff]  }
 0x159   : > { %3072 = vmatpush1.bf16.msra.mxu0 %v4844_v42 }
 0x15a   : > { %3073 = vmatprep.subr.bf16.mxu0 %v4852_v43 }
 0x15b   : > { %3115 = vmatpush1.bf16.msra.mxu1 %v4862_v48 }
 0x15c   : > { %3116 = vmatprep.subr.bf16.mxu1 %v4867_v49  ;;  %v4912_v49 = vld [vmem:[%s5548_s7 + $0x3c4] ss:$196 sps:$4 sm:$0xff]  }
 0x15d   : > { %3074 = vmatpush1.bf16.msra.mxu0 %v4850_v46 }
 0x15e   : > { %3075 = vmatprep.subr.bf16.mxu0 %v4855_v47 }
 0x15f   : > { %3117 = vmatpush1.bf16.msra.mxu1 %v4865_v52 }
 0x160   : > { %3118 = vmatprep.subr.bf16.mxu1 %v4873_v54  ;;  %v4910_v54 = vld [vmem:[%s5548_s7 + $0x3c0] ss:$196 sps:$4 sm:$0xff]  }
 0x161   : > { %3076 = vmatpush1.bf16.msra.mxu0 %v4853_v50  ;;  %v2281_v50 = vand.u32 %v4916_v38, %v5543_v62 }
 0x162   : > { %3077 = vmatprep.subr.bf16.mxu0 %v4861_v51 }
 0x163   : > { %3119 = vmatpush1.bf16.msra.mxu1 %v4871_v58  ;;  %v4922_v58 = vld [vmem:[%s5548_s7 + $0x550] ss:$196 sps:$4 sm:$0xff]  }
 0x164   : > { %3120 = vmatprep.subr.bf16.mxu1 %v4879_v59  ;;  %v4927_v59 = vld [vmem:[%s5548_s7 + $0x3cc] ss:$196 sps:$4 sm:$0xff]  }
 0x165   : > { %3078 = vmatpush1.bf16.msra.mxu0 %v4859_v55 }
 0x166   : > { %3155 = vmatprep.subr.bf16.mxu0 %v2266_v57  ;;  %v4915_v57 = vld [vmem:[%s5548_s7 + $0x23c] ss:$196 sps:$4 sm:$0xff]  }
 0x167   : > { %3121 = vmatpush1.bf16.msra.mxu1 %v4877_v1  ;;  %v4931_v1 = vld [vmem:[%s5548_s7 + $0x244] ss:$196 sps:$4 sm:$0xff]  }
 0x168   : > { %4405 = vmatmul.mubr.msk.bf16.vlgmr.msra.gmra.mxu0 %vm2134_vm2, %v5779_v61  ;;  %3198 = vmatprep.subr.bf16.mxu1 %v2272_v3  ;;  %v4919_v3 = vld [vmem:[%s5548_s7 + $0xb0] ss:$196 sps:$4 sm:$0xff]  }
 0x169   : > { %3156 = vmatpush1.bf16.msra.mxu0 %v2263_v63  ;;  %3181 = vmatprep.mubr.bf16.mxu0 %v4965_v60  ;;  %v4921_v63 = vld [vmem:[%s5548_s7 + $0xb4] ss:$196 sps:$4 sm:$0xff]  }
 0x16a   : > { %3157 = vmatprep.subr.bf16.mxu0 %v4876_v0  ;;  %4406 = vmatmul.mubr.msk.bf16.vlgmr.msra.gmra.mxu1 %vm2134_vm2, %v5779_v61  ;;  %v4925_v0 = vld [vmem:[%s5548_s7 + $0x3c8] ss:$196 sps:$4 sm:$0xff]  }
 0x16b   : > { %3199 = vmatpush1.bf16.msra.mxu1 %v2269_v6  ;;  %3224 = vmatprep.mubr.bf16.mxu1 %v4965_v60  ;;  %v4929_v6 = vld [vmem:[%s5548_s7 + $0x240] ss:$196 sps:$4 sm:$0xff]  }
 0x16c   : > { %3200 = vmatprep.subr.bf16.mxu1 %v4894_v7  ;;  %v4935_v7 = vld [vmem:[%s5548_s7 + $0xbc] ss:$196 sps:$4 sm:$0xff]  }
 0x16d   : > { %3158 = vmatpush1.bf16.msra.mxu0 %v4874_v4  ;;  %v4928_v4 = vld [vmem:[%s5548_s7 + $0x6e0] ss:$196 sps:$4 sm:$0x3f]  }
 0x16e   : > { %3159 = vmatprep.subr.bf16.mxu0 %v4882_v5 }
 0x16f   : > { %3201 = vmatpush1.bf16.msra.mxu1 %v4892_v10 }
 0x170   : > { %3202 = vmatprep.subr.bf16.mxu1 %v4897_v11  ;;  %v2287_v11 = vand.u32 %v4928_v4, %v5543_v62 }
 0x171   : > { %3160 = vmatpush1.bf16.msra.mxu0 %v4880_v8 }
 0x172   : > { %3161 = vmatprep.subr.bf16.mxu0 %v4885_v9 }
 0x173   : > { %3203 = vmatpush1.bf16.msra.mxu1 %v4895_v15  ;;  %v4933_v15 = vld [vmem:[%s5548_s7 + $0xb8] ss:$196 sps:$4 sm:$0xff]  }
 0x174   : > { %v2323_v18 = vpop.f32.mrf.mxu0  ;;  %3204 = vmatprep.subr.bf16.mxu1 %v4903_v17 }
 0x175   : > { %vm3374_vm3 = vcmp.gt.f32.partialorder %v2323_v18, %v5876_v12  ;;  %3162 = vmatpush1.bf16.msra.mxu0 %v4883_v13 }
 0x176   : > { %v3472_v22 = vsel %vm3374_vm3, 1.0, %v4966_v21  ;;  %v2325_v24 = vpop.f32.mrf.mxu0  ;;  %3163 = vmatprep.subr.bf16.mxu0 %v4891_v14  ;;  %v2366_v35 = vpop.f32.mrf.mxu1 }
 0x177   : > { %vm3375_vm4 = vcmp.gt.f32.partialorder %v2325_v24, %v5876_v12  ;;  %vm3376_vm6 = vcmp.gt.f32.partialorder %v2366_v35, %v5876_v12  ;;  %3205 = vmatpush1.bf16.msra.mxu1 %v4901_v27 }
 0x178   : > { %v3473_v30 = vsel %vm3375_vm4, 1.0, %v4966_v21  ;;  %v2327_v31 = vpop.f32.mrf.mxu0  ;;  %v3474_v39 = vsel %vm3376_vm6, 1.0, %v4966_v21  ;;  %v2368_v40 = vpop.f32.mrf.mxu1  ;;  %3206 = vmatprep.subr.bf16.mxu1 %v4909_v28 }
 0x179   : > { %v4470_v32 = vpack.c.bf16 %v3473_v30, %v3472_v22  ;;  %vm3423_vm5 = vcmp.gt.f32.partialorder %v2327_v31, %v5891_v25  ;;  %3164 = vmatpush1.bf16.msra.mxu0 %v4889_v19  ;;  %vm3377_vm8 = vcmp.gt.f32.partialorder %v2368_v40, %v5876_v12 }
 0x17a   : > { %v2329_v36 = vpop.f32.mrf.mxu0  ;;  %3241 = vmatprep.subr.bf16.mxu0 %v2278_v26  ;;  %v3521_v42 = vsel %vm3423_vm5, 1.0, %v4966_v21  ;;  %v3475_v46 = vsel %vm3377_vm8, 1.0, %v4966_v21  ;;  %v2370_v47 = vpop.f32.mrf.mxu1 }
 0x17b   : > { %3866 = vst [vmem:[%s5906_s12] sm:$0xff] %v4470_v32  ;;  %vm3424_vm7 = vcmp.gt.f32.partialorder %v2329_v36, %v5891_v25  ;;  %v4471_v48 = vpack.c.bf16 %v3475_v46, %v3474_v39  ;;  %vm3425_vm9 = vcmp.gt.f32.partialorder %v2370_v47, %v5891_v25  ;;  %3207 = vmatpush1.bf16.msra.mxu1 %v4907_v37  ;;  %v4937_v32 = vld [vmem:[%s5548_s7 + $0x248] ss:$196 sps:$4 sm:$0xff]  }
 0x17c   : > { %v3522_v43 = vsel %vm3424_vm7, 1.0, %v4966_v21  ;;  %4407 = vmatmul.mubr.msk.bf16.vlgmr.msra.gmra.mxu0 %vm2134_vm2, %v5779_v61  ;;  %v3523_v51 = vsel %vm3425_vm9, 1.0, %v4966_v21  ;;  %v2372_v52 = vpop.f32.mrf.mxu1  ;;  %3284 = vmatprep.subr.bf16.mxu1 %v2284_v41 }
 0x17d   : > { %v4495_v44 = vpack.c.bf16 %v3522_v43, %v3521_v42  ;;  %3242 = vmatpush1.bf16.msra.mxu0 %v2275_v33  ;;  %3267 = vmatprep.mubr.bf16.mxu0 %v4965_v60  ;;  %3867 = vst [vmem:[%s5906_s12 + $0x8] sm:$0xff] %v4471_v48  ;;  %vm3426_vm10 = vcmp.gt.f32.partialorder %v2372_v52, %v5891_v25 }
 0x17e   : > { %3243 = vmatprep.subr.bf16.mxu0 %v4906_v34  ;;  %v3524_v55 = vsel %vm3426_vm10, 1.0, %v4966_v21  ;;  %4408 = vmatmul.mubr.msk.bf16.vlgmr.msra.gmra.mxu1 %vm2134_vm2, %v5779_v61  ;;  %v4938_v34 = vld [vmem:[%s5548_s7 + $0xc0] ss:$196 sps:$4 sm:$0xff]  }
 0x17f   : > { %3891 = vst [vmem:[%s5906_s12 + $0xc4] sm:$0xff] %v4495_v44  ;;  %v4496_v56 = vpack.c.bf16 %v3524_v55, %v3523_v51  ;;  %3285 = vmatpush1.bf16.msra.mxu1 %v2281_v50  ;;  %3310 = vmatprep.mubr.bf16.mxu1 %v4965_v60 }
 0x180   : > { %3286 = vmatprep.subr.bf16.mxu1 %v4924_v53 }
 0x181   : > { %3244 = vmatpush1.bf16.msra.mxu0 %v4904_v45  ;;  %3892 = vst [vmem:[%s5906_s12 + $0xcc] sm:$0xff] %v4496_v56 }
 0x182   : > { %3245 = vmatprep.subr.bf16.mxu0 %v4912_v49 }
 0x183   : > { %3287 = vmatpush1.bf16.msra.mxu1 %v4922_v58 }
 0x184   : > { %3288 = vmatprep.subr.bf16.mxu1 %v4927_v59 }
 0x185   : > { %3246 = vmatpush1.bf16.msra.mxu0 %v4910_v54 }
 0x186   : > { %3247 = vmatprep.subr.bf16.mxu0 %v4915_v57 }
 0x187   : > { %3289 = vmatpush1.bf16.msra.mxu1 %v4925_v0 }
 0x188   : > { %v2409_v2 = vpop.f32.mrf.mxu0  ;;  %3290 = vmatprep.subr.bf16.mxu1 %v4931_v1 }
 0x189   : > { %vm3378_vm11 = vcmp.gt.f32.partialorder %v2409_v2, %v5876_v12  ;;  %3248 = vmatpush1.bf16.msra.mxu0 %v4913_v23 }
 0x18a   : > { %v3476_v5 = vsel %vm3378_vm11, 1.0, %v4966_v21  ;;  %v2411_v60 = vpop.f32.mrf.mxu0  ;;  %3249 = vmatprep.subr.bf16.mxu0 %v4921_v63  ;;  %v2452_v13 = vpop.f32.mrf.mxu1 }
 0x18b   : > { %vm3379_vm12 = vcmp.gt.f32.partialorder %v2411_v60, %v5876_v12  ;;  %vm3380_vm14 = vcmp.gt.f32.partialorder %v2452_v13, %v5876_v12  ;;  %3291 = vmatpush1.bf16.msra.mxu1 %v4929_v6 }
 0x18c   : > { %v3477_v8 = vsel %vm3379_vm12, 1.0, %v4966_v21  ;;  %v2413_v9 = vpop.f32.mrf.mxu0  ;;  %v3478_v16 = vsel %vm3380_vm14, 1.0, %v4966_v21  ;;  %v2454_v17 = vpop.f32.mrf.mxu1  ;;  %3292 = vmatprep.subr.bf16.mxu1 %v4935_v7 }
 0x18d   : > { %v4472_v10 = vpack.c.bf16 %v3477_v8, %v3476_v5  ;;  %vm3427_vm13 = vcmp.gt.f32.partialorder %v2413_v9, %v5891_v25  ;;  %3250 = vmatpush1.bf16.msra.mxu0 %v4919_v3  ;;  %vm3381_vm0 = vcmp.gt.f32.partialorder %v2454_v17, %v5876_v12 }
 0x18e   : > { %v2415_v14 = vpop.f32.mrf.mxu0  ;;  %4527 = vmatprep.subr.bf16.mxu0 %v4966_v21  ;;  %v3525_v18 = vsel %vm3427_vm13, 1.0, %v4966_v21  ;;  %v3479_v22 = vsel %vm3381_vm0, 1.0, %v4966_v21  ;;  %v2456_v24 = vpop.f32.mrf.mxu1 }
 0x18f   : > { %3868 = vst [vmem:[%s5906_s12 + $0x10] sm:$0xff] %v4472_v10  ;;  %vm3428_vm15 = vcmp.gt.f32.partialorder %v2415_v14, %v5891_v25  ;;  %v4473_v26 = vpack.c.bf16 %v3479_v22, %v3478_v16  ;;  %vm3429_vm3 = vcmp.gt.f32.partialorder %v2456_v24, %v5891_v25  ;;  %3293 = vmatpush1.bf16.msra.mxu1 %v4933_v15 }
 0x190   : > { %v3526_v62 = vsel %vm3428_vm15, 1.0, %v4966_v21  ;;  %4409 = vmatmul.mubr.msk.bf16.vlgmr.msra.gmra.mxu0 %vm2134_vm2, %v5779_v61  ;;  %v3527_v27 = vsel %vm3429_vm3, 1.0, %v4966_v21  ;;  %v2458_v28 = vpop.f32.mrf.mxu1 }
 0x191   : > { %v4497_v19 = vpack.c.bf16 %v3526_v62, %v3525_v18  ;;  %4528 = vmatpush3.bf16.msra.mxu0 %v2287_v11  ;;  %4537 = vmatprep.mubr.msk.bf16.mxu0 %vm4967_vm1, %v4966_v21  ;;  %3869 = vst [vmem:[%s5906_s12 + $0x18] sm:$0xff] %v4473_v26  ;;  %vm3430_vm4 = vcmp.gt.f32.partialorder %v2458_v28, %v5891_v25 }
 0x192   : > { %4529 = vmatprep.subr.bf16.mxu0 %v4966_v21  ;;  %v3528_v30 = vsel %vm3430_vm4, 1.0, %v4966_v21  ;;  %4410 = vmatmul.mubr.msk.bf16.vlgmr.msra.gmra.mxu1 %vm2134_vm2, %v5779_v61 }
 0x193   : > { %3893 = vst [vmem:[%s5906_s12 + $0xd4] sm:$0xff] %v4497_v19  ;;  %v4498_v31 = vpack.c.bf16 %v3528_v30, %v3527_v27 }
 0x195   : > { %4530 = vmatpush3.bf16.msra.mxu0 %v4932_v20  ;;  %3894 = vst [vmem:[%s5906_s12 + $0xdc] sm:$0xff] %v4498_v31 }
 0x196   : > { %4531 = vmatprep.subr.bf16.mxu0 %v4966_v21 }
 0x199   : > { %4532 = vmatpush3.bf16.msra.mxu0 %v4936_v29 }
 0x19a   : > { %4533 = vmatprep.subr.bf16.mxu0 %v4966_v21 }
 0x19c   : > { %v2495_v33 = vpop.f32.mrf.mxu0 }
 0x19d   : > { %vm3382_vm5 = vcmp.gt.f32.partialorder %v2495_v33, %v5876_v12  ;;  %4534 = vmatpush3.bf16.msra.mxu0 %v4937_v32 }
 0x19e   : > { %v3480_v35 = vsel %vm3382_vm5, 1.0, %v4966_v21  ;;  %v2497_v36 = vpop.f32.mrf.mxu0  ;;  %4535 = vmatprep.subr.bf16.mxu0 %v4966_v21  ;;  %v2538_v40 = vpop.f32.mrf.mxu1 }
 0x19f   : > { %vm3383_vm6 = vcmp.gt.f32.partialorder %v2497_v36, %v5876_v12  ;;  %vm3384_vm8 = vcmp.gt.f32.partialorder %v2538_v40, %v5876_v12 }
 0x1a0   : > { %v3481_v37 = vsel %vm3383_vm6, 1.0, %v4966_v21  ;;  %v2499_v38 = vpop.f32.mrf.mxu0  ;;  %v3482_v42 = vsel %vm3384_vm8, 1.0, %v4966_v21  ;;  %v2540_v43 = vpop.f32.mrf.mxu1 }
 0x1a1   : > { %v4474_v39 = vpack.c.bf16 %v3481_v37, %v3480_v35  ;;  %vm3431_vm7 = vcmp.gt.f32.partialorder %v2499_v38, %v5891_v25  ;;  %4536 = vmatpush3.bf16.msra.mxu0 %v4938_v34  ;;  %vm3385_vm10 = vcmp.gt.f32.partialorder %v2540_v43, %v5876_v12 }
 0x1a2   : > { %v2501_v41 = vpop.f32.mrf.mxu0  ;;  %v3529_v44 = vsel %vm3431_vm7, 1.0, %v4966_v21  ;;  %v3483_v47 = vsel %vm3385_vm10, 1.0, %v4966_v21  ;;  %v2542_v48 = vpop.f32.mrf.mxu1 }
 0x1a3   : > { %3870 = vst [vmem:[%s5906_s12 + $0x20] sm:$0xff] %v4474_v39  ;;  %vm3432_vm9 = vcmp.gt.f32.partialorder %v2501_v41, %v5891_v25  ;;  %v4475_v49 = vpack.c.bf16 %v3483_v47, %v3482_v42  ;;  %vm3433_vm11 = vcmp.gt.f32.partialorder %v2542_v48, %v5891_v25 }
 0x1a4   : > { %v3530_v45 = vsel %vm3432_vm9, 1.0, %v4966_v21  ;;  %4538 = vmatmul.mubr.msk.bf16.vlgmr.msra.gmra.mxu0 %vm2134_vm2, %v5779_v61  ;;  %v3531_v50 = vsel %vm3433_vm11, 1.0, %v4966_v21  ;;  %v2544_v51 = vpop.f32.mrf.mxu1 }
 0x1a5   : > { %v4499_v46 = vpack.c.bf16 %v3530_v45, %v3529_v44  ;;  %3871 = vst [vmem:[%s5906_s12 + $0x28] sm:$0xff] %v4475_v49  ;;  %vm3434_vm12 = vcmp.gt.f32.partialorder %v2544_v51, %v5891_v25 }
 0x1a6   : > { %v3532_v52 = vsel %vm3434_vm12, 1.0, %v4966_v21 }
 0x1a7   : > { %3895 = vst [vmem:[%s5906_s12 + $0xe4] sm:$0xff] %v4499_v46  ;;  %v4500_v61 = vpack.c.bf16 %v3532_v52, %v3531_v50 }
 0x1a9   : > { %3896 = vst [vmem:[%s5906_s12 + $0xec] sm:$0xff] %v4500_v61 }
 0x1b0   : > { %v2581_v53 = vpop.f32.mrf.mxu0 }
 0x1b1   : > { %vm3386_vm2 = vcmp.gt.f32.partialorder %v2581_v53, %v5876_v12 }
 0x1b2   : > { %v3484_v54 = vsel %vm3386_vm2, 1.0, %v4966_v21  ;;  %v2583_v55 = vpop.f32.mrf.mxu0  ;;  %v2624_v59 = vpop.f32.mrf.mxu1 }
 0x1b3   : > { %vm3387_vm13 = vcmp.gt.f32.partialorder %v2583_v55, %v5876_v12  ;;  %vm3388_vm15 = vcmp.gt.f32.partialorder %v2624_v59, %v5876_v12 }
 0x1b4   : > { %v3485_v56 = vsel %vm3387_vm13, 1.0, %v4966_v21  ;;  %v2585_v57 = vpop.f32.mrf.mxu0  ;;  %v3486_v63 = vsel %vm3388_vm15, 1.0, %v4966_v21  ;;  %v2626_v0 = vpop.f32.mrf.mxu1 }
 0x1b5   : > { %v4476_v58 = vpack.c.bf16 %v3485_v56, %v3484_v54  ;;  %vm3435_vm14 = vcmp.gt.f32.partialorder %v2585_v57, %v5891_v25  ;;  %vm3389_vm1 = vcmp.gt.f32.partialorder %v2626_v0, %v5876_v12 }
 0x1b6   : > { %v2587_v23 = vpop.f32.mrf.mxu0  ;;  %v3533_v1 = vsel %vm3435_vm14, 1.0, %v4966_v21  ;;  %v3487_v4 = vsel %vm3389_vm1, 1.0, %v4966_v21  ;;  %v2628_v5 = vpop.f32.mrf.mxu1 }
 0x1b7   : > { %3872 = vst [vmem:[%s5906_s12 + $0x30] sm:$0xff] %v4476_v58  ;;  %vm3436_vm0 = vcmp.gt.f32.partialorder %v2587_v23, %v5891_v25  ;;  %v4477_v60 = vpack.c.bf16 %v3487_v4, %v3486_v63  ;;  %vm3437_vm3 = vcmp.gt.f32.partialorder %v2628_v5, %v5891_v25 }
 0x1b8   : > { %v3534_v2 = vsel %vm3436_vm0, 1.0, %v4966_v21  ;;  %v3535_v6 = vsel %vm3437_vm3, 1.0, %v4966_v21  ;;  %v2630_v7 = vpop.f32.mrf.mxu1 }
 0x1b9   : > { %v4501_v3 = vpack.c.bf16 %v3534_v2, %v3533_v1  ;;  %3873 = vst [vmem:[%s5906_s12 + $0x38] sm:$0xff] %v4477_v60  ;;  %vm3438_vm4 = vcmp.gt.f32.partialorder %v2630_v7, %v5891_v25 }
 0x1ba   : > { %v3536_v8 = vsel %vm3438_vm4, 1.0, %v4966_v21 }
 0x1bb   : > { %3897 = vst [vmem:[%s5906_s12 + $0xf4] sm:$0xff] %v4501_v3  ;;  %v4502_v9 = vpack.c.bf16 %v3536_v8, %v3535_v6 }
 0x1bd   : > { %3898 = vst [vmem:[%s5906_s12 + $0xfc] sm:$0xff] %v4502_v9 }
 0x1c4   : > { %v2667_v10 = vpop.f32.mrf.mxu0 }
 0x1c5   : > { %vm3390_vm5 = vcmp.gt.f32.partialorder %v2667_v10, %v5876_v12 }
 0x1c6   : > { %v3488_v11 = vsel %vm3390_vm5, 1.0, %v4966_v21  ;;  %v2669_v13 = vpop.f32.mrf.mxu0  ;;  %v2710_v17 = vpop.f32.mrf.mxu1 }
 0x1c7   : > { %vm3391_vm6 = vcmp.gt.f32.partialorder %v2669_v13, %v5876_v12  ;;  %vm3392_vm8 = vcmp.gt.f32.partialorder %v2710_v17, %v5876_v12 }
 0x1c8   : > { %v3489_v14 = vsel %vm3391_vm6, 1.0, %v4966_v21  ;;  %v2671_v15 = vpop.f32.mrf.mxu0  ;;  %v3490_v62 = vsel %vm3392_vm8, 1.0, %v4966_v21  ;;  %v2712_v19 = vpop.f32.mrf.mxu1 }
 0x1c9   : > { %v4478_v16 = vpack.c.bf16 %v3489_v14, %v3488_v11  ;;  %vm3439_vm7 = vcmp.gt.f32.partialorder %v2671_v15, %v5891_v25  ;;  %vm3393_vm10 = vcmp.gt.f32.partialorder %v2712_v19, %v5876_v12 }
 0x1ca   : > { %v2673_v18 = vpop.f32.mrf.mxu0  ;;  %v3537_v20 = vsel %vm3439_vm7, 1.0, %v4966_v21  ;;  %v3491_v26 = vsel %vm3393_vm10, 1.0, %v4966_v21  ;;  %v2714_v27 = vpop.f32.mrf.mxu1 }
 0x1cb   : > { %3874 = vst [vmem:[%s5906_s12 + $0x40] sm:$0xff] %v4478_v16  ;;  %vm3440_vm9 = vcmp.gt.f32.partialorder %v2673_v18, %v5891_v25  ;;  %v4479_v28 = vpack.c.bf16 %v3491_v26, %v3490_v62  ;;  %vm3441_vm11 = vcmp.gt.f32.partialorder %v2714_v27, %v5891_v25 }
 0x1cc   : > { %v3538_v22 = vsel %vm3440_vm9, 1.0, %v4966_v21  ;;  %v3539_v29 = vsel %vm3441_vm11, 1.0, %v4966_v21  ;;  %v2716_v30 = vpop.f32.mrf.mxu1 }
 0x1cd   : > { %v4503_v24 = vpack.c.bf16 %v3538_v22, %v3537_v20  ;;  %3875 = vst [vmem:[%s5906_s12 + $0x48] sm:$0xff] %v4479_v28  ;;  %vm3442_vm12 = vcmp.gt.f32.partialorder %v2716_v30, %v5891_v25 }
 0x1ce   : > { %v3540_v31 = vsel %vm3442_vm12, 1.0, %v4966_v21 }
 0x1cf   : > { %3899 = vst [vmem:[%s5906_s12 + $0x104] sm:$0xff] %v4503_v24  ;;  %v4504_v32 = vpack.c.bf16 %v3540_v31, %v3539_v29 }
 0x1d1   : > { %3900 = vst [vmem:[%s5906_s12 + $0x10c] sm:$0xff] %v4504_v32 }
 0x1d8   : > { %v2753_v33 = vpop.f32.mrf.mxu0 }
 0x1d9   : > { %vm3394_vm2 = vcmp.gt.f32.partialorder %v2753_v33, %v5876_v12 }
 0x1da   : > { %v3492_v34 = vsel %vm3394_vm2, 1.0, %v4966_v21  ;;  %v2755_v35 = vpop.f32.mrf.mxu0  ;;  %v2796_v39 = vpop.f32.mrf.mxu1 }
 0x1db   : > { %vm3395_vm13 = vcmp.gt.f32.partialorder %v2755_v35, %v5876_v12  ;;  %vm3396_vm15 = vcmp.gt.f32.partialorder %v2796_v39, %v5876_v12 }
 0x1dc   : > { %v3493_v36 = vsel %vm3395_vm13, 1.0, %v4966_v21  ;;  %v2757_v37 = vpop.f32.mrf.mxu0  ;;  %v3494_v41 = vsel %vm3396_vm15, 1.0, %v4966_v21  ;;  %v2798_v42 = vpop.f32.mrf.mxu1 }
 0x1dd   : > { %v4480_v38 = vpack.c.bf16 %v3493_v36, %v3492_v34  ;;  %vm3443_vm14 = vcmp.gt.f32.partialorder %v2757_v37, %v5891_v25  ;;  %vm3397_vm1 = vcmp.gt.f32.partialorder %v2798_v42, %v5876_v12 }
 0x1de   : > { %v2759_v40 = vpop.f32.mrf.mxu0  ;;  %v3541_v43 = vsel %vm3443_vm14, 1.0, %v4966_v21  ;;  %v3495_v46 = vsel %vm3397_vm1, 1.0, %v4966_v21  ;;  %v2800_v47 = vpop.f32.mrf.mxu1 }
 0x1df   : > { %3876 = vst [vmem:[%s5906_s12 + $0x50] sm:$0xff] %v4480_v38  ;;  %vm3444_vm0 = vcmp.gt.f32.partialorder %v2759_v40, %v5891_v25  ;;  %v4481_v48 = vpack.c.bf16 %v3495_v46, %v3494_v41  ;;  %vm3445_vm3 = vcmp.gt.f32.partialorder %v2800_v47, %v5891_v25 }
 0x1e0   : > { %v3542_v44 = vsel %vm3444_vm0, 1.0, %v4966_v21  ;;  %v3543_v49 = vsel %vm3445_vm3, 1.0, %v4966_v21  ;;  %v2802_v50 = vpop.f32.mrf.mxu1 }
 0x1e1   : > { %v4505_v45 = vpack.c.bf16 %v3542_v44, %v3541_v43  ;;  %3877 = vst [vmem:[%s5906_s12 + $0x58] sm:$0xff] %v4481_v48  ;;  %vm3446_vm4 = vcmp.gt.f32.partialorder %v2802_v50, %v5891_v25 }
 0x1e2   : > { %v3544_v51 = vsel %vm3446_vm4, 1.0, %v4966_v21 }
 0x1e3   : > { %3901 = vst [vmem:[%s5906_s12 + $0x114] sm:$0xff] %v4505_v45  ;;  %v4506_v52 = vpack.c.bf16 %v3544_v51, %v3543_v49 }
 0x1e5   : > { %3902 = vst [vmem:[%s5906_s12 + $0x11c] sm:$0xff] %v4506_v52 }
 0x1ec   : > { %v2839_v61 = vpop.f32.mrf.mxu0 }
 0x1ed   : > { %vm3398_vm5 = vcmp.gt.f32.partialorder %v2839_v61, %v5876_v12 }
 0x1ee   : > { %v3496_v53 = vsel %vm3398_vm5, 1.0, %v4966_v21  ;;  %v2841_v54 = vpop.f32.mrf.mxu0  ;;  %v2882_v58 = vpop.f32.mrf.mxu1 }
 0x1ef   : > { %vm3399_vm6 = vcmp.gt.f32.partialorder %v2841_v54, %v5876_v12  ;;  %vm3400_vm8 = vcmp.gt.f32.partialorder %v2882_v58, %v5876_v12 }
 0x1f0   : > { %v3497_v55 = vsel %vm3399_vm6, 1.0, %v4966_v21  ;;  %v2843_v56 = vpop.f32.mrf.mxu0  ;;  %v3498_v23 = vsel %vm3400_vm8, 1.0, %v4966_v21  ;;  %v2884_v63 = vpop.f32.mrf.mxu1 }
 0x1f1   : > { %v4482_v57 = vpack.c.bf16 %v3497_v55, %v3496_v53  ;;  %vm3447_vm7 = vcmp.gt.f32.partialorder %v2843_v56, %v5891_v25  ;;  %vm3401_vm10 = vcmp.gt.f32.partialorder %v2884_v63, %v5876_v12 }
 0x1f2   : > { %v2845_v59 = vpop.f32.mrf.mxu0  ;;  %v3545_v0 = vsel %vm3447_vm7, 1.0, %v4966_v21  ;;  %v3499_v3 = vsel %vm3401_vm10, 1.0, %v4966_v21  ;;  %v2886_v4 = vpop.f32.mrf.mxu1 }
 0x1f3   : > { %3878 = vst [vmem:[%s5906_s12 + $0x60] sm:$0xff] %v4482_v57  ;;  %vm3448_vm9 = vcmp.gt.f32.partialorder %v2845_v59, %v5891_v25  ;;  %v4483_v5 = vpack.c.bf16 %v3499_v3, %v3498_v23  ;;  %vm3449_vm11 = vcmp.gt.f32.partialorder %v2886_v4, %v5891_v25 }
 0x1f4   : > { %v3546_v1 = vsel %vm3448_vm9, 1.0, %v4966_v21  ;;  %v3547_v60 = vsel %vm3449_vm11, 1.0, %v4966_v21  ;;  %v2888_v6 = vpop.f32.mrf.mxu1 }
 0x1f5   : > { %v4507_v2 = vpack.c.bf16 %v3546_v1, %v3545_v0  ;;  %3879 = vst [vmem:[%s5906_s12 + $0x68] sm:$0xff] %v4483_v5  ;;  %vm3450_vm12 = vcmp.gt.f32.partialorder %v2888_v6, %v5891_v25 }
 0x1f6   : > { %v3548_v7 = vsel %vm3450_vm12, 1.0, %v4966_v21 }
 0x1f7   : > { %3903 = vst [vmem:[%s5906_s12 + $0x124] sm:$0xff] %v4507_v2  ;;  %v4508_v8 = vpack.c.bf16 %v3548_v7, %v3547_v60 }
 0x1f9   : > { %3904 = vst [vmem:[%s5906_s12 + $0x12c] sm:$0xff] %v4508_v8 }
 0x200   : > { %v2925_v9 = vpop.f32.mrf.mxu0 }
 0x201   : > { %vm3402_vm2 = vcmp.gt.f32.partialorder %v2925_v9, %v5876_v12 }
 0x202   : > { %v3500_v10 = vsel %vm3402_vm2, 1.0, %v4966_v21  ;;  %v2927_v11 = vpop.f32.mrf.mxu0  ;;  %v2968_v16 = vpop.f32.mrf.mxu1 }
 0x203   : > { %vm3403_vm13 = vcmp.gt.f32.partialorder %v2927_v11, %v5876_v12  ;;  %vm3404_vm15 = vcmp.gt.f32.partialorder %v2968_v16, %v5876_v12 }
 0x204   : > { %v3501_v13 = vsel %vm3403_vm13, 1.0, %v4966_v21  ;;  %v2929_v14 = vpop.f32.mrf.mxu0  ;;  %v3502_v18 = vsel %vm3404_vm15, 1.0, %v4966_v21  ;;  %v2970_v62 = vpop.f32.mrf.mxu1 }
 0x205   : > { %v4484_v15 = vpack.c.bf16 %v3501_v13, %v3500_v10  ;;  %vm3451_vm14 = vcmp.gt.f32.partialorder %v2929_v14, %v5891_v25  ;;  %vm3405_vm1 = vcmp.gt.f32.partialorder %v2970_v62, %v5876_v12 }
 0x206   : > { %v2931_v17 = vpop.f32.mrf.mxu0  ;;  %v3549_v19 = vsel %vm3451_vm14, 1.0, %v4966_v21  ;;  %v3503_v24 = vsel %vm3405_vm1, 1.0, %v4966_v21  ;;  %v2972_v26 = vpop.f32.mrf.mxu1 }
 0x207   : > { %3880 = vst [vmem:[%s5906_s12 + $0x70] sm:$0xff] %v4484_v15  ;;  %vm3452_vm0 = vcmp.gt.f32.partialorder %v2931_v17, %v5891_v25  ;;  %v4485_v27 = vpack.c.bf16 %v3503_v24, %v3502_v18  ;;  %vm3453_vm3 = vcmp.gt.f32.partialorder %v2972_v26, %v5891_v25 }
 0x208   : > { %v3550_v20 = vsel %vm3452_vm0, 1.0, %v4966_v21  ;;  %v3551_v28 = vsel %vm3453_vm3, 1.0, %v4966_v21  ;;  %v2974_v29 = vpop.f32.mrf.mxu1 }
 0x209   : > { %v4509_v22 = vpack.c.bf16 %v3550_v20, %v3549_v19  ;;  %3881 = vst [vmem:[%s5906_s12 + $0x78] sm:$0xff] %v4485_v27  ;;  %vm3454_vm4 = vcmp.gt.f32.partialorder %v2974_v29, %v5891_v25 }
 0x20a   : > { %v3552_v30 = vsel %vm3454_vm4, 1.0, %v4966_v21 }
 0x20b   : > { %3905 = vst [vmem:[%s5906_s12 + $0x134] sm:$0xff] %v4509_v22  ;;  %v4510_v31 = vpack.c.bf16 %v3552_v30, %v3551_v28 }
 0x20d   : > { %3906 = vst [vmem:[%s5906_s12 + $0x13c] sm:$0xff] %v4510_v31 }
 0x214   : > { %v3011_v32 = vpop.f32.mrf.mxu0 }
 0x215   : > { %vm3406_vm5 = vcmp.gt.f32.partialorder %v3011_v32, %v5876_v12 }
 0x216   : > { %v3504_v33 = vsel %vm3406_vm5, 1.0, %v4966_v21  ;;  %v3013_v34 = vpop.f32.mrf.mxu0  ;;  %v3054_v38 = vpop.f32.mrf.mxu1 }
 0x217   : > { %vm3407_vm6 = vcmp.gt.f32.partialorder %v3013_v34, %v5876_v12  ;;  %vm3408_vm8 = vcmp.gt.f32.partialorder %v3054_v38, %v5876_v12 }
 0x218   : > { %v3505_v35 = vsel %vm3407_vm6, 1.0, %v4966_v21  ;;  %v3015_v36 = vpop.f32.mrf.mxu0  ;;  %v3506_v40 = vsel %vm3408_vm8, 1.0, %v4966_v21  ;;  %v3056_v41 = vpop.f32.mrf.mxu1 }
 0x219   : > { %v4486_v37 = vpack.c.bf16 %v3505_v35, %v3504_v33  ;;  %vm3455_vm7 = vcmp.gt.f32.partialorder %v3015_v36, %v5891_v25  ;;  %vm3409_vm10 = vcmp.gt.f32.partialorder %v3056_v41, %v5876_v12 }
 0x21a   : > { %v3017_v39 = vpop.f32.mrf.mxu0  ;;  %v3553_v42 = vsel %vm3455_vm7, 1.0, %v4966_v21  ;;  %v3507_v45 = vsel %vm3409_vm10, 1.0, %v4966_v21  ;;  %v3058_v46 = vpop.f32.mrf.mxu1 }
 0x21b   : > { %3882 = vst [vmem:[%s5906_s12 + $0x80] sm:$0xff] %v4486_v37  ;;  %vm3456_vm9 = vcmp.gt.f32.partialorder %v3017_v39, %v5891_v25  ;;  %v4487_v47 = vpack.c.bf16 %v3507_v45, %v3506_v40  ;;  %vm3457_vm11 = vcmp.gt.f32.partialorder %v3058_v46, %v5891_v25 }
 0x21c   : > { %v3554_v43 = vsel %vm3456_vm9, 1.0, %v4966_v21  ;;  %v3555_v48 = vsel %vm3457_vm11, 1.0, %v4966_v21  ;;  %v3060_v49 = vpop.f32.mrf.mxu1 }
 0x21d   : > { %v4511_v44 = vpack.c.bf16 %v3554_v43, %v3553_v42  ;;  %3883 = vst [vmem:[%s5906_s12 + $0x88] sm:$0xff] %v4487_v47  ;;  %vm3458_vm12 = vcmp.gt.f32.partialorder %v3060_v49, %v5891_v25 }
 0x21e   : > { %v3556_v50 = vsel %vm3458_vm12, 1.0, %v4966_v21 }
 0x21f   : > { %3907 = vst [vmem:[%s5906_s12 + $0x144] sm:$0xff] %v4511_v44  ;;  %v4512_v51 = vpack.c.bf16 %v3556_v50, %v3555_v48 }
 0x221   : > { %3908 = vst [vmem:[%s5906_s12 + $0x14c] sm:$0xff] %v4512_v51 }
 0x228   : > { %v3097_v52 = vpop.f32.mrf.mxu0 }
 0x229   : > { %vm3410_vm2 = vcmp.gt.f32.partialorder %v3097_v52, %v5876_v12 }
 0x22a   : > { %v3508_v61 = vsel %vm3410_vm2, 1.0, %v4966_v21  ;;  %v3099_v53 = vpop.f32.mrf.mxu0  ;;  %v3140_v57 = vpop.f32.mrf.mxu1 }
 0x22b   : > { %vm3411_vm13 = vcmp.gt.f32.partialorder %v3099_v53, %v5876_v12  ;;  %vm3412_vm15 = vcmp.gt.f32.partialorder %v3140_v57, %v5876_v12 }
 0x22c   : > { %v3509_v54 = vsel %vm3411_vm13, 1.0, %v4966_v21  ;;  %v3101_v55 = vpop.f32.mrf.mxu0  ;;  %v3510_v59 = vsel %vm3412_vm15, 1.0, %v4966_v21  ;;  %v3142_v23 = vpop.f32.mrf.mxu1 }
 0x22d   : > { %v4488_v56 = vpack.c.bf16 %v3509_v54, %v3508_v61  ;;  %vm3459_vm14 = vcmp.gt.f32.partialorder %v3101_v55, %v5891_v25  ;;  %vm3413_vm1 = vcmp.gt.f32.partialorder %v3142_v23, %v5876_v12  ;;  %v3950_v23 = vld [vmem:[%s5906_s12 + $0x28] sm:$0xff] (%p5018_p5) }
 0x22e   : > { %v3103_v58 = vpop.f32.mrf.mxu0  ;;  %v3557_v63 = vsel %vm3459_vm14, 1.0, %v4966_v21  ;;  %v3511_v2 = vsel %vm3413_vm1, 1.0, %v4966_v21  ;;  %v3144_v3 = vpop.f32.mrf.mxu1  ;;  %3951 = vst [vmem:[%s6204_s21 + $0x28] sm:$0xff] (%p5018_p5), %v3950_v23 }
 0x22f   : > { %3884 = vst [vmem:[%s5906_s12 + $0x90] sm:$0xff] %v4488_v56  ;;  %vm3460_vm0 = vcmp.gt.f32.partialorder %v3103_v58, %v5891_v25  ;;  %v4489_v4 = vpack.c.bf16 %v3511_v2, %v3510_v59  ;;  %vm3461_vm3 = vcmp.gt.f32.partialorder %v3144_v3, %v5891_v25  ;;  %v3946_v58 = vld [vmem:[%s5906_s12 + $0x18] sm:$0xff] (%p5018_p5)  ;;  %v3948_v59 = vld [vmem:[%s5906_s12 + $0x20] sm:$0xff] (%p5018_p5)  ;;  %v3958_v2 = vld [vmem:[%s5906_s12 + $0x48] sm:$0xff] (%p5018_p5) }
 0x230   : > { %v3558_v0 = vsel %vm3460_vm0, 1.0, %v4966_v21  ;;  %v3559_v5 = vsel %vm3461_vm3, 1.0, %v4966_v21  ;;  %v3146_v60 = vpop.f32.mrf.mxu1  ;;  %3947 = vst [vmem:[%s6204_s21 + $0x18] sm:$0xff] (%p5018_p5), %v3946_v58  ;;  %3949 = vst [vmem:[%s6204_s21 + $0x20] sm:$0xff] (%p5018_p5), %v3948_v59  ;;  %v3960_v3 = vld [vmem:[%s5906_s12 + $0x50] sm:$0xff] (%p5018_p5) }
 0x231   : > { %v4513_v1 = vpack.c.bf16 %v3558_v0, %v3557_v63  ;;  %3885 = vst [vmem:[%s5906_s12 + $0x98] sm:$0xff] %v4489_v4  ;;  %vm3462_vm4 = vcmp.gt.f32.partialorder %v3146_v60, %v5891_v25  ;;  %v3952_v63 = vld [vmem:[%s5906_s12 + $0x30] sm:$0xff] (%p5018_p5)  ;;  %v3954_v0 = vld [vmem:[%s5906_s12 + $0x38] sm:$0xff] (%p5018_p5)  ;;  %3959 = vst [vmem:[%s6204_s21 + $0x48] sm:$0xff] (%p5018_p5), %v3958_v2 }
 0x232   : > { %v3560_v6 = vsel %vm3462_vm4, 1.0, %v4966_v21  ;;  %3953 = vst [vmem:[%s6204_s21 + $0x30] sm:$0xff] (%p5018_p5), %v3952_v63  ;;  %3955 = vst [vmem:[%s6204_s21 + $0x38] sm:$0xff] (%p5018_p5), %v3954_v0  ;;  %v3962_v4 = vld [vmem:[%s5906_s12 + $0x58] sm:$0xff] (%p5018_p5)  ;;  %v3966_v60 = vld [vmem:[%s5906_s12 + $0x68] sm:$0xff] (%p5018_p5) }
 0x233   : > { %3909 = vst [vmem:[%s5906_s12 + $0x154] sm:$0xff] %v4513_v1  ;;  %v4514_v7 = vpack.c.bf16 %v3560_v6, %v3559_v5  ;;  %v3956_v1 = vld [vmem:[%s5906_s12 + $0x40] sm:$0xff] (%p5018_p5)  ;;  %3961 = vst [vmem:[%s6204_s21 + $0x50] sm:$0xff] (%p5018_p5), %v3960_v3  ;;  %v3968_v6 = vld [vmem:[%s5906_s12 + $0x70] sm:$0xff] (%p5018_p5) }
 0x234   : > { %3957 = vst [vmem:[%s6204_s21 + $0x40] sm:$0xff] (%p5018_p5), %v3956_v1  ;;  %3963 = vst [vmem:[%s6204_s21 + $0x58] sm:$0xff] (%p5018_p5), %v3962_v4  ;;  %v3964_v5 = vld [vmem:[%s5906_s12 + $0x60] sm:$0xff] (%p5018_p5) }
 0x235   : > { %3910 = vst [vmem:[%s5906_s12 + $0x15c] sm:$0xff] %v4514_v7  ;;  %3965 = vst [vmem:[%s6204_s21 + $0x60] sm:$0xff] (%p5018_p5), %v3964_v5  ;;  %v3970_v7 = vld [vmem:[%s5906_s12 + $0x78] sm:$0xff] (%p5018_p5) }
 0x236   : > { %3967 = vst [vmem:[%s6204_s21 + $0x68] sm:$0xff] (%p5018_p5), %v3966_v60  ;;  %3969 = vst [vmem:[%s6204_s21 + $0x70] sm:$0xff] (%p5018_p5), %v3968_v6 }
 0x237   : > { %3971 = vst [vmem:[%s6204_s21 + $0x78] sm:$0xff] (%p5018_p5), %v3970_v7 }
 0x23c   : > { %v3183_v8 = vpop.f32.mrf.mxu0 }
 0x23d   : > { %vm3414_vm5 = vcmp.gt.f32.partialorder %v3183_v8, %v5876_v12  ;;  %v3972_v8 = vld [vmem:[%s5906_s12 + $0x80] sm:$0xff] (%p5018_p5) }
 0x23e   : > { %v3512_v9 = vsel %vm3414_vm5, 1.0, %v4966_v21  ;;  %v3185_v10 = vpop.f32.mrf.mxu0  ;;  %v3226_v15 = vpop.f32.mrf.mxu1  ;;  %3973 = vst [vmem:[%s6204_s21 + $0x80] sm:$0xff] (%p5018_p5), %v3972_v8 }
 0x23f   : > { %vm3415_vm6 = vcmp.gt.f32.partialorder %v3185_v10, %v5876_v12  ;;  %vm3416_vm8 = vcmp.gt.f32.partialorder %v3226_v15, %v5876_v12  ;;  %v3976_v10 = vld [vmem:[%s5906_s12 + $0x90] sm:$0xff] (%p5018_p5) }
 0x240   : > { %v3513_v11 = vsel %vm3415_vm6, 1.0, %v4966_v21  ;;  %v3187_v13 = vpop.f32.mrf.mxu0  ;;  %v3514_v17 = vsel %vm3416_vm8, 1.0, %v4966_v21  ;;  %v3228_v18 = vpop.f32.mrf.mxu1  ;;  %3977 = vst [vmem:[%s6204_s21 + $0x90] sm:$0xff] (%p5018_p5), %v3976_v10 }
 0x241   : > { %v4490_v14 = vpack.c.bf16 %v3513_v11, %v3512_v9  ;;  %vm3463_vm7 = vcmp.gt.f32.partialorder %v3187_v13, %v5891_v25  ;;  %vm3417_vm10 = vcmp.gt.f32.partialorder %v3228_v18, %v5876_v12  ;;  %v3974_v9 = vld [vmem:[%s5906_s12 + $0x88] sm:$0xff] (%p5018_p5)  ;;  %v3978_v11 = vld [vmem:[%s5906_s12 + $0x98] sm:$0xff] (%p5018_p5) }
 0x242   : > { %v3189_v16 = vpop.f32.mrf.mxu0  ;;  %v3561_v62 = vsel %vm3463_vm7, 1.0, %v4966_v21  ;;  %v3515_v22 = vsel %vm3417_vm10, 1.0, %v4966_v21  ;;  %v3230_v24 = vpop.f32.mrf.mxu1  ;;  %3975 = vst [vmem:[%s6204_s21 + $0x88] sm:$0xff] (%p5018_p5), %v3974_v9  ;;  %3979 = vst [vmem:[%s6204_s21 + $0x98] sm:$0xff] (%p5018_p5), %v3978_v11  ;;  %v3990_v18 = vld [vmem:[%s5906_s12 + $0xcc] sm:$0xff] (%p5018_p5) }
 0x243   : > { %3886 = vst [vmem:[%s5906_s12 + $0xa0] sm:$0xff] %v4490_v14  ;;  %vm3464_vm9 = vcmp.gt.f32.partialorder %v3189_v16, %v5891_v25  ;;  %v4491_v26 = vpack.c.bf16 %v3515_v22, %v3514_v17  ;;  %vm3465_vm11 = vcmp.gt.f32.partialorder %v3230_v24, %v5891_v25  ;;  %v3988_v17 = vld [vmem:[%s5906_s12 + $0xc4] sm:$0xff] (%p5018_p5)  ;;  %3991 = vst [vmem:[%s6204_s21 + $0x318] sm:$0xff] (%p5018_p5), %v3990_v18  ;;  %v3998_v22 = vld [vmem:[%s5906_s12 + $0xec] sm:$0xff] (%p5018_p5) }
 0x244   : > { %v3562_v19 = vsel %vm3464_vm9, 1.0, %v4966_v21  ;;  %v3563_v27 = vsel %vm3465_vm11, 1.0, %v4966_v21  ;;  %v3232_v28 = vpop.f32.mrf.mxu1  ;;  %3989 = vst [vmem:[%s6204_s21 + $0x310] sm:$0xff] (%p5018_p5), %v3988_v17  ;;  %3999 = vst [vmem:[%s6204_s21 + $0x338] sm:$0xff] (%p5018_p5), %v3998_v22  ;;  %v4000_v24 = vld [vmem:[%s5906_s12 + $0xf4] sm:$0xff] (%p5018_p5) }
 0x245   : > { %v4515_v20 = vpack.c.bf16 %v3562_v19, %v3561_v62  ;;  %3887 = vst [vmem:[%s5906_s12 + $0xa8] sm:$0xff] %v4491_v26  ;;  %vm3466_vm12 = vcmp.gt.f32.partialorder %v3232_v28, %v5891_v25  ;;  %v3992_v62 = vld [vmem:[%s5906_s12 + $0xd4] sm:$0xff] (%p5018_p5)  ;;  %v3994_v19 = vld [vmem:[%s5906_s12 + $0xdc] sm:$0xff] (%p5018_p5)  ;;  %4001 = vst [vmem:[%s6204_s21 + $0x340] sm:$0xff] (%p5018_p5), %v4000_v24 }
 0x246   : > { %v3564_v29 = vsel %vm3466_vm12, 1.0, %v4966_v21  ;;  %3993 = vst [vmem:[%s6204_s21 + $0x320] sm:$0xff] (%p5018_p5), %v3992_v62  ;;  %3995 = vst [vmem:[%s6204_s21 + $0x328] sm:$0xff] (%p5018_p5), %v3994_v19  ;;  %v4002_v26 = vld [vmem:[%s5906_s12 + $0xfc] sm:$0xff] (%p5018_p5)  ;;  %v4006_v28 = vld [vmem:[%s5906_s12 + $0x10c] sm:$0xff] (%p5018_p5) }
 0x247   : > { %3911 = vst [vmem:[%s5906_s12 + $0x164] sm:$0xff] %v4515_v20  ;;  %v4516_v30 = vpack.c.bf16 %v3564_v29, %v3563_v27  ;;  %v3996_v20 = vld [vmem:[%s5906_s12 + $0xe4] sm:$0xff] (%p5018_p5)  ;;  %4003 = vst [vmem:[%s6204_s21 + $0x348] sm:$0xff] (%p5018_p5), %v4002_v26  ;;  %v4008_v29 = vld [vmem:[%s5906_s12 + $0x114] sm:$0xff] (%p5018_p5) }
 0x248   : > { %3997 = vst [vmem:[%s6204_s21 + $0x330] sm:$0xff] (%p5018_p5), %v3996_v20  ;;  %v4004_v27 = vld [vmem:[%s5906_s12 + $0x104] sm:$0xff] (%p5018_p5)  ;;  %4007 = vst [vmem:[%s6204_s21 + $0x358] sm:$0xff] (%p5018_p5), %v4006_v28 }
 0x249   : > { %3912 = vst [vmem:[%s5906_s12 + $0x16c] sm:$0xff] %v4516_v30  ;;  %4005 = vst [vmem:[%s6204_s21 + $0x350] sm:$0xff] (%p5018_p5), %v4004_v27  ;;  %v4010_v30 = vld [vmem:[%s5906_s12 + $0x11c] sm:$0xff] (%p5018_p5) }
 0x24a   : > { %v3980_v13 = vld [vmem:[%s5906_s12 + $0xa0] sm:$0xff] (%p5018_p5)  ;;  %4009 = vst [vmem:[%s6204_s21 + $0x360] sm:$0xff] (%p5018_p5), %v4008_v29  ;;  %4011 = vst [vmem:[%s6204_s21 + $0x368] sm:$0xff] (%p5018_p5), %v4010_v30 }
 0x24b   : > { %3981 = vst [vmem:[%s6204_s21 + $0xa0] sm:$0xff] (%p5018_p5), %v3980_v13 }
 0x24c   : > { %v3982_v14 = vld [vmem:[%s5906_s12 + $0xa8] sm:$0xff] (%p5018_p5) }
 0x24d   : > { %3983 = vst [vmem:[%s6204_s21 + $0xa8] sm:$0xff] (%p5018_p5), %v3982_v14 }
 0x250   : > { %v3269_v31 = vpop.f32.mrf.mxu0 }
 0x251   : > { %vm3418_vm2 = vcmp.gt.f32.partialorder %v3269_v31, %v5876_v12  ;;  %v4012_v31 = vld [vmem:[%s5906_s12 + $0x124] sm:$0xff] (%p5018_p5) }
 0x252   : > { %v3516_v32 = vsel %vm3418_vm2, 1.0, %v4966_v21  ;;  %v3271_v33 = vpop.f32.mrf.mxu0  ;;  %v3312_v37 = vpop.f32.mrf.mxu1  ;;  %4013 = vst [vmem:[%s6204_s21 + $0x370] sm:$0xff] (%p5018_p5), %v4012_v31 }
 0x253   : > { %vm3419_vm13 = vcmp.gt.f32.partialorder %v3271_v33, %v5876_v12  ;;  %vm3420_vm15 = vcmp.gt.f32.partialorder %v3312_v37, %v5876_v12  ;;  %v4016_v33 = vld [vmem:[%s5906_s12 + $0x134] sm:$0xff] (%p5018_p5) }
 0x254   : > { %v3517_v34 = vsel %vm3419_vm13, 1.0, %v4966_v21  ;;  %v3273_v35 = vpop.f32.mrf.mxu0  ;;  %v3518_v39 = vsel %vm3420_vm15, 1.0, %v4966_v21  ;;  %v3314_v40 = vpop.f32.mrf.mxu1  ;;  %4017 = vst [vmem:[%s6204_s21 + $0x380] sm:$0xff] (%p5018_p5), %v4016_v33  ;;  %v4024_v37 = vld [vmem:[%s5906_s12 + $0x154] sm:$0xff] (%p5018_p5) }
 0x255   : > { %v4492_v36 = vpack.c.bf16 %v3517_v34, %v3516_v32  ;;  %vm3467_vm14 = vcmp.gt.f32.partialorder %v3273_v35, %v5891_v25  ;;  %vm3421_vm1 = vcmp.gt.f32.partialorder %v3314_v40, %v5876_v12  ;;  %v4014_v32 = vld [vmem:[%s5906_s12 + $0x12c] sm:$0xff] (%p5018_p5)  ;;  %v4018_v34 = vld [vmem:[%s5906_s12 + $0x13c] sm:$0xff] (%p5018_p5)  ;;  %v4020_v35 = vld [vmem:[%s5906_s12 + $0x144] sm:$0xff] (%p5018_p5)  ;;  %4025 = vst [vmem:[%s6204_s21 + $0x3a0] sm:$0xff] (%p5018_p5), %v4024_v37 }
 0x256   : > { %v3275_v38 = vpop.f32.mrf.mxu0  ;;  %v3565_v41 = vsel %vm3467_vm14, 1.0, %v4966_v21  ;;  %v3519_v44 = vsel %vm3421_vm1, 1.0, %v4966_v21  ;;  %v3316_v45 = vpop.f32.mrf.mxu1  ;;  %4015 = vst [vmem:[%s6204_s21 + $0x378] sm:$0xff] (%p5018_p5), %v4014_v32  ;;  %4019 = vst [vmem:[%s6204_s21 + $0x388] sm:$0xff] (%p5018_p5), %v4018_v34  ;;  %v4030_v40 = vld [vmem:[%s5906_s12 + $0x16c] sm:$0xff] (%p5018_p5) }
 0x257   : > { %3888 = vst [vmem:[%s5906_s12 + $0xb0] sm:$0xff] %v4492_v36  ;;  %vm3468_vm0 = vcmp.gt.f32.partialorder %v3275_v38, %v5891_v25  ;;  %v4493_v46 = vpack.c.bf16 %v3519_v44, %v3518_v39  ;;  %vm3469_vm3 = vcmp.gt.f32.partialorder %v3316_v45, %v5891_v25  ;;  %v4022_v36 = vld [vmem:[%s5906_s12 + $0x14c] sm:$0xff] (%p5018_p5)  ;;  %4021 = vst [vmem:[%s6204_s21 + $0x390] sm:$0xff] (%p5018_p5), %v4020_v35  ;;  %v4026_v38 = vld [vmem:[%s5906_s12 + $0x15c] sm:$0xff] (%p5018_p5) }
 0x258   : > { %v3566_v42 = vsel %vm3468_vm0, 1.0, %v4966_v21  ;;  %v3567_v47 = vsel %vm3469_vm3, 1.0, %v4966_v21  ;;  %v3318_v48 = vpop.f32.mrf.mxu1  ;;  %4023 = vst [vmem:[%s6204_s21 + $0x398] sm:$0xff] (%p5018_p5), %v4022_v36  ;;  %v4028_v39 = vld [vmem:[%s5906_s12 + $0x164] sm:$0xff] (%p5018_p5)  ;;  %4027 = vst [vmem:[%s6204_s21 + $0x3a8] sm:$0xff] (%p5018_p5), %v4026_v38 }
 0x259   : > { %v4517_v43 = vpack.c.bf16 %v3566_v42, %v3565_v41  ;;  %3889 = vst [vmem:[%s5906_s12 + $0xb8] sm:$0xff] %v4493_v46  ;;  %vm3470_vm4 = vcmp.gt.f32.partialorder %v3318_v48, %v5891_v25  ;;  %4029 = vst [vmem:[%s6204_s21 + $0x3b0] sm:$0xff] (%p5018_p5), %v4028_v39 }
 0x25a   : > { %v3568_v49 = vsel %vm3470_vm4, 1.0, %v4966_v21  ;;  %4031 = vst [vmem:[%s6204_s21 + $0x3b8] sm:$0xff] (%p5018_p5), %v4030_v40 }
 0x25b   : > { %3913 = vst [vmem:[%s5906_s12 + $0x174] sm:$0xff] %v4517_v43  ;;  %v4518_v50 = vpack.c.bf16 %v3568_v49, %v3567_v47 }
 0x25d   : > { %3914 = vst [vmem:[%s5906_s12 + $0x17c] sm:$0xff] %v4518_v50 }
 0x25e   : > { %v3984_v15 = vld [vmem:[%s5906_s12 + $0xb0] sm:$0xff] (%p5018_p5) }
 0x25f   : > { %3985 = vst [vmem:[%s6204_s21 + $0xb0] sm:$0xff] (%p5018_p5), %v3984_v15 }
 0x260   : > { %v3986_v16 = vld [vmem:[%s5906_s12 + $0xb8] sm:$0xff] (%p5018_p5) }
 0x261   : > { %3987 = vst [vmem:[%s6204_s21 + $0xb8] sm:$0xff] (%p5018_p5), %v3986_v16 }
 0x262   : > { %v4032_v41 = vld [vmem:[%s5906_s12 + $0x174] sm:$0xff] (%p5018_p5) }
 0x263   : > { %4033 = vst [vmem:[%s6204_s21 + $0x3c0] sm:$0xff] (%p5018_p5), %v4032_v41 }
 0x264   : > { %v3355_v51 = vpop.f32.mrf.mxu0  ;;  %v4034_v42 = vld [vmem:[%s5906_s12 + $0x17c] sm:$0xff] (%p5018_p5) }
 0x265   : > { %vm3422_vm5 = vcmp.gt.f32.partialorder %v3355_v51, %v5876_v12  ;;  %v3940_v12 = vld [vmem:[%s5906_s12] sm:$0xff] (%p5018_p5)  ;;  %4035 = vst [vmem:[%s6204_s21 + $0x3c8] sm:$0xff] (%p5018_p5), %v4034_v42 }
 0x266   : > { %v3520_v52 = vsel %vm3422_vm5, 1.0, %v4966_v21  ;;  %v4539_v61 = vpop.f32.mrf.mxu0  ;;  %3941 = vst [vmem:[%s6204_s21] sm:$0xff] (%p5018_p5), %v3940_v12 }
 0x267   : > { %v4494_v53 = vpack.c.bf16 %v3520_v52, %v3520_v52 }
 0x268   : > { %v3358_v54 = vpop.f32.mrf.mxu0 }
 0x269   : > { %3890 = vst [vmem:[%s5906_s12 + $0xc0] sm:$0xf] %v4494_v53  ;;  %vm3471_vm6 = vcmp.gt.f32.partialorder %v3358_v54, %v5891_v25  ;;  %3922 = sbr.rel (!%p5018_p5) target bundleno = 630 (0x276), region = 62  ;;  %v3944_v25 = vld [vmem:[%s5906_s12 + $0x10] sm:$0xff] (%p5018_p5) }
 0x26a   : > { %v3569_v55 = vsel %vm3471_vm6, 1.0, %v4966_v21  ;;  %v4540_v56 = vpop.f32.mrf.mxu0  ;;  %v3942_v21 = vld [vmem:[%s5906_s12 + $0x8] sm:$0xff] (%p5018_p5)  ;;  %3945 = vst [vmem:[%s6204_s21 + $0x10] sm:$0xff] (%p5018_p5), %v3944_v25 }
 0x26b   : > { %v4519_v57 = vpack.c.bf16 %v3569_v55, %v3569_v55  ;;  %3943 = vst [vmem:[%s6204_s21 + $0x8] sm:$0xff] (%p5018_p5), %v3942_v21 }
 0x26d   : > { %3915 = vst [vmem:[%s5906_s12 + $0x184] sm:$0xf] %v4519_v57 }
 0x270   : > { %v4463_v43 = vld [vmem:[%s5906_s12 + $0xc0] sm:$0xf] }
 0x271   : > { %4464 = vst [vmem:[%s6204_s21 + $0xc0] sm:$0xf] %v4463_v43 }
 0x274   : > { %v4465_v44 = vld [vmem:[%s5906_s12 + $0x184] sm:$0xf] }
 0x275   : > { %4466 = vst [vmem:[%s6204_s21 + $0x3d0] sm:$0xf] %v4465_v44 }
 0x276 PF: > { %p10_p10 = scmp.ge.s32.totalorder %s5005_s16, 6   ;;  %s6315_s12 = smov %s4958_s13 }
 0x277   : > { %s6316_s13 = smov %s5016_s19  ;;  %s6317_s14 = smov %s5005_s16 }
 0x278   :  { %12 = sbr.rel (!%p10_p10) target bundleno = 2 (0x2), region = 131 }

// kernel: forward.5
= control target key start
LH: loop header
LB: loop body
LE: loop exit
PB: predicated region body
PF: predicated region fallthrough
CT: control target
= control target key end

     0   :  { %s2531_s12 = smov 0   ;;  %s2533_s13 = smov 0   ;;  %s3215_s0 = inlined_call_operand.vmem [shape: bf16[32,400], index: 0, kind: input, shape index: {}]   ;;  %s3216_s1 = inlined_call_operand.vmem [shape: bf16[400,1536], index: 1, kind: input, shape index: {}]   ;;  %s3217_s2 = inlined_call_operand.vmem [shape: f32[32,1], index: 2, kind: input, shape index: {}]   ;;  %s3218_s3 = inlined_call_operand.vmem [shape: bf16[32,1536], index: 3, kind: output, shape index: {}]  }
   0x1   :  { %s2535_s14 = smov 0  }
   0x2 LB: > { %s2018_s15 = sadd.s32 4294967295, %s2507_s14   ;;  %s2548_s16 = sadd.s32 1, %s2507_s14   ;;  %s2507_s14 = sphi %s2535_s14, %s3222_s14   ;;  %s2503_s13 = sphi %s2533_s13, %s3221_s13   ;;  %s2499_s12 = sphi %s2531_s12, %s3220_s12  }
   0x3   : > { %s38_s17 = ssub.s32 %s2507_s14, %s2548_s16  ;;  %s41_s18 = sadd.s32 1, %s2503_s13 }
   0x4   : > { %p39_p0 = scmp.eq.s32.totalorder %s38_s17, 0  ;;  %p48_p1 = scmp.ne.s32.totalorder %s2503_s13, %s2499_s12 }
   0x5   : > { %p49_p2 = scmp.eq.s32.totalorder %s2507_s14, 0  ;;  %p99_p3 = scmp.eq.s32.totalorder %s2018_s15, 1 }
   0x6   : > { %s2559_s19 = scalar_select %p39_p0, %s2503_s13, %s41_s18  }
   0x7   : > { %p50_p4 = por %p49_p2, %p48_p1  ;;  %p2561_p5 = por %p99_p3, %p48_p1 }
   0x8   : > { %p2021_p6 = scmp.ge.s32.totalorder %s2507_s14, 2 }
   0xa   : > { %127 = sbr.rel (%p2021_p6) target bundleno = 95 (0x5f), region = 24 }
   0xf   : > { %130 = sbr.rel (!%p50_p4) target bundleno = 95 (0x5f), region = 28  ;;  %s132_s21 = sand.u32 (%p50_p4), 1, %s2503_s13  }
  0x10   : > { %s2203_s22 = smul.u32 (%p50_p4), 24, %s2507_s14 }
  0x11   : > { %s2217_s23 = smul.u32 (%p50_p4), 1200, %s132_s21 }
  0x12   : > { %s2571_s26 = scalar_lea.vmem (%p50_p4), %s3216_s1, %s2203_s22 }
  0x13   : > { %v150_v0 = vld [vmem:[%s2571_s26] sm:$0xff] (%p50_p4)  ;;  %v152_v1 = vld [vmem:[%s2571_s26 + $0x8] sm:$0xff] (%p50_p4)  ;;  %v154_v2 = vld [vmem:[%s2571_s26 + $0x10] sm:$0xff] (%p50_p4)  ;;  %s2576_s27 = scalar_lea.vmem (%p50_p4), [#allocation2], %s2217_s23 }
  0x14   : > { %151 = vst [vmem:[%s2576_s27] sm:$0xff] %v150_v0  ;;  %153 = vst [vmem:[%s2576_s27 + $0x8] sm:$0xff] %v152_v1  ;;  %v156_v3 = vld [vmem:[%s2571_s26 + $0x30] sm:$0xff]  ;;  %v158_v4 = vld [vmem:[%s2571_s26 + $0x38] sm:$0xff] }
  0x15   : > { %155 = vst [vmem:[%s2576_s27 + $0x10] sm:$0xff] %v154_v2  ;;  %v160_v5 = vld [vmem:[%s2571_s26 + $0x40] sm:$0xff]  ;;  %157 = vst [vmem:[%s2576_s27 + $0x18] sm:$0xff] %v156_v3  ;;  %v164_v7 = vld [vmem:[%s2571_s26 + $0x68] sm:$0xff] }
  0x16   : > { %159 = vst [vmem:[%s2576_s27 + $0x20] sm:$0xff] %v158_v4  ;;  %161 = vst [vmem:[%s2576_s27 + $0x28] sm:$0xff] %v160_v5  ;;  %v162_v6 = vld [vmem:[%s2571_s26 + $0x60] sm:$0xff]  ;;  %v166_v8 = vld [vmem:[%s2571_s26 + $0x70] sm:$0xff] }
  0x17   : > { %163 = vst [vmem:[%s2576_s27 + $0x30] sm:$0xff] %v162_v6  ;;  %165 = vst [vmem:[%s2576_s27 + $0x38] sm:$0xff] %v164_v7  ;;  %v168_v9 = vld [vmem:[%s2571_s26 + $0x90] sm:$0xff]  ;;  %v170_v10 = vld [vmem:[%s2571_s26 + $0x98] sm:$0xff] }
  0x18   : > { %167 = vst [vmem:[%s2576_s27 + $0x40] sm:$0xff] %v166_v8  ;;  %v172_v11 = vld [vmem:[%s2571_s26 + $0xa0] sm:$0xff]  ;;  %169 = vst [vmem:[%s2576_s27 + $0x48] sm:$0xff] %v168_v9  ;;  %v176_v13 = vld [vmem:[%s2571_s26 + $0xc8] sm:$0xff] }
  0x19   : > { %171 = vst [vmem:[%s2576_s27 + $0x50] sm:$0xff] %v170_v10  ;;  %173 = vst [vmem:[%s2576_s27 + $0x58] sm:$0xff] %v172_v11  ;;  %v174_v12 = vld [vmem:[%s2571_s26 + $0xc0] sm:$0xff]  ;;  %v178_v14 = vld [vmem:[%s2571_s26 + $0xd0] sm:$0xff] }
  0x1a   : > { %175 = vst [vmem:[%s2576_s27 + $0x60] sm:$0xff] %v174_v12  ;;  %177 = vst [vmem:[%s2576_s27 + $0x68] sm:$0xff] %v176_v13  ;;  %v180_v15 = vld [vmem:[%s2571_s26 + $0xf0] sm:$0xff]  ;;  %v182_v16 = vld [vmem:[%s2571_s26 + $0xf8] sm:$0xff] }
  0x1b   : > { %179 = vst [vmem:[%s2576_s27 + $0x70] sm:$0xff] %v178_v14  ;;  %v184_v17 = vld [vmem:[%s2571_s26 + $0x100] sm:$0xff]  ;;  %181 = vst [vmem:[%s2576_s27 + $0x78] sm:$0xff] %v180_v15  ;;  %v188_v19 = vld [vmem:[%s2571_s26 + $0x128] sm:$0xff] }
  0x1c   : > { %183 = vst [vmem:[%s2576_s27 + $0x80] sm:$0xff] %v182_v16  ;;  %185 = vst [vmem:[%s2576_s27 + $0x88] sm:$0xff] %v184_v17  ;;  %v186_v18 = vld [vmem:[%s2571_s26 + $0x120] sm:$0xff]  ;;  %v190_v20 = vld [vmem:[%s2571_s26 + $0x130] sm:$0xff] }
  0x1d   : > { %187 = vst [vmem:[%s2576_s27 + $0x90] sm:$0xff] %v186_v18  ;;  %189 = vst [vmem:[%s2576_s27 + $0x98] sm:$0xff] %v188_v19  ;;  %v192_v21 = vld [vmem:[%s2571_s26 + $0x150] sm:$0xff]  ;;  %v194_v22 = vld [vmem:[%s2571_s26 + $0x158] sm:$0xff] }
  0x1e   : > { %191 = vst [vmem:[%s2576_s27 + $0xa0] sm:$0xff] %v190_v20  ;;  %v196_v23 = vld [vmem:[%s2571_s26 + $0x160] sm:$0xff]  ;;  %193 = vst [vmem:[%s2576_s27 + $0xa8] sm:$0xff] %v192_v21  ;;  %v200_v25 = vld [vmem:[%s2571_s26 + $0x188] sm:$0xff] }
  0x1f   : > { %195 = vst [vmem:[%s2576_s27 + $0xb0] sm:$0xff] %v194_v22  ;;  %197 = vst [vmem:[%s2576_s27 + $0xb8] sm:$0xff] %v196_v23  ;;  %v198_v24 = vld [vmem:[%s2571_s26 + $0x180] sm:$0xff]  ;;  %v202_v26 = vld [vmem:[%s2571_s26 + $0x190] sm:$0xff] }
  0x20   : > { %199 = vst [vmem:[%s2576_s27 + $0xc0] sm:$0xff] %v198_v24  ;;  %201 = vst [vmem:[%s2576_s27 + $0xc8] sm:$0xff] %v200_v25  ;;  %v204_v27 = vld [vmem:[%s2571_s26 + $0x1b0] sm:$0xff]  ;;  %v206_v28 = vld [vmem:[%s2571_s26 + $0x1b8] sm:$0xff] }
  0x21   : > { %203 = vst [vmem:[%s2576_s27 + $0xd0] sm:$0xff] %v202_v26  ;;  %v208_v29 = vld [vmem:[%s2571_s26 + $0x1c0] sm:$0xff]  ;;  %205 = vst [vmem:[%s2576_s27 + $0xd8] sm:$0xff] %v204_v27  ;;  %v212_v31 = vld [vmem:[%s2571_s26 + $0x1e8] sm:$0xff] }
  0x22   : > { %207 = vst [vmem:[%s2576_s27 + $0xe0] sm:$0xff] %v206_v28  ;;  %209 = vst [vmem:[%s2576_s27 + $0xe8] sm:$0xff] %v208_v29  ;;  %v210_v30 = vld [vmem:[%s2571_s26 + $0x1e0] sm:$0xff]  ;;  %v214_v32 = vld [vmem:[%s2571_s26 + $0x1f0] sm:$0xff] }
  0x23   : > { %211 = vst [vmem:[%s2576_s27 + $0xf0] sm:$0xff] %v210_v30  ;;  %213 = vst [vmem:[%s2576_s27 + $0xf8] sm:$0xff] %v212_v31  ;;  %v216_v33 = vld [vmem:[%s2571_s26 + $0x210] sm:$0xff]  ;;  %v218_v34 = vld [vmem:[%s2571_s26 + $0x218] sm:$0xff] }
  0x24   : > { %215 = vst [vmem:[%s2576_s27 + $0x100] sm:$0xff] %v214_v32  ;;  %v220_v35 = vld [vmem:[%s2571_s26 + $0x220] sm:$0xff]  ;;  %217 = vst [vmem:[%s2576_s27 + $0x108] sm:$0xff] %v216_v33  ;;  %v224_v37 = vld [vmem:[%s2571_s26 + $0x248] sm:$0xff] }
  0x25   : > { %219 = vst [vmem:[%s2576_s27 + $0x110] sm:$0xff] %v218_v34  ;;  %221 = vst [vmem:[%s2576_s27 + $0x118] sm:$0xff] %v220_v35  ;;  %v222_v36 = vld [vmem:[%s2571_s26 + $0x240] sm:$0xff]  ;;  %v226_v38 = vld [vmem:[%s2571_s26 + $0x250] sm:$0xff] }
  0x26   : > { %223 = vst [vmem:[%s2576_s27 + $0x120] sm:$0xff] %v222_v36  ;;  %225 = vst [vmem:[%s2576_s27 + $0x128] sm:$0xff] %v224_v37  ;;  %v228_v39 = vld [vmem:[%s2571_s26 + $0x270] sm:$0xff]  ;;  %v230_v40 = vld [vmem:[%s2571_s26 + $0x278] sm:$0xff] }
  0x27   : > { %227 = vst [vmem:[%s2576_s27 + $0x130] sm:$0xff] %v226_v38  ;;  %v232_v41 = vld [vmem:[%s2571_s26 + $0x280] sm:$0xff]  ;;  %229 = vst [vmem:[%s2576_s27 + $0x138] sm:$0xff] %v228_v39  ;;  %v236_v43 = vld [vmem:[%s2571_s26 + $0x2a8] sm:$0xff] }
  0x28   : > { %231 = vst [vmem:[%s2576_s27 + $0x140] sm:$0xff] %v230_v40  ;;  %233 = vst [vmem:[%s2576_s27 + $0x148] sm:$0xff] %v232_v41  ;;  %v234_v42 = vld [vmem:[%s2571_s26 + $0x2a0] sm:$0xff]  ;;  %v238_v44 = vld [vmem:[%s2571_s26 + $0x2b0] sm:$0xff] }
  0x29   : > { %235 = vst [vmem:[%s2576_s27 + $0x150] sm:$0xff] %v234_v42  ;;  %237 = vst [vmem:[%s2576_s27 + $0x158] sm:$0xff] %v236_v43  ;;  %v240_v45 = vld [vmem:[%s2571_s26 + $0x2d0] sm:$0xff]  ;;  %v242_v46 = vld [vmem:[%s2571_s26 + $0x2d8] sm:$0xff] }
  0x2a   : > { %239 = vst [vmem:[%s2576_s27 + $0x160] sm:$0xff] %v238_v44  ;;  %v244_v47 = vld [vmem:[%s2571_s26 + $0x2e0] sm:$0xff]  ;;  %241 = vst [vmem:[%s2576_s27 + $0x168] sm:$0xff] %v240_v45  ;;  %v248_v49 = vld [vmem:[%s2571_s26 + $0x308] sm:$0xff] }
  0x2b   : > { %243 = vst [vmem:[%s2576_s27 + $0x170] sm:$0xff] %v242_v46  ;;  %245 = vst [vmem:[%s2576_s27 + $0x178] sm:$0xff] %v244_v47  ;;  %v246_v48 = vld [vmem:[%s2571_s26 + $0x300] sm:$0xff]  ;;  %v250_v50 = vld [vmem:[%s2571_s26 + $0x310] sm:$0xff] }
  0x2c   : > { %247 = vst [vmem:[%s2576_s27 + $0x180] sm:$0xff] %v246_v48  ;;  %249 = vst [vmem:[%s2576_s27 + $0x188] sm:$0xff] %v248_v49  ;;  %v252_v51 = vld [vmem:[%s2571_s26 + $0x330] sm:$0xff]  ;;  %v254_v52 = vld [vmem:[%s2571_s26 + $0x338] sm:$0xff] }
  0x2d   : > { %251 = vst [vmem:[%s2576_s27 + $0x190] sm:$0xff] %v250_v50  ;;  %v256_v53 = vld [vmem:[%s2571_s26 + $0x340] sm:$0xff]  ;;  %253 = vst [vmem:[%s2576_s27 + $0x198] sm:$0xff] %v252_v51  ;;  %v260_v55 = vld [vmem:[%s2571_s26 + $0x368] sm:$0xff] }
  0x2e   : > { %255 = vst [vmem:[%s2576_s27 + $0x1a0] sm:$0xff] %v254_v52  ;;  %257 = vst [vmem:[%s2576_s27 + $0x1a8] sm:$0xff] %v256_v53  ;;  %v258_v54 = vld [vmem:[%s2571_s26 + $0x360] sm:$0xff]  ;;  %v262_v56 = vld [vmem:[%s2571_s26 + $0x370] sm:$0xff] }
  0x2f   : > { %259 = vst [vmem:[%s2576_s27 + $0x1b0] sm:$0xff] %v258_v54  ;;  %261 = vst [vmem:[%s2576_s27 + $0x1b8] sm:$0xff] %v260_v55  ;;  %v264_v57 = vld [vmem:[%s2571_s26 + $0x390] sm:$0xff]  ;;  %v266_v58 = vld [vmem:[%s2571_s26 + $0x398] sm:$0xff] }
  0x30   : > { %263 = vst [vmem:[%s2576_s27 + $0x1c0] sm:$0xff] %v262_v56  ;;  %v268_v59 = vld [vmem:[%s2571_s26 + $0x3a0] sm:$0xff]  ;;  %265 = vst [vmem:[%s2576_s27 + $0x1c8] sm:$0xff] %v264_v57  ;;  %v272_v61 = vld [vmem:[%s2571_s26 + $0x3c8] sm:$0xff] }
  0x31   : > { %267 = vst [vmem:[%s2576_s27 + $0x1d0] sm:$0xff] %v266_v58  ;;  %269 = vst [vmem:[%s2576_s27 + $0x1d8] sm:$0xff] %v268_v59  ;;  %v270_v60 = vld [vmem:[%s2571_s26 + $0x3c0] sm:$0xff]  ;;  %v274_v62 = vld [vmem:[%s2571_s26 + $0x3d0] sm:$0xff] }
  0x32   : > { %271 = vst [vmem:[%s2576_s27 + $0x1e0] sm:$0xff] %v270_v60  ;;  %273 = vst [vmem:[%s2576_s27 + $0x1e8] sm:$0xff] %v272_v61  ;;  %v276_v63 = vld [vmem:[%s2571_s26 + $0x3f0] sm:$0xff]  ;;  %v278_v0 = vld [vmem:[%s2571_s26 + $0x3f8] sm:$0xff] }
  0x33   : > { %275 = vst [vmem:[%s2576_s27 + $0x1f0] sm:$0xff] %v274_v62  ;;  %v280_v1 = vld [vmem:[%s2571_s26 + $0x400] sm:$0xff]  ;;  %277 = vst [vmem:[%s2576_s27 + $0x1f8] sm:$0xff] %v276_v63  ;;  %v284_v3 = vld [vmem:[%s2571_s26 + $0x428] sm:$0xff] }
  0x34   : > { %279 = vst [vmem:[%s2576_s27 + $0x200] sm:$0xff] %v278_v0  ;;  %281 = vst [vmem:[%s2576_s27 + $0x208] sm:$0xff] %v280_v1  ;;  %v282_v2 = vld [vmem:[%s2571_s26 + $0x420] sm:$0xff]  ;;  %v286_v4 = vld [vmem:[%s2571_s26 + $0x430] sm:$0xff] }
  0x35   : > { %283 = vst [vmem:[%s2576_s27 + $0x210] sm:$0xff] %v282_v2  ;;  %285 = vst [vmem:[%s2576_s27 + $0x218] sm:$0xff] %v284_v3  ;;  %v288_v5 = vld [vmem:[%s2571_s26 + $0x450] sm:$0xff]  ;;  %v290_v6 = vld [vmem:[%s2571_s26 + $0x458] sm:$0xff] }
  0x36   : > { %287 = vst [vmem:[%s2576_s27 + $0x220] sm:$0xff] %v286_v4  ;;  %v292_v7 = vld [vmem:[%s2571_s26 + $0x460] sm:$0xff]  ;;  %289 = vst [vmem:[%s2576_s27 + $0x228] sm:$0xff] %v288_v5  ;;  %v296_v9 = vld [vmem:[%s2571_s26 + $0x488] sm:$0xff] }
  0x37   : > { %291 = vst [vmem:[%s2576_s27 + $0x230] sm:$0xff] %v290_v6  ;;  %293 = vst [vmem:[%s2576_s27 + $0x238] sm:$0xff] %v292_v7  ;;  %v294_v8 = vld [vmem:[%s2571_s26 + $0x480] sm:$0xff]  ;;  %v298_v10 = vld [vmem:[%s2571_s26 + $0x490] sm:$0xff] }
  0x38   : > { %295 = vst [vmem:[%s2576_s27 + $0x240] sm:$0xff] %v294_v8  ;;  %297 = vst [vmem:[%s2576_s27 + $0x248] sm:$0xff] %v296_v9  ;;  %v300_v11 = vld [vmem:[%s2571_s26 + $0x4b0] sm:$0xff]  ;;  %v302_v12 = vld [vmem:[%s2571_s26 + $0x4b8] sm:$0xff] }
  0x39   : > { %299 = vst [vmem:[%s2576_s27 + $0x250] sm:$0xff] %v298_v10  ;;  %v304_v13 = vld [vmem:[%s2571_s26 + $0x4c0] sm:$0xff]  ;;  %301 = vst [vmem:[%s2576_s27 + $0x258] sm:$0xff] %v300_v11  ;;  %v308_v15 = vld [vmem:[%s2571_s26 + $0x4e8] sm:$0xff] }
  0x3a   : > { %303 = vst [vmem:[%s2576_s27 + $0x260] sm:$0xff] %v302_v12  ;;  %305 = vst [vmem:[%s2576_s27 + $0x268] sm:$0xff] %v304_v13  ;;  %v306_v14 = vld [vmem:[%s2571_s26 + $0x4e0] sm:$0xff]  ;;  %v310_v16 = vld [vmem:[%s2571_s26 + $0x4f0] sm:$0xff] }
  0x3b   : > { %307 = vst [vmem:[%s2576_s27 + $0x270] sm:$0xff] %v306_v14  ;;  %309 = vst [vmem:[%s2576_s27 + $0x278] sm:$0xff] %v308_v15  ;;  %v312_v17 = vld [vmem:[%s2571_s26 + $0x510] sm:$0xff]  ;;  %v314_v18 = vld [vmem:[%s2571_s26 + $0x518] sm:$0xff] }
  0x3c   : > { %311 = vst [vmem:[%s2576_s27 + $0x280] sm:$0xff] %v310_v16  ;;  %v316_v19 = vld [vmem:[%s2571_s26 + $0x520] sm:$0xff]  ;;  %313 = vst [vmem:[%s2576_s27 + $0x288] sm:$0xff] %v312_v17  ;;  %v320_v21 = vld [vmem:[%s2571_s26 + $0x548] sm:$0xff] }
  0x3d   : > { %315 = vst [vmem:[%s2576_s27 + $0x290] sm:$0xff] %v314_v18  ;;  %317 = vst [vmem:[%s2576_s27 + $0x298] sm:$0xff] %v316_v19  ;;  %v318_v20 = vld [vmem:[%s2571_s26 + $0x540] sm:$0xff]  ;;  %v322_v22 = vld [vmem:[%s2571_s26 + $0x550] sm:$0xff] }
  0x3e   : > { %319 = vst [vmem:[%s2576_s27 + $0x2a0] sm:$0xff] %v318_v20  ;;  %321 = vst [vmem:[%s2576_s27 + $0x2a8] sm:$0xff] %v320_v21  ;;  %v324_v23 = vld [vmem:[%s2571_s26 + $0x570] sm:$0xff]  ;;  %v326_v24 = vld [vmem:[%s2571_s26 + $0x578] sm:$0xff] }
  0x3f   : > { %323 = vst [vmem:[%s2576_s27 + $0x2b0] sm:$0xff] %v322_v22  ;;  %v328_v25 = vld [vmem:[%s2571_s26 + $0x580] sm:$0xff]  ;;  %325 = vst [vmem:[%s2576_s27 + $0x2b8] sm:$0xff] %v324_v23  ;;  %v332_v27 = vld [vmem:[%s2571_s26 + $0x5a8] sm:$0xff] }
  0x40   : > { %327 = vst [vmem:[%s2576_s27 + $0x2c0] sm:$0xff] %v326_v24  ;;  %329 = vst [vmem:[%s2576_s27 + $0x2c8] sm:$0xff] %v328_v25  ;;  %v330_v26 = vld [vmem:[%s2571_s26 + $0x5a0] sm:$0xff]  ;;  %v334_v28 = vld [vmem:[%s2571_s26 + $0x5b0] sm:$0xff] }
  0x41   : > { %331 = vst [vmem:[%s2576_s27 + $0x2d0] sm:$0xff] %v330_v26  ;;  %333 = vst [vmem:[%s2576_s27 + $0x2d8] sm:$0xff] %v332_v27  ;;  %v336_v29 = vld [vmem:[%s2571_s26 + $0x5d0] sm:$0xff]  ;;  %v338_v30 = vld [vmem:[%s2571_s26 + $0x5d8] sm:$0xff] }
  0x42   : > { %335 = vst [vmem:[%s2576_s27 + $0x2e0] sm:$0xff] %v334_v28  ;;  %v340_v31 = vld [vmem:[%s2571_s26 + $0x5e0] sm:$0xff]  ;;  %337 = vst [vmem:[%s2576_s27 + $0x2e8] sm:$0xff] %v336_v29  ;;  %v344_v33 = vld [vmem:[%s2571_s26 + $0x608] sm:$0xff] }
  0x43   : > { %339 = vst [vmem:[%s2576_s27 + $0x2f0] sm:$0xff] %v338_v30  ;;  %341 = vst [vmem:[%s2576_s27 + $0x2f8] sm:$0xff] %v340_v31  ;;  %v342_v32 = vld [vmem:[%s2571_s26 + $0x600] sm:$0xff]  ;;  %v346_v34 = vld [vmem:[%s2571_s26 + $0x610] sm:$0xff] }
  0x44   : > { %343 = vst [vmem:[%s2576_s27 + $0x300] sm:$0xff] %v342_v32  ;;  %345 = vst [vmem:[%s2576_s27 + $0x308] sm:$0xff] %v344_v33  ;;  %v348_v35 = vld [vmem:[%s2571_s26 + $0x630] sm:$0xff]  ;;  %v350_v36 = vld [vmem:[%s2571_s26 + $0x638] sm:$0xff] }
  0x45   : > { %347 = vst [vmem:[%s2576_s27 + $0x310] sm:$0xff] %v346_v34  ;;  %v352_v37 = vld [vmem:[%s2571_s26 + $0x640] sm:$0xff]  ;;  %349 = vst [vmem:[%s2576_s27 + $0x318] sm:$0xff] %v348_v35  ;;  %v356_v39 = vld [vmem:[%s2571_s26 + $0x668] sm:$0xff] }
  0x46   : > { %351 = vst [vmem:[%s2576_s27 + $0x320] sm:$0xff] %v350_v36  ;;  %353 = vst [vmem:[%s2576_s27 + $0x328] sm:$0xff] %v352_v37  ;;  %v354_v38 = vld [vmem:[%s2571_s26 + $0x660] sm:$0xff]  ;;  %v358_v40 = vld [vmem:[%s2571_s26 + $0x670] sm:$0xff] }
  0x47   : > { %355 = vst [vmem:[%s2576_s27 + $0x330] sm:$0xff] %v354_v38  ;;  %357 = vst [vmem:[%s2576_s27 + $0x338] sm:$0xff] %v356_v39  ;;  %v360_v41 = vld [vmem:[%s2571_s26 + $0x690] sm:$0xff]  ;;  %v362_v42 = vld [vmem:[%s2571_s26 + $0x698] sm:$0xff] }
  0x48   : > { %359 = vst [vmem:[%s2576_s27 + $0x340] sm:$0xff] %v358_v40  ;;  %v364_v43 = vld [vmem:[%s2571_s26 + $0x6a0] sm:$0xff]  ;;  %361 = vst [vmem:[%s2576_s27 + $0x348] sm:$0xff] %v360_v41  ;;  %v368_v45 = vld [vmem:[%s2571_s26 + $0x6c8] sm:$0xff] }
  0x49   : > { %363 = vst [vmem:[%s2576_s27 + $0x350] sm:$0xff] %v362_v42  ;;  %365 = vst [vmem:[%s2576_s27 + $0x358] sm:$0xff] %v364_v43  ;;  %v366_v44 = vld [vmem:[%s2571_s26 + $0x6c0] sm:$0xff]  ;;  %v370_v46 = vld [vmem:[%s2571_s26 + $0x6d0] sm:$0xff] }
  0x4a   : > { %367 = vst [vmem:[%s2576_s27 + $0x360] sm:$0xff] %v366_v44  ;;  %369 = vst [vmem:[%s2576_s27 + $0x368] sm:$0xff] %v368_v45  ;;  %v372_v47 = vld [vmem:[%s2571_s26 + $0x6f0] sm:$0xff]  ;;  %v374_v48 = vld [vmem:[%s2571_s26 + $0x6f8] sm:$0xff] }
  0x4b   : > { %371 = vst [vmem:[%s2576_s27 + $0x370] sm:$0xff] %v370_v46  ;;  %v376_v49 = vld [vmem:[%s2571_s26 + $0x700] sm:$0xff]  ;;  %373 = vst [vmem:[%s2576_s27 + $0x378] sm:$0xff] %v372_v47  ;;  %v380_v51 = vld [vmem:[%s2571_s26 + $0x728] sm:$0xff] }
  0x4c   : > { %375 = vst [vmem:[%s2576_s27 + $0x380] sm:$0xff] %v374_v48  ;;  %377 = vst [vmem:[%s2576_s27 + $0x388] sm:$0xff] %v376_v49  ;;  %v378_v50 = vld [vmem:[%s2571_s26 + $0x720] sm:$0xff]  ;;  %v382_v52 = vld [vmem:[%s2571_s26 + $0x730] sm:$0xff] }
  0x4d   : > { %379 = vst [vmem:[%s2576_s27 + $0x390] sm:$0xff] %v378_v50  ;;  %381 = vst [vmem:[%s2576_s27 + $0x398] sm:$0xff] %v380_v51  ;;  %v384_v53 = vld [vmem:[%s2571_s26 + $0x750] sm:$0xff]  ;;  %v386_v54 = vld [vmem:[%s2571_s26 + $0x758] sm:$0xff] }
  0x4e   : > { %383 = vst [vmem:[%s2576_s27 + $0x3a0] sm:$0xff] %v382_v52  ;;  %v388_v55 = vld [vmem:[%s2571_s26 + $0x760] sm:$0xff]  ;;  %385 = vst [vmem:[%s2576_s27 + $0x3a8] sm:$0xff] %v384_v53  ;;  %v392_v57 = vld [vmem:[%s2571_s26 + $0x788] sm:$0xff] }
  0x4f   : > { %387 = vst [vmem:[%s2576_s27 + $0x3b0] sm:$0xff] %v386_v54  ;;  %389 = vst [vmem:[%s2576_s27 + $0x3b8] sm:$0xff] %v388_v55  ;;  %v390_v56 = vld [vmem:[%s2571_s26 + $0x780] sm:$0xff]  ;;  %v394_v58 = vld [vmem:[%s2571_s26 + $0x790] sm:$0xff] }
  0x50   : > { %391 = vst [vmem:[%s2576_s27 + $0x3c0] sm:$0xff] %v390_v56  ;;  %393 = vst [vmem:[%s2576_s27 + $0x3c8] sm:$0xff] %v392_v57  ;;  %v396_v59 = vld [vmem:[%s2571_s26 + $0x7b0] sm:$0xff]  ;;  %v398_v60 = vld [vmem:[%s2571_s26 + $0x7b8] sm:$0xff] }
  0x51   : > { %395 = vst [vmem:[%s2576_s27 + $0x3d0] sm:$0xff] %v394_v58  ;;  %v400_v61 = vld [vmem:[%s2571_s26 + $0x7c0] sm:$0xff]  ;;  %397 = vst [vmem:[%s2576_s27 + $0x3d8] sm:$0xff] %v396_v59  ;;  %v404_v63 = vld [vmem:[%s2571_s26 + $0x7e8] sm:$0xff] }
  0x52   : > { %399 = vst [vmem:[%s2576_s27 + $0x3e0] sm:$0xff] %v398_v60  ;;  %401 = vst [vmem:[%s2576_s27 + $0x3e8] sm:$0xff] %v400_v61  ;;  %v402_v62 = vld [vmem:[%s2571_s26 + $0x7e0] sm:$0xff]  ;;  %v406_v0 = vld [vmem:[%s2571_s26 + $0x7f0] sm:$0xff] }
  0x53   : > { %403 = vst [vmem:[%s2576_s27 + $0x3f0] sm:$0xff] %v402_v62  ;;  %405 = vst [vmem:[%s2576_s27 + $0x3f8] sm:$0xff] %v404_v63  ;;  %v408_v1 = vld [vmem:[%s2571_s26 + $0x810] sm:$0xff]  ;;  %v410_v2 = vld [vmem:[%s2571_s26 + $0x818] sm:$0xff] }
  0x54   : > { %407 = vst [vmem:[%s2576_s27 + $0x400] sm:$0xff] %v406_v0  ;;  %v412_v3 = vld [vmem:[%s2571_s26 + $0x820] sm:$0xff]  ;;  %409 = vst [vmem:[%s2576_s27 + $0x408] sm:$0xff] %v408_v1  ;;  %v416_v5 = vld [vmem:[%s2571_s26 + $0x848] sm:$0xff] }
  0x55   : > { %411 = vst [vmem:[%s2576_s27 + $0x410] sm:$0xff] %v410_v2  ;;  %413 = vst [vmem:[%s2576_s27 + $0x418] sm:$0xff] %v412_v3  ;;  %v414_v4 = vld [vmem:[%s2571_s26 + $0x840] sm:$0xff]  ;;  %v418_v6 = vld [vmem:[%s2571_s26 + $0x850] sm:$0xff] }
  0x56   : > { %415 = vst [vmem:[%s2576_s27 + $0x420] sm:$0xff] %v414_v4  ;;  %417 = vst [vmem:[%s2576_s27 + $0x428] sm:$0xff] %v416_v5  ;;  %v420_v7 = vld [vmem:[%s2571_s26 + $0x870] sm:$0xff]  ;;  %v422_v8 = vld [vmem:[%s2571_s26 + $0x878] sm:$0xff] }
  0x57   : > { %419 = vst [vmem:[%s2576_s27 + $0x430] sm:$0xff] %v418_v6  ;;  %v424_v9 = vld [vmem:[%s2571_s26 + $0x880] sm:$0xff]  ;;  %421 = vst [vmem:[%s2576_s27 + $0x438] sm:$0xff] %v420_v7  ;;  %v428_v11 = vld [vmem:[%s2571_s26 + $0x8a8] sm:$0xff] }
  0x58   : > { %423 = vst [vmem:[%s2576_s27 + $0x440] sm:$0xff] %v422_v8  ;;  %425 = vst [vmem:[%s2576_s27 + $0x448] sm:$0xff] %v424_v9  ;;  %v426_v10 = vld [vmem:[%s2571_s26 + $0x8a0] sm:$0xff]  ;;  %v430_v12 = vld [vmem:[%s2571_s26 + $0x8b0] sm:$0xff] }
  0x59   : > { %427 = vst [vmem:[%s2576_s27 + $0x450] sm:$0xff] %v426_v10  ;;  %429 = vst [vmem:[%s2576_s27 + $0x458] sm:$0xff] %v428_v11  ;;  %v432_v13 = vld [vmem:[%s2571_s26 + $0x8d0] sm:$0xff]  ;;  %v434_v14 = vld [vmem:[%s2571_s26 + $0x8d8] sm:$0xff] }
  0x5a   : > { %431 = vst [vmem:[%s2576_s27 + $0x460] sm:$0xff] %v430_v12  ;;  %v436_v15 = vld [vmem:[%s2571_s26 + $0x8e0] sm:$0xff]  ;;  %433 = vst [vmem:[%s2576_s27 + $0x468] sm:$0xff] %v432_v13  ;;  %v440_v17 = vld [vmem:[%s2571_s26 + $0x908] sm:$0xff] }
  0x5b   : > { %435 = vst [vmem:[%s2576_s27 + $0x470] sm:$0xff] %v434_v14  ;;  %437 = vst [vmem:[%s2576_s27 + $0x478] sm:$0xff] %v436_v15  ;;  %v438_v16 = vld [vmem:[%s2571_s26 + $0x900] sm:$0xff]  ;;  %v442_v18 = vld [vmem:[%s2571_s26 + $0x910] sm:$0xff] }
  0x5c   : > { %439 = vst [vmem:[%s2576_s27 + $0x480] sm:$0xff] %v438_v16  ;;  %441 = vst [vmem:[%s2576_s27 + $0x488] sm:$0xff] %v440_v17  ;;  %v444_v19 = vld [vmem:[%s2571_s26 + $0x930] sm:$0xff]  ;;  %v446_v20 = vld [vmem:[%s2571_s26 + $0x938] sm:$0xff] }
  0x5d   : > { %443 = vst [vmem:[%s2576_s27 + $0x490] sm:$0xff] %v442_v18  ;;  %v448_v21 = vld [vmem:[%s2571_s26 + $0x940] sm:$0xff]  ;;  %445 = vst [vmem:[%s2576_s27 + $0x498] sm:$0xff] %v444_v19 }
  0x5e   : > { %447 = vst [vmem:[%s2576_s27 + $0x4a0] sm:$0xff] %v446_v20  ;;  %449 = vst [vmem:[%s2576_s27 + $0x4a8] sm:$0xff] %v448_v21 }
  0x5f PF: > { %p2023_p7 = scmp.ge.s32.totalorder %s2507_s14, 1  ;;  %p454_p8 = scmp.lt.s32.totalorder %s2507_s14, 3 }
  0x61   : > { %p455_p9 = pnand %p2023_p7, %p454_p8 }
  0x62   : > { %s461_s28 = sand.u32 (!%p455_p9), 1, %s2499_s12  }
  0x63   : > { %458 = sbr.rel (%p455_p9) target bundleno = 492 (0x1ec), region = 51 }
  0x64   : > { %s2218_s4 = smul.u32 (!%p455_p9), 1200, %s461_s28 }
  0x65   : > { %s2219_s10 = smul.u32 (!%p455_p9), 96, %s461_s28 }
  0x66   : > { %s2892_s7 = scalar_lea.vmem (!%p455_p9), [#allocation2], %s2218_s4 }
  0x67   : > { %s3127_s12 = scalar_lea.vmem (!%p455_p9), [#allocation3], %s2219_s10 }
  0x68   : > { %v2881_v22 = vld [vmem:[%s3215_s0 + $0xc] ss:$16 sps:$4 sm:$0xff]   ;;  %vm1432_vm0 = vcmask 130048   ;;  %v2890_v23 = vld [vmem:[%s3215_s0 + $0x4] ss:$16 sps:$4 sm:$0xff]   ;;  %v2509_v38 = vmov 0  }
  0x69   : > { %2182 = vmatprep.mubr.msk.bf16.mxu1 %vm1432_vm0, %v2881_v22  ;;  %v2248_v24 = vld [vmem:[%s2892_s7 + $0x154] ss:$24 sps:$4 sm:$0xff]   ;;  %1471 = vmatprep.mubr.bf16.mxu0 %v2890_v23  ;;  %v2252_v26 = vld [vmem:[%s2892_s7 + $0x150] ss:$24 sps:$4 sm:$0xff]   ;;  %v2254_v28 = vld [vmem:[%s2892_s7 + $0x124] ss:$24 sps:$4 sm:$0xff]  }
  0x6a   : > { %v2250_v25 = vld [vmem:[%s2892_s7 + $0x454] ss:$24 sps:$4 sm:$0xff]   ;;  %1439 = vmatprep.subr.bf16.mxu0 %v2248_v24  ;;  %v2253_v27 = vld [vmem:[%s2892_s7 + $0x450] ss:$24 sps:$4 sm:$0xff]   ;;  %v2256_v29 = vld [vmem:[%s2892_s7 + $0x424] ss:$24 sps:$4 sm:$0xff]   ;;  %2246 = vset.pattern.permute.xlu0 %v2509_v38 }
  0x6b   : > { %1492 = vmatprep.subr.bf16.mxu1 %v2250_v25  ;;  %1440 = vmatpush1.bf16.msra.mxu0 %v2252_v26  ;;  %v2258_v30 = vld [vmem:[%s2892_s7 + $0x120] ss:$24 sps:$4 sm:$0xff]   ;;  %v2260_v32 = vld [vmem:[%s2892_s7 + $0xf4] ss:$24 sps:$4 sm:$0xff]   ;;  %v2264_v34 = vld [vmem:[%s2892_s7 + $0xf0] ss:$24 sps:$4 sm:$0xff]  }
  0x6c   : > { %1493 = vmatpush1.bf16.msra.mxu1 %v2253_v27  ;;  %1441 = vmatprep.subr.bf16.mxu0 %v2254_v28  ;;  %v2259_v31 = vld [vmem:[%s2892_s7 + $0x420] ss:$24 sps:$4 sm:$0xff]   ;;  %v2262_v33 = vld [vmem:[%s2892_s7 + $0x3f4] ss:$24 sps:$4 sm:$0xff]   ;;  %v2265_v35 = vld [vmem:[%s2892_s7 + $0x3f0] ss:$24 sps:$4 sm:$0xff]  }
  0x6d   : > { %1494 = vmatprep.subr.bf16.mxu1 %v2256_v29  ;;  %v2266_v36 = vld [vmem:[%s2892_s7 + $0xc4] ss:$24 sps:$4 sm:$0xff]   ;;  %2247 = vset.pattern.permute.xlu1 %v2509_v38  ;;  %v2270_v39 = vld [vmem:[%s2892_s7 + $0xc0] ss:$24 sps:$4 sm:$0xff]   ;;  %v2272_v41 = vld [vmem:[%s2892_s7 + $0x94] ss:$24 sps:$4 sm:$0xff]  }
  0x6e   : > { %v2268_v37 = vld [vmem:[%s2892_s7 + $0x3c4] ss:$24 sps:$4 sm:$0xff]   ;;  %v2271_v40 = vld [vmem:[%s2892_s7 + $0x3c0] ss:$24 sps:$4 sm:$0xff]   ;;  %v2274_v42 = vld [vmem:[%s2892_s7 + $0x394] ss:$24 sps:$4 sm:$0xff]  }
  0x6f   : > { %1442 = vmatpush1.bf16.msra.mxu0 %v2258_v30  ;;  %v2276_v43 = vld [vmem:[%s2892_s7 + $0x90] ss:$24 sps:$4 sm:$0xff]   ;;  %v2278_v45 = vld [vmem:[%s2892_s7 + $0x64] ss:$24 sps:$4 sm:$0xff]   ;;  %v2282_v47 = vld [vmem:[%s2892_s7 + $0x60] ss:$24 sps:$4 sm:$0xff]  }
  0x70   : > { %1495 = vmatpush1.bf16.msra.mxu1 %v2259_v31  ;;  %1443 = vmatprep.subr.bf16.mxu0 %v2260_v32  ;;  %v2277_v44 = vld [vmem:[%s2892_s7 + $0x390] ss:$24 sps:$4 sm:$0xff]   ;;  %v2280_v46 = vld [vmem:[%s2892_s7 + $0x364] ss:$24 sps:$4 sm:$0xff]   ;;  %v2283_v48 = vld [vmem:[%s2892_s7 + $0x360] ss:$24 sps:$4 sm:$0xff]  }
  0x71   : > { %1496 = vmatprep.subr.bf16.mxu1 %v2262_v33  ;;  %v2284_v49 = vld [vmem:[%s2892_s7 + $0x34] ss:$24 sps:$4 sm:$0xff]   ;;  %v2288_v51 = vld [vmem:[%s2892_s7 + $0x30] ss:$24 sps:$4 sm:$0xff]   ;;  %v2290_v53 = vld [vmem:[%s2892_s7 + $0x4] ss:$24 sps:$4 sm:$0xff]  }
  0x72   : > { %v2286_v50 = vld [vmem:[%s2892_s7 + $0x334] ss:$24 sps:$4 sm:$0xff]   ;;  %v2289_v52 = vld [vmem:[%s2892_s7 + $0x330] ss:$24 sps:$4 sm:$0xff]   ;;  %v2292_v54 = vld [vmem:[%s2892_s7 + $0x304] ss:$24 sps:$4 sm:$0xff]  }
  0x73   : > { %1444 = vmatpush1.bf16.msra.mxu0 %v2264_v34  ;;  %v2294_v55 = vld [vmem:[%s2892_s7] ss:$24 sps:$4 sm:$0xff]   ;;  %v2296_v57 = vld [vmem:[%s2892_s7 + $0x2d4] ss:$24 sps:$4 sm:$0xff]   ;;  %v2298_v58 = vld [vmem:[%s2892_s7 + $0x484] ss:$24 sps:$4 sm:$0xff]  }
  0x74   : > { %1497 = vmatpush1.bf16.msra.mxu1 %v2265_v35  ;;  %1445 = vmatprep.subr.bf16.mxu0 %v2266_v36  ;;  %v2295_v56 = vld [vmem:[%s2892_s7 + $0x300] ss:$24 sps:$4 sm:$0xff]   ;;  %v2300_v59 = vld [vmem:[%s2892_s7 + $0x2d0] ss:$24 sps:$4 sm:$0xff]   ;;  %v2302_v61 = vld [vmem:[%s2892_s7 + $0x2a4] ss:$24 sps:$4 sm:$0xff]  }
  0x75   : > { %1498 = vmatprep.subr.bf16.mxu1 %v2268_v37  ;;  %v2301_v60 = vld [vmem:[%s2892_s7 + $0x480] ss:$24 sps:$4 sm:$0xff]   ;;  %v2308_v62 = vld [vmem:[%s2892_s7 + $0x15c] ss:$24 sps:$4 sm:$0xff]   ;;  %v2315_v3 = vld [vmem:[%s2892_s7 + $0x12c] ss:$24 sps:$4 sm:$0xff]  }
  0x76   : > { %v2936_v63 = vld [vmem:[%s3215_s0 + $0x8] ss:$16 sps:$4 sm:$0xff]   ;;  %v2311_v2 = vld [vmem:[%s2892_s7 + $0x274] ss:$24 sps:$4 sm:$0xff]   ;;  %v2317_v6 = vld [vmem:[%s2892_s7 + $0x244] ss:$24 sps:$4 sm:$0xff]  }
  0x77   : > { %1446 = vmatpush1.bf16.msra.mxu0 %v2270_v39  ;;  %v2306_v0 = vld [vmem:[%s2892_s7 + $0x158] ss:$24 sps:$4 sm:$0xff]   ;;  %v2313_v4 = vld [vmem:[%s2892_s7 + $0x128] ss:$24 sps:$4 sm:$0xff]   ;;  %v2321_v7 = vld [vmem:[%s2892_s7 + $0xfc] ss:$24 sps:$4 sm:$0xff]  }
  0x78   : > { %1499 = vmatpush1.bf16.msra.mxu1 %v2271_v40  ;;  %1447 = vmatprep.subr.bf16.mxu0 %v2272_v41  ;;  %v2309_v1 = vld [vmem:[%s2892_s7 + $0x2a0] ss:$24 sps:$4 sm:$0xff]   ;;  %v2316_v5 = vld [vmem:[%s2892_s7 + $0x270] ss:$24 sps:$4 sm:$0xff]   ;;  %v2323_v10 = vld [vmem:[%s2892_s7 + $0x214] ss:$24 sps:$4 sm:$0xff]  }
  0x79   : > { %1500 = vmatprep.subr.bf16.mxu1 %v2274_v42  ;;  %v2319_v8 = vld [vmem:[%s2892_s7 + $0xf8] ss:$24 sps:$4 sm:$0xff]   ;;  %v2327_v11 = vld [vmem:[%s2892_s7 + $0xcc] ss:$24 sps:$4 sm:$0xff]   ;;  %v2325_v12 = vld [vmem:[%s2892_s7 + $0xc8] ss:$24 sps:$4 sm:$0xff]  }
  0x7a   : > { %v2322_v9 = vld [vmem:[%s2892_s7 + $0x240] ss:$24 sps:$4 sm:$0xff]   ;;  %v2328_v13 = vld [vmem:[%s2892_s7 + $0x210] ss:$24 sps:$4 sm:$0xff]   ;;  %v2329_v14 = vld [vmem:[%s2892_s7 + $0x1e4] ss:$24 sps:$4 sm:$0xff]  }
  0x7b   : > { %1448 = vmatpush1.bf16.msra.mxu0 %v2276_v43  ;;  %v2333_v15 = vld [vmem:[%s2892_s7 + $0x9c] ss:$24 sps:$4 sm:$0xff]   ;;  %v2331_v16 = vld [vmem:[%s2892_s7 + $0x98] ss:$24 sps:$4 sm:$0xff]   ;;  %v2339_v19 = vld [vmem:[%s2892_s7 + $0x6c] ss:$24 sps:$4 sm:$0xff]  }
  0x7c   : > { %1501 = vmatpush1.bf16.msra.mxu1 %v2277_v44  ;;  %1449 = vmatprep.subr.bf16.mxu0 %v2278_v45  ;;  %v2334_v17 = vld [vmem:[%s2892_s7 + $0x1e0] ss:$24 sps:$4 sm:$0xff]   ;;  %v2335_v18 = vld [vmem:[%s2892_s7 + $0x1b4] ss:$24 sps:$4 sm:$0xff]   ;;  %v2340_v21 = vld [vmem:[%s2892_s7 + $0x1b0] ss:$24 sps:$4 sm:$0xff]  }
  0x7d   : > { %1502 = vmatprep.subr.bf16.mxu1 %v2280_v46  ;;  %v2337_v20 = vld [vmem:[%s2892_s7 + $0x68] ss:$24 sps:$4 sm:$0xff]   ;;  %v2341_v24 = vld [vmem:[%s2892_s7 + $0x184] ss:$24 sps:$4 sm:$0xff]   ;;  %v2343_v26 = vld [vmem:[%s2892_s7 + $0x38] ss:$24 sps:$4 sm:$0xff]  }
  0x7e   : > { %v2345_v25 = vld [vmem:[%s2892_s7 + $0x3c] ss:$24 sps:$4 sm:$0xff]   ;;  %v2346_v27 = vld [vmem:[%s2892_s7 + $0x180] ss:$24 sps:$4 sm:$0xff]   ;;  %v2352_v30 = vld [vmem:[%s2892_s7 + $0xc] ss:$24 sps:$4 sm:$0xff]  }
  0x7f   : > { %1450 = vmatpush1.bf16.msra.mxu0 %v2282_v47  ;;  %v2968_v28 = vld [vmem:[%s3215_s0 + $0x2c] ss:$16 sps:$4 sm:$0xff]   ;;  %v2973_v29 = vld [vmem:[%s3215_s0 + $0x28] ss:$16 sps:$4 sm:$0xff]   ;;  %v2980_v32 = vld [vmem:[%s3215_s0] ss:$16 sps:$4 sm:$0xff]  }
  0x80   : > { %1503 = vmatpush1.bf16.msra.mxu1 %v2283_v48  ;;  %1451 = vmatprep.subr.bf16.mxu0 %v2284_v49  ;;  %v2355_v31 = vld [vmem:[%s2892_s7 + $0x45c] ss:$24 sps:$4 sm:$0xff]   ;;  %v2350_v33 = vld [vmem:[%s2892_s7 + $0x8] ss:$24 sps:$4 sm:$0xff]   ;;  %v2353_v34 = vld [vmem:[%s2892_s7 + $0x458] ss:$24 sps:$4 sm:$0xff]  }
  0x81   : > { %1504 = vmatprep.subr.bf16.mxu1 %v2286_v50  ;;  %v2358_v35 = vld [vmem:[%s2892_s7 + $0x2dc] ss:$24 sps:$4 sm:$0xff]   ;;  %v2361_v36 = vld [vmem:[%s2892_s7 + $0x42c] ss:$24 sps:$4 sm:$0xff]   ;;  %v2356_v38 = vld [vmem:[%s2892_s7 + $0x2d8] ss:$24 sps:$4 sm:$0xff]  }
  0x82   : > { %v2992_v37 = vld [vmem:[%s3215_s0 + $0x24] ss:$16 sps:$4 sm:$0xff]   ;;  %v2359_v39 = vld [vmem:[%s2892_s7 + $0x428] ss:$24 sps:$4 sm:$0xff]   ;;  %v2365_v43 = vld [vmem:[%s2892_s7 + $0x3f8] ss:$24 sps:$4 sm:$0xff]  }
  0x83   : > { %1452 = vmatpush1.bf16.msra.mxu0 %v2288_v51  ;;  %v2364_v40 = vld [vmem:[%s2892_s7 + $0x2ac] ss:$24 sps:$4 sm:$0xff]   ;;  %v2367_v41 = vld [vmem:[%s2892_s7 + $0x3fc] ss:$24 sps:$4 sm:$0xff]   ;;  %v2362_v42 = vld [vmem:[%s2892_s7 + $0x2a8] ss:$24 sps:$4 sm:$0xff]  }
  0x84   : > { %1505 = vmatpush1.bf16.msra.mxu1 %v2289_v52  ;;  %1453 = vmatprep.subr.bf16.mxu0 %v2290_v53  ;;  %v3006_v44 = vld [vmem:[%s3215_s0 + $0x20] ss:$16 sps:$4 sm:$0xff]   ;;  %v2370_v45 = vld [vmem:[%s2892_s7 + $0x27c] ss:$24 sps:$4 sm:$0xff]   ;;  %v2373_v46 = vld [vmem:[%s2892_s7 + $0x3cc] ss:$24 sps:$4 sm:$0xff]  }
  0x85   : > { %1506 = vmatprep.subr.bf16.mxu1 %v2292_v54  ;;  %v2368_v47 = vld [vmem:[%s2892_s7 + $0x278] ss:$24 sps:$4 sm:$0xff]   ;;  %v2371_v48 = vld [vmem:[%s2892_s7 + $0x3c8] ss:$24 sps:$4 sm:$0xff]   ;;  %v2376_v49 = vld [vmem:[%s2892_s7 + $0x24c] ss:$24 sps:$4 sm:$0xff]  }
  0x86   : > { %v2379_v50 = vld [vmem:[%s2892_s7 + $0x39c] ss:$24 sps:$4 sm:$0xff]   ;;  %v2374_v51 = vld [vmem:[%s2892_s7 + $0x248] ss:$24 sps:$4 sm:$0xff]   ;;  %v2377_v52 = vld [vmem:[%s2892_s7 + $0x398] ss:$24 sps:$4 sm:$0xff]  }
  0x87   : > { %1454 = vmatpush1.bf16.msra.mxu0 %v2294_v55  ;;  %v2382_v53 = vld [vmem:[%s2892_s7 + $0x21c] ss:$24 sps:$4 sm:$0xff]   ;;  %v2385_v54 = vld [vmem:[%s2892_s7 + $0x36c] ss:$24 sps:$4 sm:$0xff]   ;;  %v2380_v55 = vld [vmem:[%s2892_s7 + $0x218] ss:$24 sps:$4 sm:$0xff]  }
  0x88   : > { %1507 = vmatpush1.bf16.msra.mxu1 %v2295_v56  ;;  %1455 = vmatprep.subr.bf16.mxu0 %v2296_v57  ;;  %v2383_v56 = vld [vmem:[%s2892_s7 + $0x368] ss:$24 sps:$4 sm:$0xff]   ;;  %v2394_v57 = vld [vmem:[%s2892_s7 + $0x1ec] ss:$24 sps:$4 sm:$0xff]   ;;  %s2216_s28 = smul.u32 (%p2561_p5), 24, %s2018_s15 }
  0x89   : > { %1522 = vmatprep.subr.bf16.mxu1 %v2298_v58  ;;  %v2397_v58 = vld [vmem:[%s2892_s7 + $0x33c] ss:$24 sps:$4 sm:$0xff]  }
  0x8b   : > { %1456 = vmatpush2.bf16.msra.mxu0 %v2300_v59  ;;  %v1757_v59 = vld [vmem:[%s3217_s2] sm:$0xff] }
  0x8c   : > { %1523 = vmatpush2.bf16.msra.mxu1 %v2301_v60  ;;  %1457 = vmatprep.subr.bf16.mxu0 %v2302_v61  ;;  %v2392_v60 = vld [vmem:[%s2892_s7 + $0x1e8] ss:$24 sps:$4 sm:$0xff]   ;;  %v2395_v61 = vld [vmem:[%s2892_s7 + $0x338] ss:$24 sps:$4 sm:$0xff]  }
  0x8d   : > { %1545 = vmatprep.subr.bf16.mxu1 %v2308_v62  ;;  %1763 = vperm.xlu0 %2246, %v1757_v59   ;;  %v1758_v62 = vld [vmem:[%s3217_s2 + $0x8] sm:$0xff] }
  0x8e   : > { %v2473_v59 = vld [vmem:[%s2892_s7 + $0x1f0] ss:$24 sps:$4 sm:$0xff]  }
  0x8f   : > { %1525 = vmatmul.mubr.bf16.vlgmr.msra.gmra.mxu1 %v2936_v63  ;;  %1458 = vmatpush2.bf16.msra.mxu0 %v2309_v1  ;;  %v2403_v1 = vld [vmem:[%s2892_s7 + $0x30c] ss:$24 sps:$4 sm:$0xff]  }
  0x90   : > { %1546 = vmatpush1.bf16.msra.mxu1 %v2306_v0  ;;  %1459 = vmatprep.subr.bf16.mxu0 %v2311_v2  ;;  %v2400_v0 = vld [vmem:[%s2892_s7 + $0x1bc] ss:$24 sps:$4 sm:$0xff]   ;;  %v2398_v2 = vld [vmem:[%s2892_s7 + $0x1b8] ss:$24 sps:$4 sm:$0xff]  }
  0x91   : > { %1547 = vmatprep.subr.bf16.mxu1 %v2315_v3  ;;  %2183 = vmatprep.mubr.msk.bf16.mxu1 %vm1432_vm0, %v2968_v28  ;;  %v2401_v3 = vld [vmem:[%s2892_s7 + $0x308] ss:$24 sps:$4 sm:$0xff]  }
  0x92   : > { %1768 = vperm.xlu0 %2246, %v1758_v62   ;;  %v2482_v62 = vld [vmem:[%s2892_s7 + $0x190] ss:$24 sps:$4 sm:$0xff]  }
  0x93   : > { %1460 = vmatpush2.bf16.msra.mxu0 %v2316_v5  ;;  %v2409_v5 = vld [vmem:[%s2892_s7 + $0x48c] ss:$24 sps:$4 sm:$0xff]  }
  0x94   : > { %1548 = vmatpush1.bf16.msra.mxu1 %v2313_v4  ;;  %1461 = vmatprep.subr.bf16.mxu0 %v2317_v6  ;;  %v2406_v4 = vld [vmem:[%s2892_s7 + $0x18c] ss:$24 sps:$4 sm:$0xff]   ;;  %v2404_v6 = vld [vmem:[%s2892_s7 + $0x188] ss:$24 sps:$4 sm:$0xff]  }
  0x95   : > { %1549 = vmatprep.subr.bf16.mxu1 %v2321_v7  ;;  %v2407_v7 = vld [vmem:[%s2892_s7 + $0x488] ss:$24 sps:$4 sm:$0xff]  }
  0x97   : > { %1462 = vmatpush2.bf16.msra.mxu0 %v2322_v9  ;;  %1535 = vmatmul.mubr.bf16.gmra.mxu1 %v2973_v29  ;;  %v2430_v9 = vld [vmem:[%s2892_s7 + $0x464] ss:$24 sps:$4 sm:$0xff]  }
  0x98   : > { %1550 = vmatpush1.bf16.msra.mxu1 %v2319_v8  ;;  %1463 = vmatprep.subr.bf16.mxu0 %v2323_v10  ;;  %v2412_v8 = vld [vmem:[%s2892_s7 + $0x164] ss:$24 sps:$4 sm:$0xff]   ;;  %v2410_v10 = vld [vmem:[%s2892_s7 + $0x160] ss:$24 sps:$4 sm:$0xff]  }
  0x99   : > { %1551 = vmatprep.subr.bf16.mxu1 %v2327_v11  ;;  %1577 = vmatprep.mubr.bf16.mxu1 %v2890_v23  ;;  %v2415_v11 = vld [vmem:[%s2892_s7 + $0x134] ss:$24 sps:$4 sm:$0xff]  }
  0x9b   : > { %1464 = vmatpush2.bf16.msra.mxu0 %v2328_v13  ;;  %v1759_v13 = vld [vmem:[%s3217_s2 + $0x10] sm:$0xff] }
  0x9c   : > { %1552 = vmatpush1.bf16.msra.mxu1 %v2325_v12  ;;  %1465 = vmatprep.subr.bf16.mxu0 %v2329_v14  ;;  %v2428_v12 = vld [vmem:[%s2892_s7 + $0x460] ss:$24 sps:$4 sm:$0xff]   ;;  %v2436_v14 = vld [vmem:[%s2892_s7 + $0x434] ss:$24 sps:$4 sm:$0xff]  }
  0x9d   : > { %1553 = vmatprep.subr.bf16.mxu1 %v2333_v15  ;;  %1773 = vperm.xlu1 %2247, %v1759_v13   ;;  %v2413_v15 = vld [vmem:[%s2892_s7 + $0x130] ss:$24 sps:$4 sm:$0xff]  }
  0x9f   : > { %1466 = vmatpush2.bf16.msra.mxu0 %v2334_v17  ;;  %v1760_v17 = vld [vmem:[%s3217_s2 + $0x18] sm:$0xff] }
  0xa0   : > { %1554 = vmatpush1.bf16.msra.mxu1 %v2331_v16  ;;  %1467 = vmatprep.subr.bf16.mxu0 %v2335_v18  ;;  %v2434_v16 = vld [vmem:[%s2892_s7 + $0x430] ss:$24 sps:$4 sm:$0xff]   ;;  %v2418_v18 = vld [vmem:[%s2892_s7 + $0x104] ss:$24 sps:$4 sm:$0xff]  }
  0xa1   : > { %1555 = vmatprep.subr.bf16.mxu1 %v2339_v19  ;;  %v2442_v19 = vld [vmem:[%s2892_s7 + $0x404] ss:$24 sps:$4 sm:$0xff]   ;;  %1778 = vperm.xlu1 %2247, %v1760_v17  }
  0xa3   : > { %1468 = vmatpush2.bf16.msra.mxu0 %v2340_v21  ;;  %v2440_v21 = vld [vmem:[%s2892_s7 + $0x400] ss:$24 sps:$4 sm:$0xff]  }
  0xa4   : > { %1556 = vmatpush1.bf16.msra.mxu1 %v2337_v20  ;;  %1469 = vmatprep.subr.bf16.mxu0 %v2341_v24  ;;  %v2416_v20 = vld [vmem:[%s2892_s7 + $0x100] ss:$24 sps:$4 sm:$0xff]   ;;  %v2421_v24 = vld [vmem:[%s2892_s7 + $0xd4] ss:$24 sps:$4 sm:$0xff]  }
  0xa5   : > { %1557 = vmatprep.subr.bf16.mxu1 %v2345_v25  ;;  %v2448_v25 = vld [vmem:[%s2892_s7 + $0x3d4] ss:$24 sps:$4 sm:$0xff]  }
  0xa7   : > { %1470 = vmatpush2.bf16.msra.mxu0 %v2346_v27  ;;  %v2446_v27 = vld [vmem:[%s2892_s7 + $0x3d0] ss:$24 sps:$4 sm:$0xff]  }
  0xa8   : > { %1558 = vmatpush1.bf16.msra.mxu1 %v2343_v26  ;;  %1598 = vmatprep.subr.bf16.mxu0 %v2355_v31  ;;  %v2419_v26 = vld [vmem:[%s2892_s7 + $0xd0] ss:$24 sps:$4 sm:$0xff]   ;;  %v2454_v31 = vld [vmem:[%s2892_s7 + $0x3a4] ss:$24 sps:$4 sm:$0xff]  }
  0xa9   : > { %1559 = vmatprep.subr.bf16.mxu1 %v2352_v30  ;;  %v2424_v30 = vld [vmem:[%s2892_s7 + $0xa4] ss:$24 sps:$4 sm:$0xff]  }
  0xaa   : > { %1472 = vmatmul.mubr.bf16.vlgmr.msra.gmra.mxu0 %v2980_v32 }
  0xab   : > { %1599 = vmatpush1.bf16.msra.mxu0 %v2353_v34  ;;  %1481 = vmatprep.mubr.bf16.mxu0 %v2992_v37  ;;  %v2452_v34 = vld [vmem:[%s2892_s7 + $0x3a0] ss:$24 sps:$4 sm:$0xff]  }
  0xac   : > { %1560 = vmatpush1.bf16.msra.mxu1 %v2350_v33  ;;  %1600 = vmatprep.subr.bf16.mxu0 %v2361_v36  ;;  %v2422_v33 = vld [vmem:[%s2892_s7 + $0xa0] ss:$24 sps:$4 sm:$0xff]   ;;  %v2460_v36 = vld [vmem:[%s2892_s7 + $0x374] ss:$24 sps:$4 sm:$0xff]  }
  0xad   : > { %1561 = vmatprep.subr.bf16.mxu1 %v2358_v35  ;;  %v2427_v35 = vld [vmem:[%s2892_s7 + $0x74] ss:$24 sps:$4 sm:$0xff]  }
  0xaf   : > { %1601 = vmatpush1.bf16.msra.mxu0 %v2359_v39  ;;  %v2466_v39 = vld [vmem:[%s2892_s7 + $0x344] ss:$24 sps:$4 sm:$0xff]  }
  0xb0   : > { %1562 = vmatpush2.bf16.msra.mxu1 %v2356_v38  ;;  %1602 = vmatprep.subr.bf16.mxu0 %v2367_v41  ;;  %v2425_v38 = vld [vmem:[%s2892_s7 + $0x70] ss:$24 sps:$4 sm:$0xff]   ;;  %v2464_v41 = vld [vmem:[%s2892_s7 + $0x340] ss:$24 sps:$4 sm:$0xff]  }
  0xb1   : > { %1563 = vmatprep.subr.bf16.mxu1 %v2364_v40  ;;  %v2431_v40 = vld [vmem:[%s2892_s7 + $0x40] ss:$24 sps:$4 sm:$0xff]  }
  0xb2   : > { %1482 = vmatmul.mubr.bf16.gmra.mxu0 %v3006_v44 }
  0xb3   : > { %1603 = vmatpush1.bf16.msra.mxu0 %v2365_v43  ;;  %2184 = vmatprep.mubr.msk.bf16.mxu0 %vm1432_vm0, %v2881_v22  ;;  %v2472_v43 = vld [vmem:[%s2892_s7 + $0x314] ss:$24 sps:$4 sm:$0xff]  }
  0xb4   : > { %1564 = vmatpush2.bf16.msra.mxu1 %v2362_v42  ;;  %1604 = vmatprep.subr.bf16.mxu0 %v2373_v46  ;;  %v2439_v42 = vld [vmem:[%s2892_s7 + $0x14] ss:$24 sps:$4 sm:$0xff]   ;;  %v2470_v46 = vld [vmem:[%s2892_s7 + $0x310] ss:$24 sps:$4 sm:$0xff]  }
  0xb5   : > { %1565 = vmatprep.subr.bf16.mxu1 %v2370_v45  ;;  %v2437_v45 = vld [vmem:[%s2892_s7 + $0x10] ss:$24 sps:$4 sm:$0xff]  }
  0xb7   : > { %1605 = vmatpush1.bf16.msra.mxu0 %v2371_v48  ;;  %v2478_v48 = vld [vmem:[%s2892_s7 + $0x494] ss:$24 sps:$4 sm:$0xff]  }
  0xb8   : > { %1566 = vmatpush2.bf16.msra.mxu1 %v2368_v47  ;;  %1606 = vmatprep.subr.bf16.mxu0 %v2379_v50  ;;  %v2445_v47 = vld [vmem:[%s2892_s7 + $0x2e4] ss:$24 sps:$4 sm:$0xff]   ;;  %v2476_v50 = vld [vmem:[%s2892_s7 + $0x490] ss:$24 sps:$4 sm:$0xff]  }
  0xb9   : > { %1567 = vmatprep.subr.bf16.mxu1 %v2376_v49  ;;  %v2443_v49 = vld [vmem:[%s2892_s7 + $0x2e0] ss:$24 sps:$4 sm:$0xff]  }
  0xbb   : > { %1607 = vmatpush1.bf16.msra.mxu0 %v2377_v52  ;;  %v2449_v52 = vld [vmem:[%s2892_s7 + $0x2b0] ss:$24 sps:$4 sm:$0xff]  }
  0xbc   : > { %1568 = vmatpush2.bf16.msra.mxu1 %v2374_v51  ;;  %1608 = vmatprep.subr.bf16.mxu0 %v2385_v54  ;;  %v2451_v51 = vld [vmem:[%s2892_s7 + $0x2b4] ss:$24 sps:$4 sm:$0xff]   ;;  %v2455_v54 = vld [vmem:[%s2892_s7 + $0x280] ss:$24 sps:$4 sm:$0xff]  }
  0xbd   : > { %1569 = vmatprep.subr.bf16.mxu1 %v2382_v53  ;;  %v2457_v53 = vld [vmem:[%s2892_s7 + $0x284] ss:$24 sps:$4 sm:$0xff]  }
  0xbf   : > { %1609 = vmatpush1.bf16.msra.mxu0 %v2383_v56  ;;  %v2461_v56 = vld [vmem:[%s2892_s7 + $0x250] ss:$24 sps:$4 sm:$0xff]  }
  0xc0   : > { %1570 = vmatpush2.bf16.msra.mxu1 %v2380_v55  ;;  %1610 = vmatprep.subr.bf16.mxu0 %v2397_v58  ;;  %v2463_v55 = vld [vmem:[%s2892_s7 + $0x254] ss:$24 sps:$4 sm:$0xff]  }
  0xc1   : > { %1571 = vmatprep.subr.bf16.mxu1 %v2394_v57  ;;  %v2469_v57 = vld [vmem:[%s2892_s7 + $0x224] ss:$24 sps:$4 sm:$0xff]   ;;  %v2475_v58 = vld [vmem:[%s2892_s7 + $0x1f4] ss:$24 sps:$4 sm:$0xff]  }
  0xc3   : > { %1611 = vmatpush1.bf16.msra.mxu0 %v2395_v61  ;;  %v2484_v61 = vld [vmem:[%s2892_s7 + $0x194] ss:$24 sps:$4 sm:$0xff]  }
  0xc4   : > { %1572 = vmatpush2.bf16.msra.mxu1 %v2392_v60  ;;  %1612 = vmatprep.subr.bf16.mxu0 %v2403_v1  ;;  %v2481_v60 = vld [vmem:[%s2892_s7 + $0x1c4] ss:$24 sps:$4 sm:$0xff]  }
  0xc5   : > { %1573 = vmatprep.subr.bf16.mxu1 %v2400_v0 }
  0xc7   : > { %1613 = vmatpush1.bf16.msra.mxu0 %v2401_v3 }
  0xc8   : > { %1574 = vmatpush2.bf16.msra.mxu1 %v2398_v2  ;;  %1628 = vmatprep.subr.bf16.mxu0 %v2409_v5 }
  0xc9   : > { %1575 = vmatprep.subr.bf16.mxu1 %v2406_v4 }
  0xcb   : > { %1629 = vmatpush2.bf16.msra.mxu0 %v2407_v7 }
  0xcc   : > { %1576 = vmatpush2.bf16.msra.mxu1 %v2404_v6  ;;  %1651 = vmatprep.subr.bf16.mxu0 %v2412_v8 }
  0xcd   : > { %1704 = vmatprep.subr.bf16.mxu1 %v2430_v9 }
  0xce   : > { %1631 = vmatmul.mubr.bf16.vlgmr.msra.gmra.mxu0 %v2936_v63 }
  0xcf   : > { %1578 = vmatmul.mubr.bf16.vlgmr.msra.gmra.mxu1 %v2980_v32  ;;  %1652 = vmatpush1.bf16.msra.mxu0 %v2410_v10 }
  0xd0   : > { %1705 = vmatpush1.bf16.msra.mxu1 %v2428_v12  ;;  %1653 = vmatprep.subr.bf16.mxu0 %v2415_v11 }
  0xd1   : > { %1706 = vmatprep.subr.bf16.mxu1 %v2436_v14  ;;  %1587 = vmatprep.mubr.bf16.mxu1 %v2992_v37 }
  0xd2   : > { %2185 = vmatprep.mubr.msk.bf16.mxu0 %vm1432_vm0, %v2968_v28 }
  0xd3   : > { %1654 = vmatpush1.bf16.msra.mxu0 %v2413_v15 }
  0xd4   : > { %1707 = vmatpush1.bf16.msra.mxu1 %v2434_v16  ;;  %1655 = vmatprep.subr.bf16.mxu0 %v2418_v18 }
  0xd5   : > { %1708 = vmatprep.subr.bf16.mxu1 %v2442_v19 }
  0xd6   : > { %1641 = vmatmul.mubr.bf16.gmra.mxu0 %v2973_v29 }
  0xd7   : > { %1588 = vmatmul.mubr.bf16.gmra.mxu1 %v3006_v44  ;;  %1656 = vmatpush1.bf16.msra.mxu0 %v2416_v20 }
  0xd8   : > { %1709 = vmatpush1.bf16.msra.mxu1 %v2440_v21  ;;  %1657 = vmatprep.subr.bf16.mxu0 %v2421_v24 }
  0xd9   : > { %1710 = vmatprep.subr.bf16.mxu1 %v2448_v25  ;;  %2186 = vmatprep.mubr.msk.bf16.mxu1 %vm1432_vm0, %v2881_v22  ;;  %v2458_v22 = vld [vmem:[%s2892_s7 + $0x370] ss:$24 sps:$4 sm:$0xff]  }
  0xda   : > { %1683 = vmatprep.mubr.bf16.mxu0 %v2890_v23  ;;  %v2433_v23 = vld [vmem:[%s2892_s7 + $0x44] ss:$24 sps:$4 sm:$0xff]  }
  0xdb   : > { %1658 = vmatpush1.bf16.msra.mxu0 %v2419_v26 }
  0xdc   : > { %1711 = vmatpush1.bf16.msra.mxu1 %v2446_v27  ;;  %1659 = vmatprep.subr.bf16.mxu0 %v2424_v30 }
  0xdd   : > { %1712 = vmatprep.subr.bf16.mxu1 %v2454_v31 }
  0xdf   : > { %1660 = vmatpush1.bf16.msra.mxu0 %v2422_v33 }
  0xe0   : > { %1713 = vmatpush1.bf16.msra.mxu1 %v2452_v34  ;;  %1661 = vmatprep.subr.bf16.mxu0 %v2427_v35 }
  0xe1   : > { %1714 = vmatprep.subr.bf16.mxu1 %v2460_v36 }
  0xe3   : > { %1662 = vmatpush1.bf16.msra.mxu0 %v2425_v38 }
  0xe4   : > { %1715 = vmatpush1.bf16.msra.mxu1 %v2458_v22  ;;  %1663 = vmatprep.subr.bf16.mxu0 %v2433_v23 }
  0xe5   : > { %1716 = vmatprep.subr.bf16.mxu1 %v2466_v39 }
  0xe7   : > { %1664 = vmatpush1.bf16.msra.mxu0 %v2431_v40 }
  0xe8   : > { %1717 = vmatpush1.bf16.msra.mxu1 %v2464_v41  ;;  %1665 = vmatprep.subr.bf16.mxu0 %v2439_v42 }
  0xe9   : > { %1718 = vmatprep.subr.bf16.mxu1 %v2472_v43 }
  0xeb   : > { %1666 = vmatpush1.bf16.msra.mxu0 %v2437_v45 }
  0xec   : > { %1719 = vmatpush1.bf16.msra.mxu1 %v2470_v46  ;;  %1667 = vmatprep.subr.bf16.mxu0 %v2445_v47 }
  0xed   : > { %1734 = vmatprep.subr.bf16.mxu1 %v2478_v48 }
  0xef   : > { %1668 = vmatpush2.bf16.msra.mxu0 %v2443_v49 }
  0xf0   : > { %1735 = vmatpush2.bf16.msra.mxu1 %v2476_v50  ;;  %1669 = vmatprep.subr.bf16.mxu0 %v2451_v51 }
  0xf3   : > { %1737 = vmatmul.mubr.bf16.vlgmr.msra.gmra.mxu1 %v2936_v63  ;;  %1670 = vmatpush2.bf16.msra.mxu0 %v2449_v52  ;;  %v2467_v63 = vld [vmem:[%s2892_s7 + $0x220] ss:$24 sps:$4 sm:$0xff]  }
  0xf4   : > { %2187 = vmatprep.mubr.msk.bf16.mxu1 %vm1432_vm0, %v2968_v28  ;;  %1671 = vmatprep.subr.bf16.mxu0 %v2457_v53  ;;  %v2479_v28 = vld [vmem:[%s2892_s7 + $0x1c0] ss:$24 sps:$4 sm:$0xff]   ;;  %s1922_s7 = scalar_lea.vmem (%p2561_p5), %s3218_s3, %s2216_s28 }
  0xf7   : > { %1672 = vmatpush2.bf16.msra.mxu0 %v2455_v54 }
  0xf8   : > { %1673 = vmatprep.subr.bf16.mxu0 %v2463_v55 }
  0xfb   : > { %1747 = vmatmul.mubr.bf16.gmra.mxu1 %v2973_v29  ;;  %1674 = vmatpush2.bf16.msra.mxu0 %v2461_v56 }
  0xfc   : > { %1675 = vmatprep.subr.bf16.mxu0 %v2469_v57 }
  0xff   : > { %1676 = vmatpush2.bf16.msra.mxu0 %v2467_v63 }
 0x100   : > { %1677 = vmatprep.subr.bf16.mxu0 %v2475_v58 }
 0x103   : > { %1678 = vmatpush2.bf16.msra.mxu0 %v2473_v59 }
 0x104   : > { %1679 = vmatprep.subr.bf16.mxu0 %v2481_v60 }
 0x107   : > { %1680 = vmatpush2.bf16.msra.mxu0 %v2479_v28 }
 0x108   : > { %1681 = vmatprep.subr.bf16.mxu0 %v2484_v61  ;;  %v3114_v2 = vpop.permute.xlu0 %1763 }
 0x10b   : > { %1682 = vmatpush2.bf16.msra.mxu0 %v2482_v62 }
 0x10e   : > { %1684 = vmatmul.mubr.bf16.vlgmr.msra.gmra.mxu0 %v2980_v32  ;;  %v3119_v32 = vpop.permute.xlu0 %1768 }
 0x10f   : > { %1693 = vmatprep.mubr.bf16.mxu0 %v2992_v37  ;;  %v2510_v37 = vmov 0.0  }
 0x116   : > { %1694 = vmatmul.mubr.bf16.gmra.mxu0 %v3006_v44 }
 0x118   : > { %v3123_v12 = vpop.permute.xlu1 %1773 }
 0x11c   : > { %v3134_v27 = vpop.permute.xlu1 %1778 }
 0x14f   : > { %v1526_v29 = vpop.f32.mrf.mxu1 }
 0x151   : > { %v1528_v0 = vpop.f32.mrf.mxu1 }
 0x153   : > { %v1530_v1 = vpop.f32.mrf.mxu1 }
 0x155   : > { %v1532_v3 = vpop.f32.mrf.mxu1 }
 0x157   : > { %v1536_v5 = vpop.f32.mrf.mxu1 }
 0x159   : > { %v1538_v10 = vpop.f32.mrf.mxu1 }
 0x15b   : > { %v1540_v18 = vpop.f32.mrf.mxu1 }
 0x15d   : > { %v1542_v33 = vpop.f32.mrf.mxu1 }
 0x16a   : > { %v1473_v4 = vpop.f32.mrf.mxu0 }
 0x16b   : > { %v1527_v6 = vadd.f32 %v1526_v29, %v1473_v4 }
 0x16c   : > { %v1475_v7 = vpop.f32.mrf.mxu0 }
 0x16d   : > { %v1529_v8 = vadd.f32 %v1528_v0, %v1475_v7  ;;  %vm1781_vm1 = vcmp.gt.f32.partialorder %v1527_v6, %v3114_v2 }
 0x16e   : > { %v1805_v44 = vsel %vm1781_vm1, 1.0, %v2510_v37  ;;  %v1477_v9 = vpop.f32.mrf.mxu0 }
 0x16f   : > { %vm1782_vm2 = vcmp.gt.f32.partialorder %v1529_v8, %v3114_v2  ;;  %v1531_v11 = vadd.f32 %v1530_v1, %v1477_v9 }
 0x170   : > { %v1806_v13 = vsel %vm1782_vm2, 1.0, %v2510_v37  ;;  %v1479_v14 = vpop.f32.mrf.mxu0 }
 0x171   : > { %v2204_v15 = vpack.c.bf16 %v1806_v13, %v1805_v44  ;;  %v1533_v16 = vadd.f32 %v1532_v3, %v1479_v14  ;;  %vm1787_vm3 = vcmp.gt.f32.partialorder %v1531_v11, %v3119_v32 }
 0x172   : > { %v1483_v17 = vpop.f32.mrf.mxu0  ;;  %v1811_v20 = vsel %vm1787_vm3, 1.0, %v2510_v37 }
 0x173   : > { %1901 = vst [vmem:[%s3127_s12] sm:$0xff] %v2204_v15  ;;  %vm1788_vm4 = vcmp.gt.f32.partialorder %v1533_v16, %v3119_v32  ;;  %v1537_v19 = vadd.f32 %v1536_v5, %v1483_v17 }
 0x174   : > { %v1812_v21 = vsel %vm1788_vm4, 1.0, %v2510_v37  ;;  %v1485_v24 = vpop.f32.mrf.mxu0 }
 0x175   : > { %v2207_v25 = vpack.c.bf16 %v1812_v21, %v1811_v20  ;;  %v1539_v26 = vadd.f32 %v1538_v10, %v1485_v24  ;;  %vm1793_vm5 = vcmp.gt.f32.partialorder %v1537_v19, %v3123_v12 }
 0x176   : > { %v1817_v30 = vsel %vm1793_vm5, 1.0, %v2510_v37  ;;  %v1487_v31 = vpop.f32.mrf.mxu0 }
 0x177   : > { %1904 = vst [vmem:[%s3127_s12 + $0x18] sm:$0xff] %v2207_v25  ;;  %vm1794_vm6 = vcmp.gt.f32.partialorder %v1539_v26, %v3123_v12  ;;  %v1541_v34 = vadd.f32 %v1540_v18, %v1487_v31 }
 0x178   : > { %v1818_v35 = vsel %vm1794_vm6, 1.0, %v2510_v37  ;;  %v1489_v36 = vpop.f32.mrf.mxu0 }
 0x179   : > { %v2210_v38 = vpack.c.bf16 %v1818_v35, %v1817_v30  ;;  %v1543_v22 = vadd.f32 %v1542_v33, %v1489_v36  ;;  %vm1799_vm7 = vcmp.gt.f32.partialorder %v1541_v34, %v3134_v27 }
 0x17a   : > { %v1823_v23 = vsel %vm1799_vm7, 1.0, %v2510_v37 }
 0x17b   : > { %1907 = vst [vmem:[%s3127_s12 + $0x30] sm:$0xff] %v2210_v38  ;;  %vm1800_vm8 = vcmp.gt.f32.partialorder %v1543_v22, %v3134_v27 }
 0x17c   : > { %v1824_v39 = vsel %vm1800_vm8, 1.0, %v2510_v37 }
 0x17d   : > { %v2213_v40 = vpack.c.bf16 %v1824_v39, %v1823_v23 }
 0x17f   : > { %1910 = vst [vmem:[%s3127_s12 + $0x48] sm:$0xff] %v2213_v40 }
 0x18e   : > { %v1632_v42 = vpop.f32.mrf.mxu0 }
 0x18f   : > { %v1579_v41 = vpop.f32.mrf.mxu1 }
 0x190   : > { %v1633_v43 = vadd.f32 %v1632_v42, %v1579_v41  ;;  %v1634_v46 = vpop.f32.mrf.mxu0 }
 0x191   : > { %v1581_v45 = vpop.f32.mrf.mxu1 }
 0x192   : > { %vm1783_vm9 = vcmp.gt.f32.partialorder %v1633_v43, %v3114_v2  ;;  %v1635_v47 = vadd.f32 %v1634_v46, %v1581_v45  ;;  %v1636_v50 = vpop.f32.mrf.mxu0 }
 0x193   : > { %v1807_v48 = vsel %vm1783_vm9, 1.0, %v2510_v37  ;;  %v1583_v49 = vpop.f32.mrf.mxu1 }
 0x194   : > { %vm1784_vm10 = vcmp.gt.f32.partialorder %v1635_v47, %v3114_v2  ;;  %v1637_v51 = vadd.f32 %v1636_v50, %v1583_v49  ;;  %v1638_v54 = vpop.f32.mrf.mxu0 }
 0x195   : > { %v1808_v52 = vsel %vm1784_vm10, 1.0, %v2510_v37  ;;  %v1585_v53 = vpop.f32.mrf.mxu1 }
 0x196   : > { %v2205_v55 = vpack.c.bf16 %v1808_v52, %v1807_v48  ;;  %vm1789_vm11 = vcmp.gt.f32.partialorder %v1637_v51, %v3119_v32  ;;  %v1639_v56 = vadd.f32 %v1638_v54, %v1585_v53  ;;  %v1642_v63 = vpop.f32.mrf.mxu0  ;;  %v1941_v53 = vld [vmem:[%s3127_s12 + $0x18] sm:$0xff] (%p2561_p5) }
 0x197   : > { %v1589_v57 = vpop.f32.mrf.mxu1  ;;  %v1813_v59 = vsel %vm1789_vm11, 1.0, %v2510_v37  ;;  %1942 = vst [vmem:[%s1922_s7 + $0x30] sm:$0xff] (%p2561_p5), %v1941_v53 }
 0x198   : > { %1902 = vst [vmem:[%s3127_s12 + $0x8] sm:$0xff] %v2205_v55  ;;  %vm1790_vm12 = vcmp.gt.f32.partialorder %v1639_v56, %v3119_v32  ;;  %v1643_v58 = vadd.f32 %v1642_v63, %v1589_v57  ;;  %v1644_v61 = vpop.f32.mrf.mxu0  ;;  %v1947_v56 = vld [vmem:[%s3127_s12 + $0x30] sm:$0xff] (%p2561_p5) }
 0x199   : > { %v1814_v60 = vsel %vm1790_vm12, 1.0, %v2510_v37  ;;  %v1591_v28 = vpop.f32.mrf.mxu1  ;;  %1948 = vst [vmem:[%s1922_s7 + $0x60] sm:$0xff] (%p2561_p5), %v1947_v56 }
 0x19a   : > { %v2208_v62 = vpack.c.bf16 %v1814_v60, %v1813_v59  ;;  %vm1795_vm13 = vcmp.gt.f32.partialorder %v1643_v58, %v3123_v12  ;;  %v1645_v29 = vadd.f32 %v1644_v61, %v1591_v28  ;;  %v1646_v3 = vpop.f32.mrf.mxu0  ;;  %v1953_v58 = vld [vmem:[%s3127_s12 + $0x48] sm:$0xff] (%p2561_p5) }
 0x19b   : > { %v1819_v0 = vsel %vm1795_vm13, 1.0, %v2510_v37  ;;  %v1593_v1 = vpop.f32.mrf.mxu1  ;;  %1954 = vst [vmem:[%s1922_s7 + $0x90] sm:$0xff] (%p2561_p5), %v1953_v58 }
 0x19c   : > { %1905 = vst [vmem:[%s3127_s12 + $0x20] sm:$0xff] %v2208_v62  ;;  %vm1796_vm14 = vcmp.gt.f32.partialorder %v1645_v29, %v3123_v12  ;;  %v1647_v4 = vadd.f32 %v1646_v3, %v1593_v1  ;;  %v1648_v7 = vpop.f32.mrf.mxu0 }
 0x19d   : > { %v1820_v5 = vsel %vm1796_vm14, 1.0, %v2510_v37  ;;  %v1595_v6 = vpop.f32.mrf.mxu1 }
 0x19e   : > { %v2211_v8 = vpack.c.bf16 %v1820_v5, %v1819_v0  ;;  %vm1801_vm15 = vcmp.gt.f32.partialorder %v1647_v4, %v3134_v27  ;;  %v1649_v44 = vadd.f32 %v1648_v7, %v1595_v6 }
 0x19f   : > { %v1825_v9 = vsel %vm1801_vm15, 1.0, %v2510_v37 }
 0x1a0   : > { %1908 = vst [vmem:[%s3127_s12 + $0x38] sm:$0xff] %v2211_v8  ;;  %vm1802_vm0 = vcmp.gt.f32.partialorder %v1649_v44, %v3134_v27 }
 0x1a1   : > { %v1826_v10 = vsel %vm1802_vm0, 1.0, %v2510_v37 }
 0x1a2   : > { %v2214_v11 = vpack.c.bf16 %v1826_v10, %v1825_v9 }
 0x1a3   : > { %v1943_v54 = vld [vmem:[%s3127_s12 + $0x20] sm:$0xff] (%p2561_p5) }
 0x1a4   : > { %1911 = vst [vmem:[%s3127_s12 + $0x50] sm:$0xff] %v2214_v11  ;;  %1944 = vst [vmem:[%s1922_s7 + $0x38] sm:$0xff] (%p2561_p5), %v1943_v54 }
 0x1a7   : > { %v1949_v57 = vld [vmem:[%s3127_s12 + $0x38] sm:$0xff] (%p2561_p5) }
 0x1a8   : > { %1950 = vst [vmem:[%s1922_s7 + $0x68] sm:$0xff] (%p2561_p5), %v1949_v57 }
 0x1ab   : > { %v1955_v59 = vld [vmem:[%s3127_s12 + $0x50] sm:$0xff] (%p2561_p5) }
 0x1ac   : > { %1956 = vst [vmem:[%s1922_s7 + $0x98] sm:$0xff] (%p2561_p5), %v1955_v59 }
 0x1b3   : > { %v1738_v13 = vpop.f32.mrf.mxu1 }
 0x1b5   : > { %v1740_v14 = vpop.f32.mrf.mxu1 }
 0x1b7   : > { %v1742_v15 = vpop.f32.mrf.mxu1 }
 0x1b9   : > { %v1744_v16 = vpop.f32.mrf.mxu1 }
 0x1bb   : > { %v1748_v20 = vpop.f32.mrf.mxu1 }
 0x1bd   : > { %v1750_v31 = vpop.f32.mrf.mxu1 }
 0x1bf   : > { %v1752_v23 = vpop.f32.mrf.mxu1 }
 0x1c1   : > { %v1754_v45 = vpop.f32.mrf.mxu1 }
 0x1ce   : > { %v1685_v17 = vpop.f32.mrf.mxu0 }
 0x1cf   : > { %v1739_v18 = vadd.f32 %v1738_v13, %v1685_v17 }
 0x1d0   : > { %v1687_v19 = vpop.f32.mrf.mxu0 }
 0x1d1   : > { %vm1785_vm1 = vcmp.gt.f32.partialorder %v1739_v18, %v3114_v2  ;;  %v1741_v21 = vadd.f32 %v1740_v14, %v1687_v19 }
 0x1d2   : > { %v1689_v24 = vpop.f32.mrf.mxu0  ;;  %v1809_v26 = vsel %vm1785_vm1, 1.0, %v2510_v37 }
 0x1d3   : > { %vm1786_vm2 = vcmp.gt.f32.partialorder %v1741_v21, %v3114_v2  ;;  %v1743_v25 = vadd.f32 %v1742_v15, %v1689_v24 }
 0x1d4   : > { %v1810_v30 = vsel %vm1786_vm2, 1.0, %v2510_v37  ;;  %v1691_v33 = vpop.f32.mrf.mxu0 }
 0x1d5   : > { %v2206_v34 = vpack.c.bf16 %v1810_v30, %v1809_v26  ;;  %vm1791_vm3 = vcmp.gt.f32.partialorder %v1743_v25, %v3119_v32  ;;  %v1745_v35 = vadd.f32 %v1744_v16, %v1691_v33 }
 0x1d6   : > { %v1695_v36 = vpop.f32.mrf.mxu0  ;;  %v1815_v22 = vsel %vm1791_vm3, 1.0, %v2510_v37 }
 0x1d7   : > { %1903 = vst [vmem:[%s3127_s12 + $0x10] sm:$0xff] %v2206_v34  ;;  %vm1792_vm4 = vcmp.gt.f32.partialorder %v1745_v35, %v3119_v32  ;;  %v1749_v38 = vadd.f32 %v1748_v20, %v1695_v36 }
 0x1d8   : > { %v1816_v2 = vsel %vm1792_vm4, 1.0, %v2510_v37  ;;  %v1697_v39 = vpop.f32.mrf.mxu0 }
 0x1d9   : > { %v2209_v40 = vpack.c.bf16 %v1816_v2, %v1815_v22  ;;  %vm1797_vm5 = vcmp.gt.f32.partialorder %v1749_v38, %v3123_v12  ;;  %v1751_v41 = vadd.f32 %v1750_v31, %v1697_v39 }
 0x1da   : > { %v1699_v42 = vpop.f32.mrf.mxu0  ;;  %v1821_v32 = vsel %vm1797_vm5, 1.0, %v2510_v37 }
 0x1db   : > { %1906 = vst [vmem:[%s3127_s12 + $0x28] sm:$0xff] %v2209_v40  ;;  %vm1798_vm6 = vcmp.gt.f32.partialorder %v1751_v41, %v3123_v12  ;;  %v1753_v43 = vadd.f32 %v1752_v23, %v1699_v42  ;;  %v1935_v12 = vld [vmem:[%s3127_s12] sm:$0xff] (%p2561_p5) }
 0x1dc   : > { %v1822_v46 = vsel %vm1798_vm6, 1.0, %v2510_v37  ;;  %v1701_v47 = vpop.f32.mrf.mxu0  ;;  %1936 = vst [vmem:[%s1922_s7] sm:$0xff] (%p2561_p5), %v1935_v12 }
 0x1dd   : > { %v2212_v48 = vpack.c.bf16 %v1822_v46, %v1821_v32  ;;  %vm1803_vm7 = vcmp.gt.f32.partialorder %v1753_v43, %v3134_v27  ;;  %v1755_v49 = vadd.f32 %v1754_v45, %v1701_v47 }
 0x1de   : > { %v1827_v50 = vsel %vm1803_vm7, 1.0, %v2510_v37 }
 0x1df   : > { %1909 = vst [vmem:[%s3127_s12 + $0x40] sm:$0xff] %v2212_v48  ;;  %vm1804_vm8 = vcmp.gt.f32.partialorder %v1755_v49, %v3134_v27  ;;  %1919 = sbr.rel (!%p2561_p5) target bundleno = 492 (0x1ec), region = 59  ;;  %v1937_v27 = vld [vmem:[%s3127_s12 + $0x8] sm:$0xff] (%p2561_p5) }
 0x1e0   : > { %v1828_v51 = vsel %vm1804_vm8, 1.0, %v2510_v37  ;;  %v1939_v37 = vld [vmem:[%s3127_s12 + $0x10] sm:$0xff] (%p2561_p5)  ;;  %1938 = vst [vmem:[%s1922_s7 + $0x8] sm:$0xff] (%p2561_p5), %v1937_v27 }
 0x1e1   : > { %v2215_v52 = vpack.c.bf16 %v1828_v51, %v1827_v50  ;;  %1940 = vst [vmem:[%s1922_s7 + $0x10] sm:$0xff] (%p2561_p5), %v1939_v37 }
 0x1e2   : > { %v1945_v55 = vld [vmem:[%s3127_s12 + $0x28] sm:$0xff] (%p2561_p5) }
 0x1e3   : > { %1912 = vst [vmem:[%s3127_s12 + $0x58] sm:$0xff] %v2215_v52  ;;  %1946 = vst [vmem:[%s1922_s7 + $0x40] sm:$0xff] (%p2561_p5), %v1945_v55 }
 0x1e6   : > { %v1951_v63 = vld [vmem:[%s3127_s12 + $0x40] sm:$0xff] }
 0x1e7   : > { %1952 = vst [vmem:[%s1922_s7 + $0x70] sm:$0xff] %v1951_v63 }
 0x1ea   : > { %v1957_v60 = vld [vmem:[%s3127_s12 + $0x58] sm:$0xff] }
 0x1eb   : > { %1958 = vst [vmem:[%s1922_s7 + $0xa0] sm:$0xff] %v1957_v60 }
 0x1ec PF: > { %p10_p10 = scmp.ge.s32.totalorder %s2548_s16, 4   ;;  %s3220_s12 = smov %s2503_s13 }
 0x1ed   : > { %s3221_s13 = smov %s2559_s19  ;;  %s3222_s14 = smov %s2548_s16 }
 0x1ee   :  { %12 = sbr.rel (!%p10_p10) target bundleno = 2 (0x2), region = 113 }

// kernel: forward.6
= control target key start
LH: loop header
LB: loop body
LE: loop exit
PB: predicated region body
PF: predicated region fallthrough
CT: control target
= control target key end

     0   :  { %s1287_s12 = smov 0   ;;  %s1289_s13 = smov 0   ;;  %s1569_s0 = inlined_call_operand.vmem [shape: bf16[64,288], index: 0, kind: input, shape index: {}]   ;;  %s1570_s1 = inlined_call_operand.vmem [shape: bf16[288,512], index: 1, kind: input, shape index: {}]   ;;  %s1571_s2 = inlined_call_operand.vmem [shape: f32[64,1], index: 2, kind: input, shape index: {}]   ;;  %s1572_s3 = inlined_call_operand.vmem [shape: bf16[64,512], index: 3, kind: output, shape index: {}]  }
   0x1   :  { %s1291_s14 = smov 0  }
   0x2 LB: > { %s1058_s15 = sadd.s32 4294967295, %s1263_s14   ;;  %s1304_s16 = sadd.s32 1, %s1263_s14   ;;  %s1263_s14 = sphi %s1291_s14, %s1576_s14   ;;  %s1259_s13 = sphi %s1289_s13, %s1575_s13   ;;  %s1255_s12 = sphi %s1287_s12, %s1574_s12  }
   0x3   : > { %s38_s17 = ssub.s32 %s1263_s14, %s1304_s16  ;;  %s41_s18 = sadd.s32 1, %s1259_s13 }
   0x4   : > { %p39_p0 = scmp.eq.s32.totalorder %s38_s17, 0  ;;  %p48_p1 = scmp.ne.s32.totalorder %s1259_s13, %s1255_s12 }
   0x5   : > { %p49_p2 = scmp.eq.s32.totalorder %s1263_s14, 0  ;;  %p99_p3 = scmp.eq.s32.totalorder %s1058_s15, 1 }
   0x6   : > { %s1315_s19 = scalar_select %p39_p0, %s1259_s13, %s41_s18  }
   0x7   : > { %p50_p4 = por %p49_p2, %p48_p1  ;;  %p1317_p5 = por %p99_p3, %p48_p1 }
   0x8   : > { %p1061_p6 = scmp.ge.s32.totalorder %s1263_s14, 2 }
   0xa   : > { %127 = sbr.rel (%p1061_p6) target bundleno = 37 (0x25), region = 24 }
   0xf   : > { %130 = sbr.rel (!%p50_p4) target bundleno = 37 (0x25), region = 28  ;;  %s132_s21 = sand.u32 (%p50_p4), 1, %s1259_s13  }
  0x10   : > { %s1131_s22 = sshll.u32 (%p50_p4), %s1263_s14, 3  ;;  %s1141_s23 = smul.u32 (%p50_p4), 288, %s132_s21 }
  0x11   : > { %s1327_s26 = scalar_lea.vmem (%p50_p4), %s1570_s1, %s1131_s22 }
  0x12   : > { %v236_v0 = vld [vmem:[%s1327_s26] sm:$0xff] (%p50_p4)  ;;  %v238_v1 = vld [vmem:[%s1327_s26 + $0x10] sm:$0xff] (%p50_p4)  ;;  %s1335_s27 = scalar_lea.vmem (%p50_p4), [#allocation2], %s1141_s23 }
  0x13   : > { %v240_v2 = vld [vmem:[%s1327_s26 + $0x20] sm:$0xff] (%p50_p4)  ;;  %v242_v3 = vld [vmem:[%s1327_s26 + $0x30] sm:$0xff] (%p50_p4)  ;;  %237 = vst [vmem:[%s1335_s27] sm:$0xff] (%p50_p4), %v236_v0  ;;  %239 = vst [vmem:[%s1335_s27 + $0x8] sm:$0xff] (%p50_p4), %v238_v1 }
  0x14   : > { %v244_v4 = vld [vmem:[%s1327_s26 + $0x40] sm:$0xff]  ;;  %v246_v5 = vld [vmem:[%s1327_s26 + $0x50] sm:$0xff]  ;;  %241 = vst [vmem:[%s1335_s27 + $0x10] sm:$0xff] %v240_v2  ;;  %243 = vst [vmem:[%s1335_s27 + $0x18] sm:$0xff] %v242_v3 }
  0x15   : > { %245 = vst [vmem:[%s1335_s27 + $0x20] sm:$0xff] %v244_v4  ;;  %247 = vst [vmem:[%s1335_s27 + $0x28] sm:$0xff] %v246_v5  ;;  %v248_v6 = vld [vmem:[%s1327_s26 + $0x60] sm:$0xff]  ;;  %v250_v7 = vld [vmem:[%s1327_s26 + $0x70] sm:$0xff] }
  0x16   : > { %v252_v8 = vld [vmem:[%s1327_s26 + $0x80] sm:$0xff]  ;;  %249 = vst [vmem:[%s1335_s27 + $0x30] sm:$0xff] %v248_v6  ;;  %251 = vst [vmem:[%s1335_s27 + $0x38] sm:$0xff] %v250_v7  ;;  %v254_v9 = vld [vmem:[%s1327_s26 + $0x90] sm:$0xff] }
  0x17   : > { %253 = vst [vmem:[%s1335_s27 + $0x40] sm:$0xff] %v252_v8  ;;  %v256_v10 = vld [vmem:[%s1327_s26 + $0xa0] sm:$0xff]  ;;  %v258_v11 = vld [vmem:[%s1327_s26 + $0xb0] sm:$0xff]  ;;  %255 = vst [vmem:[%s1335_s27 + $0x48] sm:$0xff] %v254_v9 }
  0x18   : > { %257 = vst [vmem:[%s1335_s27 + $0x50] sm:$0xff] %v256_v10  ;;  %259 = vst [vmem:[%s1335_s27 + $0x58] sm:$0xff] %v258_v11  ;;  %v260_v12 = vld [vmem:[%s1327_s26 + $0xc0] sm:$0xff]  ;;  %v262_v13 = vld [vmem:[%s1327_s26 + $0xd0] sm:$0xff] }
  0x19   : > { %v264_v14 = vld [vmem:[%s1327_s26 + $0xe0] sm:$0xff]  ;;  %261 = vst [vmem:[%s1335_s27 + $0x60] sm:$0xff] %v260_v12  ;;  %263 = vst [vmem:[%s1335_s27 + $0x68] sm:$0xff] %v262_v13  ;;  %v266_v15 = vld [vmem:[%s1327_s26 + $0xf0] sm:$0xff] }
  0x1a   : > { %265 = vst [vmem:[%s1335_s27 + $0x70] sm:$0xff] %v264_v14  ;;  %v268_v16 = vld [vmem:[%s1327_s26 + $0x100] sm:$0xff]  ;;  %v270_v17 = vld [vmem:[%s1327_s26 + $0x110] sm:$0xff]  ;;  %267 = vst [vmem:[%s1335_s27 + $0x78] sm:$0xff] %v266_v15 }
  0x1b   : > { %269 = vst [vmem:[%s1335_s27 + $0x80] sm:$0xff] %v268_v16  ;;  %271 = vst [vmem:[%s1335_s27 + $0x88] sm:$0xff] %v270_v17  ;;  %v272_v18 = vld [vmem:[%s1327_s26 + $0x120] sm:$0xff]  ;;  %v274_v19 = vld [vmem:[%s1327_s26 + $0x130] sm:$0xff] }
  0x1c   : > { %v276_v20 = vld [vmem:[%s1327_s26 + $0x140] sm:$0xff]  ;;  %273 = vst [vmem:[%s1335_s27 + $0x90] sm:$0xff] %v272_v18  ;;  %275 = vst [vmem:[%s1335_s27 + $0x98] sm:$0xff] %v274_v19  ;;  %v278_v21 = vld [vmem:[%s1327_s26 + $0x150] sm:$0xff] }
  0x1d   : > { %277 = vst [vmem:[%s1335_s27 + $0xa0] sm:$0xff] %v276_v20  ;;  %v280_v22 = vld [vmem:[%s1327_s26 + $0x160] sm:$0xff]  ;;  %v282_v23 = vld [vmem:[%s1327_s26 + $0x170] sm:$0xff]  ;;  %279 = vst [vmem:[%s1335_s27 + $0xa8] sm:$0xff] %v278_v21 }
  0x1e   : > { %281 = vst [vmem:[%s1335_s27 + $0xb0] sm:$0xff] %v280_v22  ;;  %283 = vst [vmem:[%s1335_s27 + $0xb8] sm:$0xff] %v282_v23  ;;  %v284_v24 = vld [vmem:[%s1327_s26 + $0x180] sm:$0xff]  ;;  %v286_v25 = vld [vmem:[%s1327_s26 + $0x190] sm:$0xff] }
  0x1f   : > { %v288_v26 = vld [vmem:[%s1327_s26 + $0x1a0] sm:$0xff]  ;;  %285 = vst [vmem:[%s1335_s27 + $0xc0] sm:$0xff] %v284_v24  ;;  %287 = vst [vmem:[%s1335_s27 + $0xc8] sm:$0xff] %v286_v25  ;;  %v290_v27 = vld [vmem:[%s1327_s26 + $0x1b0] sm:$0xff] }
  0x20   : > { %289 = vst [vmem:[%s1335_s27 + $0xd0] sm:$0xff] %v288_v26  ;;  %v292_v28 = vld [vmem:[%s1327_s26 + $0x1c0] sm:$0xff]  ;;  %v294_v29 = vld [vmem:[%s1327_s26 + $0x1d0] sm:$0xff]  ;;  %291 = vst [vmem:[%s1335_s27 + $0xd8] sm:$0xff] %v290_v27 }
  0x21   : > { %293 = vst [vmem:[%s1335_s27 + $0xe0] sm:$0xff] %v292_v28  ;;  %295 = vst [vmem:[%s1335_s27 + $0xe8] sm:$0xff] %v294_v29  ;;  %v296_v30 = vld [vmem:[%s1327_s26 + $0x1e0] sm:$0xff]  ;;  %v298_v31 = vld [vmem:[%s1327_s26 + $0x1f0] sm:$0xff] }
  0x22   : > { %v300_v32 = vld [vmem:[%s1327_s26 + $0x200] sm:$0xff]  ;;  %297 = vst [vmem:[%s1335_s27 + $0xf0] sm:$0xff] %v296_v30  ;;  %299 = vst [vmem:[%s1335_s27 + $0xf8] sm:$0xff] %v298_v31  ;;  %v302_v33 = vld [vmem:[%s1327_s26 + $0x210] sm:$0xff] }
  0x23   : > { %301 = vst [vmem:[%s1335_s27 + $0x100] sm:$0xff] %v300_v32  ;;  %v304_v34 = vld [vmem:[%s1327_s26 + $0x220] sm:$0xff]  ;;  %v306_v35 = vld [vmem:[%s1327_s26 + $0x230] sm:$0xff]  ;;  %303 = vst [vmem:[%s1335_s27 + $0x108] sm:$0xff] %v302_v33 }
  0x24   : > { %305 = vst [vmem:[%s1335_s27 + $0x110] sm:$0xff] %v304_v34  ;;  %307 = vst [vmem:[%s1335_s27 + $0x118] sm:$0xff] %v306_v35 }
  0x25 PF: > { %p1064_p7 = scmp.ge.s32.totalorder %s1263_s14, 1  ;;  %p312_p8 = scmp.lt.s32.totalorder %s1263_s14, 3 }
  0x27   : > { %p313_p9 = pnand %p1064_p7, %p312_p8 }
  0x28   : > { %s319_s28 = sand.u32 (!%p313_p9), 1, %s1255_s12  }
  0x29   : > { %316 = sbr.rel (%p313_p9) target bundleno = 351 (0x15f), region = 66  ;;  %s1065_s7 = sshll.u32 (!%p313_p9), %s319_s28, 6 }
  0x2a   : > { %s1142_s29 = smul.u32 (!%p313_p9), 288, %s319_s28  ;;  %s1520_s8 = scalar_lea.vmem (!%p313_p9), [#allocation3], %s1065_s7 }
  0x2c   : > { %s1414_s5 = scalar_lea.vmem (!%p313_p9), [#allocation2], %s1142_s29 }
  0x2e   : > { %v1265_v36 = vmov 0   ;;  %v1228_v37 = vld [vmem:[%s1569_s0 + $0x4] ss:$12 sps:$4 sm:$0xff]   ;;  %v1171_v38 = vld [vmem:[%s1414_s5 + $0x74] ss:$8 sps:$4 sm:$0xff]   ;;  %vm636_vm0 = vcmask 261120  }
  0x2f   : > { %754 = vmatprep.mubr.bf16.mxu1 %v1265_v36  ;;  %1169 = vset.pattern.permute.xlu0 %v1265_v36  ;;  %v1173_v39 = vld [vmem:[%s1414_s5 + $0x70] ss:$8 sps:$4 sm:$0xff]   ;;  %v1174_v40 = vld [vmem:[%s1414_s5 + $0x64] ss:$8 sps:$4 sm:$0xff]   ;;  %v1176_v41 = vld [vmem:[%s1414_s5 + $0x60] ss:$8 sps:$4 sm:$0xff]  }
  0x30   : > { %1170 = vset.pattern.permute.xlu1 %v1265_v36  ;;  %681 = vmatprep.mubr.bf16.mxu0 %v1228_v37  ;;  %v1177_v42 = vld [vmem:[%s1414_s5 + $0x54] ss:$8 sps:$4 sm:$0xff]   ;;  %v1179_v43 = vld [vmem:[%s1414_s5 + $0x50] ss:$8 sps:$4 sm:$0xff]   ;;  %v1180_v44 = vld [vmem:[%s1414_s5 + $0x44] ss:$8 sps:$4 sm:$0xff]  }
  0x31   : > { %649 = vmatprep.subr.bf16.mxu0 %v1171_v38  ;;  %v1182_v45 = vld [vmem:[%s1414_s5 + $0x40] ss:$8 sps:$4 sm:$0xff]   ;;  %v1183_v46 = vld [vmem:[%s1414_s5 + $0x34] ss:$8 sps:$4 sm:$0xff]   ;;  %v1185_v47 = vld [vmem:[%s1414_s5 + $0x30] ss:$8 sps:$4 sm:$0xff]  }
  0x32   : > { %650 = vmatpush1.bf16.msra.mxu0 %v1173_v39  ;;  %v1186_v48 = vld [vmem:[%s1414_s5 + $0x24] ss:$8 sps:$4 sm:$0xff]   ;;  %v1210_v49 = vld [vmem:[%s1414_s5 + $0x114] ss:$8 sps:$4 sm:$0xff]   ;;  %v1212_v50 = vld [vmem:[%s1414_s5 + $0x110] ss:$8 sps:$4 sm:$0xff]  }
  0x33   : > { %651 = vmatprep.subr.bf16.mxu0 %v1174_v40  ;;  %v1188_v51 = vld [vmem:[%s1414_s5 + $0x20] ss:$8 sps:$4 sm:$0xff]   ;;  %v1189_v52 = vld [vmem:[%s1414_s5 + $0x14] ss:$8 sps:$4 sm:$0xff]   ;;  %734 = vmatprep.subr.bf16.mxu1 %v1210_v49  ;;  %v1216_v53 = vld [vmem:[%s1414_s5 + $0x104] ss:$8 sps:$4 sm:$0xff]  }
  0x34   : > { %735 = vmatpush1.bf16.msra.mxu1 %v1212_v50  ;;  %v1218_v54 = vld [vmem:[%s1414_s5 + $0x100] ss:$8 sps:$4 sm:$0xff]   ;;  %v1191_v55 = vld [vmem:[%s1414_s5 + $0x10] ss:$8 sps:$4 sm:$0xff]   ;;  %v1192_v56 = vld [vmem:[%s1414_s5 + $0x4] ss:$8 sps:$4 sm:$0xff]  }
  0x35   : > { %736 = vmatprep.subr.bf16.mxu1 %v1216_v53  ;;  %v1222_v57 = vld [vmem:[%s1569_s0 + $0x8] ss:$12 sps:$4 sm:$0xff]   ;;  %v795_v60 = vld [vmem:[%s1571_s2] sm:$0xff]  ;;  %v1197_v62 = vld [vmem:[%s1414_s5 + $0xf0] ss:$8 sps:$4 sm:$0xff]   ;;  %s1140_s12 = sshll.u32 (%p1317_p5), %s1058_s15, 3 }
  0x36   : > { %652 = vmatpush1.bf16.msra.mxu0 %v1176_v41  ;;  %v1194_v58 = vld [vmem:[%s1414_s5] ss:$8 sps:$4 sm:$0xff]   ;;  %v1195_v59 = vld [vmem:[%s1414_s5 + $0xf4] ss:$8 sps:$4 sm:$0xff]   ;;  %805 = vperm.xlu0 %1169, %v795_v60   ;;  %v1198_v0 = vld [vmem:[%s1414_s5 + $0xe4] ss:$8 sps:$4 sm:$0xff]   ;;  %s940_s10 = scalar_lea.vmem (%p1317_p5), %s1572_s3, %s1140_s12 }
  0x37   : > { %653 = vmatprep.subr.bf16.mxu0 %v1177_v42  ;;  %v797_v61 = vld [vmem:[%s1571_s2 + $0x10] sm:$0xff]  ;;  %v796_v63 = vld [vmem:[%s1571_s2 + $0x8] sm:$0xff]  ;;  %v798_v2 = vld [vmem:[%s1571_s2 + $0x18] sm:$0xff] }
  0x38   : > { %737 = vmatpush1.bf16.msra.mxu1 %v1218_v54  ;;  %815 = vperm.xlu1 %1170, %v797_v61   ;;  %v1229_v1 = vld [vmem:[%s1569_s0 + $0x20] ss:$12 sps:$4 sm:$0xff]   ;;  %v1201_v5 = vld [vmem:[%s1414_s5 + $0xd4] ss:$8 sps:$4 sm:$0xff]   ;;  %v1203_v7 = vld [vmem:[%s1414_s5 + $0xd0] ss:$8 sps:$4 sm:$0xff]  }
  0x39   : > { %v1200_v3 = vld [vmem:[%s1414_s5 + $0xe0] ss:$8 sps:$4 sm:$0xff]   ;;  %v801_v8 = vld [vmem:[%s1571_s2 + $0x30] sm:$0xff]  ;;  %v1204_v9 = vld [vmem:[%s1414_s5 + $0xc4] ss:$8 sps:$4 sm:$0xff]  }
  0x3a   : > { %654 = vmatpush1.bf16.msra.mxu0 %v1179_v43  ;;  %810 = vperm.xlu0 %1169, %v796_v63   ;;  %v799_v4 = vld [vmem:[%s1571_s2 + $0x20] sm:$0xff]  ;;  %v800_v6 = vld [vmem:[%s1571_s2 + $0x28] sm:$0xff]  ;;  %v802_v11 = vld [vmem:[%s1571_s2 + $0x38] sm:$0xff] }
  0x3b   : > { %655 = vmatprep.subr.bf16.mxu0 %v1180_v44  ;;  %1114 = vmatmul.mubr.msk.bf16.vlgmr.msra.gmra.mxu1 %vm636_vm0, %v1222_v57  ;;  %v1233_v10 = vld [vmem:[%s1569_s0 + $0x38] ss:$12 sps:$4 sm:$0xff]   ;;  %v1206_v12 = vld [vmem:[%s1414_s5 + $0xc0] ss:$8 sps:$4 sm:$0xff]   ;;  %v1207_v13 = vld [vmem:[%s1414_s5 + $0xb4] ss:$8 sps:$4 sm:$0xff]  }
  0x3c   : > { %764 = vmatprep.mubr.bf16.mxu1 %v1265_v36  ;;  %820 = vperm.xlu1 %1170, %v798_v2   ;;  %v1209_v14 = vld [vmem:[%s1414_s5 + $0xb0] ss:$8 sps:$4 sm:$0xff]   ;;  %v1213_v15 = vld [vmem:[%s1414_s5 + $0xa4] ss:$8 sps:$4 sm:$0xff]   ;;  %v1215_v17 = vld [vmem:[%s1414_s5 + $0xa0] ss:$8 sps:$4 sm:$0xff]  }
  0x3d   : > { %v1237_v16 = vld [vmem:[%s1569_s0 + $0x50] ss:$12 sps:$4 sm:$0xff]   ;;  %v1223_v20 = vld [vmem:[%s1414_s5 + $0x84] ss:$8 sps:$4 sm:$0xff]   ;;  %v1225_v21 = vld [vmem:[%s1414_s5 + $0x80] ss:$8 sps:$4 sm:$0xff]  }
  0x3e   : > { %656 = vmatpush1.bf16.msra.mxu0 %v1182_v45  ;;  %825 = vperm.xlu0 %1169, %v799_v4   ;;  %v1219_v18 = vld [vmem:[%s1414_s5 + $0x94] ss:$8 sps:$4 sm:$0xff]   ;;  %v1221_v19 = vld [vmem:[%s1414_s5 + $0x90] ss:$8 sps:$4 sm:$0xff]   ;;  %v1226_v22 = vld [vmem:[%s1569_s0] ss:$12 sps:$4 sm:$0xff]  }
  0x3f   : > { %657 = vmatprep.subr.bf16.mxu0 %v1183_v46  ;;  %v1230_v23 = vld [vmem:[%s1569_s0 + $0x1c] ss:$12 sps:$4 sm:$0xff]   ;;  %v1232_v24 = vld [vmem:[%s1569_s0 + $0x18] ss:$12 sps:$4 sm:$0xff]   ;;  %v1234_v25 = vld [vmem:[%s1569_s0 + $0x34] ss:$12 sps:$4 sm:$0xff]  }
  0x40   : > { %830 = vperm.xlu1 %1170, %v800_v6   ;;  %v1236_v26 = vld [vmem:[%s1569_s0 + $0x30] ss:$12 sps:$4 sm:$0xff]   ;;  %v1238_v27 = vld [vmem:[%s1569_s0 + $0x4c] ss:$12 sps:$4 sm:$0xff]   ;;  %v1240_v28 = vld [vmem:[%s1569_s0 + $0x48] ss:$12 sps:$4 sm:$0xff]  }
  0x41   : > { %v1266_v46 = vmov 0.0  }
  0x42   : > { %658 = vmatpush1.bf16.msra.mxu0 %v1185_v47  ;;  %835 = vperm.xlu0 %1169, %v801_v8  }
  0x43   : > { %659 = vmatprep.subr.bf16.mxu0 %v1186_v48  ;;  %1115 = vmatmul.mubr.msk.bf16.gmra.mxu1 %vm636_vm0, %v1229_v1 }
  0x44   : > { %774 = vmatprep.mubr.bf16.mxu1 %v1265_v36  ;;  %840 = vperm.xlu1 %1170, %v802_v11  }
  0x46   : > { %660 = vmatpush1.bf16.msra.mxu0 %v1188_v51 }
  0x47   : > { %661 = vmatprep.subr.bf16.mxu0 %v1189_v52 }
  0x4a   : > { %662 = vmatpush1.bf16.msra.mxu0 %v1191_v55 }
  0x4b   : > { %663 = vmatprep.subr.bf16.mxu0 %v1192_v56  ;;  %1116 = vmatmul.mubr.msk.bf16.gmra.mxu1 %vm636_vm0, %v1233_v10 }
  0x4c   : > { %784 = vmatprep.mubr.bf16.mxu1 %v1265_v36 }
  0x4e   : > { %664 = vmatpush1.bf16.msra.mxu0 %v1194_v58 }
  0x4f   : > { %665 = vmatprep.subr.bf16.mxu0 %v1195_v59 }
  0x52   : > { %666 = vmatpush2.bf16.msra.mxu0 %v1197_v62 }
  0x53   : > { %667 = vmatprep.subr.bf16.mxu0 %v1198_v0  ;;  %1117 = vmatmul.mubr.msk.bf16.gmra.mxu1 %vm636_vm0, %v1237_v16 }
  0x56   : > { %668 = vmatpush2.bf16.msra.mxu0 %v1200_v3 }
  0x57   : > { %669 = vmatprep.subr.bf16.mxu0 %v1201_v5 }
  0x5a   : > { %670 = vmatpush2.bf16.msra.mxu0 %v1203_v7 }
  0x5b   : > { %671 = vmatprep.subr.bf16.mxu0 %v1204_v9 }
  0x5e   : > { %672 = vmatpush2.bf16.msra.mxu0 %v1206_v12 }
  0x5f   : > { %673 = vmatprep.subr.bf16.mxu0 %v1207_v13 }
  0x62   : > { %674 = vmatpush2.bf16.msra.mxu0 %v1209_v14 }
  0x63   : > { %675 = vmatprep.subr.bf16.mxu0 %v1213_v15 }
  0x66   : > { %676 = vmatpush2.bf16.msra.mxu0 %v1215_v17 }
  0x67   : > { %677 = vmatprep.subr.bf16.mxu0 %v1219_v18 }
  0x6a   : > { %678 = vmatpush2.bf16.msra.mxu0 %v1221_v19 }
  0x6b   : > { %679 = vmatprep.subr.bf16.mxu0 %v1223_v20 }
  0x6e   : > { %680 = vmatpush2.bf16.msra.mxu0 %v1225_v21 }
  0x71   : > { %682 = vmatmul.mubr.bf16.vlgmr.msra.gmra.mxu0 %v1226_v22 }
  0x72   : > { %691 = vmatprep.mubr.bf16.mxu0 %v1230_v23 }
  0x79   : > { %692 = vmatmul.mubr.bf16.gmra.mxu0 %v1232_v24 }
  0x7a   : > { %701 = vmatprep.mubr.bf16.mxu0 %v1234_v25 }
  0x81   : > { %702 = vmatmul.mubr.bf16.gmra.mxu0 %v1236_v26 }
  0x82   : > { %711 = vmatprep.mubr.bf16.mxu0 %v1238_v27 }
  0x89   : > { %712 = vmatmul.mubr.bf16.gmra.mxu0 %v1240_v28 }
  0xb1   : > { %v806_v36 = vpop.permute.xlu0 %805 }
  0xb3   : > { %v816_v53 = vpop.permute.xlu1 %815 }
  0xb5   : > { %v811_v44 = vpop.permute.xlu0 %810 }
  0xb7   : > { %v821_v63 = vpop.permute.xlu1 %820 }
  0xb9   : > { %v826_v8 = vpop.permute.xlu0 %825 }
  0xbb   : > { %v831_v17 = vpop.permute.xlu1 %830 }
  0xbd   : > { %v836_v26 = vpop.permute.xlu0 %835 }
  0xfb   : > { %v756_v29 = vpop.f32.mrf.mxu1 }
  0xfd   : > { %v758_v30 = vpop.f32.mrf.mxu1 }
  0xff   : > { %v760_v31 = vpop.f32.mrf.mxu1 }
 0x101   : > { %v762_v32 = vpop.f32.mrf.mxu1 }
 0x103   : > { %v766_v33 = vpop.f32.mrf.mxu1 }
 0x105   : > { %v768_v34 = vpop.f32.mrf.mxu1 }
 0x107   : > { %v770_v35 = vpop.f32.mrf.mxu1 }
 0x109   : > { %v772_v37 = vpop.f32.mrf.mxu1 }
 0x10b   : > { %v776_v41 = vpop.f32.mrf.mxu1 }
 0x10d   : > { %v778_v50 = vpop.f32.mrf.mxu1 }
 0x10f   : > { %v780_v59 = vpop.f32.mrf.mxu1 }
 0x111   : > { %v782_v4 = vpop.f32.mrf.mxu1 }
 0x113   : > { %v786_v13 = vpop.f32.mrf.mxu1 }
 0x115   : > { %v788_v21 = vpop.f32.mrf.mxu1 }
 0x131   : > { %v683_v38 = vpop.f32.mrf.mxu0 }
 0x132   : > { %v757_v39 = vadd.f32 %v756_v29, %v683_v38 }
 0x133   : > { %v685_v40 = vpop.f32.mrf.mxu0 }
 0x134   : > { %vm843_vm1 = vcmp.gt.f32.partialorder %v757_v39, %v806_v36  ;;  %v759_v42 = vadd.f32 %v758_v30, %v685_v40  ;;  %v790_v30 = vpop.f32.mrf.mxu1 }
 0x135   : > { %v687_v43 = vpop.f32.mrf.mxu0  ;;  %v859_v47 = vsel %vm843_vm1, 1.0, %v1266_v46 }
 0x136   : > { %vm844_vm2 = vcmp.gt.f32.partialorder %v759_v42, %v806_v36  ;;  %v761_v45 = vadd.f32 %v760_v31, %v687_v43  ;;  %v792_v38 = vpop.f32.mrf.mxu1 }
 0x137   : > { %v860_v48 = vsel %vm844_vm2, 1.0, %v1266_v46  ;;  %v689_v49 = vpop.f32.mrf.mxu0 }
 0x138   : > { %v1132_v51 = vpack.c.bf16 %v860_v48, %v859_v47  ;;  %vm845_vm3 = vcmp.gt.f32.partialorder %v761_v45, %v811_v44  ;;  %v763_v52 = vadd.f32 %v762_v32, %v689_v49 }
 0x139   : > { %v693_v54 = vpop.f32.mrf.mxu0  ;;  %v861_v56 = vsel %vm845_vm3, 1.0, %v1266_v46 }
 0x13a   : > { %923 = vst [vmem:[%s1520_s8] sm:$0xff] %v1132_v51  ;;  %vm846_vm4 = vcmp.gt.f32.partialorder %v763_v52, %v811_v44  ;;  %v767_v55 = vadd.f32 %v766_v33, %v693_v54 }
 0x13b   : > { %v862_v57 = vsel %vm846_vm4, 1.0, %v1266_v46  ;;  %v695_v58 = vpop.f32.mrf.mxu0 }
 0x13c   : > { %v1133_v60 = vpack.c.bf16 %v862_v57, %v861_v56  ;;  %vm847_vm5 = vcmp.gt.f32.partialorder %v767_v55, %v816_v53  ;;  %v769_v61 = vadd.f32 %v768_v34, %v695_v58 }
 0x13d   : > { %v697_v62 = vpop.f32.mrf.mxu0  ;;  %v863_v1 = vsel %vm847_vm5, 1.0, %v1266_v46 }
 0x13e   : > { %924 = vst [vmem:[%s1520_s8 + $0x8] sm:$0xff] %v1133_v60  ;;  %vm848_vm6 = vcmp.gt.f32.partialorder %v769_v61, %v816_v53  ;;  %v771_v0 = vadd.f32 %v770_v35, %v697_v62  ;;  %v841_v35 = vpop.permute.xlu1 %840 }
 0x13f   : > { %v864_v2 = vsel %vm848_vm6, 1.0, %v1266_v46  ;;  %v699_v3 = vpop.f32.mrf.mxu0 }
 0x140   : > { %v1134_v5 = vpack.c.bf16 %v864_v2, %v863_v1  ;;  %vm849_vm7 = vcmp.gt.f32.partialorder %v771_v0, %v821_v63  ;;  %v773_v6 = vadd.f32 %v772_v37, %v699_v3 }
 0x141   : > { %v703_v7 = vpop.f32.mrf.mxu0  ;;  %v865_v10 = vsel %vm849_vm7, 1.0, %v1266_v46  ;;  %v983_v47 = vld [vmem:[%s1520_s8] sm:$0xff] (%p1317_p5) }
 0x142   : > { %925 = vst [vmem:[%s1520_s8 + $0x10] sm:$0xff] %v1134_v5  ;;  %vm850_vm8 = vcmp.gt.f32.partialorder %v773_v6, %v821_v63  ;;  %v777_v9 = vadd.f32 %v776_v41, %v703_v7  ;;  %984 = vst [vmem:[%s940_s10] sm:$0xff] (%p1317_p5), %v983_v47 }
 0x143   : > { %v866_v11 = vsel %vm850_vm8, 1.0, %v1266_v46  ;;  %v705_v12 = vpop.f32.mrf.mxu0 }
 0x144   : > { %v1135_v14 = vpack.c.bf16 %v866_v11, %v865_v10  ;;  %vm851_vm9 = vcmp.gt.f32.partialorder %v777_v9, %v826_v8  ;;  %v779_v15 = vadd.f32 %v778_v50, %v705_v12 }
 0x145   : > { %v707_v16 = vpop.f32.mrf.mxu0  ;;  %v867_v19 = vsel %vm851_vm9, 1.0, %v1266_v46  ;;  %v985_v48 = vld [vmem:[%s1520_s8 + $0x8] sm:$0xff] (%p1317_p5) }
 0x146   : > { %926 = vst [vmem:[%s1520_s8 + $0x18] sm:$0xff] %v1135_v14  ;;  %vm852_vm10 = vcmp.gt.f32.partialorder %v779_v15, %v826_v8  ;;  %v781_v18 = vadd.f32 %v780_v59, %v707_v16  ;;  %986 = vst [vmem:[%s940_s10 + $0x10] sm:$0xff] (%p1317_p5), %v985_v48 }
 0x147   : > { %v868_v20 = vsel %vm852_vm10, 1.0, %v1266_v46  ;;  %v709_v22 = vpop.f32.mrf.mxu0 }
 0x148   : > { %v1136_v23 = vpack.c.bf16 %v868_v20, %v867_v19  ;;  %vm853_vm11 = vcmp.gt.f32.partialorder %v781_v18, %v831_v17  ;;  %v783_v24 = vadd.f32 %v782_v4, %v709_v22 }
 0x149   : > { %v713_v25 = vpop.f32.mrf.mxu0  ;;  %v869_v28 = vsel %vm853_vm11, 1.0, %v1266_v46  ;;  %v987_v49 = vld [vmem:[%s1520_s8 + $0x10] sm:$0xff] (%p1317_p5) }
 0x14a   : > { %927 = vst [vmem:[%s1520_s8 + $0x20] sm:$0xff] %v1136_v23  ;;  %vm854_vm12 = vcmp.gt.f32.partialorder %v783_v24, %v831_v17  ;;  %v787_v27 = vadd.f32 %v786_v13, %v713_v25  ;;  %988 = vst [vmem:[%s940_s10 + $0x20] sm:$0xff] (%p1317_p5), %v987_v49 }
 0x14b   : > { %v870_v29 = vsel %vm854_vm12, 1.0, %v1266_v46  ;;  %v715_v31 = vpop.f32.mrf.mxu0 }
 0x14c   : > { %v1137_v32 = vpack.c.bf16 %v870_v29, %v869_v28  ;;  %vm855_vm13 = vcmp.gt.f32.partialorder %v787_v27, %v836_v26  ;;  %v789_v33 = vadd.f32 %v788_v21, %v715_v31 }
 0x14d   : > { %v717_v34 = vpop.f32.mrf.mxu0  ;;  %v871_v37 = vsel %vm855_vm13, 1.0, %v1266_v46 }
 0x14e   : > { %928 = vst [vmem:[%s1520_s8 + $0x28] sm:$0xff] %v1137_v32  ;;  %vm856_vm14 = vcmp.gt.f32.partialorder %v789_v33, %v836_v26  ;;  %v791_v36 = vadd.f32 %v790_v30, %v717_v34 }
 0x14f   : > { %v872_v39 = vsel %vm856_vm14, 1.0, %v1266_v46  ;;  %v719_v40 = vpop.f32.mrf.mxu0 }
 0x150   : > { %v1138_v41 = vpack.c.bf16 %v872_v39, %v871_v37  ;;  %vm857_vm15 = vcmp.gt.f32.partialorder %v791_v36, %v841_v35  ;;  %v793_v42 = vadd.f32 %v792_v38, %v719_v40 }
 0x151   : > { %v873_v43 = vsel %vm857_vm15, 1.0, %v1266_v46  ;;  %v991_v50 = vld [vmem:[%s1520_s8 + $0x20] sm:$0xff] (%p1317_p5) }
 0x152   : > { %929 = vst [vmem:[%s1520_s8 + $0x30] sm:$0xff] %v1138_v41  ;;  %vm858_vm0 = vcmp.gt.f32.partialorder %v793_v42, %v841_v35  ;;  %937 = sbr.rel (!%p1317_p5) target bundleno = 351 (0x15f), region = 74  ;;  %992 = vst [vmem:[%s940_s10 + $0x40] sm:$0xff] (%p1317_p5), %v991_v50 }
 0x153   : > { %v874_v44 = vsel %vm858_vm0, 1.0, %v1266_v46  ;;  %v989_v46 = vld [vmem:[%s1520_s8 + $0x18] sm:$0xff] (%p1317_p5) }
 0x154   : > { %v1139_v45 = vpack.c.bf16 %v874_v44, %v873_v43  ;;  %990 = vst [vmem:[%s940_s10 + $0x30] sm:$0xff] (%p1317_p5), %v989_v46 }
 0x155   : > { %v993_v51 = vld [vmem:[%s1520_s8 + $0x28] sm:$0xff] (%p1317_p5) }
 0x156   : > { %930 = vst [vmem:[%s1520_s8 + $0x38] sm:$0xff] %v1139_v45  ;;  %994 = vst [vmem:[%s940_s10 + $0x50] sm:$0xff] (%p1317_p5), %v993_v51 }
 0x159   : > { %v995_v52 = vld [vmem:[%s1520_s8 + $0x30] sm:$0xff] }
 0x15a   : > { %996 = vst [vmem:[%s940_s10 + $0x60] sm:$0xff] %v995_v52 }
 0x15d   : > { %v997_v53 = vld [vmem:[%s1520_s8 + $0x38] sm:$0xff] }
 0x15e   : > { %998 = vst [vmem:[%s940_s10 + $0x70] sm:$0xff] %v997_v53 }
 0x15f PF: > { %p10_p10 = scmp.ge.s32.totalorder %s1304_s16, 4   ;;  %s1574_s12 = smov %s1259_s13 }
 0x160   : > { %s1575_s13 = smov %s1315_s19  ;;  %s1576_s14 = smov %s1304_s16 }
 0x161   :  { %12 = sbr.rel (!%p10_p10) target bundleno = 2 (0x2), region = 143 }

// kernel: forward.7
= control target key start
LH: loop header
LB: loop body
LE: loop exit
PB: predicated region body
PF: predicated region fallthrough
CT: control target
= control target key end

     0   :  { %vm6442_vm8 = vmmov 0   ;;  %s8560_s1 = inlined_call_operand.vmem [shape: bf16[2304,512], index: 1, kind: input, shape index: {}]   ;;  %s8561_s0 = inlined_call_operand.vmem [shape: bf16[8,2304], index: 0, kind: input, shape index: {}]   ;;  %s8562_s3 = inlined_call_operand.vmem [shape: bf16[512,128], index: 3, kind: input, shape index: {}]   ;;  %s8563_s2 = inlined_call_operand.vmem [shape: f32[1,512], index: 2, kind: input, shape index: {}]   ;;  %s8564_s5 = inlined_call_operand.vmem [shape: bf16[128,128], index: 5, kind: input, shape index: {}]   ;;  %s8565_s4 = inlined_call_operand.vmem [shape: f32[1,128], index: 4, kind: input, shape index: {}]   ;;  %s8566_s8 = inlined_call_operand.vmem [shape: f32[8,128], index: 8, kind: output, shape index: {1}]   ;;  %s8567_s6 = inlined_call_operand.vmem [shape: f32[1,128], index: 6, kind: input, shape index: {}]   ;;  %s8568_s7 = inlined_call_operand.vmem [shape: f32[8,128], index: 7, kind: output, shape index: {0}]  }
   0x1   :  { %v5518_v0 = vld [vmem:[%s8560_s1 + $0xe4] ss:$16 sps:$4 sm:$0xff]   ;;  %v5522_v2 = vld [vmem:[%s8560_s1 + $0xe0] ss:$16 sps:$4 sm:$0xff]   ;;  %v30_v48 = vld [vmem:[%s8561_s0 + $0x8] sm:$0xff] }
   0x2   :  { %v5520_v1 = vld [vmem:[%s8560_s1 + $0x2e4] ss:$16 sps:$4 sm:$0xff]   ;;  %3557 = vmatprep.subr.bf16.mxu0 %v5518_v0  ;;  %v5523_v3 = vld [vmem:[%s8560_s1 + $0x2e0] ss:$16 sps:$4 sm:$0xff]   ;;  %v6640_v51 = vcombine.high %v30_v48, %v30_v48 }
   0x3   :  { %3598 = vmatprep.subr.bf16.mxu1 %v5520_v1  ;;  %v5524_v4 = vld [vmem:[%s8560_s1 + $0xc4] ss:$16 sps:$4 sm:$0xff]   ;;  %3558 = vmatpush1.bf16.msra.mxu0 %v5522_v2  ;;  %v5528_v6 = vld [vmem:[%s8560_s1 + $0xc0] ss:$16 sps:$4 sm:$0xff]  }
   0x4   :  { %3599 = vmatpush1.bf16.msra.mxu1 %v5523_v3  ;;  %v5526_v5 = vld [vmem:[%s8560_s1 + $0x2c4] ss:$16 sps:$4 sm:$0xff]   ;;  %3559 = vmatprep.subr.bf16.mxu0 %v5524_v4  ;;  %v5529_v7 = vld [vmem:[%s8560_s1 + $0x2c0] ss:$16 sps:$4 sm:$0xff]  }
   0x5   :  { %3600 = vmatprep.subr.bf16.mxu1 %v5526_v5  ;;  %v5530_v8 = vld [vmem:[%s8560_s1 + $0xa4] ss:$16 sps:$4 sm:$0xff]   ;;  %v5534_v10 = vld [vmem:[%s8560_s1 + $0xa0] ss:$16 sps:$4 sm:$0xff]   ;;  %3630 = vmatprep.mubr.bf16.mxu1 %v6640_v51 }
   0x6   :  { %v5532_v9 = vld [vmem:[%s8560_s1 + $0x2a4] ss:$16 sps:$4 sm:$0xff]   ;;  %v5535_v11 = vld [vmem:[%s8560_s1 + $0x2a0] ss:$16 sps:$4 sm:$0xff]  }
   0x7   :  { %3560 = vmatpush1.bf16.msra.mxu0 %v5528_v6  ;;  %v5536_v12 = vld [vmem:[%s8560_s1 + $0x84] ss:$16 sps:$4 sm:$0xff]   ;;  %v5540_v14 = vld [vmem:[%s8560_s1 + $0x80] ss:$16 sps:$4 sm:$0xff]  }
   0x8   :  { %3601 = vmatpush1.bf16.msra.mxu1 %v5529_v7  ;;  %3561 = vmatprep.subr.bf16.mxu0 %v5530_v8  ;;  %v5538_v13 = vld [vmem:[%s8560_s1 + $0x284] ss:$16 sps:$4 sm:$0xff]   ;;  %v5541_v15 = vld [vmem:[%s8560_s1 + $0x280] ss:$16 sps:$4 sm:$0xff]   ;;  %v6700_v7 = vcombine.low %v30_v48, %v30_v48 }
   0x9   :  { %3602 = vmatprep.subr.bf16.mxu1 %v5532_v9  ;;  %v5542_v16 = vld [vmem:[%s8560_s1 + $0x64] ss:$16 sps:$4 sm:$0xff]   ;;  %v5546_v18 = vld [vmem:[%s8560_s1 + $0x60] ss:$16 sps:$4 sm:$0xff]  }
   0xa   :  { %v5544_v17 = vld [vmem:[%s8560_s1 + $0x264] ss:$16 sps:$4 sm:$0xff]   ;;  %v5547_v19 = vld [vmem:[%s8560_s1 + $0x260] ss:$16 sps:$4 sm:$0xff]  }
   0xb   :  { %3562 = vmatpush1.bf16.msra.mxu0 %v5534_v10  ;;  %v5548_v20 = vld [vmem:[%s8560_s1 + $0x44] ss:$16 sps:$4 sm:$0xff]   ;;  %v5552_v22 = vld [vmem:[%s8560_s1 + $0x40] ss:$16 sps:$4 sm:$0xff]  }
   0xc   :  { %3603 = vmatpush1.bf16.msra.mxu1 %v5535_v11  ;;  %3563 = vmatprep.subr.bf16.mxu0 %v5536_v12  ;;  %v5550_v21 = vld [vmem:[%s8560_s1 + $0x244] ss:$16 sps:$4 sm:$0xff]   ;;  %v5553_v23 = vld [vmem:[%s8560_s1 + $0x240] ss:$16 sps:$4 sm:$0xff]  }
   0xd   :  { %3604 = vmatprep.subr.bf16.mxu1 %v5538_v13  ;;  %v5554_v24 = vld [vmem:[%s8560_s1 + $0x24] ss:$16 sps:$4 sm:$0xff]   ;;  %v5558_v26 = vld [vmem:[%s8560_s1 + $0x20] ss:$16 sps:$4 sm:$0xff]  }
   0xe   :  { %v5556_v25 = vld [vmem:[%s8560_s1 + $0x224] ss:$16 sps:$4 sm:$0xff]   ;;  %v5559_v27 = vld [vmem:[%s8560_s1 + $0x220] ss:$16 sps:$4 sm:$0xff]  }
   0xf   :  { %3564 = vmatpush1.bf16.msra.mxu0 %v5540_v14  ;;  %v5560_v28 = vld [vmem:[%s8560_s1 + $0x4] ss:$16 sps:$4 sm:$0xff]   ;;  %v5564_v30 = vld [vmem:[%s8560_s1] ss:$16 sps:$4 sm:$0xff]  }
  0x10   :  { %3605 = vmatpush1.bf16.msra.mxu1 %v5541_v15  ;;  %3565 = vmatprep.subr.bf16.mxu0 %v5542_v16  ;;  %v5562_v29 = vld [vmem:[%s8560_s1 + $0x204] ss:$16 sps:$4 sm:$0xff]   ;;  %v5565_v31 = vld [vmem:[%s8560_s1 + $0x200] ss:$16 sps:$4 sm:$0xff]  }
  0x11   :  { %3606 = vmatprep.subr.bf16.mxu1 %v5544_v17  ;;  %v5566_v32 = vld [vmem:[%s8560_s1 + $0x1e4] ss:$16 sps:$4 sm:$0xff]   ;;  %v5570_v34 = vld [vmem:[%s8560_s1 + $0x1e0] ss:$16 sps:$4 sm:$0xff]  }
  0x12   :  { %v5568_v33 = vld [vmem:[%s8560_s1 + $0x3e4] ss:$16 sps:$4 sm:$0xff]   ;;  %v5571_v35 = vld [vmem:[%s8560_s1 + $0x3e0] ss:$16 sps:$4 sm:$0xff]  }
  0x13   :  { %3566 = vmatpush1.bf16.msra.mxu0 %v5546_v18  ;;  %v5572_v36 = vld [vmem:[%s8560_s1 + $0x1c4] ss:$16 sps:$4 sm:$0xff]   ;;  %v5576_v38 = vld [vmem:[%s8560_s1 + $0x1c0] ss:$16 sps:$4 sm:$0xff]  }
  0x14   :  { %3607 = vmatpush1.bf16.msra.mxu1 %v5547_v19  ;;  %3567 = vmatprep.subr.bf16.mxu0 %v5548_v20  ;;  %v5574_v37 = vld [vmem:[%s8560_s1 + $0x3c4] ss:$16 sps:$4 sm:$0xff]   ;;  %v5577_v39 = vld [vmem:[%s8560_s1 + $0x3c0] ss:$16 sps:$4 sm:$0xff]  }
  0x15   :  { %3608 = vmatprep.subr.bf16.mxu1 %v5550_v21  ;;  %v5578_v40 = vld [vmem:[%s8560_s1 + $0x1a4] ss:$16 sps:$4 sm:$0xff]   ;;  %v5582_v42 = vld [vmem:[%s8560_s1 + $0x1a0] ss:$16 sps:$4 sm:$0xff]  }
  0x16   :  { %v5580_v41 = vld [vmem:[%s8560_s1 + $0x3a4] ss:$16 sps:$4 sm:$0xff]   ;;  %v5583_v43 = vld [vmem:[%s8560_s1 + $0x3a0] ss:$16 sps:$4 sm:$0xff]  }
  0x17   :  { %3568 = vmatpush1.bf16.msra.mxu0 %v5552_v22  ;;  %v5584_v44 = vld [vmem:[%s8560_s1 + $0x184] ss:$16 sps:$4 sm:$0xff]   ;;  %v5588_v49 = vld [vmem:[%s8560_s1 + $0x180] ss:$16 sps:$4 sm:$0xff]  }
  0x18   :  { %3609 = vmatpush1.bf16.msra.mxu1 %v5553_v23  ;;  %3569 = vmatprep.subr.bf16.mxu0 %v5554_v24  ;;  %v5586_v45 = vld [vmem:[%s8560_s1 + $0x384] ss:$16 sps:$4 sm:$0xff]   ;;  %v5589_v50 = vld [vmem:[%s8560_s1 + $0x380] ss:$16 sps:$4 sm:$0xff]  }
  0x19   :  { %3610 = vmatprep.subr.bf16.mxu1 %v5556_v25  ;;  %v29_v46 = vld [vmem:[%s8561_s0] sm:$0xff] }
  0x1a   :  { %v6629_v47 = vcombine.high %v29_v46, %v29_v46  ;;  %v5590_v52 = vld [vmem:[%s8560_s1 + $0x164] ss:$16 sps:$4 sm:$0xff]   ;;  %v5594_v54 = vld [vmem:[%s8560_s1 + $0x160] ss:$16 sps:$4 sm:$0xff]   ;;  %v6698_v6 = vcombine.low %v29_v46, %v29_v46 }
  0x1b   :  { %3570 = vmatpush1.bf16.msra.mxu0 %v5558_v26  ;;  %v5592_v53 = vld [vmem:[%s8560_s1 + $0x364] ss:$16 sps:$4 sm:$0xff]   ;;  %v5595_v55 = vld [vmem:[%s8560_s1 + $0x360] ss:$16 sps:$4 sm:$0xff]  }
  0x1c   :  { %3611 = vmatpush1.bf16.msra.mxu1 %v5559_v27  ;;  %3571 = vmatprep.subr.bf16.mxu0 %v5560_v28  ;;  %v5596_v56 = vld [vmem:[%s8560_s1 + $0x144] ss:$16 sps:$4 sm:$0xff]   ;;  %v5600_v58 = vld [vmem:[%s8560_s1 + $0x140] ss:$16 sps:$4 sm:$0xff]  }
  0x1d   :  { %3612 = vmatprep.subr.bf16.mxu1 %v5562_v29  ;;  %3589 = vmatprep.mubr.bf16.mxu0 %v6629_v47  ;;  %v5598_v57 = vld [vmem:[%s8560_s1 + $0x344] ss:$16 sps:$4 sm:$0xff]   ;;  %v5601_v59 = vld [vmem:[%s8560_s1 + $0x340] ss:$16 sps:$4 sm:$0xff]  }
  0x1e   :  { %v5602_v60 = vld [vmem:[%s8560_s1 + $0x124] ss:$16 sps:$4 sm:$0xff]   ;;  %v5606_v62 = vld [vmem:[%s8560_s1 + $0x120] ss:$16 sps:$4 sm:$0xff]  }
  0x1f   :  { %3572 = vmatpush1.bf16.msra.mxu0 %v5564_v30  ;;  %v5604_v61 = vld [vmem:[%s8560_s1 + $0x324] ss:$16 sps:$4 sm:$0xff]   ;;  %v5607_v63 = vld [vmem:[%s8560_s1 + $0x320] ss:$16 sps:$4 sm:$0xff]  }
  0x20   :  { %3613 = vmatpush1.bf16.msra.mxu1 %v5565_v31  ;;  %3573 = vmatprep.subr.bf16.mxu0 %v5566_v32  ;;  %v5608_v0 = vld [vmem:[%s8560_s1 + $0x104] ss:$16 sps:$4 sm:$0xff]   ;;  %v5612_v2 = vld [vmem:[%s8560_s1 + $0x100] ss:$16 sps:$4 sm:$0xff]  }
  0x21   :  { %3614 = vmatprep.subr.bf16.mxu1 %v5568_v33  ;;  %v5610_v1 = vld [vmem:[%s8560_s1 + $0x304] ss:$16 sps:$4 sm:$0xff]   ;;  %v5613_v3 = vld [vmem:[%s8560_s1 + $0x300] ss:$16 sps:$4 sm:$0xff]   ;;  %v6784_v33 = vld [vmem:[%s8561_s0 + $0x18] sm:$0xff] }
  0x22   :  { %v5620_v4 = vld [vmem:[%s8560_s1 + $0x4e4] ss:$16 sps:$4 sm:$0xff]   ;;  %v5618_v8 = vld [vmem:[%s8560_s1 + $0x4e0] ss:$16 sps:$4 sm:$0xff]  }
  0x23   :  { %3574 = vmatpush2.bf16.msra.mxu0 %v5570_v34  ;;  %v5623_v5 = vld [vmem:[%s8560_s1 + $0x6e4] ss:$16 sps:$4 sm:$0xff]   ;;  %v5621_v9 = vld [vmem:[%s8560_s1 + $0x6e0] ss:$16 sps:$4 sm:$0xff]  }
  0x24   :  { %3615 = vmatpush2.bf16.msra.mxu1 %v5571_v35  ;;  %3575 = vmatprep.subr.bf16.mxu0 %v5572_v36  ;;  %v5626_v10 = vld [vmem:[%s8560_s1 + $0x4c4] ss:$16 sps:$4 sm:$0xff]   ;;  %v5624_v12 = vld [vmem:[%s8560_s1 + $0x4c0] ss:$16 sps:$4 sm:$0xff]  }
  0x25   :  { %3616 = vmatprep.subr.bf16.mxu1 %v5574_v37  ;;  %v5629_v11 = vld [vmem:[%s8560_s1 + $0x6c4] ss:$16 sps:$4 sm:$0xff]   ;;  %v5627_v13 = vld [vmem:[%s8560_s1 + $0x6c0] ss:$16 sps:$4 sm:$0xff]   ;;  %v6798_v37 = vcombine.high %v6784_v33, %v6784_v33 }
  0x26   :  { %v5632_v14 = vld [vmem:[%s8560_s1 + $0x4a4] ss:$16 sps:$4 sm:$0xff]   ;;  %v5630_v16 = vld [vmem:[%s8560_s1 + $0x4a0] ss:$16 sps:$4 sm:$0xff]  }
  0x27   :  { %3576 = vmatpush2.bf16.msra.mxu0 %v5576_v38  ;;  %v5635_v15 = vld [vmem:[%s8560_s1 + $0x6a4] ss:$16 sps:$4 sm:$0xff]   ;;  %v5633_v17 = vld [vmem:[%s8560_s1 + $0x6a0] ss:$16 sps:$4 sm:$0xff]  }
  0x28   :  { %3617 = vmatpush2.bf16.msra.mxu1 %v5577_v39  ;;  %3577 = vmatprep.subr.bf16.mxu0 %v5578_v40  ;;  %v5638_v18 = vld [vmem:[%s8560_s1 + $0x484] ss:$16 sps:$4 sm:$0xff]   ;;  %v5636_v20 = vld [vmem:[%s8560_s1 + $0x480] ss:$16 sps:$4 sm:$0xff]  }
  0x29   :  { %3618 = vmatprep.subr.bf16.mxu1 %v5580_v41  ;;  %v5641_v19 = vld [vmem:[%s8560_s1 + $0x684] ss:$16 sps:$4 sm:$0xff]   ;;  %v5639_v21 = vld [vmem:[%s8560_s1 + $0x680] ss:$16 sps:$4 sm:$0xff]  }
  0x2a   :  { %v5644_v22 = vld [vmem:[%s8560_s1 + $0x464] ss:$16 sps:$4 sm:$0xff]   ;;  %v5642_v24 = vld [vmem:[%s8560_s1 + $0x460] ss:$16 sps:$4 sm:$0xff]  }
  0x2b   :  { %3578 = vmatpush2.bf16.msra.mxu0 %v5582_v42  ;;  %v5647_v23 = vld [vmem:[%s8560_s1 + $0x664] ss:$16 sps:$4 sm:$0xff]   ;;  %v5645_v25 = vld [vmem:[%s8560_s1 + $0x660] ss:$16 sps:$4 sm:$0xff]  }
  0x2c   :  { %3619 = vmatpush2.bf16.msra.mxu1 %v5583_v43  ;;  %3579 = vmatprep.subr.bf16.mxu0 %v5584_v44  ;;  %v5650_v26 = vld [vmem:[%s8560_s1 + $0x444] ss:$16 sps:$4 sm:$0xff]   ;;  %v5648_v28 = vld [vmem:[%s8560_s1 + $0x440] ss:$16 sps:$4 sm:$0xff]  }
  0x2d   :  { %3620 = vmatprep.subr.bf16.mxu1 %v5586_v45  ;;  %v5653_v27 = vld [vmem:[%s8560_s1 + $0x644] ss:$16 sps:$4 sm:$0xff]   ;;  %v5651_v29 = vld [vmem:[%s8560_s1 + $0x640] ss:$16 sps:$4 sm:$0xff]  }
  0x2e   :  { %v5656_v30 = vld [vmem:[%s8560_s1 + $0x424] ss:$16 sps:$4 sm:$0xff]   ;;  %v5654_v34 = vld [vmem:[%s8560_s1 + $0x420] ss:$16 sps:$4 sm:$0xff]  }
  0x2f   :  { %3580 = vmatpush2.bf16.msra.mxu0 %v5588_v49  ;;  %v5659_v31 = vld [vmem:[%s8560_s1 + $0x624] ss:$16 sps:$4 sm:$0xff]   ;;  %v5657_v35 = vld [vmem:[%s8560_s1 + $0x620] ss:$16 sps:$4 sm:$0xff]  }
  0x30   :  { %3621 = vmatpush2.bf16.msra.mxu1 %v5589_v50  ;;  %3581 = vmatprep.subr.bf16.mxu0 %v5590_v52  ;;  %v6779_v32 = vld [vmem:[%s8561_s0 + $0x10] sm:$0xff] }
  0x31   :  { %3622 = vmatprep.subr.bf16.mxu1 %v5592_v53  ;;  %v6794_v36 = vcombine.high %v6779_v32, %v6779_v32  ;;  %v5662_v38 = vld [vmem:[%s8560_s1 + $0x404] ss:$16 sps:$4 sm:$0xff]   ;;  %v5660_v40 = vld [vmem:[%s8560_s1 + $0x400] ss:$16 sps:$4 sm:$0xff]  }
  0x32   :  { %v5665_v39 = vld [vmem:[%s8560_s1 + $0x604] ss:$16 sps:$4 sm:$0xff]   ;;  %v5663_v41 = vld [vmem:[%s8560_s1 + $0x600] ss:$16 sps:$4 sm:$0xff]  }
  0x33   :  { %3582 = vmatpush2.bf16.msra.mxu0 %v5594_v54  ;;  %v5668_v42 = vld [vmem:[%s8560_s1 + $0x5e4] ss:$16 sps:$4 sm:$0xff]   ;;  %v5666_v44 = vld [vmem:[%s8560_s1 + $0x5e0] ss:$16 sps:$4 sm:$0xff]  }
  0x34   :  { %3623 = vmatpush2.bf16.msra.mxu1 %v5595_v55  ;;  %3583 = vmatprep.subr.bf16.mxu0 %v5596_v56  ;;  %v5671_v43 = vld [vmem:[%s8560_s1 + $0x7e4] ss:$16 sps:$4 sm:$0xff]   ;;  %v5669_v45 = vld [vmem:[%s8560_s1 + $0x7e0] ss:$16 sps:$4 sm:$0xff]  }
  0x35   :  { %3624 = vmatprep.subr.bf16.mxu1 %v5598_v57  ;;  %v5674_v46 = vld [vmem:[%s8560_s1 + $0x5c4] ss:$16 sps:$4 sm:$0xff]   ;;  %v5672_v49 = vld [vmem:[%s8560_s1 + $0x5c0] ss:$16 sps:$4 sm:$0xff]  }
  0x36   :  { %v5677_v48 = vld [vmem:[%s8560_s1 + $0x7c4] ss:$16 sps:$4 sm:$0xff]   ;;  %v5675_v50 = vld [vmem:[%s8560_s1 + $0x7c0] ss:$16 sps:$4 sm:$0xff]  }
  0x37   :  { %3584 = vmatpush2.bf16.msra.mxu0 %v5600_v58  ;;  %v5680_v52 = vld [vmem:[%s8560_s1 + $0x5a4] ss:$16 sps:$4 sm:$0xff]   ;;  %v5678_v54 = vld [vmem:[%s8560_s1 + $0x5a0] ss:$16 sps:$4 sm:$0xff]  }
  0x38   :  { %3625 = vmatpush2.bf16.msra.mxu1 %v5601_v59  ;;  %3585 = vmatprep.subr.bf16.mxu0 %v5602_v60  ;;  %v5683_v53 = vld [vmem:[%s8560_s1 + $0x7a4] ss:$16 sps:$4 sm:$0xff]   ;;  %v5681_v55 = vld [vmem:[%s8560_s1 + $0x7a0] ss:$16 sps:$4 sm:$0xff]  }
  0x39   :  { %3626 = vmatprep.subr.bf16.mxu1 %v5604_v61  ;;  %v5686_v56 = vld [vmem:[%s8560_s1 + $0x584] ss:$16 sps:$4 sm:$0xff]   ;;  %v5684_v58 = vld [vmem:[%s8560_s1 + $0x580] ss:$16 sps:$4 sm:$0xff]  }
  0x3a   :  { %v5689_v57 = vld [vmem:[%s8560_s1 + $0x784] ss:$16 sps:$4 sm:$0xff]   ;;  %v5687_v59 = vld [vmem:[%s8560_s1 + $0x780] ss:$16 sps:$4 sm:$0xff]  }
  0x3b   :  { %3586 = vmatpush2.bf16.msra.mxu0 %v5606_v62  ;;  %v5692_v60 = vld [vmem:[%s8560_s1 + $0x564] ss:$16 sps:$4 sm:$0xff]   ;;  %v5690_v62 = vld [vmem:[%s8560_s1 + $0x560] ss:$16 sps:$4 sm:$0xff]  }
  0x3c   :  { %3627 = vmatpush2.bf16.msra.mxu1 %v5607_v63  ;;  %3587 = vmatprep.subr.bf16.mxu0 %v5608_v0  ;;  %v5695_v61 = vld [vmem:[%s8560_s1 + $0x764] ss:$16 sps:$4 sm:$0xff]   ;;  %v5693_v63 = vld [vmem:[%s8560_s1 + $0x760] ss:$16 sps:$4 sm:$0xff]  }
  0x3d   :  { %3628 = vmatprep.subr.bf16.mxu1 %v5610_v1  ;;  %v5698_v0 = vld [vmem:[%s8560_s1 + $0x544] ss:$16 sps:$4 sm:$0xff]  }
  0x3e   :  { %v5701_v1 = vld [vmem:[%s8560_s1 + $0x744] ss:$16 sps:$4 sm:$0xff]  }
  0x3f   :  { %3588 = vmatpush2.bf16.msra.mxu0 %v5612_v2  ;;  %v5696_v2 = vld [vmem:[%s8560_s1 + $0x540] ss:$16 sps:$4 sm:$0xff]  }
  0x40   :  { %3629 = vmatpush2.bf16.msra.mxu1 %v5613_v3  ;;  %3639 = vmatprep.subr.bf16.mxu0 %v5620_v4  ;;  %v5699_v3 = vld [vmem:[%s8560_s1 + $0x740] ss:$16 sps:$4 sm:$0xff]   ;;  %v5704_v4 = vld [vmem:[%s8560_s1 + $0x524] ss:$16 sps:$4 sm:$0xff]  }
  0x41   :  { %3680 = vmatprep.subr.bf16.mxu1 %v5623_v5  ;;  %v5707_v5 = vld [vmem:[%s8560_s1 + $0x724] ss:$16 sps:$4 sm:$0xff]  }
  0x42   :  { %3590 = vmatmul.mubr.bf16.vlgmr.msra.gmra.mxu0 %v6698_v6 }
  0x43   :  { %3631 = vmatmul.mubr.bf16.vlgmr.msra.gmra.mxu1 %v6700_v7  ;;  %3640 = vmatpush1.bf16.msra.mxu0 %v5618_v8  ;;  %v5702_v8 = vld [vmem:[%s8560_s1 + $0x520] ss:$16 sps:$4 sm:$0xff]  }
  0x44   :  { %3681 = vmatpush1.bf16.msra.mxu1 %v5621_v9  ;;  %3641 = vmatprep.subr.bf16.mxu0 %v5626_v10  ;;  %v5705_v9 = vld [vmem:[%s8560_s1 + $0x720] ss:$16 sps:$4 sm:$0xff]   ;;  %v5710_v10 = vld [vmem:[%s8560_s1 + $0x504] ss:$16 sps:$4 sm:$0xff]  }
  0x45   :  { %3682 = vmatprep.subr.bf16.mxu1 %v5629_v11  ;;  %3671 = vmatprep.mubr.bf16.mxu0 %v6794_v36  ;;  %v5713_v11 = vld [vmem:[%s8560_s1 + $0x704] ss:$16 sps:$4 sm:$0xff]  }
  0x46   :  { %3712 = vmatprep.mubr.bf16.mxu1 %v6798_v37 }
  0x47   :  { %3642 = vmatpush1.bf16.msra.mxu0 %v5624_v12  ;;  %v5708_v12 = vld [vmem:[%s8560_s1 + $0x500] ss:$16 sps:$4 sm:$0xff]  }
  0x48   :  { %3683 = vmatpush1.bf16.msra.mxu1 %v5627_v13  ;;  %3643 = vmatprep.subr.bf16.mxu0 %v5632_v14  ;;  %v5711_v13 = vld [vmem:[%s8560_s1 + $0x700] ss:$16 sps:$4 sm:$0xff]   ;;  %v5720_v14 = vld [vmem:[%s8560_s1 + $0x8e4] ss:$16 sps:$4 sm:$0xff]  }
  0x49   :  { %3684 = vmatprep.subr.bf16.mxu1 %v5635_v15  ;;  %v5723_v15 = vld [vmem:[%s8560_s1 + $0xae4] ss:$16 sps:$4 sm:$0xff]  }
  0x4b   :  { %3644 = vmatpush1.bf16.msra.mxu0 %v5630_v16  ;;  %v6918_v16 = vcombine.low %v6779_v32, %v6779_v32  ;;  %v5738_v32 = vld [vmem:[%s8560_s1 + $0x884] ss:$16 sps:$4 sm:$0xff]  }
  0x4c   :  { %3685 = vmatpush1.bf16.msra.mxu1 %v5633_v17  ;;  %3645 = vmatprep.subr.bf16.mxu0 %v5638_v18  ;;  %v6922_v17 = vcombine.low %v6784_v33, %v6784_v33  ;;  %v5718_v18 = vld [vmem:[%s8560_s1 + $0x8e0] ss:$16 sps:$4 sm:$0xff]   ;;  %v5741_v33 = vld [vmem:[%s8560_s1 + $0xa84] ss:$16 sps:$4 sm:$0xff]  }
  0x4d   :  { %3686 = vmatprep.subr.bf16.mxu1 %v5641_v19  ;;  %v5721_v19 = vld [vmem:[%s8560_s1 + $0xae0] ss:$16 sps:$4 sm:$0xff]  }
  0x4f   :  { %3646 = vmatpush1.bf16.msra.mxu0 %v5636_v20  ;;  %v5726_v20 = vld [vmem:[%s8560_s1 + $0x8c4] ss:$16 sps:$4 sm:$0xff]  }
  0x50   :  { %3687 = vmatpush1.bf16.msra.mxu1 %v5639_v21  ;;  %3647 = vmatprep.subr.bf16.mxu0 %v5644_v22  ;;  %v5729_v21 = vld [vmem:[%s8560_s1 + $0xac4] ss:$16 sps:$4 sm:$0xff]  }
  0x51   :  { %3688 = vmatprep.subr.bf16.mxu1 %v5647_v23  ;;  %v6939_v22 = vld [vmem:[%s8561_s0 + $0x20] sm:$0xff]  ;;  %v6944_v23 = vld [vmem:[%s8561_s0 + $0x28] sm:$0xff] }
  0x53   :  { %3648 = vmatpush1.bf16.msra.mxu0 %v5642_v24  ;;  %v6948_v24 = vcombine.high %v6939_v22, %v6939_v22 }
  0x54   :  { %3689 = vmatpush1.bf16.msra.mxu1 %v5645_v25  ;;  %3649 = vmatprep.subr.bf16.mxu0 %v5650_v26  ;;  %v6952_v25 = vcombine.high %v6944_v23, %v6944_v23  ;;  %v5724_v26 = vld [vmem:[%s8560_s1 + $0x8c0] ss:$16 sps:$4 sm:$0xff]  }
  0x55   :  { %3690 = vmatprep.subr.bf16.mxu1 %v5653_v27  ;;  %v5727_v27 = vld [vmem:[%s8560_s1 + $0xac0] ss:$16 sps:$4 sm:$0xff]  }
  0x57   :  { %3650 = vmatpush1.bf16.msra.mxu0 %v5648_v28  ;;  %v5732_v28 = vld [vmem:[%s8560_s1 + $0x8a4] ss:$16 sps:$4 sm:$0xff]  }
  0x58   :  { %3691 = vmatpush1.bf16.msra.mxu1 %v5651_v29  ;;  %3651 = vmatprep.subr.bf16.mxu0 %v5656_v30  ;;  %v5735_v29 = vld [vmem:[%s8560_s1 + $0xaa4] ss:$16 sps:$4 sm:$0xff]   ;;  %v5730_v30 = vld [vmem:[%s8560_s1 + $0x8a0] ss:$16 sps:$4 sm:$0xff]  }
  0x59   :  { %3692 = vmatprep.subr.bf16.mxu1 %v5659_v31  ;;  %v5733_v31 = vld [vmem:[%s8560_s1 + $0xaa0] ss:$16 sps:$4 sm:$0xff]  }
  0x5b   :  { %3652 = vmatpush1.bf16.msra.mxu0 %v5654_v34  ;;  %v5736_v34 = vld [vmem:[%s8560_s1 + $0x880] ss:$16 sps:$4 sm:$0xff]  }
  0x5c   :  { %3693 = vmatpush1.bf16.msra.mxu1 %v5657_v35  ;;  %3653 = vmatprep.subr.bf16.mxu0 %v5662_v38  ;;  %v5739_v35 = vld [vmem:[%s8560_s1 + $0xa80] ss:$16 sps:$4 sm:$0xff]   ;;  %v5744_v38 = vld [vmem:[%s8560_s1 + $0x864] ss:$16 sps:$4 sm:$0xff]  }
  0x5d   :  { %3694 = vmatprep.subr.bf16.mxu1 %v5665_v39  ;;  %v5747_v39 = vld [vmem:[%s8560_s1 + $0xa64] ss:$16 sps:$4 sm:$0xff]  }
  0x5f   :  { %3654 = vmatpush1.bf16.msra.mxu0 %v5660_v40  ;;  %v5742_v40 = vld [vmem:[%s8560_s1 + $0x860] ss:$16 sps:$4 sm:$0xff]  }
  0x60   :  { %3695 = vmatpush1.bf16.msra.mxu1 %v5663_v41  ;;  %3655 = vmatprep.subr.bf16.mxu0 %v5668_v42  ;;  %v5745_v41 = vld [vmem:[%s8560_s1 + $0xa60] ss:$16 sps:$4 sm:$0xff]   ;;  %v5750_v42 = vld [vmem:[%s8560_s1 + $0x844] ss:$16 sps:$4 sm:$0xff]  }
  0x61   :  { %3696 = vmatprep.subr.bf16.mxu1 %v5671_v43  ;;  %v5753_v43 = vld [vmem:[%s8560_s1 + $0xa44] ss:$16 sps:$4 sm:$0xff]  }
  0x63   :  { %3656 = vmatpush2.bf16.msra.mxu0 %v5666_v44  ;;  %v5748_v44 = vld [vmem:[%s8560_s1 + $0x840] ss:$16 sps:$4 sm:$0xff]  }
  0x64   :  { %3697 = vmatpush2.bf16.msra.mxu1 %v5669_v45  ;;  %3657 = vmatprep.subr.bf16.mxu0 %v5674_v46  ;;  %v5751_v45 = vld [vmem:[%s8560_s1 + $0xa40] ss:$16 sps:$4 sm:$0xff]   ;;  %v5756_v46 = vld [vmem:[%s8560_s1 + $0x824] ss:$16 sps:$4 sm:$0xff]  }
  0x65   :  { %3698 = vmatprep.subr.bf16.mxu1 %v5677_v48  ;;  %v5759_v48 = vld [vmem:[%s8560_s1 + $0xa24] ss:$16 sps:$4 sm:$0xff]  }
  0x67   :  { %3658 = vmatpush2.bf16.msra.mxu0 %v5672_v49  ;;  %v5754_v49 = vld [vmem:[%s8560_s1 + $0x820] ss:$16 sps:$4 sm:$0xff]  }
  0x68   :  { %3699 = vmatpush2.bf16.msra.mxu1 %v5675_v50  ;;  %3659 = vmatprep.subr.bf16.mxu0 %v5680_v52  ;;  %v5757_v50 = vld [vmem:[%s8560_s1 + $0xa20] ss:$16 sps:$4 sm:$0xff]   ;;  %v5762_v52 = vld [vmem:[%s8560_s1 + $0x804] ss:$16 sps:$4 sm:$0xff]  }
  0x69   :  { %3700 = vmatprep.subr.bf16.mxu1 %v5683_v53  ;;  %v5765_v53 = vld [vmem:[%s8560_s1 + $0xa04] ss:$16 sps:$4 sm:$0xff]  }
  0x6b   :  { %3660 = vmatpush2.bf16.msra.mxu0 %v5678_v54  ;;  %v5760_v54 = vld [vmem:[%s8560_s1 + $0x800] ss:$16 sps:$4 sm:$0xff]  }
  0x6c   :  { %3701 = vmatpush2.bf16.msra.mxu1 %v5681_v55  ;;  %3661 = vmatprep.subr.bf16.mxu0 %v5686_v56  ;;  %v5763_v55 = vld [vmem:[%s8560_s1 + $0xa00] ss:$16 sps:$4 sm:$0xff]   ;;  %v5768_v56 = vld [vmem:[%s8560_s1 + $0x9e4] ss:$16 sps:$4 sm:$0xff]  }
  0x6d   :  { %3702 = vmatprep.subr.bf16.mxu1 %v5689_v57  ;;  %v5771_v57 = vld [vmem:[%s8560_s1 + $0xbe4] ss:$16 sps:$4 sm:$0xff]  }
  0x6f   :  { %3662 = vmatpush2.bf16.msra.mxu0 %v5684_v58  ;;  %v5766_v58 = vld [vmem:[%s8560_s1 + $0x9e0] ss:$16 sps:$4 sm:$0xff]  }
  0x70   :  { %3703 = vmatpush2.bf16.msra.mxu1 %v5687_v59  ;;  %3663 = vmatprep.subr.bf16.mxu0 %v5692_v60  ;;  %v5769_v59 = vld [vmem:[%s8560_s1 + $0xbe0] ss:$16 sps:$4 sm:$0xff]   ;;  %v5774_v60 = vld [vmem:[%s8560_s1 + $0x9c4] ss:$16 sps:$4 sm:$0xff]  }
  0x71   :  { %3704 = vmatprep.subr.bf16.mxu1 %v5695_v61  ;;  %v5777_v61 = vld [vmem:[%s8560_s1 + $0xbc4] ss:$16 sps:$4 sm:$0xff]  }
  0x73   :  { %3664 = vmatpush2.bf16.msra.mxu0 %v5690_v62  ;;  %v5772_v62 = vld [vmem:[%s8560_s1 + $0x9c0] ss:$16 sps:$4 sm:$0xff]  }
  0x74   :  { %3705 = vmatpush2.bf16.msra.mxu1 %v5693_v63  ;;  %3665 = vmatprep.subr.bf16.mxu0 %v5698_v0  ;;  %v5775_v63 = vld [vmem:[%s8560_s1 + $0xbc0] ss:$16 sps:$4 sm:$0xff]   ;;  %v5780_v0 = vld [vmem:[%s8560_s1 + $0x9a4] ss:$16 sps:$4 sm:$0xff]  }
  0x75   :  { %3706 = vmatprep.subr.bf16.mxu1 %v5701_v1  ;;  %v5783_v1 = vld [vmem:[%s8560_s1 + $0xba4] ss:$16 sps:$4 sm:$0xff]  }
  0x77   :  { %3666 = vmatpush2.bf16.msra.mxu0 %v5696_v2  ;;  %v5778_v2 = vld [vmem:[%s8560_s1 + $0x9a0] ss:$16 sps:$4 sm:$0xff]  }
  0x78   :  { %3707 = vmatpush2.bf16.msra.mxu1 %v5699_v3  ;;  %3667 = vmatprep.subr.bf16.mxu0 %v5704_v4  ;;  %v5781_v3 = vld [vmem:[%s8560_s1 + $0xba0] ss:$16 sps:$4 sm:$0xff]   ;;  %v5786_v4 = vld [vmem:[%s8560_s1 + $0x984] ss:$16 sps:$4 sm:$0xff]  }
  0x79   :  { %3708 = vmatprep.subr.bf16.mxu1 %v5707_v5  ;;  %v5789_v5 = vld [vmem:[%s8560_s1 + $0xb84] ss:$16 sps:$4 sm:$0xff]  }
  0x7b   :  { %3668 = vmatpush2.bf16.msra.mxu0 %v5702_v8  ;;  %v5784_v8 = vld [vmem:[%s8560_s1 + $0x980] ss:$16 sps:$4 sm:$0xff]  }
  0x7c   :  { %3709 = vmatpush2.bf16.msra.mxu1 %v5705_v9  ;;  %3669 = vmatprep.subr.bf16.mxu0 %v5710_v10  ;;  %v5787_v9 = vld [vmem:[%s8560_s1 + $0xb80] ss:$16 sps:$4 sm:$0xff]   ;;  %v5792_v10 = vld [vmem:[%s8560_s1 + $0x964] ss:$16 sps:$4 sm:$0xff]  }
  0x7d   :  { %3710 = vmatprep.subr.bf16.mxu1 %v5713_v11  ;;  %v5795_v11 = vld [vmem:[%s8560_s1 + $0xb64] ss:$16 sps:$4 sm:$0xff]  }
  0x7f   :  { %3670 = vmatpush2.bf16.msra.mxu0 %v5708_v12  ;;  %v5790_v12 = vld [vmem:[%s8560_s1 + $0x960] ss:$16 sps:$4 sm:$0xff]  }
  0x80   :  { %3711 = vmatpush2.bf16.msra.mxu1 %v5711_v13  ;;  %3721 = vmatprep.subr.bf16.mxu0 %v5720_v14  ;;  %v5793_v13 = vld [vmem:[%s8560_s1 + $0xb60] ss:$16 sps:$4 sm:$0xff]   ;;  %v5798_v14 = vld [vmem:[%s8560_s1 + $0x944] ss:$16 sps:$4 sm:$0xff]  }
  0x81   :  { %3762 = vmatprep.subr.bf16.mxu1 %v5723_v15  ;;  %v5801_v15 = vld [vmem:[%s8560_s1 + $0xb44] ss:$16 sps:$4 sm:$0xff]  }
  0x82   :  { %3672 = vmatmul.mubr.bf16.vlgmr.msra.gmra.mxu0 %v6918_v16 }
  0x83   :  { %3713 = vmatmul.mubr.bf16.vlgmr.msra.gmra.mxu1 %v6922_v17  ;;  %3722 = vmatpush1.bf16.msra.mxu0 %v5718_v18  ;;  %v5796_v18 = vld [vmem:[%s8560_s1 + $0x940] ss:$16 sps:$4 sm:$0xff]  }
  0x84   :  { %3763 = vmatpush1.bf16.msra.mxu1 %v5721_v19  ;;  %3723 = vmatprep.subr.bf16.mxu0 %v5726_v20  ;;  %v5799_v19 = vld [vmem:[%s8560_s1 + $0xb40] ss:$16 sps:$4 sm:$0xff]   ;;  %v5804_v20 = vld [vmem:[%s8560_s1 + $0x924] ss:$16 sps:$4 sm:$0xff]  }
  0x85   :  { %3764 = vmatprep.subr.bf16.mxu1 %v5729_v21  ;;  %3753 = vmatprep.mubr.bf16.mxu0 %v6948_v24  ;;  %v5807_v21 = vld [vmem:[%s8560_s1 + $0xb24] ss:$16 sps:$4 sm:$0xff]  }
  0x86   :  { %3794 = vmatprep.mubr.bf16.mxu1 %v6952_v25 }
  0x87   :  { %3724 = vmatpush1.bf16.msra.mxu0 %v5724_v26  ;;  %v5802_v26 = vld [vmem:[%s8560_s1 + $0x920] ss:$16 sps:$4 sm:$0xff]  }
  0x88   :  { %3765 = vmatpush1.bf16.msra.mxu1 %v5727_v27  ;;  %3725 = vmatprep.subr.bf16.mxu0 %v5732_v28  ;;  %v5805_v27 = vld [vmem:[%s8560_s1 + $0xb20] ss:$16 sps:$4 sm:$0xff]   ;;  %v5810_v28 = vld [vmem:[%s8560_s1 + $0x904] ss:$16 sps:$4 sm:$0xff]  }
  0x89   :  { %3766 = vmatprep.subr.bf16.mxu1 %v5735_v29  ;;  %v5813_v29 = vld [vmem:[%s8560_s1 + $0xb04] ss:$16 sps:$4 sm:$0xff]  }
  0x8b   :  { %3726 = vmatpush1.bf16.msra.mxu0 %v5730_v30  ;;  %v5808_v30 = vld [vmem:[%s8560_s1 + $0x900] ss:$16 sps:$4 sm:$0xff]  }
  0x8c   :  { %3767 = vmatpush1.bf16.msra.mxu1 %v5733_v31  ;;  %3727 = vmatprep.subr.bf16.mxu0 %v5738_v32  ;;  %v5811_v31 = vld [vmem:[%s8560_s1 + $0xb00] ss:$16 sps:$4 sm:$0xff]   ;;  %v5820_v32 = vld [vmem:[%s8560_s1 + $0xce4] ss:$16 sps:$4 sm:$0xff]  }
  0x8d   :  { %3768 = vmatprep.subr.bf16.mxu1 %v5741_v33  ;;  %v5823_v33 = vld [vmem:[%s8560_s1 + $0xee4] ss:$16 sps:$4 sm:$0xff]  }
  0x8f   :  { %3728 = vmatpush1.bf16.msra.mxu0 %v5736_v34  ;;  %v5818_v34 = vld [vmem:[%s8560_s1 + $0xce0] ss:$16 sps:$4 sm:$0xff]  }
  0x90   :  { %3769 = vmatpush1.bf16.msra.mxu1 %v5739_v35  ;;  %3729 = vmatprep.subr.bf16.mxu0 %v5744_v38  ;;  %v5821_v35 = vld [vmem:[%s8560_s1 + $0xee0] ss:$16 sps:$4 sm:$0xff]   ;;  %v7146_v38 = vcombine.low %v6939_v22, %v6939_v22  ;;  %v5826_v22 = vld [vmem:[%s8560_s1 + $0xcc4] ss:$16 sps:$4 sm:$0xff]  }
  0x91   :  { %3770 = vmatprep.subr.bf16.mxu1 %v5747_v39  ;;  %v7150_v39 = vcombine.low %v6944_v23, %v6944_v23  ;;  %v5829_v23 = vld [vmem:[%s8560_s1 + $0xec4] ss:$16 sps:$4 sm:$0xff]  }
  0x93   :  { %3730 = vmatpush1.bf16.msra.mxu0 %v5742_v40  ;;  %v7155_v40 = vld [vmem:[%s8561_s0 + $0x30] sm:$0xff] }
  0x94   :  { %3771 = vmatpush1.bf16.msra.mxu1 %v5745_v41  ;;  %3731 = vmatprep.subr.bf16.mxu0 %v5750_v42  ;;  %v7160_v41 = vld [vmem:[%s8561_s0 + $0x38] sm:$0xff]  ;;  %v7170_v42 = vcombine.high %v7155_v40, %v7155_v40 }
  0x95   :  { %3772 = vmatprep.subr.bf16.mxu1 %v5753_v43  ;;  %v7174_v43 = vcombine.high %v7160_v41, %v7160_v41 }
  0x97   :  { %3732 = vmatpush1.bf16.msra.mxu0 %v5748_v44  ;;  %v5824_v44 = vld [vmem:[%s8560_s1 + $0xcc0] ss:$16 sps:$4 sm:$0xff]  }
  0x98   :  { %3773 = vmatpush1.bf16.msra.mxu1 %v5751_v45  ;;  %3733 = vmatprep.subr.bf16.mxu0 %v5756_v46  ;;  %v5827_v45 = vld [vmem:[%s8560_s1 + $0xec0] ss:$16 sps:$4 sm:$0xff]   ;;  %v5832_v46 = vld [vmem:[%s8560_s1 + $0xca4] ss:$16 sps:$4 sm:$0xff]  }
  0x99   :  { %3774 = vmatprep.subr.bf16.mxu1 %v5759_v48  ;;  %v5835_v48 = vld [vmem:[%s8560_s1 + $0xea4] ss:$16 sps:$4 sm:$0xff]  }
  0x9b   :  { %3734 = vmatpush1.bf16.msra.mxu0 %v5754_v49  ;;  %v5830_v49 = vld [vmem:[%s8560_s1 + $0xca0] ss:$16 sps:$4 sm:$0xff]  }
  0x9c   :  { %3775 = vmatpush1.bf16.msra.mxu1 %v5757_v50  ;;  %3735 = vmatprep.subr.bf16.mxu0 %v5762_v52  ;;  %v5833_v50 = vld [vmem:[%s8560_s1 + $0xea0] ss:$16 sps:$4 sm:$0xff]   ;;  %v5838_v52 = vld [vmem:[%s8560_s1 + $0xc84] ss:$16 sps:$4 sm:$0xff]  }
  0x9d   :  { %3776 = vmatprep.subr.bf16.mxu1 %v5765_v53  ;;  %v5841_v53 = vld [vmem:[%s8560_s1 + $0xe84] ss:$16 sps:$4 sm:$0xff]  }
  0x9f   :  { %3736 = vmatpush1.bf16.msra.mxu0 %v5760_v54  ;;  %v5836_v54 = vld [vmem:[%s8560_s1 + $0xc80] ss:$16 sps:$4 sm:$0xff]  }
  0xa0   :  { %3777 = vmatpush1.bf16.msra.mxu1 %v5763_v55  ;;  %3737 = vmatprep.subr.bf16.mxu0 %v5768_v56  ;;  %v5839_v55 = vld [vmem:[%s8560_s1 + $0xe80] ss:$16 sps:$4 sm:$0xff]   ;;  %v5844_v56 = vld [vmem:[%s8560_s1 + $0xc64] ss:$16 sps:$4 sm:$0xff]  }
  0xa1   :  { %3778 = vmatprep.subr.bf16.mxu1 %v5771_v57  ;;  %v5847_v57 = vld [vmem:[%s8560_s1 + $0xe64] ss:$16 sps:$4 sm:$0xff]  }
  0xa3   :  { %3738 = vmatpush2.bf16.msra.mxu0 %v5766_v58  ;;  %v5842_v58 = vld [vmem:[%s8560_s1 + $0xc60] ss:$16 sps:$4 sm:$0xff]  }
  0xa4   :  { %3779 = vmatpush2.bf16.msra.mxu1 %v5769_v59  ;;  %3739 = vmatprep.subr.bf16.mxu0 %v5774_v60  ;;  %v5845_v59 = vld [vmem:[%s8560_s1 + $0xe60] ss:$16 sps:$4 sm:$0xff]   ;;  %v5850_v60 = vld [vmem:[%s8560_s1 + $0xc44] ss:$16 sps:$4 sm:$0xff]  }
  0xa5   :  { %3780 = vmatprep.subr.bf16.mxu1 %v5777_v61  ;;  %v5853_v61 = vld [vmem:[%s8560_s1 + $0xe44] ss:$16 sps:$4 sm:$0xff]  }
  0xa7   :  { %3740 = vmatpush2.bf16.msra.mxu0 %v5772_v62  ;;  %v5848_v62 = vld [vmem:[%s8560_s1 + $0xc40] ss:$16 sps:$4 sm:$0xff]  }
  0xa8   :  { %3781 = vmatpush2.bf16.msra.mxu1 %v5775_v63  ;;  %3741 = vmatprep.subr.bf16.mxu0 %v5780_v0  ;;  %v5851_v63 = vld [vmem:[%s8560_s1 + $0xe40] ss:$16 sps:$4 sm:$0xff]   ;;  %v5856_v0 = vld [vmem:[%s8560_s1 + $0xc24] ss:$16 sps:$4 sm:$0xff]  }
  0xa9   :  { %3782 = vmatprep.subr.bf16.mxu1 %v5783_v1  ;;  %v5859_v1 = vld [vmem:[%s8560_s1 + $0xe24] ss:$16 sps:$4 sm:$0xff]  }
  0xab   :  { %3742 = vmatpush2.bf16.msra.mxu0 %v5778_v2  ;;  %v5854_v2 = vld [vmem:[%s8560_s1 + $0xc20] ss:$16 sps:$4 sm:$0xff]  }
  0xac   :  { %3783 = vmatpush2.bf16.msra.mxu1 %v5781_v3  ;;  %3743 = vmatprep.subr.bf16.mxu0 %v5786_v4  ;;  %v5857_v3 = vld [vmem:[%s8560_s1 + $0xe20] ss:$16 sps:$4 sm:$0xff]   ;;  %v5862_v4 = vld [vmem:[%s8560_s1 + $0xc04] ss:$16 sps:$4 sm:$0xff]  }
  0xad   :  { %3784 = vmatprep.subr.bf16.mxu1 %v5789_v5  ;;  %v5865_v5 = vld [vmem:[%s8560_s1 + $0xe04] ss:$16 sps:$4 sm:$0xff]  }
  0xaf   :  { %3744 = vmatpush2.bf16.msra.mxu0 %v5784_v8  ;;  %v5860_v8 = vld [vmem:[%s8560_s1 + $0xc00] ss:$16 sps:$4 sm:$0xff]  }
  0xb0   :  { %3785 = vmatpush2.bf16.msra.mxu1 %v5787_v9  ;;  %3745 = vmatprep.subr.bf16.mxu0 %v5792_v10  ;;  %v5863_v9 = vld [vmem:[%s8560_s1 + $0xe00] ss:$16 sps:$4 sm:$0xff]   ;;  %v5868_v10 = vld [vmem:[%s8560_s1 + $0xde4] ss:$16 sps:$4 sm:$0xff]  }
  0xb1   :  { %3786 = vmatprep.subr.bf16.mxu1 %v5795_v11  ;;  %v5871_v11 = vld [vmem:[%s8560_s1 + $0xfe4] ss:$16 sps:$4 sm:$0xff]  }
  0xb3   :  { %3746 = vmatpush2.bf16.msra.mxu0 %v5790_v12  ;;  %v5866_v12 = vld [vmem:[%s8560_s1 + $0xde0] ss:$16 sps:$4 sm:$0xff]  }
  0xb4   :  { %3787 = vmatpush2.bf16.msra.mxu1 %v5793_v13  ;;  %3747 = vmatprep.subr.bf16.mxu0 %v5798_v14  ;;  %v5869_v13 = vld [vmem:[%s8560_s1 + $0xfe0] ss:$16 sps:$4 sm:$0xff]   ;;  %v5874_v14 = vld [vmem:[%s8560_s1 + $0xdc4] ss:$16 sps:$4 sm:$0xff]  }
  0xb5   :  { %3788 = vmatprep.subr.bf16.mxu1 %v5801_v15  ;;  %v5877_v15 = vld [vmem:[%s8560_s1 + $0xfc4] ss:$16 sps:$4 sm:$0xff]  }
  0xb7   :  { %3748 = vmatpush2.bf16.msra.mxu0 %v5796_v18  ;;  %v5872_v18 = vld [vmem:[%s8560_s1 + $0xdc0] ss:$16 sps:$4 sm:$0xff]  }
  0xb8   :  { %3789 = vmatpush2.bf16.msra.mxu1 %v5799_v19  ;;  %3749 = vmatprep.subr.bf16.mxu0 %v5804_v20  ;;  %v5875_v19 = vld [vmem:[%s8560_s1 + $0xfc0] ss:$16 sps:$4 sm:$0xff]   ;;  %v5880_v20 = vld [vmem:[%s8560_s1 + $0xda4] ss:$16 sps:$4 sm:$0xff]  }
  0xb9   :  { %3790 = vmatprep.subr.bf16.mxu1 %v5807_v21  ;;  %v5883_v21 = vld [vmem:[%s8560_s1 + $0xfa4] ss:$16 sps:$4 sm:$0xff]  }
  0xbb   :  { %3750 = vmatpush2.bf16.msra.mxu0 %v5802_v26  ;;  %v5878_v26 = vld [vmem:[%s8560_s1 + $0xda0] ss:$16 sps:$4 sm:$0xff]  }
  0xbc   :  { %3791 = vmatpush2.bf16.msra.mxu1 %v5805_v27  ;;  %3751 = vmatprep.subr.bf16.mxu0 %v5810_v28  ;;  %v5881_v27 = vld [vmem:[%s8560_s1 + $0xfa0] ss:$16 sps:$4 sm:$0xff]   ;;  %v5886_v28 = vld [vmem:[%s8560_s1 + $0xd84] ss:$16 sps:$4 sm:$0xff]  }
  0xbd   :  { %3792 = vmatprep.subr.bf16.mxu1 %v5813_v29  ;;  %v5889_v29 = vld [vmem:[%s8560_s1 + $0xf84] ss:$16 sps:$4 sm:$0xff]  }
  0xbf   :  { %3752 = vmatpush2.bf16.msra.mxu0 %v5808_v30  ;;  %v5884_v30 = vld [vmem:[%s8560_s1 + $0xd80] ss:$16 sps:$4 sm:$0xff]  }
  0xc0   :  { %3793 = vmatpush2.bf16.msra.mxu1 %v5811_v31  ;;  %3803 = vmatprep.subr.bf16.mxu0 %v5820_v32  ;;  %v5887_v31 = vld [vmem:[%s8560_s1 + $0xf80] ss:$16 sps:$4 sm:$0xff]   ;;  %v5892_v32 = vld [vmem:[%s8560_s1 + $0xd64] ss:$16 sps:$4 sm:$0xff]  }
  0xc1   :  { %3844 = vmatprep.subr.bf16.mxu1 %v5823_v33  ;;  %v5895_v33 = vld [vmem:[%s8560_s1 + $0xf64] ss:$16 sps:$4 sm:$0xff]  }
  0xc2   :  { %3754 = vmatmul.mubr.bf16.vlgmr.msra.gmra.mxu0 %v7146_v38 }
  0xc3   :  { %3795 = vmatmul.mubr.bf16.vlgmr.msra.gmra.mxu1 %v7150_v39  ;;  %3804 = vmatpush1.bf16.msra.mxu0 %v5818_v34  ;;  %v5890_v34 = vld [vmem:[%s8560_s1 + $0xd60] ss:$16 sps:$4 sm:$0xff]  }
  0xc4   :  { %3845 = vmatpush1.bf16.msra.mxu1 %v5821_v35  ;;  %3805 = vmatprep.subr.bf16.mxu0 %v5826_v22  ;;  %v5893_v35 = vld [vmem:[%s8560_s1 + $0xf60] ss:$16 sps:$4 sm:$0xff]   ;;  %v5898_v22 = vld [vmem:[%s8560_s1 + $0xd44] ss:$16 sps:$4 sm:$0xff]  }
  0xc5   :  { %3846 = vmatprep.subr.bf16.mxu1 %v5829_v23  ;;  %3835 = vmatprep.mubr.bf16.mxu0 %v7170_v42  ;;  %v5901_v23 = vld [vmem:[%s8560_s1 + $0xf44] ss:$16 sps:$4 sm:$0xff]  }
  0xc6   :  { %3876 = vmatprep.mubr.bf16.mxu1 %v7174_v43 }
  0xc7   :  { %3806 = vmatpush1.bf16.msra.mxu0 %v5824_v44  ;;  %v5896_v44 = vld [vmem:[%s8560_s1 + $0xd40] ss:$16 sps:$4 sm:$0xff]  }
  0xc8   :  { %3847 = vmatpush1.bf16.msra.mxu1 %v5827_v45  ;;  %3807 = vmatprep.subr.bf16.mxu0 %v5832_v46  ;;  %v5899_v45 = vld [vmem:[%s8560_s1 + $0xf40] ss:$16 sps:$4 sm:$0xff]   ;;  %v5904_v46 = vld [vmem:[%s8560_s1 + $0xd24] ss:$16 sps:$4 sm:$0xff]  }
  0xc9   :  { %3848 = vmatprep.subr.bf16.mxu1 %v5835_v48  ;;  %v5907_v48 = vld [vmem:[%s8560_s1 + $0xf24] ss:$16 sps:$4 sm:$0xff]  }
  0xcb   :  { %3808 = vmatpush1.bf16.msra.mxu0 %v5830_v49  ;;  %v5902_v49 = vld [vmem:[%s8560_s1 + $0xd20] ss:$16 sps:$4 sm:$0xff]  }
  0xcc   :  { %3849 = vmatpush1.bf16.msra.mxu1 %v5833_v50  ;;  %3809 = vmatprep.subr.bf16.mxu0 %v5838_v52  ;;  %v5905_v50 = vld [vmem:[%s8560_s1 + $0xf20] ss:$16 sps:$4 sm:$0xff]   ;;  %v5910_v52 = vld [vmem:[%s8560_s1 + $0xd04] ss:$16 sps:$4 sm:$0xff]  }
  0xcd   :  { %3850 = vmatprep.subr.bf16.mxu1 %v5841_v53  ;;  %v5913_v53 = vld [vmem:[%s8560_s1 + $0xf04] ss:$16 sps:$4 sm:$0xff]  }
  0xcf   :  { %3810 = vmatpush1.bf16.msra.mxu0 %v5836_v54  ;;  %v5908_v54 = vld [vmem:[%s8560_s1 + $0xd00] ss:$16 sps:$4 sm:$0xff]  }
  0xd0   :  { %3851 = vmatpush1.bf16.msra.mxu1 %v5839_v55  ;;  %3811 = vmatprep.subr.bf16.mxu0 %v5844_v56  ;;  %v5911_v55 = vld [vmem:[%s8560_s1 + $0xf00] ss:$16 sps:$4 sm:$0xff]   ;;  %v5920_v56 = vld [vmem:[%s8560_s1 + $0x10e4] ss:$16 sps:$4 sm:$0xff]  }
  0xd1   :  { %3852 = vmatprep.subr.bf16.mxu1 %v5847_v57  ;;  %v5923_v57 = vld [vmem:[%s8560_s1 + $0xec] ss:$16 sps:$4 sm:$0xff]  }
  0xd3   :  { %3812 = vmatpush1.bf16.msra.mxu0 %v5842_v58  ;;  %v5918_v58 = vld [vmem:[%s8560_s1 + $0x10e0] ss:$16 sps:$4 sm:$0xff]  }
  0xd4   :  { %3853 = vmatpush1.bf16.msra.mxu1 %v5845_v59  ;;  %3813 = vmatprep.subr.bf16.mxu0 %v5850_v60  ;;  %v7365_v59 = vcombine.low %v7155_v40, %v7155_v40  ;;  %v7369_v60 = vcombine.low %v7160_v41, %v7160_v41  ;;  %v5926_v40 = vld [vmem:[%s8560_s1 + $0x10c4] ss:$16 sps:$4 sm:$0xff]   ;;  %v5929_v41 = vld [vmem:[%s8560_s1 + $0xcc] ss:$16 sps:$4 sm:$0xff]  }
  0xd5   :  { %3854 = vmatprep.subr.bf16.mxu1 %v5853_v61  ;;  %v7374_v61 = vld [vmem:[%s8561_s0 + $0x40] sm:$0xff] }
  0xd7   :  { %3814 = vmatpush1.bf16.msra.mxu0 %v5848_v62  ;;  %v5921_v62 = vld [vmem:[%s8560_s1 + $0xe8] ss:$16 sps:$4 sm:$0xff]  }
  0xd8   :  { %3855 = vmatpush1.bf16.msra.mxu1 %v5851_v63  ;;  %3815 = vmatprep.subr.bf16.mxu0 %v5856_v0  ;;  %v7387_v63 = vcombine.high %v7374_v61, %v7374_v61 }
  0xd9   :  { %3856 = vmatprep.subr.bf16.mxu1 %v5859_v1 }
  0xdb   :  { %3816 = vmatpush1.bf16.msra.mxu0 %v5854_v2  ;;  %v5924_v2 = vld [vmem:[%s8560_s1 + $0x10c0] ss:$16 sps:$4 sm:$0xff]  }
  0xdc   :  { %3857 = vmatpush1.bf16.msra.mxu1 %v5857_v3  ;;  %3817 = vmatprep.subr.bf16.mxu0 %v5862_v4  ;;  %v5927_v4 = vld [vmem:[%s8560_s1 + $0xc8] ss:$16 sps:$4 sm:$0xff]  }
  0xdd   :  { %3858 = vmatprep.subr.bf16.mxu1 %v5865_v5 }
  0xdf   :  { %3818 = vmatpush1.bf16.msra.mxu0 %v5860_v8 }
  0xe0   :  { %3859 = vmatpush1.bf16.msra.mxu1 %v5863_v9  ;;  %3819 = vmatprep.subr.bf16.mxu0 %v5868_v10  ;;  %v5932_v9 = vld [vmem:[%s8560_s1 + $0x10a4] ss:$16 sps:$4 sm:$0xff]   ;;  %v5935_v10 = vld [vmem:[%s8560_s1 + $0xac] ss:$16 sps:$4 sm:$0xff]  }
  0xe1   :  { %3860 = vmatprep.subr.bf16.mxu1 %v5871_v11 }
  0xe3   :  { %3820 = vmatpush2.bf16.msra.mxu0 %v5866_v12 }
  0xe4   :  { %3861 = vmatpush2.bf16.msra.mxu1 %v5869_v13  ;;  %3821 = vmatprep.subr.bf16.mxu0 %v5874_v14  ;;  %v5930_v14 = vld [vmem:[%s8560_s1 + $0x10a0] ss:$16 sps:$4 sm:$0xff]  }
  0xe5   :  { %3862 = vmatprep.subr.bf16.mxu1 %v5877_v15  ;;  %v5933_v15 = vld [vmem:[%s8560_s1 + $0xa8] ss:$16 sps:$4 sm:$0xff]  }
  0xe7   :  { %3822 = vmatpush2.bf16.msra.mxu0 %v5872_v18 }
  0xe8   :  { %3863 = vmatpush2.bf16.msra.mxu1 %v5875_v19  ;;  %3823 = vmatprep.subr.bf16.mxu0 %v5880_v20  ;;  %v5941_v20 = vld [vmem:[%s8560_s1 + $0x8c] ss:$16 sps:$4 sm:$0xff]  }
  0xe9   :  { %3864 = vmatprep.subr.bf16.mxu1 %v5883_v21  ;;  %v5936_v21 = vld [vmem:[%s8560_s1 + $0x1080] ss:$16 sps:$4 sm:$0xff]  }
  0xeb   :  { %3824 = vmatpush2.bf16.msra.mxu0 %v5878_v26  ;;  %v5939_v26 = vld [vmem:[%s8560_s1 + $0x88] ss:$16 sps:$4 sm:$0xff]  }
  0xec   :  { %3865 = vmatpush2.bf16.msra.mxu1 %v5881_v27  ;;  %3825 = vmatprep.subr.bf16.mxu0 %v5886_v28  ;;  %v5944_v27 = vld [vmem:[%s8560_s1 + $0x1064] ss:$16 sps:$4 sm:$0xff]   ;;  %v5947_v28 = vld [vmem:[%s8560_s1 + $0x6c] ss:$16 sps:$4 sm:$0xff]  }
  0xed   :  { %3866 = vmatprep.subr.bf16.mxu1 %v5889_v29  ;;  %v5942_v29 = vld [vmem:[%s8560_s1 + $0x1060] ss:$16 sps:$4 sm:$0xff]  }
  0xef   :  { %3826 = vmatpush2.bf16.msra.mxu0 %v5884_v30  ;;  %v5945_v30 = vld [vmem:[%s8560_s1 + $0x68] ss:$16 sps:$4 sm:$0xff]  }
  0xf0   :  { %3867 = vmatpush2.bf16.msra.mxu1 %v5887_v31  ;;  %3827 = vmatprep.subr.bf16.mxu0 %v5892_v32  ;;  %v5950_v31 = vld [vmem:[%s8560_s1 + $0x1044] ss:$16 sps:$4 sm:$0xff]   ;;  %v5953_v32 = vld [vmem:[%s8560_s1 + $0x4c] ss:$16 sps:$4 sm:$0xff]  }
  0xf1   :  { %3868 = vmatprep.subr.bf16.mxu1 %v5895_v33  ;;  %v5948_v33 = vld [vmem:[%s8560_s1 + $0x1040] ss:$16 sps:$4 sm:$0xff]  }
  0xf3   :  { %3828 = vmatpush2.bf16.msra.mxu0 %v5890_v34  ;;  %v5951_v34 = vld [vmem:[%s8560_s1 + $0x48] ss:$16 sps:$4 sm:$0xff]  }
  0xf4   :  { %3869 = vmatpush2.bf16.msra.mxu1 %v5893_v35  ;;  %3829 = vmatprep.subr.bf16.mxu0 %v5898_v22  ;;  %v5956_v35 = vld [vmem:[%s8560_s1 + $0x1024] ss:$16 sps:$4 sm:$0xff]   ;;  %v5959_v22 = vld [vmem:[%s8560_s1 + $0x2c] ss:$16 sps:$4 sm:$0xff]  }
  0xf5   :  { %3870 = vmatprep.subr.bf16.mxu1 %v5901_v23  ;;  %v5954_v23 = vld [vmem:[%s8560_s1 + $0x1020] ss:$16 sps:$4 sm:$0xff]  }
  0xf7   :  { %3830 = vmatpush2.bf16.msra.mxu0 %v5896_v44  ;;  %v5957_v44 = vld [vmem:[%s8560_s1 + $0x28] ss:$16 sps:$4 sm:$0xff]  }
  0xf8   :  { %3871 = vmatpush2.bf16.msra.mxu1 %v5899_v45  ;;  %3831 = vmatprep.subr.bf16.mxu0 %v5904_v46  ;;  %v5962_v45 = vld [vmem:[%s8560_s1 + $0x1004] ss:$16 sps:$4 sm:$0xff]   ;;  %v5965_v46 = vld [vmem:[%s8560_s1 + $0xc] ss:$16 sps:$4 sm:$0xff]  }
  0xf9   :  { %3872 = vmatprep.subr.bf16.mxu1 %v5907_v48  ;;  %v5960_v48 = vld [vmem:[%s8560_s1 + $0x1000] ss:$16 sps:$4 sm:$0xff]  }
  0xfb   :  { %3832 = vmatpush2.bf16.msra.mxu0 %v5902_v49  ;;  %v5963_v49 = vld [vmem:[%s8560_s1 + $0x8] ss:$16 sps:$4 sm:$0xff]  }
  0xfc   :  { %3873 = vmatpush2.bf16.msra.mxu1 %v5905_v50  ;;  %3833 = vmatprep.subr.bf16.mxu0 %v5910_v52  ;;  %v5968_v50 = vld [vmem:[%s8560_s1 + $0x11e4] ss:$16 sps:$4 sm:$0xff]   ;;  %v5971_v52 = vld [vmem:[%s8560_s1 + $0x1ec] ss:$16 sps:$4 sm:$0xff]  }
  0xfd   :  { %3874 = vmatprep.subr.bf16.mxu1 %v5913_v53  ;;  %v5966_v53 = vld [vmem:[%s8560_s1 + $0x11e0] ss:$16 sps:$4 sm:$0xff]  }
  0xff   :  { %3834 = vmatpush2.bf16.msra.mxu0 %v5908_v54  ;;  %v5969_v54 = vld [vmem:[%s8560_s1 + $0x1e8] ss:$16 sps:$4 sm:$0xff]  }
 0x100   :  { %3875 = vmatpush2.bf16.msra.mxu1 %v5911_v55  ;;  %3885 = vmatprep.subr.bf16.mxu0 %v5920_v56  ;;  %v5974_v55 = vld [vmem:[%s8560_s1 + $0x11c4] ss:$16 sps:$4 sm:$0xff]   ;;  %v5977_v56 = vld [vmem:[%s8560_s1 + $0x1cc] ss:$16 sps:$4 sm:$0xff]  }
 0x101   :  { %3926 = vmatprep.subr.bf16.mxu1 %v5923_v57  ;;  %v5972_v57 = vld [vmem:[%s8560_s1 + $0x11c0] ss:$16 sps:$4 sm:$0xff]  }
 0x102   :  { %v3591_v0 = vpop.f32.mrf.mxu0  ;;  %3836 = vmatmul.mubr.bf16.vlgmr.msra.gmra.mxu0 %v7365_v59 }
 0x103   :  { %v3632_v1 = vpop.f32.mrf.mxu1  ;;  %3877 = vmatmul.mubr.bf16.vlgmr.msra.gmra.mxu1 %v7369_v60  ;;  %3886 = vmatpush1.bf16.msra.mxu0 %v5918_v58  ;;  %v5975_v58 = vld [vmem:[%s8560_s1 + $0x1c8] ss:$16 sps:$4 sm:$0xff]  }
 0x104   :  { %v7394_v3 = vadd.f32 %v3632_v1, %v3591_v0  ;;  %3927 = vmatpush1.bf16.msra.mxu1 %v5921_v62  ;;  %v3593_v5 = vpop.f32.mrf.mxu0  ;;  %3887 = vmatprep.subr.bf16.mxu0 %v5926_v40  ;;  %v5980_v62 = vld [vmem:[%s8560_s1 + $0x11a4] ss:$16 sps:$4 sm:$0xff]   ;;  %v5983_v40 = vld [vmem:[%s8560_s1 + $0x1ac] ss:$16 sps:$4 sm:$0xff]   ;;  %v5981_v0 = vld [vmem:[%s8560_s1 + $0x1a8] ss:$16 sps:$4 sm:$0xff]  }
 0x105   :  { %v3634_v8 = vpop.f32.mrf.mxu1  ;;  %3928 = vmatprep.subr.bf16.mxu1 %v5929_v41  ;;  %3917 = vmatprep.mubr.bf16.mxu0 %v7387_v63  ;;  %v5978_v41 = vld [vmem:[%s8560_s1 + $0x11a0] ss:$16 sps:$4 sm:$0xff]   ;;  %v5986_v1 = vld [vmem:[%s8560_s1 + $0x1184] ss:$16 sps:$4 sm:$0xff]  }
 0x106   :  { %v7405_v11 = vadd.f32 %v3634_v8, %v3593_v5  ;;  %3958 = vmatprep.mubr.bf16.mxu1 %v6629_v47  ;;  %v3595_v12 = vpop.f32.mrf.mxu0  ;;  %v5938_v47 = vld [vmem:[%s8560_s1 + $0x1084] ss:$16 sps:$4 sm:$0xff]   ;;  %v5987_v5 = vld [vmem:[%s8560_s1 + $0x188] ss:$16 sps:$4 sm:$0xff]  }
 0x107   :  { %v3636_v13 = vpop.f32.mrf.mxu1  ;;  %3888 = vmatpush1.bf16.msra.mxu0 %v5924_v2  ;;  %v5989_v2 = vld [vmem:[%s8560_s1 + $0x18c] ss:$16 sps:$4 sm:$0xff]   ;;  %v5992_v8 = vld [vmem:[%s8560_s1 + $0x1164] ss:$16 sps:$4 sm:$0xff]   ;;  %v5993_v12 = vld [vmem:[%s8560_s1 + $0x168] ss:$16 sps:$4 sm:$0xff]  }
 0x108   :  { %3929 = vmatpush1.bf16.msra.mxu1 %v5927_v4  ;;  %v3596_v18 = vpop.f32.mrf.mxu0  ;;  %3889 = vmatprep.subr.bf16.mxu0 %v5932_v9  ;;  %v5984_v4 = vld [vmem:[%s8560_s1 + $0x1180] ss:$16 sps:$4 sm:$0xff]   ;;  %v5995_v9 = vld [vmem:[%s8560_s1 + $0x16c] ss:$16 sps:$4 sm:$0xff]   ;;  %v5998_v13 = vld [vmem:[%s8560_s1 + $0x1144] ss:$16 sps:$4 sm:$0xff]  }
 0x109   :  { %v3637_v19 = vpop.f32.mrf.mxu1  ;;  %3930 = vmatprep.subr.bf16.mxu1 %v5935_v10  ;;  %v5990_v10 = vld [vmem:[%s8560_s1 + $0x1160] ss:$16 sps:$4 sm:$0xff]   ;;  %v5999_v18 = vld [vmem:[%s8560_s1 + $0x148] ss:$16 sps:$4 sm:$0xff]  }
 0x10a   :  { %v6004_v19 = vld [vmem:[%s8560_s1 + $0x1124] ss:$16 sps:$4 sm:$0xff]  }
 0x10b   :  { %3890 = vmatpush1.bf16.msra.mxu0 %v5930_v14  ;;  %v6001_v14 = vld [vmem:[%s8560_s1 + $0x14c] ss:$16 sps:$4 sm:$0xff]  }
 0x10c   :  { %3931 = vmatpush1.bf16.msra.mxu1 %v5933_v15  ;;  %3891 = vmatprep.subr.bf16.mxu0 %v5938_v47  ;;  %v5996_v15 = vld [vmem:[%s8560_s1 + $0x1140] ss:$16 sps:$4 sm:$0xff]   ;;  %v6007_v47 = vld [vmem:[%s8560_s1 + $0x12c] ss:$16 sps:$4 sm:$0xff]  }
 0x10d   :  { %3932 = vmatprep.subr.bf16.mxu1 %v5941_v20  ;;  %v6002_v20 = vld [vmem:[%s8560_s1 + $0x1120] ss:$16 sps:$4 sm:$0xff]  }
 0x10f   :  { %3892 = vmatpush1.bf16.msra.mxu0 %v5936_v21  ;;  %v6005_v21 = vld [vmem:[%s8560_s1 + $0x128] ss:$16 sps:$4 sm:$0xff]  }
 0x110   :  { %3933 = vmatpush1.bf16.msra.mxu1 %v5939_v26  ;;  %3893 = vmatprep.subr.bf16.mxu0 %v5944_v27  ;;  %v6010_v26 = vld [vmem:[%s8560_s1 + $0x1104] ss:$16 sps:$4 sm:$0xff]   ;;  %v6013_v27 = vld [vmem:[%s8560_s1 + $0x10c] ss:$16 sps:$4 sm:$0xff]  }
 0x111   :  { %3934 = vmatprep.subr.bf16.mxu1 %v5947_v28  ;;  %v6008_v28 = vld [vmem:[%s8560_s1 + $0x1100] ss:$16 sps:$4 sm:$0xff]  }
 0x113   :  { %3894 = vmatpush1.bf16.msra.mxu0 %v5942_v29  ;;  %v6011_v29 = vld [vmem:[%s8560_s1 + $0x108] ss:$16 sps:$4 sm:$0xff]  }
 0x114   :  { %3935 = vmatpush1.bf16.msra.mxu1 %v5945_v30  ;;  %3895 = vmatprep.subr.bf16.mxu0 %v5950_v31  ;;  %v6018_v30 = vld [vmem:[%s8560_s1 + $0x2ec] ss:$16 sps:$4 sm:$0xff]  }
 0x115   :  { %3936 = vmatprep.subr.bf16.mxu1 %v5953_v32  ;;  %v6021_v31 = vld [vmem:[%s8560_s1 + $0x4ec] ss:$16 sps:$4 sm:$0xff]   ;;  %v6016_v32 = vld [vmem:[%s8560_s1 + $0x2e8] ss:$16 sps:$4 sm:$0xff]  }
 0x117   :  { %3896 = vmatpush1.bf16.msra.mxu0 %v5948_v33  ;;  %v6019_v33 = vld [vmem:[%s8560_s1 + $0x4e8] ss:$16 sps:$4 sm:$0xff]  }
 0x118   :  { %3937 = vmatpush1.bf16.msra.mxu1 %v5951_v34  ;;  %3897 = vmatprep.subr.bf16.mxu0 %v5956_v35  ;;  %v7585_v34 = vcombine.low %v7374_v61, %v7374_v61  ;;  %v6024_v35 = vld [vmem:[%s8560_s1 + $0x2cc] ss:$16 sps:$4 sm:$0xff]   ;;  %v6025_v61 = vld [vmem:[%s8560_s1 + $0x4c8] ss:$16 sps:$4 sm:$0xff]  }
 0x119   :  { %3938 = vmatprep.subr.bf16.mxu1 %v5959_v22  ;;  %v6027_v22 = vld [vmem:[%s8560_s1 + $0x4cc] ss:$16 sps:$4 sm:$0xff]  }
 0x11b   :  { %3898 = vmatpush1.bf16.msra.mxu0 %v5954_v23  ;;  %v6022_v23 = vld [vmem:[%s8560_s1 + $0x2c8] ss:$16 sps:$4 sm:$0xff]  }
 0x11c   :  { %3939 = vmatpush1.bf16.msra.mxu1 %v5957_v44  ;;  %3899 = vmatprep.subr.bf16.mxu0 %v5962_v45 }
 0x11d   :  { %3940 = vmatprep.subr.bf16.mxu1 %v5965_v46 }
 0x11f   :  { %3900 = vmatpush1.bf16.msra.mxu0 %v5960_v48 }
 0x120   :  { %3941 = vmatpush1.bf16.msra.mxu1 %v5963_v49  ;;  %3901 = vmatprep.subr.bf16.mxu0 %v5968_v50  ;;  %v6030_v50 = vld [vmem:[%s8560_s1 + $0x2ac] ss:$16 sps:$4 sm:$0xff]  }
 0x121   :  { %3942 = vmatprep.subr.bf16.mxu1 %v5971_v52  ;;  %v6033_v52 = vld [vmem:[%s8560_s1 + $0x4ac] ss:$16 sps:$4 sm:$0xff]  }
 0x123   :  { %3902 = vmatpush2.bf16.msra.mxu0 %v5966_v53 }
 0x124   :  { %3943 = vmatpush2.bf16.msra.mxu1 %v5969_v54  ;;  %3903 = vmatprep.subr.bf16.mxu0 %v5974_v55  ;;  %v6031_v54 = vld [vmem:[%s8560_s1 + $0x4a8] ss:$16 sps:$4 sm:$0xff]  }
 0x125   :  { %3944 = vmatprep.subr.bf16.mxu1 %v5977_v56 }
 0x127   :  { %3904 = vmatpush2.bf16.msra.mxu0 %v5972_v57 }
 0x128   :  { %3945 = vmatpush2.bf16.msra.mxu1 %v5975_v58  ;;  %3905 = vmatprep.subr.bf16.mxu0 %v5980_v62  ;;  %v6036_v62 = vld [vmem:[%s8560_s1 + $0x28c] ss:$16 sps:$4 sm:$0xff]  }
 0x129   :  { %3946 = vmatprep.subr.bf16.mxu1 %v5983_v40  ;;  %v6037_v40 = vld [vmem:[%s8560_s1 + $0x488] ss:$16 sps:$4 sm:$0xff]  }
 0x12b   :  { %3906 = vmatpush2.bf16.msra.mxu0 %v5978_v41  ;;  %v6042_v41 = vld [vmem:[%s8560_s1 + $0x26c] ss:$16 sps:$4 sm:$0xff]  }
 0x12c   :  { %3947 = vmatpush2.bf16.msra.mxu1 %v5981_v0  ;;  %3907 = vmatprep.subr.bf16.mxu0 %v5986_v1  ;;  %v6045_v0 = vld [vmem:[%s8560_s1 + $0x46c] ss:$16 sps:$4 sm:$0xff]   ;;  %v6040_v1 = vld [vmem:[%s8560_s1 + $0x268] ss:$16 sps:$4 sm:$0xff]  }
 0x12d   :  { %3948 = vmatprep.subr.bf16.mxu1 %v5989_v2  ;;  %v6043_v2 = vld [vmem:[%s8560_s1 + $0x468] ss:$16 sps:$4 sm:$0xff]  }
 0x12f   :  { %3908 = vmatpush2.bf16.msra.mxu0 %v5984_v4  ;;  %v6048_v4 = vld [vmem:[%s8560_s1 + $0x24c] ss:$16 sps:$4 sm:$0xff]  }
 0x130   :  { %3949 = vmatpush2.bf16.msra.mxu1 %v5987_v5  ;;  %3909 = vmatprep.subr.bf16.mxu0 %v5992_v8  ;;  %v6051_v5 = vld [vmem:[%s8560_s1 + $0x44c] ss:$16 sps:$4 sm:$0xff]   ;;  %v6046_v8 = vld [vmem:[%s8560_s1 + $0x248] ss:$16 sps:$4 sm:$0xff]  }
 0x131   :  { %3950 = vmatprep.subr.bf16.mxu1 %v5995_v9  ;;  %v6049_v9 = vld [vmem:[%s8560_s1 + $0x448] ss:$16 sps:$4 sm:$0xff]  }
 0x133   :  { %3910 = vmatpush2.bf16.msra.mxu0 %v5990_v10  ;;  %v6054_v10 = vld [vmem:[%s8560_s1 + $0x22c] ss:$16 sps:$4 sm:$0xff]  }
 0x134   :  { %3951 = vmatpush2.bf16.msra.mxu1 %v5993_v12  ;;  %3911 = vmatprep.subr.bf16.mxu0 %v5998_v13  ;;  %v6057_v12 = vld [vmem:[%s8560_s1 + $0x42c] ss:$16 sps:$4 sm:$0xff]   ;;  %v6052_v13 = vld [vmem:[%s8560_s1 + $0x228] ss:$16 sps:$4 sm:$0xff]  }
 0x135   :  { %3952 = vmatprep.subr.bf16.mxu1 %v6001_v14  ;;  %v6055_v14 = vld [vmem:[%s8560_s1 + $0x428] ss:$16 sps:$4 sm:$0xff]  }
 0x137   :  { %3912 = vmatpush2.bf16.msra.mxu0 %v5996_v15  ;;  %v6060_v15 = vld [vmem:[%s8560_s1 + $0x20c] ss:$16 sps:$4 sm:$0xff]  }
 0x138   :  { %3953 = vmatpush2.bf16.msra.mxu1 %v5999_v18  ;;  %3913 = vmatprep.subr.bf16.mxu0 %v6004_v19  ;;  %v6063_v18 = vld [vmem:[%s8560_s1 + $0x40c] ss:$16 sps:$4 sm:$0xff]   ;;  %v6058_v19 = vld [vmem:[%s8560_s1 + $0x208] ss:$16 sps:$4 sm:$0xff]  }
 0x139   :  { %3954 = vmatprep.subr.bf16.mxu1 %v6007_v47  ;;  %v6061_v47 = vld [vmem:[%s8560_s1 + $0x408] ss:$16 sps:$4 sm:$0xff]  }
 0x13b   :  { %3914 = vmatpush2.bf16.msra.mxu0 %v6002_v20  ;;  %v6066_v20 = vld [vmem:[%s8560_s1 + $0x3ec] ss:$16 sps:$4 sm:$0xff]  }
 0x13c   :  { %3955 = vmatpush2.bf16.msra.mxu1 %v6005_v21  ;;  %3915 = vmatprep.subr.bf16.mxu0 %v6010_v26  ;;  %v6069_v21 = vld [vmem:[%s8560_s1 + $0x5ec] ss:$16 sps:$4 sm:$0xff]   ;;  %v6064_v26 = vld [vmem:[%s8560_s1 + $0x3e8] ss:$16 sps:$4 sm:$0xff]  }
 0x13d   :  { %3956 = vmatprep.subr.bf16.mxu1 %v6013_v27  ;;  %v6067_v27 = vld [vmem:[%s8560_s1 + $0x5e8] ss:$16 sps:$4 sm:$0xff]  }
 0x13f   :  { %3916 = vmatpush2.bf16.msra.mxu0 %v6008_v28  ;;  %v6072_v28 = vld [vmem:[%s8560_s1 + $0x3cc] ss:$16 sps:$4 sm:$0xff]  }
 0x140   :  { %3957 = vmatpush2.bf16.msra.mxu1 %v6011_v29  ;;  %3967 = vmatprep.subr.bf16.mxu0 %v6018_v30  ;;  %v6075_v29 = vld [vmem:[%s8560_s1 + $0x5cc] ss:$16 sps:$4 sm:$0xff]   ;;  %v6070_v30 = vld [vmem:[%s8560_s1 + $0x3c8] ss:$16 sps:$4 sm:$0xff]  }
 0x141   :  { %4008 = vmatprep.subr.bf16.mxu1 %v6021_v31  ;;  %v6073_v31 = vld [vmem:[%s8560_s1 + $0x5c8] ss:$16 sps:$4 sm:$0xff]  }
 0x142   :  { %v3673_v44 = vpop.f32.mrf.mxu0  ;;  %3918 = vmatmul.mubr.bf16.vlgmr.msra.gmra.mxu0 %v7585_v34 }
 0x143   :  { %v3714_v45 = vpop.f32.mrf.mxu1  ;;  %3959 = vmatmul.mubr.bf16.vlgmr.msra.gmra.mxu1 %v6698_v6  ;;  %v3674_v46 = vadd.f32 %v3673_v44, %v7394_v3  ;;  %3968 = vmatpush1.bf16.msra.mxu0 %v6016_v32  ;;  %v6028_v3 = vld [vmem:[%s8560_s1 + $0x2a8] ss:$16 sps:$4 sm:$0xff]   ;;  %v6078_v32 = vld [vmem:[%s8560_s1 + $0x3ac] ss:$16 sps:$4 sm:$0xff]  }
 0x144   :  { %4009 = vmatpush1.bf16.msra.mxu1 %v6019_v33  ;;  %v3675_v48 = vpop.f32.mrf.mxu0  ;;  %3969 = vmatprep.subr.bf16.mxu0 %v6024_v35  ;;  %v6081_v33 = vld [vmem:[%s8560_s1 + $0x5ac] ss:$16 sps:$4 sm:$0xff]   ;;  %v6076_v35 = vld [vmem:[%s8560_s1 + $0x3a8] ss:$16 sps:$4 sm:$0xff]  }
 0x145   :  { %v3716_v49 = vpop.f32.mrf.mxu1  ;;  %4010 = vmatprep.subr.bf16.mxu1 %v6027_v22  ;;  %v7608_v53 = vadd.f32 %v3714_v45, %v3674_v46  ;;  %v3676_v6 = vadd.f32 %v3675_v48, %v7405_v11  ;;  %3999 = vmatprep.mubr.bf16.mxu0 %v6640_v51  ;;  %v6039_v51 = vld [vmem:[%s8560_s1 + $0x48c] ss:$16 sps:$4 sm:$0xff]   ;;  %v6079_v22 = vld [vmem:[%s8560_s1 + $0x5a8] ss:$16 sps:$4 sm:$0xff]  }
 0x146   :  { %4040 = vmatprep.mubr.bf16.mxu1 %v6794_v36  ;;  %v3677_v55 = vpop.f32.mrf.mxu0  ;;  %v6034_v36 = vld [vmem:[%s8560_s1 + $0x288] ss:$16 sps:$4 sm:$0xff]   ;;  %v6090_v46 = vld [vmem:[%s8560_s1 + $0x36c] ss:$16 sps:$4 sm:$0xff]  }
 0x147   :  { %v3718_v56 = vpop.f32.mrf.mxu1  ;;  %v7619_v57 = vadd.f32 %v3716_v49, %v3676_v6  ;;  %3970 = vmatpush1.bf16.msra.mxu0 %v6022_v23  ;;  %v6084_v23 = vld [vmem:[%s8560_s1 + $0x38c] ss:$16 sps:$4 sm:$0xff]   ;;  %v6082_v44 = vld [vmem:[%s8560_s1 + $0x388] ss:$16 sps:$4 sm:$0xff]  }
 0x148   :  { %4011 = vmatpush1.bf16.msra.mxu1 %v6025_v61  ;;  %v3678_v58 = vpop.f32.mrf.mxu0  ;;  %3971 = vmatprep.subr.bf16.mxu0 %v6030_v50  ;;  %v6087_v61 = vld [vmem:[%s8560_s1 + $0x58c] ss:$16 sps:$4 sm:$0xff]   ;;  %v6085_v45 = vld [vmem:[%s8560_s1 + $0x588] ss:$16 sps:$4 sm:$0xff]  }
 0x149   :  { %v3719_v11 = vpop.f32.mrf.mxu1  ;;  %4012 = vmatprep.subr.bf16.mxu1 %v6033_v52  ;;  %v6093_v48 = vld [vmem:[%s8560_s1 + $0x56c] ss:$16 sps:$4 sm:$0xff]   ;;  %v6088_v49 = vld [vmem:[%s8560_s1 + $0x368] ss:$16 sps:$4 sm:$0xff]  }
 0x14a   :  { %v6091_v50 = vld [vmem:[%s8560_s1 + $0x568] ss:$16 sps:$4 sm:$0xff]   ;;  %v6096_v52 = vld [vmem:[%s8560_s1 + $0x34c] ss:$16 sps:$4 sm:$0xff]  }
 0x14b   :  { %3972 = vmatpush1.bf16.msra.mxu0 %v6028_v3  ;;  %v6099_v6 = vld [vmem:[%s8560_s1 + $0x54c] ss:$16 sps:$4 sm:$0xff]   ;;  %v6094_v3 = vld [vmem:[%s8560_s1 + $0x348] ss:$16 sps:$4 sm:$0xff]  }
 0x14c   :  { %4013 = vmatpush1.bf16.msra.mxu1 %v6031_v54  ;;  %3973 = vmatprep.subr.bf16.mxu0 %v6036_v62  ;;  %v6097_v54 = vld [vmem:[%s8560_s1 + $0x548] ss:$16 sps:$4 sm:$0xff]   ;;  %v6102_v55 = vld [vmem:[%s8560_s1 + $0x32c] ss:$16 sps:$4 sm:$0xff]  }
 0x14d   :  { %4014 = vmatprep.subr.bf16.mxu1 %v6039_v51  ;;  %v6105_v56 = vld [vmem:[%s8560_s1 + $0x52c] ss:$16 sps:$4 sm:$0xff]   ;;  %v6100_v58 = vld [vmem:[%s8560_s1 + $0x328] ss:$16 sps:$4 sm:$0xff]  }
 0x14e   :  { %v6103_v11 = vld [vmem:[%s8560_s1 + $0x528] ss:$16 sps:$4 sm:$0xff]   ;;  %v6108_v62 = vld [vmem:[%s8560_s1 + $0x30c] ss:$16 sps:$4 sm:$0xff]  }
 0x14f   :  { %3974 = vmatpush1.bf16.msra.mxu0 %v6034_v36  ;;  %v6111_v51 = vld [vmem:[%s8560_s1 + $0x50c] ss:$16 sps:$4 sm:$0xff]   ;;  %v6106_v36 = vld [vmem:[%s8560_s1 + $0x308] ss:$16 sps:$4 sm:$0xff]  }
 0x150   :  { %4015 = vmatpush1.bf16.msra.mxu1 %v6037_v40  ;;  %3975 = vmatprep.subr.bf16.mxu0 %v6042_v41  ;;  %v6109_v40 = vld [vmem:[%s8560_s1 + $0x508] ss:$16 sps:$4 sm:$0xff]   ;;  %v6114_v41 = vld [vmem:[%s8560_s1 + $0x6ec] ss:$16 sps:$4 sm:$0xff]  }
 0x151   :  { %4016 = vmatprep.subr.bf16.mxu1 %v6045_v0  ;;  %v6117_v0 = vld [vmem:[%s8560_s1 + $0x8ec] ss:$16 sps:$4 sm:$0xff]  }
 0x153   :  { %3976 = vmatpush1.bf16.msra.mxu0 %v6040_v1  ;;  %v6112_v1 = vld [vmem:[%s8560_s1 + $0x6e8] ss:$16 sps:$4 sm:$0xff]  }
 0x154   :  { %4017 = vmatpush1.bf16.msra.mxu1 %v6043_v2  ;;  %3977 = vmatprep.subr.bf16.mxu0 %v6048_v4  ;;  %v6115_v2 = vld [vmem:[%s8560_s1 + $0x8e8] ss:$16 sps:$4 sm:$0xff]   ;;  %v6120_v4 = vld [vmem:[%s8560_s1 + $0x6cc] ss:$16 sps:$4 sm:$0xff]  }
 0x155   :  { %4018 = vmatprep.subr.bf16.mxu1 %v6051_v5  ;;  %v6123_v5 = vld [vmem:[%s8560_s1 + $0x8cc] ss:$16 sps:$4 sm:$0xff]  }
 0x157   :  { %3978 = vmatpush1.bf16.msra.mxu0 %v6046_v8 }
 0x158   :  { %4019 = vmatpush1.bf16.msra.mxu1 %v6049_v9  ;;  %3979 = vmatprep.subr.bf16.mxu0 %v6054_v10 }
 0x159   :  { %4020 = vmatprep.subr.bf16.mxu1 %v6057_v12  ;;  %v6118_v12 = vld [vmem:[%s8560_s1 + $0x6c8] ss:$16 sps:$4 sm:$0xff]  }
 0x15b   :  { %3980 = vmatpush1.bf16.msra.mxu0 %v6052_v13  ;;  %v6121_v13 = vld [vmem:[%s8560_s1 + $0x8c8] ss:$16 sps:$4 sm:$0xff]  }
 0x15c   :  { %4021 = vmatpush1.bf16.msra.mxu1 %v6055_v14  ;;  %3981 = vmatprep.subr.bf16.mxu0 %v6060_v15 }
 0x15d   :  { %4022 = vmatprep.subr.bf16.mxu1 %v6063_v18 }
 0x15f   :  { %3982 = vmatpush1.bf16.msra.mxu0 %v6058_v19 }
 0x160   :  { %4023 = vmatpush1.bf16.msra.mxu1 %v6061_v47  ;;  %3983 = vmatprep.subr.bf16.mxu0 %v6066_v20 }
 0x161   :  { %4024 = vmatprep.subr.bf16.mxu1 %v6069_v21  ;;  %v6124_v21 = vld [vmem:[%s8560_s1 + $0x6a8] ss:$16 sps:$4 sm:$0xff]  }
 0x163   :  { %3984 = vmatpush2.bf16.msra.mxu0 %v6064_v26  ;;  %v6127_v26 = vld [vmem:[%s8560_s1 + $0x8a8] ss:$16 sps:$4 sm:$0xff]  }
 0x164   :  { %4025 = vmatpush2.bf16.msra.mxu1 %v6067_v27  ;;  %3985 = vmatprep.subr.bf16.mxu0 %v6072_v28  ;;  %v6130_v28 = vld [vmem:[%s8560_s1 + $0x688] ss:$16 sps:$4 sm:$0xff]  }
 0x165   :  { %4026 = vmatprep.subr.bf16.mxu1 %v6075_v29  ;;  %v6133_v29 = vld [vmem:[%s8560_s1 + $0x888] ss:$16 sps:$4 sm:$0xff]  }
 0x167   :  { %3986 = vmatpush2.bf16.msra.mxu0 %v6070_v30  ;;  %v6138_v30 = vld [vmem:[%s8560_s1 + $0x66c] ss:$16 sps:$4 sm:$0xff]  }
 0x168   :  { %4027 = vmatpush2.bf16.msra.mxu1 %v6073_v31  ;;  %3987 = vmatprep.subr.bf16.mxu0 %v6078_v32  ;;  %v6141_v31 = vld [vmem:[%s8560_s1 + $0x86c] ss:$16 sps:$4 sm:$0xff]   ;;  %v6136_v32 = vld [vmem:[%s8560_s1 + $0x668] ss:$16 sps:$4 sm:$0xff]  }
 0x169   :  { %4028 = vmatprep.subr.bf16.mxu1 %v6081_v33  ;;  %v6139_v33 = vld [vmem:[%s8560_s1 + $0x868] ss:$16 sps:$4 sm:$0xff]  }
 0x16b   :  { %3988 = vmatpush2.bf16.msra.mxu0 %v6076_v35  ;;  %v6144_v35 = vld [vmem:[%s8560_s1 + $0x64c] ss:$16 sps:$4 sm:$0xff]  }
 0x16c   :  { %4029 = vmatpush2.bf16.msra.mxu1 %v6079_v22  ;;  %3989 = vmatprep.subr.bf16.mxu0 %v6084_v23  ;;  %v6147_v22 = vld [vmem:[%s8560_s1 + $0x84c] ss:$16 sps:$4 sm:$0xff]   ;;  %v6142_v23 = vld [vmem:[%s8560_s1 + $0x648] ss:$16 sps:$4 sm:$0xff]  }
 0x16d   :  { %4030 = vmatprep.subr.bf16.mxu1 %v6087_v61  ;;  %v6145_v61 = vld [vmem:[%s8560_s1 + $0x848] ss:$16 sps:$4 sm:$0xff]  }
 0x16f   :  { %3990 = vmatpush2.bf16.msra.mxu0 %v6082_v44  ;;  %v6150_v44 = vld [vmem:[%s8560_s1 + $0x62c] ss:$16 sps:$4 sm:$0xff]  }
 0x170   :  { %4031 = vmatpush2.bf16.msra.mxu1 %v6085_v45  ;;  %3991 = vmatprep.subr.bf16.mxu0 %v6090_v46  ;;  %v6153_v45 = vld [vmem:[%s8560_s1 + $0x82c] ss:$16 sps:$4 sm:$0xff]   ;;  %v6148_v46 = vld [vmem:[%s8560_s1 + $0x628] ss:$16 sps:$4 sm:$0xff]  }
 0x171   :  { %4032 = vmatprep.subr.bf16.mxu1 %v6093_v48  ;;  %v6151_v48 = vld [vmem:[%s8560_s1 + $0x828] ss:$16 sps:$4 sm:$0xff]  }
 0x173   :  { %3992 = vmatpush2.bf16.msra.mxu0 %v6088_v49  ;;  %v6156_v49 = vld [vmem:[%s8560_s1 + $0x60c] ss:$16 sps:$4 sm:$0xff]  }
 0x174   :  { %4033 = vmatpush2.bf16.msra.mxu1 %v6091_v50  ;;  %3993 = vmatprep.subr.bf16.mxu0 %v6096_v52  ;;  %v6159_v50 = vld [vmem:[%s8560_s1 + $0x80c] ss:$16 sps:$4 sm:$0xff]   ;;  %v6154_v52 = vld [vmem:[%s8560_s1 + $0x608] ss:$16 sps:$4 sm:$0xff]  }
 0x175   :  { %4034 = vmatprep.subr.bf16.mxu1 %v6099_v6  ;;  %v6157_v6 = vld [vmem:[%s8560_s1 + $0x808] ss:$16 sps:$4 sm:$0xff]  }
 0x177   :  { %3994 = vmatpush2.bf16.msra.mxu0 %v6094_v3  ;;  %v6162_v3 = vld [vmem:[%s8560_s1 + $0x7ec] ss:$16 sps:$4 sm:$0xff]  }
 0x178   :  { %4035 = vmatpush2.bf16.msra.mxu1 %v6097_v54  ;;  %3995 = vmatprep.subr.bf16.mxu0 %v6102_v55  ;;  %v6165_v54 = vld [vmem:[%s8560_s1 + $0x9ec] ss:$16 sps:$4 sm:$0xff]   ;;  %v6160_v55 = vld [vmem:[%s8560_s1 + $0x7e8] ss:$16 sps:$4 sm:$0xff]  }
 0x179   :  { %4036 = vmatprep.subr.bf16.mxu1 %v6105_v56  ;;  %v6163_v56 = vld [vmem:[%s8560_s1 + $0x9e8] ss:$16 sps:$4 sm:$0xff]  }
 0x17b   :  { %3996 = vmatpush2.bf16.msra.mxu0 %v6100_v58  ;;  %v6168_v58 = vld [vmem:[%s8560_s1 + $0x7cc] ss:$16 sps:$4 sm:$0xff]  }
 0x17c   :  { %4037 = vmatpush2.bf16.msra.mxu1 %v6103_v11  ;;  %3997 = vmatprep.subr.bf16.mxu0 %v6108_v62  ;;  %v6171_v11 = vld [vmem:[%s8560_s1 + $0x9cc] ss:$16 sps:$4 sm:$0xff]   ;;  %v6166_v62 = vld [vmem:[%s8560_s1 + $0x7c8] ss:$16 sps:$4 sm:$0xff]  }
 0x17d   :  { %4038 = vmatprep.subr.bf16.mxu1 %v6111_v51  ;;  %v6169_v51 = vld [vmem:[%s8560_s1 + $0x9c8] ss:$16 sps:$4 sm:$0xff]  }
 0x17f   :  { %3998 = vmatpush2.bf16.msra.mxu0 %v6106_v36  ;;  %v6174_v36 = vld [vmem:[%s8560_s1 + $0x7ac] ss:$16 sps:$4 sm:$0xff]  }
 0x180   :  { %4039 = vmatpush2.bf16.msra.mxu1 %v6109_v40  ;;  %4049 = vmatprep.subr.bf16.mxu0 %v6114_v41  ;;  %v6177_v40 = vld [vmem:[%s8560_s1 + $0x9ac] ss:$16 sps:$4 sm:$0xff]   ;;  %v6172_v41 = vld [vmem:[%s8560_s1 + $0x7a8] ss:$16 sps:$4 sm:$0xff]  }
 0x181   :  { %4090 = vmatprep.subr.bf16.mxu1 %v6117_v0  ;;  %v6175_v0 = vld [vmem:[%s8560_s1 + $0x9a8] ss:$16 sps:$4 sm:$0xff]  }
 0x182   :  { %v3755_v8 = vpop.f32.mrf.mxu0  ;;  %4000 = vmatmul.mubr.bf16.vlgmr.msra.gmra.mxu0 %v6700_v7  ;;  %v6126_v7 = vld [vmem:[%s8560_s1 + $0x6ac] ss:$16 sps:$4 sm:$0xff]  }
 0x183   :  { %v3796_v9 = vpop.f32.mrf.mxu1  ;;  %4041 = vmatmul.mubr.bf16.vlgmr.msra.gmra.mxu1 %v6918_v16  ;;  %v3756_v10 = vadd.f32 %v3755_v8, %v7608_v53  ;;  %4050 = vmatpush1.bf16.msra.mxu0 %v6112_v1  ;;  %v6129_v16 = vld [vmem:[%s8560_s1 + $0x8ac] ss:$16 sps:$4 sm:$0xff]  }
 0x184   :  { %4091 = vmatpush1.bf16.msra.mxu1 %v6115_v2  ;;  %v3757_v14 = vpop.f32.mrf.mxu0  ;;  %4051 = vmatprep.subr.bf16.mxu0 %v6120_v4  ;;  %v6180_v1 = vld [vmem:[%s8560_s1 + $0x78c] ss:$16 sps:$4 sm:$0xff]   ;;  %v6178_v4 = vld [vmem:[%s8560_s1 + $0x788] ss:$16 sps:$4 sm:$0xff]  }
 0x185   :  { %v3798_v15 = vpop.f32.mrf.mxu1  ;;  %4092 = vmatprep.subr.bf16.mxu1 %v6123_v5  ;;  %v7810_v53 = vadd.f32 %v3796_v9, %v3756_v10  ;;  %v3758_v18 = vadd.f32 %v3757_v14, %v7619_v57  ;;  %4081 = vmatprep.mubr.bf16.mxu0 %v6798_v37  ;;  %v6132_v37 = vld [vmem:[%s8560_s1 + $0x68c] ss:$16 sps:$4 sm:$0xff]   ;;  %v6181_v5 = vld [vmem:[%s8560_s1 + $0x988] ss:$16 sps:$4 sm:$0xff]  }
 0x186   :  { %4122 = vmatprep.mubr.bf16.mxu1 %v6948_v24  ;;  %v3759_v19 = vpop.f32.mrf.mxu0  ;;  %v6135_v24 = vld [vmem:[%s8560_s1 + $0x88c] ss:$16 sps:$4 sm:$0xff]   ;;  %v6184_v10 = vld [vmem:[%s8560_s1 + $0x768] ss:$16 sps:$4 sm:$0xff]  }
 0x187   :  { %v3800_v47 = vpop.f32.mrf.mxu1  ;;  %v7815_v20 = vadd.f32 %v3798_v15, %v3758_v18  ;;  %4052 = vmatpush1.bf16.msra.mxu0 %v6118_v12  ;;  %v6183_v2 = vld [vmem:[%s8560_s1 + $0x98c] ss:$16 sps:$4 sm:$0xff]   ;;  %v6187_v12 = vld [vmem:[%s8560_s1 + $0x968] ss:$16 sps:$4 sm:$0xff]  }
 0x188   :  { %4093 = vmatpush1.bf16.msra.mxu1 %v6121_v13  ;;  %v3760_v27 = vpop.f32.mrf.mxu0  ;;  %4053 = vmatprep.subr.bf16.mxu0 %v6126_v7  ;;  %v6186_v8 = vld [vmem:[%s8560_s1 + $0x76c] ss:$16 sps:$4 sm:$0xff]   ;;  %v6190_v15 = vld [vmem:[%s8560_s1 + $0x748] ss:$16 sps:$4 sm:$0xff]  }
 0x189   :  { %v3801_v57 = vpop.f32.mrf.mxu1  ;;  %4094 = vmatprep.subr.bf16.mxu1 %v6129_v16  ;;  %v6189_v9 = vld [vmem:[%s8560_s1 + $0x96c] ss:$16 sps:$4 sm:$0xff]   ;;  %v6193_v7 = vld [vmem:[%s8560_s1 + $0x948] ss:$16 sps:$4 sm:$0xff]  }
 0x18a   :  { %v6192_v13 = vld [vmem:[%s8560_s1 + $0x74c] ss:$16 sps:$4 sm:$0xff]   ;;  %v6196_v19 = vld [vmem:[%s8560_s1 + $0x728] ss:$16 sps:$4 sm:$0xff]  }
 0x18b   :  { %4054 = vmatpush1.bf16.msra.mxu0 %v6124_v21  ;;  %v6195_v14 = vld [vmem:[%s8560_s1 + $0x94c] ss:$16 sps:$4 sm:$0xff]   ;;  %v6199_v47 = vld [vmem:[%s8560_s1 + $0x928] ss:$16 sps:$4 sm:$0xff]  }
 0x18c   :  { %4095 = vmatpush1.bf16.msra.mxu1 %v6127_v26  ;;  %4055 = vmatprep.subr.bf16.mxu0 %v6132_v37  ;;  %v6198_v16 = vld [vmem:[%s8560_s1 + $0x72c] ss:$16 sps:$4 sm:$0xff]   ;;  %v6202_v27 = vld [vmem:[%s8560_s1 + $0x708] ss:$16 sps:$4 sm:$0xff]  }
 0x18d   :  { %4096 = vmatprep.subr.bf16.mxu1 %v6135_v24  ;;  %v6201_v18 = vld [vmem:[%s8560_s1 + $0x92c] ss:$16 sps:$4 sm:$0xff]   ;;  %v6205_v57 = vld [vmem:[%s8560_s1 + $0x908] ss:$16 sps:$4 sm:$0xff]  }
 0x18e   :  { %v6204_v21 = vld [vmem:[%s8560_s1 + $0x70c] ss:$16 sps:$4 sm:$0xff]  }
 0x18f   :  { %4056 = vmatpush1.bf16.msra.mxu0 %v6130_v28  ;;  %v6207_v26 = vld [vmem:[%s8560_s1 + $0x90c] ss:$16 sps:$4 sm:$0xff]   ;;  %v6208_v28 = vld [vmem:[%s8560_s1 + $0xae8] ss:$16 sps:$4 sm:$0xff]  }
 0x190   :  { %4097 = vmatpush1.bf16.msra.mxu1 %v6133_v29  ;;  %4057 = vmatprep.subr.bf16.mxu0 %v6138_v30  ;;  %v6210_v37 = vld [vmem:[%s8560_s1 + $0xaec] ss:$16 sps:$4 sm:$0xff]   ;;  %v6211_v29 = vld [vmem:[%s8560_s1 + $0xce8] ss:$16 sps:$4 sm:$0xff]  }
 0x191   :  { %4098 = vmatprep.subr.bf16.mxu1 %v6141_v31  ;;  %v6213_v24 = vld [vmem:[%s8560_s1 + $0xcec] ss:$16 sps:$4 sm:$0xff]  }
 0x192   :  { %v6216_v30 = vld [vmem:[%s8560_s1 + $0xacc] ss:$16 sps:$4 sm:$0xff]  }
 0x193   :  { %4058 = vmatpush1.bf16.msra.mxu0 %v6136_v32  ;;  %v6219_v31 = vld [vmem:[%s8560_s1 + $0xccc] ss:$16 sps:$4 sm:$0xff]   ;;  %v6214_v32 = vld [vmem:[%s8560_s1 + $0xac8] ss:$16 sps:$4 sm:$0xff]  }
 0x194   :  { %4099 = vmatpush1.bf16.msra.mxu1 %v6139_v33  ;;  %4059 = vmatprep.subr.bf16.mxu0 %v6144_v35  ;;  %v6217_v33 = vld [vmem:[%s8560_s1 + $0xcc8] ss:$16 sps:$4 sm:$0xff]  }
 0x195   :  { %4100 = vmatprep.subr.bf16.mxu1 %v6147_v22 }
 0x197   :  { %4060 = vmatpush1.bf16.msra.mxu0 %v6142_v23  ;;  %v6222_v23 = vld [vmem:[%s8560_s1 + $0xaac] ss:$16 sps:$4 sm:$0xff]  }
 0x198   :  { %4101 = vmatpush1.bf16.msra.mxu1 %v6145_v61  ;;  %4061 = vmatprep.subr.bf16.mxu0 %v6150_v44 }
 0x199   :  { %4102 = vmatprep.subr.bf16.mxu1 %v6153_v45 }
 0x19b   :  { %4062 = vmatpush1.bf16.msra.mxu0 %v6148_v46  ;;  %v6225_v46 = vld [vmem:[%s8560_s1 + $0xcac] ss:$16 sps:$4 sm:$0xff]  }
 0x19c   :  { %4103 = vmatpush1.bf16.msra.mxu1 %v6151_v48  ;;  %4063 = vmatprep.subr.bf16.mxu0 %v6156_v49 }
 0x19d   :  { %4104 = vmatprep.subr.bf16.mxu1 %v6159_v50 }
 0x19f   :  { %4064 = vmatpush1.bf16.msra.mxu0 %v6154_v52 }
 0x1a0   :  { %4105 = vmatpush1.bf16.msra.mxu1 %v6157_v6  ;;  %4065 = vmatprep.subr.bf16.mxu0 %v6162_v3  ;;  %v6228_v3 = vld [vmem:[%s8560_s1 + $0xa8c] ss:$16 sps:$4 sm:$0xff]  }
 0x1a1   :  { %4106 = vmatprep.subr.bf16.mxu1 %v6165_v54  ;;  %v6229_v54 = vld [vmem:[%s8560_s1 + $0xc88] ss:$16 sps:$4 sm:$0xff]  }
 0x1a3   :  { %4066 = vmatpush2.bf16.msra.mxu0 %v6160_v55  ;;  %v6234_v55 = vld [vmem:[%s8560_s1 + $0xa6c] ss:$16 sps:$4 sm:$0xff]  }
 0x1a4   :  { %4107 = vmatpush2.bf16.msra.mxu1 %v6163_v56  ;;  %4067 = vmatprep.subr.bf16.mxu0 %v6168_v58  ;;  %v6237_v56 = vld [vmem:[%s8560_s1 + $0xc6c] ss:$16 sps:$4 sm:$0xff]   ;;  %v6232_v58 = vld [vmem:[%s8560_s1 + $0xa68] ss:$16 sps:$4 sm:$0xff]  }
 0x1a5   :  { %4108 = vmatprep.subr.bf16.mxu1 %v6171_v11  ;;  %v6235_v11 = vld [vmem:[%s8560_s1 + $0xc68] ss:$16 sps:$4 sm:$0xff]  }
 0x1a7   :  { %4068 = vmatpush2.bf16.msra.mxu0 %v6166_v62  ;;  %v6240_v62 = vld [vmem:[%s8560_s1 + $0xa4c] ss:$16 sps:$4 sm:$0xff]  }
 0x1a8   :  { %4109 = vmatpush2.bf16.msra.mxu1 %v6169_v51  ;;  %4069 = vmatprep.subr.bf16.mxu0 %v6174_v36  ;;  %v6243_v51 = vld [vmem:[%s8560_s1 + $0xc4c] ss:$16 sps:$4 sm:$0xff]   ;;  %v6238_v36 = vld [vmem:[%s8560_s1 + $0xa48] ss:$16 sps:$4 sm:$0xff]  }
 0x1a9   :  { %4110 = vmatprep.subr.bf16.mxu1 %v6177_v40  ;;  %v6241_v40 = vld [vmem:[%s8560_s1 + $0xc48] ss:$16 sps:$4 sm:$0xff]  }
 0x1ab   :  { %4070 = vmatpush2.bf16.msra.mxu0 %v6172_v41  ;;  %v6246_v41 = vld [vmem:[%s8560_s1 + $0xa2c] ss:$16 sps:$4 sm:$0xff]  }
 0x1ac   :  { %4111 = vmatpush2.bf16.msra.mxu1 %v6175_v0  ;;  %4071 = vmatprep.subr.bf16.mxu0 %v6180_v1  ;;  %v6249_v0 = vld [vmem:[%s8560_s1 + $0xc2c] ss:$16 sps:$4 sm:$0xff]   ;;  %v6244_v1 = vld [vmem:[%s8560_s1 + $0xa28] ss:$16 sps:$4 sm:$0xff]  }
 0x1ad   :  { %4112 = vmatprep.subr.bf16.mxu1 %v6183_v2  ;;  %v6247_v2 = vld [vmem:[%s8560_s1 + $0xc28] ss:$16 sps:$4 sm:$0xff]  }
 0x1af   :  { %4072 = vmatpush2.bf16.msra.mxu0 %v6178_v4  ;;  %v6252_v4 = vld [vmem:[%s8560_s1 + $0xa0c] ss:$16 sps:$4 sm:$0xff]  }
 0x1b0   :  { %4113 = vmatpush2.bf16.msra.mxu1 %v6181_v5  ;;  %4073 = vmatprep.subr.bf16.mxu0 %v6186_v8  ;;  %v6255_v5 = vld [vmem:[%s8560_s1 + $0xc0c] ss:$16 sps:$4 sm:$0xff]   ;;  %v6250_v8 = vld [vmem:[%s8560_s1 + $0xa08] ss:$16 sps:$4 sm:$0xff]  }
 0x1b1   :  { %4114 = vmatprep.subr.bf16.mxu1 %v6189_v9  ;;  %v6253_v9 = vld [vmem:[%s8560_s1 + $0xc08] ss:$16 sps:$4 sm:$0xff]  }
 0x1b3   :  { %4074 = vmatpush2.bf16.msra.mxu0 %v6184_v10  ;;  %v6258_v10 = vld [vmem:[%s8560_s1 + $0xbec] ss:$16 sps:$4 sm:$0xff]  }
 0x1b4   :  { %4115 = vmatpush2.bf16.msra.mxu1 %v6187_v12  ;;  %4075 = vmatprep.subr.bf16.mxu0 %v6192_v13  ;;  %v6261_v12 = vld [vmem:[%s8560_s1 + $0xdec] ss:$16 sps:$4 sm:$0xff]   ;;  %v6256_v13 = vld [vmem:[%s8560_s1 + $0xbe8] ss:$16 sps:$4 sm:$0xff]  }
 0x1b5   :  { %4116 = vmatprep.subr.bf16.mxu1 %v6195_v14  ;;  %v6259_v14 = vld [vmem:[%s8560_s1 + $0xde8] ss:$16 sps:$4 sm:$0xff]  }
 0x1b7   :  { %4076 = vmatpush2.bf16.msra.mxu0 %v6190_v15  ;;  %v6264_v15 = vld [vmem:[%s8560_s1 + $0xbcc] ss:$16 sps:$4 sm:$0xff]  }
 0x1b8   :  { %4117 = vmatpush2.bf16.msra.mxu1 %v6193_v7  ;;  %4077 = vmatprep.subr.bf16.mxu0 %v6198_v16  ;;  %v6267_v7 = vld [vmem:[%s8560_s1 + $0xdcc] ss:$16 sps:$4 sm:$0xff]   ;;  %v6262_v16 = vld [vmem:[%s8560_s1 + $0xbc8] ss:$16 sps:$4 sm:$0xff]  }
 0x1b9   :  { %4118 = vmatprep.subr.bf16.mxu1 %v6201_v18  ;;  %v6265_v18 = vld [vmem:[%s8560_s1 + $0xdc8] ss:$16 sps:$4 sm:$0xff]  }
 0x1bb   :  { %4078 = vmatpush2.bf16.msra.mxu0 %v6196_v19  ;;  %v6270_v19 = vld [vmem:[%s8560_s1 + $0xbac] ss:$16 sps:$4 sm:$0xff]  }
 0x1bc   :  { %4119 = vmatpush2.bf16.msra.mxu1 %v6199_v47  ;;  %4079 = vmatprep.subr.bf16.mxu0 %v6204_v21  ;;  %v6273_v47 = vld [vmem:[%s8560_s1 + $0xdac] ss:$16 sps:$4 sm:$0xff]   ;;  %v6268_v21 = vld [vmem:[%s8560_s1 + $0xba8] ss:$16 sps:$4 sm:$0xff]  }
 0x1bd   :  { %4120 = vmatprep.subr.bf16.mxu1 %v6207_v26  ;;  %v6271_v26 = vld [vmem:[%s8560_s1 + $0xda8] ss:$16 sps:$4 sm:$0xff]  }
 0x1bf   :  { %4080 = vmatpush2.bf16.msra.mxu0 %v6202_v27  ;;  %v6276_v27 = vld [vmem:[%s8560_s1 + $0xb8c] ss:$16 sps:$4 sm:$0xff]  }
 0x1c0   :  { %4121 = vmatpush2.bf16.msra.mxu1 %v6205_v57  ;;  %4131 = vmatprep.subr.bf16.mxu0 %v6210_v37  ;;  %v6279_v57 = vld [vmem:[%s8560_s1 + $0xd8c] ss:$16 sps:$4 sm:$0xff]   ;;  %v6274_v37 = vld [vmem:[%s8560_s1 + $0xb88] ss:$16 sps:$4 sm:$0xff]  }
 0x1c1   :  { %4172 = vmatprep.subr.bf16.mxu1 %v6213_v24  ;;  %v6277_v24 = vld [vmem:[%s8560_s1 + $0xd88] ss:$16 sps:$4 sm:$0xff]  }
 0x1c2   :  { %v3837_v35 = vpop.f32.mrf.mxu0  ;;  %4082 = vmatmul.mubr.bf16.vlgmr.msra.gmra.mxu0 %v6922_v17 }
 0x1c3   :  { %v3878_v22 = vpop.f32.mrf.mxu1  ;;  %4123 = vmatmul.mubr.bf16.vlgmr.msra.gmra.mxu1 %v7146_v38  ;;  %v3838_v61 = vadd.f32 %v3837_v35, %v7810_v53  ;;  %4132 = vmatpush1.bf16.msra.mxu0 %v6208_v28  ;;  %v6220_v38 = vld [vmem:[%s8560_s1 + $0xaa8] ss:$16 sps:$4 sm:$0xff]   ;;  %v6282_v28 = vld [vmem:[%s8560_s1 + $0xb6c] ss:$16 sps:$4 sm:$0xff]  }
 0x1c4   :  { %4173 = vmatpush1.bf16.msra.mxu1 %v6211_v29  ;;  %v3839_v44 = vpop.f32.mrf.mxu0  ;;  %4133 = vmatprep.subr.bf16.mxu0 %v6216_v30  ;;  %v6223_v53 = vld [vmem:[%s8560_s1 + $0xca8] ss:$16 sps:$4 sm:$0xff]   ;;  %v6285_v29 = vld [vmem:[%s8560_s1 + $0xd6c] ss:$16 sps:$4 sm:$0xff]  }
 0x1c5   :  { %v3880_v45 = vpop.f32.mrf.mxu1  ;;  %4174 = vmatprep.subr.bf16.mxu1 %v6219_v31  ;;  %v8012_v48 = vadd.f32 %v3878_v22, %v3838_v61  ;;  %v3840_v17 = vadd.f32 %v3839_v44, %v7815_v20  ;;  %4163 = vmatprep.mubr.bf16.mxu0 %v6952_v25  ;;  %v6231_v25 = vld [vmem:[%s8560_s1 + $0xc8c] ss:$16 sps:$4 sm:$0xff]   ;;  %v6280_v30 = vld [vmem:[%s8560_s1 + $0xb68] ss:$16 sps:$4 sm:$0xff]  }
 0x1c6   :  { %4204 = vmatprep.mubr.bf16.mxu1 %v7170_v42  ;;  %v3841_v49 = vpop.f32.mrf.mxu0  ;;  %v6226_v42 = vld [vmem:[%s8560_s1 + $0xa88] ss:$16 sps:$4 sm:$0xff]   ;;  %v6297_v61 = vld [vmem:[%s8560_s1 + $0xd2c] ss:$16 sps:$4 sm:$0xff]  }
 0x1c7   :  { %v3882_v50 = vpop.f32.mrf.mxu1  ;;  %v8023_v52 = vadd.f32 %v3880_v45, %v3840_v17  ;;  %4134 = vmatpush1.bf16.msra.mxu0 %v6214_v32  ;;  %v6283_v31 = vld [vmem:[%s8560_s1 + $0xd68] ss:$16 sps:$4 sm:$0xff]   ;;  %v6288_v32 = vld [vmem:[%s8560_s1 + $0xb4c] ss:$16 sps:$4 sm:$0xff]  }
 0x1c8   :  { %4175 = vmatpush1.bf16.msra.mxu1 %v6217_v33  ;;  %v3842_v6 = vpop.f32.mrf.mxu0  ;;  %4135 = vmatprep.subr.bf16.mxu0 %v6222_v23  ;;  %v6291_v33 = vld [vmem:[%s8560_s1 + $0xd4c] ss:$16 sps:$4 sm:$0xff]   ;;  %v6286_v35 = vld [vmem:[%s8560_s1 + $0xb48] ss:$16 sps:$4 sm:$0xff]  }
 0x1c9   :  { %v3883_v20 = vpop.f32.mrf.mxu1  ;;  %4176 = vmatprep.subr.bf16.mxu1 %v6225_v46  ;;  %v6289_v22 = vld [vmem:[%s8560_s1 + $0xd48] ss:$16 sps:$4 sm:$0xff]   ;;  %v6294_v23 = vld [vmem:[%s8560_s1 + $0xb2c] ss:$16 sps:$4 sm:$0xff]  }
 0x1ca   :  { %v6292_v44 = vld [vmem:[%s8560_s1 + $0xb28] ss:$16 sps:$4 sm:$0xff]   ;;  %v6300_v46 = vld [vmem:[%s8560_s1 + $0xb0c] ss:$16 sps:$4 sm:$0xff]  }
 0x1cb   :  { %4136 = vmatpush1.bf16.msra.mxu0 %v6220_v38  ;;  %v6295_v45 = vld [vmem:[%s8560_s1 + $0xd28] ss:$16 sps:$4 sm:$0xff]   ;;  %v6303_v17 = vld [vmem:[%s8560_s1 + $0xd0c] ss:$16 sps:$4 sm:$0xff]  }
 0x1cc   :  { %4177 = vmatpush1.bf16.msra.mxu1 %v6223_v53  ;;  %4137 = vmatprep.subr.bf16.mxu0 %v6228_v3  ;;  %v6298_v38 = vld [vmem:[%s8560_s1 + $0xb08] ss:$16 sps:$4 sm:$0xff]   ;;  %v6306_v49 = vld [vmem:[%s8560_s1 + $0xeec] ss:$16 sps:$4 sm:$0xff]  }
 0x1cd   :  { %4178 = vmatprep.subr.bf16.mxu1 %v6231_v25  ;;  %v6301_v53 = vld [vmem:[%s8560_s1 + $0xd08] ss:$16 sps:$4 sm:$0xff]   ;;  %v6309_v50 = vld [vmem:[%s8560_s1 + $0x10ec] ss:$16 sps:$4 sm:$0xff]  }
 0x1ce   :  { %v6304_v6 = vld [vmem:[%s8560_s1 + $0xee8] ss:$16 sps:$4 sm:$0xff]   ;;  %v6312_v3 = vld [vmem:[%s8560_s1 + $0xecc] ss:$16 sps:$4 sm:$0xff]  }
 0x1cf   :  { %4138 = vmatpush1.bf16.msra.mxu0 %v6226_v42  ;;  %v6307_v20 = vld [vmem:[%s8560_s1 + $0x10e8] ss:$16 sps:$4 sm:$0xff]   ;;  %v6315_v25 = vld [vmem:[%s8560_s1 + $0x10cc] ss:$16 sps:$4 sm:$0xff]  }
 0x1d0   :  { %4179 = vmatpush1.bf16.msra.mxu1 %v6229_v54  ;;  %4139 = vmatprep.subr.bf16.mxu0 %v6234_v55 }
 0x1d1   :  { %4180 = vmatprep.subr.bf16.mxu1 %v6237_v56  ;;  %v6310_v56 = vld [vmem:[%s8560_s1 + $0xec8] ss:$16 sps:$4 sm:$0xff]  }
 0x1d3   :  { %4140 = vmatpush1.bf16.msra.mxu0 %v6232_v58  ;;  %v6313_v58 = vld [vmem:[%s8560_s1 + $0x10c8] ss:$16 sps:$4 sm:$0xff]  }
 0x1d4   :  { %4181 = vmatpush1.bf16.msra.mxu1 %v6235_v11  ;;  %4141 = vmatprep.subr.bf16.mxu0 %v6240_v62 }
 0x1d5   :  { %4182 = vmatprep.subr.bf16.mxu1 %v6243_v51 }
 0x1d7   :  { %4142 = vmatpush1.bf16.msra.mxu0 %v6238_v36  ;;  %v6316_v36 = vld [vmem:[%s8560_s1 + $0xea8] ss:$16 sps:$4 sm:$0xff]  }
 0x1d8   :  { %4183 = vmatpush1.bf16.msra.mxu1 %v6241_v40  ;;  %4143 = vmatprep.subr.bf16.mxu0 %v6246_v41  ;;  %v6319_v40 = vld [vmem:[%s8560_s1 + $0x10a8] ss:$16 sps:$4 sm:$0xff]  }
 0x1d9   :  { %4184 = vmatprep.subr.bf16.mxu1 %v6249_v0 }
 0x1db   :  { %4144 = vmatpush1.bf16.msra.mxu0 %v6244_v1  ;;  %v6322_v1 = vld [vmem:[%s8560_s1 + $0xe88] ss:$16 sps:$4 sm:$0xff]  }
 0x1dc   :  { %4185 = vmatpush1.bf16.msra.mxu1 %v6247_v2  ;;  %4145 = vmatprep.subr.bf16.mxu0 %v6252_v4  ;;  %v6325_v2 = vld [vmem:[%s8560_s1 + $0x1088] ss:$16 sps:$4 sm:$0xff]   ;;  %v6330_v4 = vld [vmem:[%s8560_s1 + $0xe6c] ss:$16 sps:$4 sm:$0xff]  }
 0x1dd   :  { %4186 = vmatprep.subr.bf16.mxu1 %v6255_v5  ;;  %v6333_v5 = vld [vmem:[%s8560_s1 + $0x106c] ss:$16 sps:$4 sm:$0xff]  }
 0x1df   :  { %4146 = vmatpush1.bf16.msra.mxu0 %v6250_v8  ;;  %v6328_v8 = vld [vmem:[%s8560_s1 + $0xe68] ss:$16 sps:$4 sm:$0xff]  }
 0x1e0   :  { %4187 = vmatpush1.bf16.msra.mxu1 %v6253_v9  ;;  %4147 = vmatprep.subr.bf16.mxu0 %v6258_v10  ;;  %v6331_v9 = vld [vmem:[%s8560_s1 + $0x1068] ss:$16 sps:$4 sm:$0xff]   ;;  %v6336_v10 = vld [vmem:[%s8560_s1 + $0xe4c] ss:$16 sps:$4 sm:$0xff]  }
 0x1e1   :  { %4188 = vmatprep.subr.bf16.mxu1 %v6261_v12  ;;  %v6339_v12 = vld [vmem:[%s8560_s1 + $0x104c] ss:$16 sps:$4 sm:$0xff]  }
 0x1e3   :  { %4148 = vmatpush2.bf16.msra.mxu0 %v6256_v13  ;;  %v6334_v13 = vld [vmem:[%s8560_s1 + $0xe48] ss:$16 sps:$4 sm:$0xff]  }
 0x1e4   :  { %4189 = vmatpush2.bf16.msra.mxu1 %v6259_v14  ;;  %4149 = vmatprep.subr.bf16.mxu0 %v6264_v15  ;;  %v6337_v14 = vld [vmem:[%s8560_s1 + $0x1048] ss:$16 sps:$4 sm:$0xff]   ;;  %v6342_v15 = vld [vmem:[%s8560_s1 + $0xe2c] ss:$16 sps:$4 sm:$0xff]  }
 0x1e5   :  { %4190 = vmatprep.subr.bf16.mxu1 %v6267_v7  ;;  %v6345_v7 = vld [vmem:[%s8560_s1 + $0x102c] ss:$16 sps:$4 sm:$0xff]  }
 0x1e7   :  { %4150 = vmatpush2.bf16.msra.mxu0 %v6262_v16  ;;  %v6340_v16 = vld [vmem:[%s8560_s1 + $0xe28] ss:$16 sps:$4 sm:$0xff]  }
 0x1e8   :  { %4191 = vmatpush2.bf16.msra.mxu1 %v6265_v18  ;;  %4151 = vmatprep.subr.bf16.mxu0 %v6270_v19  ;;  %v6343_v18 = vld [vmem:[%s8560_s1 + $0x1028] ss:$16 sps:$4 sm:$0xff]   ;;  %v6348_v19 = vld [vmem:[%s8560_s1 + $0xe0c] ss:$16 sps:$4 sm:$0xff]  }
 0x1e9   :  { %4192 = vmatprep.subr.bf16.mxu1 %v6273_v47  ;;  %v6351_v47 = vld [vmem:[%s8560_s1 + $0x100c] ss:$16 sps:$4 sm:$0xff]  }
 0x1eb   :  { %4152 = vmatpush2.bf16.msra.mxu0 %v6268_v21  ;;  %v6346_v21 = vld [vmem:[%s8560_s1 + $0xe08] ss:$16 sps:$4 sm:$0xff]  }
 0x1ec   :  { %4193 = vmatpush2.bf16.msra.mxu1 %v6271_v26  ;;  %4153 = vmatprep.subr.bf16.mxu0 %v6276_v27  ;;  %v6349_v26 = vld [vmem:[%s8560_s1 + $0x1008] ss:$16 sps:$4 sm:$0xff]   ;;  %v6354_v27 = vld [vmem:[%s8560_s1 + $0xfec] ss:$16 sps:$4 sm:$0xff]  }
 0x1ed   :  { %4194 = vmatprep.subr.bf16.mxu1 %v6279_v57  ;;  %v6357_v57 = vld [vmem:[%s8560_s1 + $0x11ec] ss:$16 sps:$4 sm:$0xff]  }
 0x1ef   :  { %4154 = vmatpush2.bf16.msra.mxu0 %v6274_v37  ;;  %v6352_v37 = vld [vmem:[%s8560_s1 + $0xfe8] ss:$16 sps:$4 sm:$0xff]  }
 0x1f0   :  { %4195 = vmatpush2.bf16.msra.mxu1 %v6277_v24  ;;  %4155 = vmatprep.subr.bf16.mxu0 %v6282_v28  ;;  %v6355_v24 = vld [vmem:[%s8560_s1 + $0x11e8] ss:$16 sps:$4 sm:$0xff]   ;;  %v6360_v28 = vld [vmem:[%s8560_s1 + $0xfcc] ss:$16 sps:$4 sm:$0xff]  }
 0x1f1   :  { %4196 = vmatprep.subr.bf16.mxu1 %v6285_v29  ;;  %v6363_v29 = vld [vmem:[%s8560_s1 + $0x11cc] ss:$16 sps:$4 sm:$0xff]  }
 0x1f3   :  { %4156 = vmatpush2.bf16.msra.mxu0 %v6280_v30  ;;  %v6358_v30 = vld [vmem:[%s8560_s1 + $0xfc8] ss:$16 sps:$4 sm:$0xff]  }
 0x1f4   :  { %4197 = vmatpush2.bf16.msra.mxu1 %v6283_v31  ;;  %4157 = vmatprep.subr.bf16.mxu0 %v6288_v32  ;;  %v6361_v31 = vld [vmem:[%s8560_s1 + $0x11c8] ss:$16 sps:$4 sm:$0xff]   ;;  %v6366_v32 = vld [vmem:[%s8560_s1 + $0xfac] ss:$16 sps:$4 sm:$0xff]  }
 0x1f5   :  { %4198 = vmatprep.subr.bf16.mxu1 %v6291_v33  ;;  %v6369_v33 = vld [vmem:[%s8560_s1 + $0x11ac] ss:$16 sps:$4 sm:$0xff]  }
 0x1f7   :  { %4158 = vmatpush2.bf16.msra.mxu0 %v6286_v35  ;;  %v6364_v35 = vld [vmem:[%s8560_s1 + $0xfa8] ss:$16 sps:$4 sm:$0xff]  }
 0x1f8   :  { %4199 = vmatpush2.bf16.msra.mxu1 %v6289_v22  ;;  %4159 = vmatprep.subr.bf16.mxu0 %v6294_v23  ;;  %v6367_v22 = vld [vmem:[%s8560_s1 + $0x11a8] ss:$16 sps:$4 sm:$0xff]   ;;  %v6372_v23 = vld [vmem:[%s8560_s1 + $0xf8c] ss:$16 sps:$4 sm:$0xff]  }
 0x1f9   :  { %4200 = vmatprep.subr.bf16.mxu1 %v6297_v61  ;;  %v6375_v61 = vld [vmem:[%s8560_s1 + $0x118c] ss:$16 sps:$4 sm:$0xff]  }
 0x1fb   :  { %4160 = vmatpush2.bf16.msra.mxu0 %v6292_v44  ;;  %v6370_v44 = vld [vmem:[%s8560_s1 + $0xf88] ss:$16 sps:$4 sm:$0xff]  }
 0x1fc   :  { %4201 = vmatpush2.bf16.msra.mxu1 %v6295_v45  ;;  %4161 = vmatprep.subr.bf16.mxu0 %v6300_v46  ;;  %v6373_v45 = vld [vmem:[%s8560_s1 + $0x1188] ss:$16 sps:$4 sm:$0xff]   ;;  %v6378_v46 = vld [vmem:[%s8560_s1 + $0xf6c] ss:$16 sps:$4 sm:$0xff]  }
 0x1fd   :  { %4202 = vmatprep.subr.bf16.mxu1 %v6303_v17  ;;  %v6381_v17 = vld [vmem:[%s8560_s1 + $0x116c] ss:$16 sps:$4 sm:$0xff]  }
 0x1ff   :  { %4162 = vmatpush2.bf16.msra.mxu0 %v6298_v38  ;;  %v6376_v38 = vld [vmem:[%s8560_s1 + $0xf68] ss:$16 sps:$4 sm:$0xff]  }
 0x200   :  { %4203 = vmatpush2.bf16.msra.mxu1 %v6301_v53  ;;  %4213 = vmatprep.subr.bf16.mxu0 %v6306_v49  ;;  %v6379_v53 = vld [vmem:[%s8560_s1 + $0x1168] ss:$16 sps:$4 sm:$0xff]   ;;  %v6384_v49 = vld [vmem:[%s8560_s1 + $0xf4c] ss:$16 sps:$4 sm:$0xff]  }
 0x201   :  { %4254 = vmatprep.subr.bf16.mxu1 %v6309_v50  ;;  %v6387_v50 = vld [vmem:[%s8560_s1 + $0x114c] ss:$16 sps:$4 sm:$0xff]  }
 0x202   :  { %v3919_v42 = vpop.f32.mrf.mxu0  ;;  %4164 = vmatmul.mubr.bf16.vlgmr.msra.gmra.mxu0 %v7150_v39  ;;  %v6318_v39 = vld [vmem:[%s8560_s1 + $0xeac] ss:$16 sps:$4 sm:$0xff]  }
 0x203   :  { %v8199_v54 = vpop.f32.mrf.mxu1  ;;  %4205 = vmatmul.mubr.bf16.vlgmr.msra.gmra.mxu1 %v7365_v59  ;;  %v8204_v55 = vadd.f32 %v3919_v42, %v8012_v48  ;;  %4214 = vmatpush1.bf16.msra.mxu0 %v6304_v6  ;;  %v6321_v59 = vld [vmem:[%s8560_s1 + $0x10ac] ss:$16 sps:$4 sm:$0xff]   ;;  %v4297_v6 = vlaneseq }
 0x204   :  { %4255 = vmatpush1.bf16.msra.mxu1 %v6307_v20  ;;  %v8212_v11 = vpop.f32.mrf.mxu0  ;;  %4215 = vmatprep.subr.bf16.mxu0 %v6312_v3  ;;  %v6382_v20 = vld [vmem:[%s8560_s1 + $0xf48] ss:$16 sps:$4 sm:$0xff]   ;;  %v6393_v42 = vld [vmem:[%s8560_s1 + $0x112c] ss:$16 sps:$4 sm:$0xff]  }
 0x205   :  { %v8214_v62 = vpop.f32.mrf.mxu1  ;;  %4256 = vmatprep.subr.bf16.mxu1 %v6315_v25  ;;  %4245 = vmatprep.mubr.bf16.mxu0 %v7174_v43  ;;  %v6324_v43 = vld [vmem:[%s8560_s1 + $0xe8c] ss:$16 sps:$4 sm:$0xff]   ;;  %v6385_v3 = vld [vmem:[%s8560_s1 + $0x1148] ss:$16 sps:$4 sm:$0xff]  }
 0x206   :  { %4286 = vmatprep.mubr.bf16.mxu1 %v7387_v63  ;;  %v3923_v48 = vpop.f32.mrf.mxu0  ;;  %v6327_v63 = vld [vmem:[%s8560_s1 + $0x108c] ss:$16 sps:$4 sm:$0xff]  }
 0x207   :  { %v3964_v51 = vpop.f32.mrf.mxu1  ;;  %4216 = vmatpush1.bf16.msra.mxu0 %v6310_v56  ;;  %v6390_v25 = vld [vmem:[%s8560_s1 + $0xf2c] ss:$16 sps:$4 sm:$0xff]   ;;  %v8368_v56 = vshrl.u32 %v4297_v6, 7 }
 0x208   :  { %4257 = vmatpush1.bf16.msra.mxu1 %v6313_v58  ;;  %v3924_v41 = vpop.f32.mrf.mxu0  ;;  %4217 = vmatprep.subr.bf16.mxu0 %v6318_v39  ;;  %v6388_v39 = vld [vmem:[%s8560_s1 + $0xf28] ss:$16 sps:$4 sm:$0xff]   ;;  %v6396_v48 = vld [vmem:[%s8560_s1 + $0xf0c] ss:$16 sps:$4 sm:$0xff]  }
 0x209   :  { %v3965_v0 = vpop.f32.mrf.mxu1  ;;  %4258 = vmatprep.subr.bf16.mxu1 %v6321_v59  ;;  %v4303_v58 = vsub.s32 1, %v8368_v56  ;;  %v6391_v59 = vld [vmem:[%s8560_s1 + $0x1128] ss:$16 sps:$4 sm:$0xff]   ;;  %v6399_v51 = vld [vmem:[%s8560_s1 + $0x110c] ss:$16 sps:$4 sm:$0xff]  }
 0x20a   :  { %v6394_v0 = vld [vmem:[%s8560_s1 + $0xf08] ss:$16 sps:$4 sm:$0xff]  }
 0x20b   :  { %4218 = vmatpush1.bf16.msra.mxu0 %v6316_v36  ;;  %v8386_v36 = vld [vmem:[%s8563_s2] sm:$0xf]  ;;  %v6429_v6 = vld [vmem:[%s8562_s3 + $0x88] sm:$0xff]  }
 0x20c   :  { %4259 = vmatpush1.bf16.msra.mxu1 %v6319_v40  ;;  %4219 = vmatprep.subr.bf16.mxu0 %v6324_v43  ;;  %v3922_v40 = vadd.f32 %v8212_v11, %v8023_v52  ;;  %v4304_v41 = vrot.slane %v8386_v36, %v4303_v58  ;;  %v6397_v43 = vld [vmem:[%s8560_s1 + $0x1108] ss:$16 sps:$4 sm:$0xff]   ;;  %v6402_v11 = vld [vmem:[%s8562_s3 + $0x70] sm:$0xff]  }
 0x20d   :  { %4260 = vmatprep.subr.bf16.mxu1 %v6327_v63  ;;  %v6400_v63 = vld [vmem:[%s8562_s3 + $0x78] sm:$0xff]  }
 0x20e   :  { %vm4318_vm0 = vcmp.gt.f32.partialorder %v3922_v40, %v4304_v41  ;;  %v6401_v52 = vld [vmem:[%s8562_s3 + $0x38] sm:$0xff]   ;;  %v6441_v41 = vmov 0.0  }
 0x20f   :  { %4220 = vmatpush1.bf16.msra.mxu0 %v6322_v1  ;;  %vm5423_vm1 = vmpackc.low %vm4318_vm0, %vm4318_vm0 }
 0x210   :  { %4261 = vmatpush1.bf16.msra.mxu1 %v6325_v2  ;;  %4221 = vmatprep.subr.bf16.mxu0 %v6330_v4 }
 0x211   :  { %4262 = vmatprep.subr.bf16.mxu1 %v6333_v5  ;;  %v6440_v5 = vmov 1.0|1.0  }
 0x213   :  { %4222 = vmatpush1.bf16.msra.mxu0 %v6328_v8  ;;  %v6403_v8 = vld [vmem:[%s8562_s3 + $0x30] sm:$0xff]  }
 0x214   :  { %4263 = vmatpush1.bf16.msra.mxu1 %v6331_v9  ;;  %4223 = vmatprep.subr.bf16.mxu0 %v6336_v10 }
 0x215   :  { %4264 = vmatprep.subr.bf16.mxu1 %v6339_v12  ;;  %v6404_v12 = vld [vmem:[%s8562_s3 + $0x68] sm:$0xff]  }
 0x217   :  { %4224 = vmatpush1.bf16.msra.mxu0 %v6334_v13 }
 0x218   :  { %4265 = vmatpush1.bf16.msra.mxu1 %v6337_v14  ;;  %4225 = vmatprep.subr.bf16.mxu0 %v6342_v15  ;;  %v6405_v15 = vld [vmem:[%s8562_s3 + $0x28] sm:$0xff]  }
 0x219   :  { %4266 = vmatprep.subr.bf16.mxu1 %v6345_v7  ;;  %v6406_v7 = vld [vmem:[%s8562_s3 + $0x60] sm:$0xff]  }
 0x21b   :  { %4226 = vmatpush1.bf16.msra.mxu0 %v6340_v16 }
 0x21c   :  { %4267 = vmatpush1.bf16.msra.mxu1 %v6343_v18  ;;  %4227 = vmatprep.subr.bf16.mxu0 %v6348_v19  ;;  %v6417_v19 = vld [vmem:[%s8562_s3 + $0xb8] sm:$0xff]  }
 0x21d   :  { %4268 = vmatprep.subr.bf16.mxu1 %v6351_v47  ;;  %v6418_v47 = vld [vmem:[%s8562_s3 + $0xf0] sm:$0xff]  }
 0x21f   :  { %4228 = vmatpush1.bf16.msra.mxu0 %v6346_v21  ;;  %v6407_v21 = vld [vmem:[%s8562_s3 + $0x20] sm:$0xff]  }
 0x220   :  { %4269 = vmatpush1.bf16.msra.mxu1 %v6349_v26  ;;  %4229 = vmatprep.subr.bf16.mxu0 %v6354_v27  ;;  %v6419_v26 = vld [vmem:[%s8562_s3 + $0xb0] sm:$0xff]   ;;  %v6408_v27 = vld [vmem:[%s8562_s3 + $0x58] sm:$0xff]  }
 0x221   :  { %4270 = vmatprep.subr.bf16.mxu1 %v6357_v57  ;;  %v6420_v57 = vld [vmem:[%s8562_s3 + $0xe8] sm:$0xff]  }
 0x223   :  { %4230 = vmatpush2.bf16.msra.mxu0 %v6352_v37  ;;  %v6409_v37 = vld [vmem:[%s8562_s3 + $0x18] sm:$0xff]  }
 0x224   :  { %4271 = vmatpush2.bf16.msra.mxu1 %v6355_v24  ;;  %4231 = vmatprep.subr.bf16.mxu0 %v6360_v28  ;;  %v6421_v24 = vld [vmem:[%s8562_s3 + $0xa8] sm:$0xff]   ;;  %v6410_v28 = vld [vmem:[%s8562_s3 + $0x50] sm:$0xff]  }
 0x225   :  { %4272 = vmatprep.subr.bf16.mxu1 %v6363_v29  ;;  %v6422_v29 = vld [vmem:[%s8562_s3 + $0xe0] sm:$0xff]  }
 0x227   :  { %4232 = vmatpush2.bf16.msra.mxu0 %v6358_v30  ;;  %v6411_v30 = vld [vmem:[%s8562_s3 + $0x10] sm:$0xff]  }
 0x228   :  { %4273 = vmatpush2.bf16.msra.mxu1 %v6361_v31  ;;  %4233 = vmatprep.subr.bf16.mxu0 %v6366_v32  ;;  %v6423_v31 = vld [vmem:[%s8562_s3 + $0xa0] sm:$0xff]   ;;  %v6412_v32 = vld [vmem:[%s8562_s3 + $0x48] sm:$0xff]  }
 0x229   :  { %4274 = vmatprep.subr.bf16.mxu1 %v6369_v33  ;;  %v6424_v33 = vld [vmem:[%s8562_s3 + $0xd8] sm:$0xff]  }
 0x22b   :  { %4234 = vmatpush2.bf16.msra.mxu0 %v6364_v35  ;;  %v4299_v35 = vsub.s32 0, %v8368_v56 }
 0x22c   :  { %4275 = vmatpush2.bf16.msra.mxu1 %v6367_v22  ;;  %4235 = vmatprep.subr.bf16.mxu0 %v6372_v23  ;;  %v6413_v22 = vld [vmem:[%s8562_s3 + $0x8] sm:$0xff]   ;;  %v6425_v23 = vld [vmem:[%s8562_s3 + $0x98] sm:$0xff]  }
 0x22d   :  { %4276 = vmatprep.subr.bf16.mxu1 %v6375_v61  ;;  %v6414_v61 = vld [vmem:[%s8562_s3 + $0x40] sm:$0xff]  }
 0x22f   :  { %4236 = vmatpush2.bf16.msra.mxu0 %v6370_v44  ;;  %v6426_v44 = vld [vmem:[%s8562_s3 + $0xd0] sm:$0xff]  }
 0x230   :  { %4277 = vmatpush2.bf16.msra.mxu1 %v6373_v45  ;;  %4237 = vmatprep.subr.bf16.mxu0 %v6378_v46  ;;  %v4300_v45 = vrot.slane %v8386_v36, %v4299_v35  ;;  %v6415_v46 = vld [vmem:[%s8562_s3] sm:$0xff]  }
 0x231   :  { %4278 = vmatprep.subr.bf16.mxu1 %v6381_v17  ;;  %v6427_v17 = vld [vmem:[%s8562_s3 + $0x90] sm:$0xff]  }
 0x232   :  { %vm4317_vm2 = vcmp.gt.f32.partialorder %v8204_v55, %v4300_v45 }
 0x233   :  { %4238 = vmatpush2.bf16.msra.mxu0 %v6376_v38  ;;  %vm5425_vm3 = vmpackc.low %vm4317_vm2, %vm4317_vm2 }
 0x234   :  { %4279 = vmatpush2.bf16.msra.mxu1 %v6379_v53  ;;  %4239 = vmatprep.subr.bf16.mxu0 %v6384_v49  ;;  %v6428_v49 = vld [vmem:[%s8562_s3 + $0xc8] sm:$0xff]  }
 0x235   :  { %4280 = vmatprep.subr.bf16.mxu1 %v6387_v50 }
 0x237   :  { %4240 = vmatpush2.bf16.msra.mxu0 %v6382_v20 }
 0x238   :  { %4281 = vmatpush2.bf16.msra.mxu1 %v6385_v3  ;;  %4241 = vmatprep.subr.bf16.mxu0 %v6390_v25 }
 0x239   :  { %4282 = vmatprep.subr.bf16.mxu1 %v6393_v42 }
 0x23b   :  { %4242 = vmatpush2.bf16.msra.mxu0 %v6388_v39  ;;  %v6430_v39 = vld [vmem:[%s8562_s3 + $0xc0] sm:$0xff]  }
 0x23c   :  { %4283 = vmatpush2.bf16.msra.mxu1 %v6391_v59  ;;  %4243 = vmatprep.subr.bf16.mxu0 %v6396_v48  ;;  %v6431_v48 = vld [vmem:[%s8562_s3 + $0x80] sm:$0xff]  }
 0x23d   :  { %4284 = vmatprep.subr.bf16.mxu1 %v6399_v51 }
 0x23f   :  { %4244 = vmatpush2.bf16.msra.mxu0 %v6394_v0  ;;  %v6432_v0 = vld [vmem:[%s8564_s5 + $0x38] sm:$0xff]  }
 0x240   :  { %4285 = vmatpush2.bf16.msra.mxu1 %v6397_v43  ;;  %5442 = vmatprep.subr.bf16.mxu0 %v6400_v63  ;;  %v6433_v43 = vld [vmem:[%s8564_s5 + $0x30] sm:$0xff]   ;;  %v6434_v63 = vld [vmem:[%s8564_s5 + $0x28] sm:$0xff]  }
 0x242   :  { %v4001_v1 = vpop.f32.mrf.mxu0  ;;  %4246 = vmatmul.mubr.bf16.vlgmr.msra.gmra.mxu0 %v7369_v60 }
 0x243   :  { %v4042_v2 = vpop.f32.mrf.mxu1  ;;  %4287 = vmatmul.mubr.bf16.vlgmr.msra.gmra.mxu1 %v7585_v34  ;;  %v4002_v4 = vadd.f32 %v4001_v1, %v8199_v54  ;;  %5443 = vmatpush3.bf16.msra.mxu0 %v6401_v52  ;;  %v6435_v52 = vld [vmem:[%s8564_s5 + $0x20] sm:$0xff]   ;;  %v6437_v1 = vld [vmem:[%s8564_s5 + $0x10] sm:$0xff]  }
 0x244   :  { %5424 = vmatprep.mubr.msk.bf16.mxu0 %vm5423_vm1, %v6440_v5  ;;  %v4003_v9 = vpop.f32.mrf.mxu0  ;;  %5444 = vmatprep.subr.bf16.mxu0 %v6402_v11  ;;  %v6436_v11 = vld [vmem:[%s8564_s5 + $0x18] sm:$0xff]  }
 0x245   :  { %v4044_v10 = vpop.f32.mrf.mxu1  ;;  %v8416_v60 = vadd.f32 %v4042_v2, %v4002_v4  ;;  %v4004_v34 = vadd.f32 %v4003_v9, %v8214_v62  ;;  %v6416_v62 = vld [vmem:[%s8562_s3 + $0xf8] sm:$0xff]  }
 0x246   :  { %v4005_v54 = vpop.f32.mrf.mxu0  ;;  %5464 = vmatprep.subr.bf16.mxu1 %v6416_v62 }
 0x247   :  { %v4046_v13 = vpop.f32.mrf.mxu1  ;;  %v8419_v14 = vadd.f32 %v4044_v10, %v4004_v34  ;;  %5445 = vmatpush3.bf16.msra.mxu0 %v6403_v8  ;;  %5465 = vmatpush3.bf16.msra.mxu1 %v6417_v19 }
 0x248   :  { %v4006_v16 = vpop.f32.mrf.mxu0  ;;  %5446 = vmatprep.subr.bf16.mxu0 %v6404_v12  ;;  %5466 = vmatprep.subr.bf16.mxu1 %v6418_v47 }
 0x249   :  { %v4047_v18 = vpop.f32.mrf.mxu1 }
 0x24b   :  { %5447 = vmatpush3.bf16.msra.mxu0 %v6405_v15  ;;  %5467 = vmatpush3.bf16.msra.mxu1 %v6419_v26  ;;  %v4307_v15 = vsub.s32 2, %v8368_v56 }
 0x24c   :  { %5448 = vmatprep.subr.bf16.mxu0 %v6406_v7  ;;  %5468 = vmatprep.subr.bf16.mxu1 %v6420_v57  ;;  %v4311_v7 = vsub.s32 3, %v8368_v56 }
 0x24d   :  { %v4308_v47 = vrot.slane %v8386_v36, %v4307_v15 }
 0x24f   :  { %5449 = vmatpush3.bf16.msra.mxu0 %v6407_v21  ;;  %5469 = vmatpush3.bf16.msra.mxu1 %v6421_v24 }
 0x250   :  { %5450 = vmatprep.subr.bf16.mxu0 %v6408_v27  ;;  %5470 = vmatprep.subr.bf16.mxu1 %v6422_v29 }
 0x253   :  { %5451 = vmatpush3.bf16.msra.mxu0 %v6409_v37  ;;  %5471 = vmatpush3.bf16.msra.mxu1 %v6423_v31  ;;  %v4312_v37 = vrot.slane %v8386_v36, %v4311_v7  ;;  %v6438_v36 = vld [vmem:[%s8564_s5 + $0x8] sm:$0xff]  }
 0x254   :  { %5452 = vmatprep.subr.bf16.mxu0 %v6410_v28  ;;  %5472 = vmatprep.subr.bf16.mxu1 %v6424_v33 }
 0x257   :  { %5453 = vmatpush3.bf16.msra.mxu0 %v6411_v30  ;;  %5473 = vmatpush3.bf16.msra.mxu1 %v6425_v23  ;;  %v6439_v23 = vld [vmem:[%s8564_s5] sm:$0xff]  }
 0x258   :  { %5454 = vmatprep.subr.bf16.mxu0 %v6412_v32  ;;  %5474 = vmatprep.subr.bf16.mxu1 %v6426_v44 }
 0x25b   :  { %5455 = vmatpush3.bf16.msra.mxu0 %v6413_v22  ;;  %5475 = vmatpush3.bf16.msra.mxu1 %v6427_v17 }
 0x25c   :  { %5456 = vmatprep.subr.bf16.mxu0 %v6414_v61  ;;  %5476 = vmatprep.subr.bf16.mxu1 %v6428_v49  ;;  %v5390_v61 = vld [vmem:[%s8565_s4] ss:$0 sm:$0xff] }
 0x25f   :  { %5457 = vmatpush3.bf16.msra.mxu0 %v6415_v46  ;;  %5477 = vmatpush3.bf16.msra.mxu1 %v6429_v6 }
 0x260   :  { %5478 = vmatprep.subr.bf16.mxu1 %v6430_v39  ;;  %5495 = vmatprep.subr.bf16.mxu0 %v6441_v41 }
 0x262   :  { %5426 = vmatmul.mubr.msk.bf16.vlgmr.msra.gmra.mxu0 %vm5425_vm3, %v6440_v5 }
 0x263   :  { %5479 = vmatpush3.bf16.msra.mxu1 %v6431_v48  ;;  %5496 = vmatpush3.bf16.msra.mxu0 %v6432_v0 }
 0x264   :  { %5497 = vmatprep.subr.bf16.mxu0 %v6441_v41  ;;  %5511 = vmatprep.mubr.msk.bf16.mxu0 %vm6442_vm8, %v6441_v41 }
 0x267   :  { %5498 = vmatpush3.bf16.msra.mxu0 %v6433_v43 }
 0x268   :  { %5499 = vmatprep.subr.bf16.mxu0 %v6441_v41 }
 0x26b   :  { %5500 = vmatpush3.bf16.msra.mxu0 %v6434_v63 }
 0x26c   :  { %5501 = vmatprep.subr.bf16.mxu0 %v6441_v41 }
 0x26f   :  { %5502 = vmatpush3.bf16.msra.mxu0 %v6435_v52 }
 0x270   :  { %5503 = vmatprep.subr.bf16.mxu0 %v6441_v41 }
 0x273   :  { %5504 = vmatpush3.bf16.msra.mxu0 %v6436_v11 }
 0x274   :  { %5505 = vmatprep.subr.bf16.mxu0 %v6441_v41 }
 0x277   :  { %5506 = vmatpush3.bf16.msra.mxu0 %v6437_v1 }
 0x278   :  { %5507 = vmatprep.subr.bf16.mxu0 %v6441_v41 }
 0x27b   :  { %5508 = vmatpush3.bf16.msra.mxu0 %v6438_v36 }
 0x27c   :  { %5509 = vmatprep.subr.bf16.mxu0 %v6441_v41 }
 0x27f   :  { %5510 = vmatpush3.bf16.msra.mxu0 %v6439_v23 }
 0x282   :  { %v4083_v38 = vpop.f32.mrf.mxu0 }
 0x283   :  { %v4124_v53 = vpop.f32.mrf.mxu1  ;;  %v4084_v50 = vadd.f32 %v4083_v38, %v8416_v60 }
 0x284   :  { %v4085_v20 = vpop.f32.mrf.mxu0 }
 0x285   :  { %v4126_v3 = vpop.f32.mrf.mxu1  ;;  %v4125_v55 = vadd.f32 %v4124_v53, %v4084_v50  ;;  %v4086_v25 = vadd.f32 %v4085_v20, %v8419_v14  ;;  %v5431_v50 = vld [vmem:[%s8567_s6] ss:$0 sm:$0xff] }
 0x286   :  { %v4087_v42 = vpop.f32.mrf.mxu0 }
 0x287   :  { %v4128_v58 = vpop.f32.mrf.mxu1  ;;  %v4127_v59 = vadd.f32 %v4126_v3, %v4086_v25 }
 0x288   :  { %v4088_v51 = vpop.f32.mrf.mxu0 }
 0x289   :  { %v4129_v40 = vpop.f32.mrf.mxu1 }
 0x2c2   :  { %v4165_v2 = vpop.f32.mrf.mxu0 }
 0x2c3   :  { %v4206_v4 = vpop.f32.mrf.mxu1  ;;  %v4166_v8 = vadd.f32 %v4165_v2, %v4125_v55 }
 0x2c4   :  { %v4167_v9 = vpop.f32.mrf.mxu0 }
 0x2c5   :  { %v4208_v10 = vpop.f32.mrf.mxu1  ;;  %v4207_v12 = vadd.f32 %v4206_v4, %v4166_v8  ;;  %v4168_v14 = vadd.f32 %v4167_v9, %v4127_v59 }
 0x2c6   :  { %v4169_v60 = vpop.f32.mrf.mxu0 }
 0x2c7   :  { %v4210_v34 = vpop.f32.mrf.mxu1  ;;  %v4209_v62 = vadd.f32 %v4208_v10, %v4168_v14 }
 0x2c8   :  { %v4170_v54 = vpop.f32.mrf.mxu0 }
 0x2c9   :  { %v4211_v13 = vpop.f32.mrf.mxu1 }
 0x302   :  { %v4247_v16 = vpop.f32.mrf.mxu0 }
 0x303   :  { %v4288_v18 = vpop.f32.mrf.mxu1  ;;  %v4248_v19 = vadd.f32 %v4247_v16, %v4207_v12 }
 0x304   :  { %v4249_v21 = vpop.f32.mrf.mxu0 }
 0x305   :  { %v4290_v26 = vpop.f32.mrf.mxu1  ;;  %v4289_v27 = vadd.f32 %v4288_v18, %v4248_v19  ;;  %v4250_v57 = vadd.f32 %v4249_v21, %v4209_v62 }
 0x306   :  { %v4251_v24 = vpop.f32.mrf.mxu0 }
 0x307   :  { %v4292_v28 = vpop.f32.mrf.mxu1  ;;  %v4291_v29 = vadd.f32 %v4290_v26, %v4250_v57  ;;  %vm4319_vm4 = vcmp.gt.f32.partialorder %v4289_v27, %v4308_v47 }
 0x308   :  { %v4252_v30 = vpop.f32.mrf.mxu0  ;;  %vm5429_vm7 = vmpackc.low %vm4319_vm4, %vm4319_vm4 }
 0x309   :  { %v4293_v31 = vpop.f32.mrf.mxu1  ;;  %vm4320_vm5 = vcmp.gt.f32.partialorder %v4291_v29, %v4312_v37 }
 0x30a   :  { %vm5427_vm6 = vmpackc.low %vm4320_vm5, %vm4320_vm5 }
 0x30b   :  { %5428 = vmatprep.mubr.msk.bf16.mxu1 %vm5427_vm6, %v6440_v5 }
 0x30c   :  { %5430 = vmatmul.mubr.msk.bf16.vlgmr.msra.gmra.mxu1 %vm5429_vm7, %v6440_v5 }
 0x322   :  { %v5458_v56 = vpop.f32.mrf.mxu0 }
 0x324   :  { %v5459_v32 = vpop.f32.mrf.mxu0 }
 0x325   :  { %v5460_v33 = vadd.f32 %v5459_v32, %v5458_v56 }
 0x326   :  { %v5461_v35 = vpop.f32.mrf.mxu0 }
 0x327   :  { %v4627_v46 = vadd.f32 %v5460_v33, %v5390_v61 }
 0x328   :  { %v5462_v22 = vpop.f32.mrf.mxu0 }
 0x3cc   :  { %v5480_v44 = vpop.f32.mrf.mxu1 }
 0x3ce   :  { %v5481_v45 = vpop.f32.mrf.mxu1 }
 0x3cf   :  { %v5482_v17 = vadd.f32 %v5481_v45, %v5480_v44 }
 0x3d0   :  { %v5483_v38 = vpop.f32.mrf.mxu1 }
 0x3d1   :  { %v4667_v53 = vadd.f32 %v5482_v17, %v4627_v46 }
 0x3d2   :  { %v5484_v49 = vpop.f32.mrf.mxu1 }
 0x3d3   :  { %4672 = vst [vmem:[%s8566_s8] sm:$0xff] %v4667_v53  ;;  %vm4673_vm9 = vcmp.gt.f32.partialorder %v4667_v53, 1.0 }
 0x3d4   :  { %vm5440_vm10 = vmpackc.low %vm4673_vm9, %vm4673_vm9 }
 0x3d5   :  { %5512 = vmatmul.mubr.msk.bf16.vlgmr.msra.gmra.mxu0 %vm5440_vm10, %v6440_v5 }
 0x495   :  { %v4781_v6 = vpop.f32.mrf.mxu0 }
 0x496   :  { %v4782_v20 = vadd.f32 %v5431_v50, %v4781_v6 }
 0x497   :  { %v5513_v3 = vpop.f32.mrf.mxu0 }
 0x498   :  { %4787 = vst [vmem:[%s8568_s7] sm:$0xff] %v4782_v20 }
 0x499   :  { %v4784_v55 = vpop.f32.mrf.mxu0 }
 0x49b   :  { %v5514_v25 = vpop.f32.mrf.mxu0 }

</bundles_post_ra>
